<compile_context>
chip_gen: v7x
topology: tpu7x:2x2x1
jax: 0.10.0
libtpu: 0.0.40
codegen_flags: <defaults>
</compile_context>

<pallas_src>
import functools

import jax
import jax.numpy as jnp
from jax.experimental import pallas as pl
from jax.experimental.pallas import tpu as pltpu


def irblock_kernel(x_ref, masks_ref,
                   bn0_s_ref, bn0_b_ref,
                   w1_ref, b1_ref,
                   prelu_ref,
                   w2_ref, b2_ref,
                   fc1_w_ref, fc1_b_ref, se_prelu_ref,
                   fc2_w_ref, fc2_b_ref,
                   o_ref,
                   col_ref,
                   *, W):
    """One batch element per grid step. x_ref: (1, H*W, C), flattened NHWC."""
    HW = x_ref.shape[1]
    C = x_ref.shape[2]

    x = x_ref[0]                         # (HW, C) f32  (residual source)
    a_main = prelu_ref[...]              # (1, 1) shared PReLU weight
    a_se = se_prelu_ref[...]             # (1, 1) SE PReLU weight

    def im2col_bf16(src):
        # src: (HW, C) f32 -> (HW, 9*C) bf16, K packed as (ky, kx, cin).
        # Tap (dy, dx) of a 3x3 / stride-1 / pad-1 conv is a roll of the flattened
        # rows by dy*W+dx (XLU sublane rotate) times a precomputed boundary mask.
        k = 0
        for dy in (-1, 0, 1):
            for dx in (-1, 0, 1):
                if dy == 0 and dx == 0:
                    patch = src                                   # center tap
                else:
                    shift = (-(dy * W + dx)) % HW
                    patch = pltpu.roll(src, shift, 0) * masks_ref[:, k:k + 1]
                col_ref[:, k * C:(k + 1) * C] = patch
                k += 1
        return col_ref[...].astype(jnp.bfloat16)

    # ---- bn0 (inference affine; precedes zero padding, so NOT folded into conv1) ----
    xb = x * bn0_s_ref[...] + bn0_b_ref[...]

    # ---- conv1 (bn1 pre-folded into w1/b1) + PReLU: single K=9*C bf16 matmul ----
    out1 = jnp.dot(im2col_bf16(xb), w1_ref[...],
                   preferred_element_type=jnp.float32) + b1_ref[...]
    out1 = jnp.where(out1 > 0, out1, out1 * a_main)

    # ---- conv2 (bn2 pre-folded into w2/b2) ----
    out2 = jnp.dot(im2col_bf16(out1), w2_ref[...],
                   preferred_element_type=jnp.float32) + b2_ref[...]

    # ---- SE: global avg pool -> fc -> PReLU -> fc -> sigmoid -> channel scale ----
    y = jnp.mean(out2, axis=0, keepdims=True)                     # (1, Cout)
    y = jnp.dot(y, fc1_w_ref[...], preferred_element_type=jnp.float32) + fc1_b_ref[...]
    y = jnp.where(y > 0, y, y * a_se)
    y = jnp.dot(y, fc2_w_ref[...], preferred_element_type=jnp.float32) + fc2_b_ref[...]
    y = jax.nn.sigmoid(y)
    out2 = out2 * y                                               # per-channel reweight

    # ---- residual add + final PReLU (same shared weight as self.prelu) ----
    out = out2 + x
    o_ref[0] = jnp.where(out > 0, out, out * a_main)


def irblock_forward(x_nchw, params):
    """x_nchw: (N, C, H, W) float32. Returns (N, C, H, W) float32."""
    N, C, H, W = x_nchw.shape
    HW = H * W
    Cout = params["w2"].shape[-1]
    assert C == Cout, "stride=1 / downsample=None path requires inplanes == planes"

    # NCHW -> (N, H*W, C) slabs for the kernel.
    x = jnp.transpose(x_nchw, (0, 2, 3, 1)).reshape(N, HW, C)

    # Fold bn1 into conv1 and bn2 into conv2 (output-channel scale of HWIO weights),
    # pack the 9 taps into the contraction dim, and cast weights to bf16 for the MXU.
    w1 = (params["w1"] * params["bn1_s"].reshape(1, 1, 1, C)
          ).reshape(9 * C, C).astype(jnp.bfloat16)
    b1 = params["b1"] * params["bn1_s"] + params["bn1_b"]
    w2 = (params["w2"] * params["bn2_s"].reshape(1, 1, 1, Cout)
          ).reshape(9 * C, Cout).astype(jnp.bfloat16)
    b2 = params["b2"] * params["bn2_s"] + params["bn2_b"]

    # Precomputed boundary masks for the 9 taps (k = ky*3 + kx), shape (HW, 9).
    hh, ww = jnp.meshgrid(jnp.arange(H), jnp.arange(W), indexing="ij")
    hh = hh.reshape(HW)
    ww = ww.reshape(HW)
    mask_cols = []
    for dy in (-1, 0, 1):
        for dx in (-1, 0, 1):
            mask_cols.append((hh + dy >= 0) & (hh + dy < H)
                             & (ww + dx >= 0) & (ww + dx < W))
    masks = jnp.stack(mask_cols, axis=1).astype(jnp.float32)       # (HW, 9)

    args = (x, masks,
            params["bn0_s"], params["bn0_b"],
            w1, b1,
            params["prelu"],
            w2, b2,
            params["fc1_w"], params["fc1_b"], params["se_prelu"],
            params["fc2_w"], params["fc2_b"])

    def rep(a):  # replicated (weights / small params): same full block every step
        zeros = (0,) * a.ndim
        return pl.BlockSpec(a.shape, lambda n, z=zeros: z)

    in_specs = ([pl.BlockSpec((1, HW, C), lambda n: (n, 0, 0))]
                + [rep(a) for a in args[1:]])

    out = pl.pallas_call(
        functools.partial(irblock_kernel, W=W),
        out_shape=jax.ShapeDtypeStruct((N, HW, Cout), jnp.float32),
        grid=(N,),
        in_specs=in_specs,
        out_specs=pl.BlockSpec((1, HW, Cout), lambda n: (n, 0, 0)),
        scratch_shapes=[pltpu.VMEM((HW, 9 * C), jnp.float32)],     # im2col buffer
        compiler_params=pltpu.CompilerParams(
            dimension_semantics=("parallel",)),
    )(*args)

    return jnp.transpose(out.reshape(N, H, W, Cout), (0, 3, 1, 2))  # -> NCHW


def _make_bn(key, c, eps=1e-5):
    """Folded inference-mode BatchNorm: returns (scale, shift), each (1, c)."""
    k1, k2, k3, k4 = jax.random.split(key, 4)
    gamma = 1.0 + 0.1 * jax.random.normal(k1, (c,), jnp.float32)
    beta = 0.1 * jax.random.normal(k2, (c,), jnp.float32)
    mean = 0.1 * jax.random.normal(k3, (c,), jnp.float32)
    var = 0.5 + jax.random.uniform(k4, (c,), jnp.float32)
    scale = gamma / jnp.sqrt(var + eps)
    shift = beta - mean * scale
    return scale.reshape(1, c), shift.reshape(1, c)


def init_params(key, inplanes, planes, reduction=16):
    assert inplanes == planes, "stride=1 / downsample=None path requires inplanes == planes"
    ks = jax.random.split(key, 10)
    hidden = planes // reduction
    bn0_s, bn0_b = _make_bn(ks[0], inplanes)
    bn1_s, bn1_b = _make_bn(ks[1], inplanes)
    bn2_s, bn2_b = _make_bn(ks[2], planes)
    return {
        "bn0_s": bn0_s, "bn0_b": bn0_b,
        "w1": 0.1 * jax.random.normal(ks[3], (3, 3, inplanes, inplanes), jnp.float32),
        "b1": 0.1 * jax.random.normal(ks[4], (1, inplanes), jnp.float32),
        "bn1_s": bn1_s, "bn1_b": bn1_b,
        "prelu": jnp.full((1, 1), 0.25, jnp.float32),        # nn.PReLU() default init
        "w2": 0.1 * jax.random.normal(ks[5], (3, 3, inplanes, planes), jnp.float32),
        "b2": 0.1 * jax.random.normal(ks[6], (1, planes), jnp.float32),
        "bn2_s": bn2_s, "bn2_b": bn2_b,
        "fc1_w": 0.1 * jax.random.normal(ks[7], (planes, hidden), jnp.float32),
        "fc1_b": 0.1 * jax.random.normal(ks[8], (1, hidden), jnp.float32),
        "se_prelu": jnp.full((1, 1), 0.25, jnp.float32),
        "fc2_w": 0.1 * jax.random.normal(ks[9], (hidden, planes), jnp.float32),
        "fc2_b": jnp.zeros((1, planes), jnp.float32),
    }


if __name__ == "__main__":
    key = jax.random.PRNGKey(0)
    kx, kp = jax.random.split(key)
    # channels must be >= 16 because SEBlock uses reduction=16 (channel // 16 >= 1)
    N, C, H, W = 2, 32, 16, 16
    x = jax.random.normal(kx, (N, C, H, W), jnp.float32)
    params = init_params(kp, C, C)

    fwd = jax.jit(irblock_forward)
    out = fwd(x, params)
    jax.block_until_ready(out)
    assert out.shape == (N, C, H, W) and out.dtype == jnp.float32
    print("KERNEL_OK")
</pallas_src>

<mosaic_0001>
module attributes {stable_mosaic.version = 11 : i64} {
  func.func @irblock_kernel(%arg0: i32, %arg1: memref<1x256x32xf32, #tpu.memory_space<vmem>>, %arg2: memref<256x9xf32, #tpu.memory_space<vmem>>, %arg3: memref<1x32xf32, #tpu.memory_space<vmem>>, %arg4: memref<1x32xf32, #tpu.memory_space<vmem>>, %arg5: memref<288x32xbf16, #tpu.memory_space<vmem>>, %arg6: memref<1x32xf32, #tpu.memory_space<vmem>>, %arg7: memref<1x1xf32, #tpu.memory_space<vmem>>, %arg8: memref<288x32xbf16, #tpu.memory_space<vmem>>, %arg9: memref<1x32xf32, #tpu.memory_space<vmem>>, %arg10: memref<32x2xf32, #tpu.memory_space<vmem>>, %arg11: memref<1x2xf32, #tpu.memory_space<vmem>>, %arg12: memref<1x1xf32, #tpu.memory_space<vmem>>, %arg13: memref<2x32xf32, #tpu.memory_space<vmem>>, %arg14: memref<1x32xf32, #tpu.memory_space<vmem>>, %arg15: memref<1x256x32xf32, #tpu.memory_space<vmem>>, %arg16: memref<256x288xf32, #tpu.memory_space<vmem>>) attributes {dimension_semantics = [#tpu.dimension_semantics<parallel>], iteration_bounds = array<i64: 2>, scalar_prefetch = 0 : i64, scratch_operands = 1 : i64, tpu.core_type = #tpu.core_type<tc>, window_params = [{transform_indices = @transform_0, window_bounds = array<i64: 1, 256, 32>}, {pipeline_mode = #tpu.pipeline_mode<synchronous>, transform_indices = @transform_1, window_bounds = array<i64: 256, 9>}, {pipeline_mode = #tpu.pipeline_mode<synchronous>, transform_indices = @transform_2, window_bounds = array<i64: 1, 32>}, {pipeline_mode = #tpu.pipeline_mode<synchronous>, transform_indices = @transform_3, window_bounds = array<i64: 1, 32>}, {pipeline_mode = #tpu.pipeline_mode<synchronous>, transform_indices = @transform_4, window_bounds = array<i64: 288, 32>}, {pipeline_mode = #tpu.pipeline_mode<synchronous>, transform_indices = @transform_5, window_bounds = array<i64: 1, 32>}, {pipeline_mode = #tpu.pipeline_mode<synchronous>, transform_indices = @transform_6, window_bounds = array<i64: 1, 1>}, {pipeline_mode = #tpu.pipeline_mode<synchronous>, transform_indices = @transform_7, window_bounds = array<i64: 288, 32>}, {pipeline_mode = #tpu.pipeline_mode<synchronous>, transform_indices = @transform_8, window_bounds = array<i64: 1, 32>}, {pipeline_mode = #tpu.pipeline_mode<synchronous>, transform_indices = @transform_9, window_bounds = array<i64: 32, 2>}, {pipeline_mode = #tpu.pipeline_mode<synchronous>, transform_indices = @transform_10, window_bounds = array<i64: 1, 2>}, {pipeline_mode = #tpu.pipeline_mode<synchronous>, transform_indices = @transform_11, window_bounds = array<i64: 1, 1>}, {pipeline_mode = #tpu.pipeline_mode<synchronous>, transform_indices = @transform_12, window_bounds = array<i64: 2, 32>}, {pipeline_mode = #tpu.pipeline_mode<synchronous>, transform_indices = @transform_13, window_bounds = array<i64: 1, 32>}, {transform_indices = @transform_14, window_bounds = array<i64: 1, 256, 32>}]} {
    %c0 = arith.constant 0 : index
    %c0_0 = arith.constant 0 : index
    %c0_1 = arith.constant 0 : index
    %0 = vector.load %arg1[%c0, %c0_0, %c0_1] : memref<1x256x32xf32, #tpu.memory_space<vmem>>, vector<1x256x32xf32>
    %1 = vector.shape_cast %0 : vector<1x256x32xf32> to vector<256x32xf32>
    %c0_2 = arith.constant 0 : index
    %c0_3 = arith.constant 0 : index
    %2 = vector.load %arg7[%c0_2, %c0_3] : memref<1x1xf32, #tpu.memory_space<vmem>>, vector<1x1xf32>
    %c0_4 = arith.constant 0 : index
    %c0_5 = arith.constant 0 : index
    %3 = vector.load %arg12[%c0_4, %c0_5] : memref<1x1xf32, #tpu.memory_space<vmem>>, vector<1x1xf32>
    %c0_6 = arith.constant 0 : index
    %c0_7 = arith.constant 0 : index
    %4 = vector.load %arg3[%c0_6, %c0_7] : memref<1x32xf32, #tpu.memory_space<vmem>>, vector<1x32xf32>
    %5 = vector.broadcast %4 : vector<1x32xf32> to vector<256x32xf32>
    %6 = arith.mulf %1, %5 : vector<256x32xf32>
    %c0_8 = arith.constant 0 : index
    %c0_9 = arith.constant 0 : index
    %7 = vector.load %arg4[%c0_8, %c0_9] : memref<1x32xf32, #tpu.memory_space<vmem>>, vector<1x32xf32>
    %8 = vector.broadcast %7 : vector<1x32xf32> to vector<256x32xf32>
    %9 = arith.addf %6, %8 : vector<256x32xf32>
    %c17_i32 = arith.constant 17 : i32
    %10 = tpu.dynamic_rotate %9 by %c17_i32 dim 0 : vector<256x32xf32>, i32 -> vector<256x32xf32>
    %c0_10 = arith.constant 0 : index
    %c0_11 = arith.constant 0 : index
    %11 = vector.load %arg2[%c0_10, %c0_11] : memref<256x9xf32, #tpu.memory_space<vmem>>, vector<256x1xf32>
    %12 = vector.broadcast %11 : vector<256x1xf32> to vector<256x32xf32>
    %13 = arith.mulf %10, %12 : vector<256x32xf32>
    %c0_12 = arith.constant 0 : index
    %c0_13 = arith.constant 0 : index
    %14 = vector.load %arg16[%c0_12, %c0_13] : memref<256x288xf32, #tpu.memory_space<vmem>>, vector<256x32xf32>
    tpu.vector_store %arg16[%c0_12, %c0_13], %13 {strides = array<i32>} : memref<256x288xf32, #tpu.memory_space<vmem>>, vector<256x32xf32>,
    %c16_i32 = arith.constant 16 : i32
    %15 = tpu.dynamic_rotate %9 by %c16_i32 dim 0 : vector<256x32xf32>, i32 -> vector<256x32xf32>
    %c0_14 = arith.constant 0 : index
    %c1 = arith.constant 1 : index
    %16 = vector.load %arg2[%c0_14, %c1] : memref<256x9xf32, #tpu.memory_space<vmem>>, vector<256x1xf32>
    %17 = vector.broadcast %16 : vector<256x1xf32> to vector<256x32xf32>
    %18 = arith.mulf %15, %17 : vector<256x32xf32>
    %c0_15 = arith.constant 0 : index
    %c32 = arith.constant 32 : index
    %19 = vector.load %arg16[%c0_15, %c32] : memref<256x288xf32, #tpu.memory_space<vmem>>, vector<256x32xf32>
    tpu.vector_store %arg16[%c0_15, %c32], %18 {strides = array<i32>} : memref<256x288xf32, #tpu.memory_space<vmem>>, vector<256x32xf32>,
    %c15_i32 = arith.constant 15 : i32
    %20 = tpu.dynamic_rotate %9 by %c15_i32 dim 0 : vector<256x32xf32>, i32 -> vector<256x32xf32>
    %c0_16 = arith.constant 0 : index
    %c2 = arith.constant 2 : index
    %21 = vector.load %arg2[%c0_16, %c2] : memref<256x9xf32, #tpu.memory_space<vmem>>, vector<256x1xf32>
    %22 = vector.broadcast %21 : vector<256x1xf32> to vector<256x32xf32>
    %23 = arith.mulf %20, %22 : vector<256x32xf32>
    %c0_17 = arith.constant 0 : index
    %c64 = arith.constant 64 : index
    %24 = vector.load %arg16[%c0_17, %c64] : memref<256x288xf32, #tpu.memory_space<vmem>>, vector<256x32xf32>
    tpu.vector_store %arg16[%c0_17, %c64], %23 {strides = array<i32>} : memref<256x288xf32, #tpu.memory_space<vmem>>, vector<256x32xf32>,
    %c1_i32 = arith.constant 1 : i32
    %25 = tpu.dynamic_rotate %9 by %c1_i32 dim 0 : vector<256x32xf32>, i32 -> vector<256x32xf32>
    %c0_18 = arith.constant 0 : index
    %c3 = arith.constant 3 : index
    %26 = vector.load %arg2[%c0_18, %c3] : memref<256x9xf32, #tpu.memory_space<vmem>>, vector<256x1xf32>
    %27 = vector.broadcast %26 : vector<256x1xf32> to vector<256x32xf32>
    %28 = arith.mulf %25, %27 : vector<256x32xf32>
    %c0_19 = arith.constant 0 : index
    %c96 = arith.constant 96 : index
    %29 = vector.load %arg16[%c0_19, %c96] : memref<256x288xf32, #tpu.memory_space<vmem>>, vector<256x32xf32>
    tpu.vector_store %arg16[%c0_19, %c96], %28 {strides = array<i32>} : memref<256x288xf32, #tpu.memory_space<vmem>>, vector<256x32xf32>,
    %c0_20 = arith.constant 0 : index
    %c128 = arith.constant 128 : index
    %30 = vector.load %arg16[%c0_20, %c128] : memref<256x288xf32, #tpu.memory_space<vmem>>, vector<256x32xf32>
    tpu.vector_store %arg16[%c0_20, %c128], %9 {strides = array<i32>} : memref<256x288xf32, #tpu.memory_space<vmem>>, vector<256x32xf32>,
    %c255_i32 = arith.constant 255 : i32
    %31 = tpu.dynamic_rotate %9 by %c255_i32 dim 0 : vector<256x32xf32>, i32 -> vector<256x32xf32>
    %c0_21 = arith.constant 0 : index
    %c5 = arith.constant 5 : index
    %32 = vector.load %arg2[%c0_21, %c5] : memref<256x9xf32, #tpu.memory_space<vmem>>, vector<256x1xf32>
    %33 = vector.broadcast %32 : vector<256x1xf32> to vector<256x32xf32>
    %34 = arith.mulf %31, %33 : vector<256x32xf32>
    %c0_22 = arith.constant 0 : index
    %c160 = arith.constant 160 : index
    %35 = vector.load %arg16[%c0_22, %c160] : memref<256x288xf32, #tpu.memory_space<vmem>>, vector<256x32xf32>
    tpu.vector_store %arg16[%c0_22, %c160], %34 {strides = array<i32>} : memref<256x288xf32, #tpu.memory_space<vmem>>, vector<256x32xf32>,
    %c241_i32 = arith.constant 241 : i32
    %36 = tpu.dynamic_rotate %9 by %c241_i32 dim 0 : vector<256x32xf32>, i32 -> vector<256x32xf32>
    %c0_23 = arith.constant 0 : index
    %c6 = arith.constant 6 : index
    %37 = vector.load %arg2[%c0_23, %c6] : memref<256x9xf32, #tpu.memory_space<vmem>>, vector<256x1xf32>
    %38 = vector.broadcast %37 : vector<256x1xf32> to vector<256x32xf32>
    %39 = arith.mulf %36, %38 : vector<256x32xf32>
    %c0_24 = arith.constant 0 : index
    %c192 = arith.constant 192 : index
    %40 = vector.load %arg16[%c0_24, %c192] : memref<256x288xf32, #tpu.memory_space<vmem>>, vector<256x32xf32>
    tpu.vector_store %arg16[%c0_24, %c192], %39 {strides = array<i32>} : memref<256x288xf32, #tpu.memory_space<vmem>>, vector<256x32xf32>,
    %c240_i32 = arith.constant 240 : i32
    %41 = tpu.dynamic_rotate %9 by %c240_i32 dim 0 : vector<256x32xf32>, i32 -> vector<256x32xf32>
    %c0_25 = arith.constant 0 : index
    %c7 = arith.constant 7 : index
    %42 = vector.load %arg2[%c0_25, %c7] : memref<256x9xf32, #tpu.memory_space<vmem>>, vector<256x1xf32>
    %43 = vector.broadcast %42 : vector<256x1xf32> to vector<256x32xf32>
    %44 = arith.mulf %41, %43 : vector<256x32xf32>
    %c0_26 = arith.constant 0 : index
    %c224 = arith.constant 224 : index
    %45 = vector.load %arg16[%c0_26, %c224] : memref<256x288xf32, #tpu.memory_space<vmem>>, vector<256x32xf32>
    tpu.vector_store %arg16[%c0_26, %c224], %44 {strides = array<i32>} : memref<256x288xf32, #tpu.memory_space<vmem>>, vector<256x32xf32>,
    %c239_i32 = arith.constant 239 : i32
    %46 = tpu.dynamic_rotate %9 by %c239_i32 dim 0 : vector<256x32xf32>, i32 -> vector<256x32xf32>
    %c0_27 = arith.constant 0 : index
    %c8 = arith.constant 8 : index
    %47 = vector.load %arg2[%c0_27, %c8] : memref<256x9xf32, #tpu.memory_space<vmem>>, vector<256x1xf32>
    %48 = vector.broadcast %47 : vector<256x1xf32> to vector<256x32xf32>
    %49 = arith.mulf %46, %48 : vector<256x32xf32>
    %c0_28 = arith.constant 0 : index
    %c256 = arith.constant 256 : index
    %50 = vector.load %arg16[%c0_28, %c256] : memref<256x288xf32, #tpu.memory_space<vmem>>, vector<256x32xf32>
    tpu.vector_store %arg16[%c0_28, %c256], %49 {strides = array<i32>} : memref<256x288xf32, #tpu.memory_space<vmem>>, vector<256x32xf32>,
    %c0_29 = arith.constant 0 : index
    %c0_30 = arith.constant 0 : index
    %51 = vector.load %arg16[%c0_29, %c0_30] : memref<256x288xf32, #tpu.memory_space<vmem>>, vector<256x288xf32>
    %52 = arith.truncf %51 : vector<256x288xf32> to vector<256x288xbf16>
    %c0_31 = arith.constant 0 : index
    %c0_32 = arith.constant 0 : index
    %53 = vector.load %arg5[%c0_31, %c0_32] : memref<288x32xbf16, #tpu.memory_space<vmem>>, vector<288x32xbf16>
    %cst = arith.constant dense<0.000000e+00> : vector<256x32xf32>
    %54 = tpu.matmul %52, %53, %cst {dimension_numbers = #tpu.dot_dimension_numbers<[1], [0], [0], [1], [0, 0, 1, 1], [], []>} : vector<256x288xbf16>, vector<288x32xbf16>, vector<256x32xf32> -> vector<256x32xf32>
    %c0_33 = arith.constant 0 : index
    %c0_34 = arith.constant 0 : index
    %55 = vector.load %arg6[%c0_33, %c0_34] : memref<1x32xf32, #tpu.memory_space<vmem>>, vector<1x32xf32>
    %56 = vector.broadcast %55 : vector<1x32xf32> to vector<256x32xf32>
    %57 = arith.addf %54, %56 : vector<256x32xf32>
    %cst_35 = arith.constant 0.000000e+00 : f32
    %58 = vector.broadcast %cst_35 : f32 to vector<256x32xf32>
    %59 = arith.cmpf ogt, %57, %58 : vector<256x32xf32>
    %60 = vector.broadcast %2 : vector<1x1xf32> to vector<256x32xf32>
    %61 = arith.mulf %57, %60 : vector<256x32xf32>
    %62 = arith.select %59, %57, %61 : vector<256x32xi1>, vector<256x32xf32>
    %c17_i32_36 = arith.constant 17 : i32
    %63 = tpu.dynamic_rotate %62 by %c17_i32_36 dim 0 : vector<256x32xf32>, i32 -> vector<256x32xf32>
    %c0_37 = arith.constant 0 : index
    %c0_38 = arith.constant 0 : index
    %64 = vector.load %arg2[%c0_37, %c0_38] : memref<256x9xf32, #tpu.memory_space<vmem>>, vector<256x1xf32>
    %65 = vector.broadcast %64 : vector<256x1xf32> to vector<256x32xf32>
    %66 = arith.mulf %63, %65 : vector<256x32xf32>
    %c0_39 = arith.constant 0 : index
    %c0_40 = arith.constant 0 : index
    %67 = vector.load %arg16[%c0_39, %c0_40] : memref<256x288xf32, #tpu.memory_space<vmem>>, vector<256x32xf32>
    tpu.vector_store %arg16[%c0_39, %c0_40], %66 {strides = array<i32>} : memref<256x288xf32, #tpu.memory_space<vmem>>, vector<256x32xf32>,
    %c16_i32_41 = arith.constant 16 : i32
    %68 = tpu.dynamic_rotate %62 by %c16_i32_41 dim 0 : vector<256x32xf32>, i32 -> vector<256x32xf32>
    %c0_42 = arith.constant 0 : index
    %c1_43 = arith.constant 1 : index
    %69 = vector.load %arg2[%c0_42, %c1_43] : memref<256x9xf32, #tpu.memory_space<vmem>>, vector<256x1xf32>
    %70 = vector.broadcast %69 : vector<256x1xf32> to vector<256x32xf32>
    %71 = arith.mulf %68, %70 : vector<256x32xf32>
    %c0_44 = arith.constant 0 : index
    %c32_45 = arith.constant 32 : index
    %72 = vector.load %arg16[%c0_44, %c32_45] : memref<256x288xf32, #tpu.memory_space<vmem>>, vector<256x32xf32>
    tpu.vector_store %arg16[%c0_44, %c32_45], %71 {strides = array<i32>} : memref<256x288xf32, #tpu.memory_space<vmem>>, vector<256x32xf32>,
    %c15_i32_46 = arith.constant 15 : i32
    %73 = tpu.dynamic_rotate %62 by %c15_i32_46 dim 0 : vector<256x32xf32>, i32 -> vector<256x32xf32>
    %c0_47 = arith.constant 0 : index
    %c2_48 = arith.constant 2 : index
    %74 = vector.load %arg2[%c0_47, %c2_48] : memref<256x9xf32, #tpu.memory_space<vmem>>, vector<256x1xf32>
    %75 = vector.broadcast %74 : vector<256x1xf32> to vector<256x32xf32>
    %76 = arith.mulf %73, %75 : vector<256x32xf32>
    %c0_49 = arith.constant 0 : index
    %c64_50 = arith.constant 64 : index
    %77 = vector.load %arg16[%c0_49, %c64_50] : memref<256x288xf32, #tpu.memory_space<vmem>>, vector<256x32xf32>
    tpu.vector_store %arg16[%c0_49, %c64_50], %76 {strides = array<i32>} : memref<256x288xf32, #tpu.memory_space<vmem>>, vector<256x32xf32>,
    %c1_i32_51 = arith.constant 1 : i32
    %78 = tpu.dynamic_rotate %62 by %c1_i32_51 dim 0 : vector<256x32xf32>, i32 -> vector<256x32xf32>
    %c0_52 = arith.constant 0 : index
    %c3_53 = arith.constant 3 : index
    %79 = vector.load %arg2[%c0_52, %c3_53] : memref<256x9xf32, #tpu.memory_space<vmem>>, vector<256x1xf32>
    %80 = vector.broadcast %79 : vector<256x1xf32> to vector<256x32xf32>
    %81 = arith.mulf %78, %80 : vector<256x32xf32>
    %c0_54 = arith.constant 0 : index
    %c96_55 = arith.constant 96 : index
    %82 = vector.load %arg16[%c0_54, %c96_55] : memref<256x288xf32, #tpu.memory_space<vmem>>, vector<256x32xf32>
    tpu.vector_store %arg16[%c0_54, %c96_55], %81 {strides = array<i32>} : memref<256x288xf32, #tpu.memory_space<vmem>>, vector<256x32xf32>,
    %c0_56 = arith.constant 0 : index
    %c128_57 = arith.constant 128 : index
    %83 = vector.load %arg16[%c0_56, %c128_57] : memref<256x288xf32, #tpu.memory_space<vmem>>, vector<256x32xf32>
    tpu.vector_store %arg16[%c0_56, %c128_57], %62 {strides = array<i32>} : memref<256x288xf32, #tpu.memory_space<vmem>>, vector<256x32xf32>,
    %c255_i32_58 = arith.constant 255 : i32
    %84 = tpu.dynamic_rotate %62 by %c255_i32_58 dim 0 : vector<256x32xf32>, i32 -> vector<256x32xf32>
    %c0_59 = arith.constant 0 : index
    %c5_60 = arith.constant 5 : index
    %85 = vector.load %arg2[%c0_59, %c5_60] : memref<256x9xf32, #tpu.memory_space<vmem>>, vector<256x1xf32>
    %86 = vector.broadcast %85 : vector<256x1xf32> to vector<256x32xf32>
    %87 = arith.mulf %84, %86 : vector<256x32xf32>
    %c0_61 = arith.constant 0 : index
    %c160_62 = arith.constant 160 : index
    %88 = vector.load %arg16[%c0_61, %c160_62] : memref<256x288xf32, #tpu.memory_space<vmem>>, vector<256x32xf32>
    tpu.vector_store %arg16[%c0_61, %c160_62], %87 {strides = array<i32>} : memref<256x288xf32, #tpu.memory_space<vmem>>, vector<256x32xf32>,
    %c241_i32_63 = arith.constant 241 : i32
    %89 = tpu.dynamic_rotate %62 by %c241_i32_63 dim 0 : vector<256x32xf32>, i32 -> vector<256x32xf32>
    %c0_64 = arith.constant 0 : index
    %c6_65 = arith.constant 6 : index
    %90 = vector.load %arg2[%c0_64, %c6_65] : memref<256x9xf32, #tpu.memory_space<vmem>>, vector<256x1xf32>
    %91 = vector.broadcast %90 : vector<256x1xf32> to vector<256x32xf32>
    %92 = arith.mulf %89, %91 : vector<256x32xf32>
    %c0_66 = arith.constant 0 : index
    %c192_67 = arith.constant 192 : index
    %93 = vector.load %arg16[%c0_66, %c192_67] : memref<256x288xf32, #tpu.memory_space<vmem>>, vector<256x32xf32>
    tpu.vector_store %arg16[%c0_66, %c192_67], %92 {strides = array<i32>} : memref<256x288xf32, #tpu.memory_space<vmem>>, vector<256x32xf32>,
    %c240_i32_68 = arith.constant 240 : i32
    %94 = tpu.dynamic_rotate %62 by %c240_i32_68 dim 0 : vector<256x32xf32>, i32 -> vector<256x32xf32>
    %c0_69 = arith.constant 0 : index
    %c7_70 = arith.constant 7 : index
    %95 = vector.load %arg2[%c0_69, %c7_70] : memref<256x9xf32, #tpu.memory_space<vmem>>, vector<256x1xf32>
    %96 = vector.broadcast %95 : vector<256x1xf32> to vector<256x32xf32>
    %97 = arith.mulf %94, %96 : vector<256x32xf32>
    %c0_71 = arith.constant 0 : index
    %c224_72 = arith.constant 224 : index
    %98 = vector.load %arg16[%c0_71, %c224_72] : memref<256x288xf32, #tpu.memory_space<vmem>>, vector<256x32xf32>
    tpu.vector_store %arg16[%c0_71, %c224_72], %97 {strides = array<i32>} : memref<256x288xf32, #tpu.memory_space<vmem>>, vector<256x32xf32>,
    %c239_i32_73 = arith.constant 239 : i32
    %99 = tpu.dynamic_rotate %62 by %c239_i32_73 dim 0 : vector<256x32xf32>, i32 -> vector<256x32xf32>
    %c0_74 = arith.constant 0 : index
    %c8_75 = arith.constant 8 : index
    %100 = vector.load %arg2[%c0_74, %c8_75] : memref<256x9xf32, #tpu.memory_space<vmem>>, vector<256x1xf32>
    %101 = vector.broadcast %100 : vector<256x1xf32> to vector<256x32xf32>
    %102 = arith.mulf %99, %101 : vector<256x32xf32>
    %c0_76 = arith.constant 0 : index
    %c256_77 = arith.constant 256 : index
    %103 = vector.load %arg16[%c0_76, %c256_77] : memref<256x288xf32, #tpu.memory_space<vmem>>, vector<256x32xf32>
    tpu.vector_store %arg16[%c0_76, %c256_77], %102 {strides = array<i32>} : memref<256x288xf32, #tpu.memory_space<vmem>>, vector<256x32xf32>,
    %c0_78 = arith.constant 0 : index
    %c0_79 = arith.constant 0 : index
    %104 = vector.load %arg16[%c0_78, %c0_79] : memref<256x288xf32, #tpu.memory_space<vmem>>, vector<256x288xf32>
    %105 = arith.truncf %104 : vector<256x288xf32> to vector<256x288xbf16>
    %c0_80 = arith.constant 0 : index
    %c0_81 = arith.constant 0 : index
    %106 = vector.load %arg8[%c0_80, %c0_81] : memref<288x32xbf16, #tpu.memory_space<vmem>>, vector<288x32xbf16>
    %cst_82 = arith.constant dense<0.000000e+00> : vector<256x32xf32>
    %107 = tpu.matmul %105, %106, %cst_82 {dimension_numbers = #tpu.dot_dimension_numbers<[1], [0], [0], [1], [0, 0, 1, 1], [], []>} : vector<256x288xbf16>, vector<288x32xbf16>, vector<256x32xf32> -> vector<256x32xf32>
    %c0_83 = arith.constant 0 : index
    %c0_84 = arith.constant 0 : index
    %108 = vector.load %arg9[%c0_83, %c0_84] : memref<1x32xf32, #tpu.memory_space<vmem>>, vector<1x32xf32>
    %109 = vector.broadcast %108 : vector<1x32xf32> to vector<256x32xf32>
    %110 = arith.addf %107, %109 : vector<256x32xf32>
    %cst_85 = arith.constant dense<0.000000e+00> : vector<32xf32>
    %111 = vector.multi_reduction <add>, %110, %cst_85 [0] : vector<256x32xf32> to vector<32xf32>
    %112 = vector.shape_cast %111 : vector<32xf32> to vector<1x32xf32>
    %cst_86 = arith.constant 2.560000e+02 : f32
    %113 = vector.broadcast %cst_86 : f32 to vector<1x32xf32>
    %114 = arith.divf %112, %113 : vector<1x32xf32>
    %c0_87 = arith.constant 0 : index
    %c0_88 = arith.constant 0 : index
    %115 = vector.load %arg10[%c0_87, %c0_88] : memref<32x2xf32, #tpu.memory_space<vmem>>, vector<32x2xf32>
    %cst_89 = arith.constant dense<0.000000e+00> : vector<1x2xf32>
    %116 = tpu.matmul %114, %115, %cst_89 {dimension_numbers = #tpu.dot_dimension_numbers<[1], [0], [0], [1], [0, 0, 1, 1], [], []>} : vector<1x32xf32>, vector<32x2xf32>, vector<1x2xf32> -> vector<1x2xf32>
    %c0_90 = arith.constant 0 : index
    %c0_91 = arith.constant 0 : index
    %117 = vector.load %arg11[%c0_90, %c0_91] : memref<1x2xf32, #tpu.memory_space<vmem>>, vector<1x2xf32>
    %118 = arith.addf %116, %117 : vector<1x2xf32>
    %cst_92 = arith.constant 0.000000e+00 : f32
    %119 = vector.broadcast %cst_92 : f32 to vector<1x2xf32>
    %120 = arith.cmpf ogt, %118, %119 : vector<1x2xf32>
    %121 = vector.broadcast %3 : vector<1x1xf32> to vector<1x2xf32>
    %122 = arith.mulf %118, %121 : vector<1x2xf32>
    %123 = arith.select %120, %118, %122 : vector<1x2xi1>, vector<1x2xf32>
    %c0_93 = arith.constant 0 : index
    %c0_94 = arith.constant 0 : index
    %124 = vector.load %arg13[%c0_93, %c0_94] : memref<2x32xf32, #tpu.memory_space<vmem>>, vector<2x32xf32>
    %cst_95 = arith.constant dense<0.000000e+00> : vector<1x32xf32>
    %125 = tpu.matmul %123, %124, %cst_95 {dimension_numbers = #tpu.dot_dimension_numbers<[1], [0], [0], [1], [0, 0, 1, 1], [], []>} : vector<1x2xf32>, vector<2x32xf32>, vector<1x32xf32> -> vector<1x32xf32>
    %c0_96 = arith.constant 0 : index
    %c0_97 = arith.constant 0 : index
    %126 = vector.load %arg14[%c0_96, %c0_97] : memref<1x32xf32, #tpu.memory_space<vmem>>, vector<1x32xf32>
    %127 = arith.addf %125, %126 : vector<1x32xf32>
    %128 = arith.negf %127 : vector<1x32xf32>
    %129 = math.exp %128 : vector<1x32xf32>
    %cst_98 = arith.constant 1.000000e+00 : f32
    %130 = vector.broadcast %cst_98 : f32 to vector<1x32xf32>
    %131 = arith.addf %130, %129 : vector<1x32xf32>
    %132 = arith.divf %130, %131 : vector<1x32xf32>
    %133 = vector.broadcast %132 : vector<1x32xf32> to vector<256x32xf32>
    %134 = arith.mulf %110, %133 : vector<256x32xf32>
    %135 = arith.addf %134, %1 : vector<256x32xf32>
    %cst_99 = arith.constant 0.000000e+00 : f32
    %136 = vector.broadcast %cst_99 : f32 to vector<256x32xf32>
    %137 = arith.cmpf ogt, %135, %136 : vector<256x32xf32>
    %138 = vector.broadcast %2 : vector<1x1xf32> to vector<256x32xf32>
    %139 = arith.mulf %135, %138 : vector<256x32xf32>
    %140 = arith.select %137, %135, %139 : vector<256x32xi1>, vector<256x32xf32>
    %c0_100 = arith.constant 0 : index
    %c0_101 = arith.constant 0 : index
    %c0_102 = arith.constant 0 : index
    %141 = vector.load %arg15[%c0_100, %c0_101, %c0_102] : memref<1x256x32xf32, #tpu.memory_space<vmem>>, vector<1x256x32xf32>
    %142 = vector.shape_cast %141 : vector<1x256x32xf32> to vector<256x32xf32>
    %143 = vector.shape_cast %140 : vector<256x32xf32> to vector<1x256x32xf32>
    tpu.vector_store %arg15[%c0_100, %c0_101, %c0_102], %143 {strides = array<i32>} : memref<1x256x32xf32, #tpu.memory_space<vmem>>, vector<1x256x32xf32>,
    return
  }
  func.func @transform_0(%arg0: i32) -> (i32, i32, i32) {
    %c0_i32 = arith.constant 0 : i32
    %c0_i32_0 = arith.constant 0 : i32
    %c0_i32_1 = arith.constant 0 : i32
    return %arg0, %c0_i32, %c0_i32_0 : i32, i32, i32
  }
  func.func @transform_1(%arg0: i32) -> (i32, i32) {
    %c0_i32 = arith.constant 0 : i32
    %c0_i32_0 = arith.constant 0 : i32
    %c0_i32_1 = arith.constant 0 : i32
    return %c0_i32, %c0_i32_0 : i32, i32
  }
  func.func @transform_2(%arg0: i32) -> (i32, i32) {
    %c0_i32 = arith.constant 0 : i32
    %c0_i32_0 = arith.constant 0 : i32
    %c0_i32_1 = arith.constant 0 : i32
    return %c0_i32, %c0_i32_0 : i32, i32
  }
  func.func @transform_3(%arg0: i32) -> (i32, i32) {
    %c0_i32 = arith.constant 0 : i32
    %c0_i32_0 = arith.constant 0 : i32
    %c0_i32_1 = arith.constant 0 : i32
    return %c0_i32, %c0_i32_0 : i32, i32
  }
  func.func @transform_4(%arg0: i32) -> (i32, i32) {
    %c0_i32 = arith.constant 0 : i32
    %c0_i32_0 = arith.constant 0 : i32
    %c0_i32_1 = arith.constant 0 : i32
    return %c0_i32, %c0_i32_0 : i32, i32
  }
  func.func @transform_5(%arg0: i32) -> (i32, i32) {
    %c0_i32 = arith.constant 0 : i32
    %c0_i32_0 = arith.constant 0 : i32
    %c0_i32_1 = arith.constant 0 : i32
    return %c0_i32, %c0_i32_0 : i32, i32
  }
  func.func @transform_6(%arg0: i32) -> (i32, i32) {
    %c0_i32 = arith.constant 0 : i32
    %c0_i32_0 = arith.constant 0 : i32
    %c0_i32_1 = arith.constant 0 : i32
    return %c0_i32, %c0_i32_0 : i32, i32
  }
  func.func @transform_7(%arg0: i32) -> (i32, i32) {
    %c0_i32 = arith.constant 0 : i32
    %c0_i32_0 = arith.constant 0 : i32
    %c0_i32_1 = arith.constant 0 : i32
    return %c0_i32, %c0_i32_0 : i32, i32
  }
  func.func @transform_8(%arg0: i32) -> (i32, i32) {
    %c0_i32 = arith.constant 0 : i32
    %c0_i32_0 = arith.constant 0 : i32
    %c0_i32_1 = arith.constant 0 : i32
    return %c0_i32, %c0_i32_0 : i32, i32
  }
  func.func @transform_9(%arg0: i32) -> (i32, i32) {
    %c0_i32 = arith.constant 0 : i32
    %c0_i32_0 = arith.constant 0 : i32
    %c0_i32_1 = arith.constant 0 : i32
    return %c0_i32, %c0_i32_0 : i32, i32
  }
  func.func @transform_10(%arg0: i32) -> (i32, i32) {
    %c0_i32 = arith.constant 0 : i32
    %c0_i32_0 = arith.constant 0 : i32
    %c0_i32_1 = arith.constant 0 : i32
    return %c0_i32, %c0_i32_0 : i32, i32
  }
  func.func @transform_11(%arg0: i32) -> (i32, i32) {
    %c0_i32 = arith.constant 0 : i32
    %c0_i32_0 = arith.constant 0 : i32
    %c0_i32_1 = arith.constant 0 : i32
    return %c0_i32, %c0_i32_0 : i32, i32
  }
  func.func @transform_12(%arg0: i32) -> (i32, i32) {
    %c0_i32 = arith.constant 0 : i32
    %c0_i32_0 = arith.constant 0 : i32
    %c0_i32_1 = arith.constant 0 : i32
    return %c0_i32, %c0_i32_0 : i32, i32
  }
  func.func @transform_13(%arg0: i32) -> (i32, i32) {
    %c0_i32 = arith.constant 0 : i32
    %c0_i32_0 = arith.constant 0 : i32
    %c0_i32_1 = arith.constant 0 : i32
    return %c0_i32, %c0_i32_0 : i32, i32
  }
  func.func @transform_14(%arg0: i32) -> (i32, i32, i32) {
    %c0_i32 = arith.constant 0 : i32
    %c0_i32_0 = arith.constant 0 : i32
    %c0_i32_1 = arith.constant 0 : i32
    return %arg0, %c0_i32, %c0_i32_0 : i32, i32, i32
  }
}

</mosaic_0001>

<bundles_post_ra>
// kernel: irblock_forward.1
= control target key start
LH: loop header
LB: loop body
LE: loop exit
PB: predicated region body
PF: predicated region fallthrough
CT: control target
= control target key end

     0   :  { %s15102_s0 = inlined_call_operand.vmem [shape: f32[2,256,32], index: 0, kind: input, shape index: {}]   ;;  %s15103_s1 = inlined_call_operand.vmem [shape: f32[256,9], index: 1, kind: input, shape index: {}]   ;;  %s15104_s2 = inlined_call_operand.vmem [shape: f32[1,32], index: 2, kind: input, shape index: {}]   ;;  %s15105_s3 = inlined_call_operand.vmem [shape: f32[1,32], index: 3, kind: input, shape index: {}]   ;;  %s15106_s4 = inlined_call_operand.vmem [shape: bf16[288,32], index: 4, kind: input, shape index: {}]   ;;  %s15107_s5 = inlined_call_operand.vmem [shape: f32[1,32], index: 5, kind: input, shape index: {}]   ;;  %s15108_s6 = inlined_call_operand.<no memory space> [shape: f32[1,1], index: 6, kind: input, shape index: {}]   ;;  %s15109_s7 = inlined_call_operand.vmem [shape: bf16[288,32], index: 7, kind: input, shape index: {}]   ;;  %s15110_s8 = inlined_call_operand.vmem [shape: f32[1,32], index: 8, kind: input, shape index: {}]   ;;  %s15111_s9 = inlined_call_operand.vmem [shape: f32[32,2], index: 9, kind: input, shape index: {}]   ;;  %s15112_s10 = inlined_call_operand.vmem [shape: f32[1,2], index: 10, kind: input, shape index: {}]   ;;  %s15113_s12 = inlined_call_operand.vmem [shape: f32[2,32], index: 12, kind: input, shape index: {}]   ;;  %s15114_s13 = inlined_call_operand.vmem [shape: f32[1,32], index: 13, kind: input, shape index: {}]   ;;  %s15115_s14 = inlined_call_operand.hbm [shape: f32[2,256,32], index: 14, kind: output, shape index: {}]   ;;  %s15116_s11 = inlined_call_operand.<no memory space> [shape: f32[1,1], index: 11, kind: input, shape index: {}]  }
   0x1   :  { %15500 = sst [smem:[#allocation137_spill]] %s15102_s0  ;;  %v19_v0 = vstv %s15108_s6  ;;  %v21_v1 = vstv %s15116_s11 }
   0x2   :  { %15501 = sst [smem:[#allocation138_spill]] %s15104_s2  ;;  %20 = vst [vmem:[#allocation3] sm:$0x1] %v19_v0  ;;  %22 = vst [vmem:[#allocation4] sm:$0x1] %v21_v1 }
   0x3   :  { %15502 = sst [smem:[#allocation139_spill]] %s15105_s3 }
   0x4   :  { %15503 = sst [smem:[#allocation140_spill]] %s15106_s4 }
   0x5   :  { %15504 = sst [smem:[#allocation141_spill]] %s15107_s5 }
   0x6   :  { %23 = vsyncpa [#allocation6], 0 }
   0x7   :  { %25 = vsyncpa [#allocation6 + $0x1], 0  ;;  %s9344_s17 = smov 0   ;;  %s9346_s18 = smov 0  }
   0x8   :  { %s9348_s19 = smov 0   ;;  %s9350_s20 = smov 0  }
   0x9 LB: > { %s9365_s6 = sadd.s32 4294967295, %s9244_s20   ;;  %s8497_s11 = sadd.s32 4294967294, %s9244_s20   ;;  %s9244_s20 = sphi %s9350_s20, %s16233_s20   ;;  %s9240_s19 = sphi %s9348_s19, %s16232_s19   ;;  %s9236_s18 = sphi %s9346_s18, %s16231_s18   ;;  %s9232_s17 = sphi %s9344_s17, %s16230_s17  }
   0xa   : > { %s9369_s21 = sadd.s32 1, %s9244_s20   ;;  %s337_s22 = sadd.s32 1, %s9240_s19 }
   0xb   : > { %s334_s23 = ssub.s32 %s9244_s20, %s9369_s21  ;;  %p347_p0 = scmp.ne.s32.totalorder %s9240_s19, %s9236_s18 }
   0xc   : > { %p335_p1 = scmp.eq.s32.totalorder %s334_s23, 0  ;;  %p348_p2 = scmp.eq.s32.totalorder %s9365_s6, 1 }
   0xd   : > { %p353_p3 = scmp.ne.s32.totalorder %s9236_s18, %s9232_s17  ;;  %p354_p4 = scmp.eq.s32.totalorder %s8497_s11, 1 }
   0xe   : > { %s9380_s24 = scalar_select %p335_p1, %s9240_s19, %s337_s22  }
   0xf   : > { %p9382_p5 = por %p348_p2, %p347_p0  ;;  %p9386_p6 = por %p354_p4, %p353_p3 }
  0x10   : > { %p8500_p7 = scmp.ge.s32.totalorder %s9244_s20, 1  ;;  %p419_p8 = scmp.lt.s32.totalorder %s9244_s20, 3 }
  0x12   : > { %p420_p9 = pnand %p8500_p7, %p419_p8 }
  0x14   : > { %423 = sbr.rel (%p420_p9) target bundleno = 3658 (0xe4a), region = 76 }
  0x1b   : > { %v9395_v2 = vld [vmem:[%s15103_s1 + $0x10] sm:$0xff]  ;;  %v9400_v3 = vld [vmem:[%s15103_s1] sm:$0xff]  ;;  %v15119_v4 = vmov 0   ;;  %v15117_v5 = vmov 1   ;;  %p465_p10 = scmp.lt.s32.totalorder %s9365_s6, 1  ;;  %v9410_v6 = vld [vmem:[%s15103_s1 + $0x18] sm:$0xff] }
  0x1c   : > { %9008 = vset.pattern.permute.xlu1 %v15119_v4  ;;  %9009 = vset.pattern.permute.xlu0 %v15117_v5  ;;  %v9418_v7 = vld [vmem:[%s15103_s1 + $0x28] sm:$0xff]  ;;  %s15507_s0 = sld [smem:[#allocation137_spill]]  ;;  %v9429_v8 = vld [vmem:[%s15103_s1 + $0x38] sm:$0xff]  ;;  %s15508_s2 = sld [smem:[#allocation138_spill]]  ;;  %vm15489_vm0 = vcmask 261120   ;;  %v9835_v4 = vld [vmem:[%s15103_s1 + $0xe0] sm:$0xff] }
  0x1d   : > { %694 = vperm.xlu1 %9008, %v9395_v2   ;;  %941 = vperm.xlu0 %9009, %v9400_v3   ;;  %s466_s11 = scalar_select %p465_p10, %s9365_s6, 1  ;;  %v9459_v24 = vld [vmem:[%s15103_s1 + $0x48] sm:$0xff]  ;;  %v9514_v44 = vld [vmem:[%s15103_s1 + $0x58] sm:$0xff]  ;;  %15556 = vst [vmem:[#allocation54_spill] sm:$0xff] %v9835_v4  ;;  %vm1259_vm2 = vcmask 523520   ;;  %vm1709_vm4 = vcmask 785920  }
  0x1e   : > { %s15509_s3 = sld [smem:[#allocation139_spill]]  ;;  %v9547_v55 = vld [vmem:[%s15103_s1 + $0x68] sm:$0xff]  ;;  %v9578_v0 = vld [vmem:[%s15103_s1 + $0x78] sm:$0xff]  ;;  %s15231_s23 = smov 32   ;;  %vm2094_vm5 = vcmask 1048320  }
  0x1f   : > { %s8586_s22 = sshll.u32 %s466_s11, 8  ;;  %15526 = vst [vmem:[#allocation24_spill] sm:$0xff] %v9578_v0  ;;  %s15229_s27 = smov 64  }
  0x20   : > { %s15355_s28 = smov 96   ;;  %s15756_s29 = smov 32  }
  0x21   : > { %699 = vperm.xlu1 %9008, %v9410_v6   ;;  %956 = vperm.xlu0 %9009, %v9410_v6   ;;  %s15787_s15 = smov 64   ;;  %s15806_s16 = smov 96  }
  0x22   : > { %s9423_s30 = scalar_lea.vmem %s15507_s0, %s8586_s22  ;;  %v9437_v11 = vld [vmem:[%s15508_s2] ss:$0 sm:$0xff]  ;;  %s15837_s4 = sld [smem:[#allocation140_spill]] }
  0x23   : > { %v471_v9 = vld [vmem:[%s9423_s30] sm:$0xff]  ;;  %v502_v10 = vld [vmem:[%s9423_s30 + $0xf8] sm:$0xff]  ;;  %v472_v15 = vld [vmem:[%s9423_s30 + $0x8] sm:$0xff]  ;;  %s15921_s5 = sld [smem:[#allocation141_spill]] }
  0x24   : > { %v9442_v12 = vld [vmem:[%s15509_s3] ss:$0 sm:$0xff]  ;;  %v512_v13 = vmul.f32 %v9437_v11, %v471_v9  ;;  %v543_v14 = vmul.f32 %v9437_v11, %v502_v10  ;;  %v501_v16 = vld [vmem:[%s9423_s30 + $0xf0] sm:$0xff]  ;;  %v513_v18 = vmul.f32 %v9437_v11, %v472_v15  ;;  %v474_v20 = vld [vmem:[%s9423_s30 + $0x18] sm:$0xff] }
  0x25   : > { %709 = vperm.xlu1 %9008, %v9418_v7   ;;  %966 = vperm.xlu0 %9009, %v9418_v7   ;;  %v473_v17 = vld [vmem:[%s9423_s30 + $0x10] sm:$0xff]  ;;  %v542_v19 = vmul.f32 %v9437_v11, %v501_v16  ;;  %v475_v22 = vld [vmem:[%s9423_s30 + $0x20] sm:$0xff]  ;;  %v476_v23 = vld [vmem:[%s9423_s30 + $0x28] sm:$0xff]  ;;  %v515_v27 = vmul.f32 %v9437_v11, %v474_v20 }
  0x26   : > { %v514_v21 = vmul.f32 %v9437_v11, %v473_v17  ;;  %v9463_v25 = vadd.f32 %v9442_v12, %v512_v13  ;;  %v9466_v26 = vadd.f32 %v9442_v12, %v543_v14  ;;  %v477_v28 = vld [vmem:[%s9423_s30 + $0x30] sm:$0xff]  ;;  %v9471_v29 = vadd.f32 %v9442_v12, %v513_v18  ;;  %v478_v33 = vld [vmem:[%s9423_s30 + $0x38] sm:$0xff]  ;;  %v479_v36 = vld [vmem:[%s9423_s30 + $0x40] sm:$0xff] }
  0x27   : > { %v9474_v30 = vadd.f32 %v9442_v12, %v542_v19  ;;  %v516_v32 = vmul.f32 %v9437_v11, %v475_v22  ;;  %v9486_v34 = vadd.f32 %v9442_v12, %v515_v27  ;;  %v517_v35 = vmul.f32 %v9437_v11, %v476_v23  ;;  %v480_v39 = vld [vmem:[%s9423_s30 + $0x48] sm:$0xff]  ;;  %v481_v42 = vld [vmem:[%s9423_s30 + $0x50] sm:$0xff]  ;;  %v482_v43 = vld [vmem:[%s9423_s30 + $0x58] sm:$0xff] }
  0x28   : > { %15510 = vst [vmem:[#allocation8_spill] sm:$0xff] %v9463_v25  ;;  %15511 = vst [vmem:[#allocation9_spill] sm:$0xff] %v9466_v26  ;;  %v9477_v31 = vadd.f32 %v9442_v12, %v514_v21  ;;  %v518_v38 = vmul.f32 %v9437_v11, %v477_v28  ;;  %v519_v41 = vmul.f32 %v9437_v11, %v478_v33  ;;  %v483_v53 = vld [vmem:[%s9423_s30 + $0x60] sm:$0xff]  ;;  %v484_v54 = vld [vmem:[%s9423_s30 + $0x68] sm:$0xff] }
  0x29   : > { %719 = vperm.xlu1 %9008, %v9429_v8   ;;  %976 = vperm.xlu0 %9009, %v9429_v8   ;;  %15512 = vst [vmem:[#allocation10_spill] sm:$0xff] %v9471_v29  ;;  %15513 = vst [vmem:[#allocation11_spill] sm:$0xff] %v9474_v30  ;;  %v9497_v37 = vadd.f32 %v9442_v12, %v516_v32  ;;  %v9506_v40 = vadd.f32 %v9442_v12, %v517_v35  ;;  %v485_v62 = vld [vmem:[%s9423_s30 + $0x70] sm:$0xff]  ;;  %v486_v63 = vld [vmem:[%s9423_s30 + $0x78] sm:$0xff] }
  0x2a   : > { %15514 = vst [vmem:[#allocation12_spill] sm:$0xff] %v9477_v31  ;;  %2127 = vst.msk [vmem:[#allocation2 + $0x8] sm:$0xff] %vm15489_vm0, %v9463_v25  ;;  %v9519_v45 = vadd.f32 %v9442_v12, %v518_v38  ;;  %v520_v46 = vmul.f32 %v9437_v11, %v479_v36  ;;  %v9525_v47 = vadd.f32 %v9442_v12, %v519_v41  ;;  %v487_v14 = vld [vmem:[%s9423_s30 + $0x80] sm:$0xff]  ;;  %v488_v15 = vld [vmem:[%s9423_s30 + $0x88] sm:$0xff] }
  0x2b   : > { %2158 = vst.msk [vmem:[#allocation2 + $0x2f0] sm:$0xff] %vm15489_vm0, %v9466_v26  ;;  %15515 = vst [vmem:[#allocation13_spill] sm:$0xff] %v9486_v34  ;;  %v521_v48 = vmul.f32 %v9437_v11, %v480_v39  ;;  %v522_v50 = vmul.f32 %v9437_v11, %v481_v42  ;;  %v523_v51 = vmul.f32 %v9437_v11, %v482_v43  ;;  %v9599_v16 = vld [vmem:[%s15103_s1 + $0x88] sm:$0xff]  ;;  %v489_v21 = vld [vmem:[%s9423_s30 + $0x90] sm:$0xff] }
  0x2c   : > { %2128 = vst.msk [vmem:[#allocation2 + $0x20] sm:$0xff] %vm15489_vm0, %v9471_v29  ;;  %2157 = vst.msk [vmem:[#allocation2 + $0x2d8] sm:$0xff] %vm15489_vm0, %v9474_v30  ;;  %v9531_v49 = vadd.f32 %v9442_v12, %v520_v46  ;;  %v524_v58 = vmul.f32 %v9437_v11, %v483_v53  ;;  %v525_v59 = vmul.f32 %v9437_v11, %v484_v54  ;;  %v490_v22 = vld [vmem:[%s9423_s30 + $0x98] sm:$0xff]  ;;  %v491_v35 = vld [vmem:[%s9423_s30 + $0xa0] sm:$0xff] }
  0x2d   : > { %2129 = vst.msk [vmem:[#allocation2 + $0x38] sm:$0xff] %vm15489_vm0, %v9477_v31  ;;  %15516 = vst [vmem:[#allocation14_spill] sm:$0xff] %v9497_v37  ;;  %729 = vperm.xlu1 %9008, %v9459_v24   ;;  %986 = vperm.xlu0 %9009, %v9459_v24   ;;  %v9540_v52 = vadd.f32 %v9442_v12, %v521_v48  ;;  %v9552_v56 = vadd.f32 %v9442_v12, %v522_v50  ;;  %v9620_v23 = vld [vmem:[%s15103_s1 + $0x98] sm:$0xff]  ;;  %v492_v36 = vld [vmem:[%s9423_s30 + $0xa8] sm:$0xff] }
  0x2e   : > { %2130 = vst.msk [vmem:[#allocation2 + $0x50] sm:$0xff] %vm15489_vm0, %v9486_v34  ;;  %15517 = vst [vmem:[#allocation15_spill] sm:$0xff] %v9506_v40  ;;  %v9555_v57 = vadd.f32 %v9442_v12, %v523_v51  ;;  %v9566_v60 = vadd.f32 %v9442_v12, %v524_v58  ;;  %v9571_v61 = vadd.f32 %v9442_v12, %v525_v59  ;;  %v9641_v38 = vld [vmem:[%s15103_s1 + $0xa8] sm:$0xff]  ;;  %v493_v46 = vld [vmem:[%s9423_s30 + $0xb0] sm:$0xff] }
  0x2f   : > { %2131 = vst.msk [vmem:[#allocation2 + $0x68] sm:$0xff] %vm15489_vm0, %v9497_v37  ;;  %15518 = vst [vmem:[#allocation16_spill] sm:$0xff] %v9519_v45  ;;  %v526_v1 = vmul.f32 %v9437_v11, %v485_v62  ;;  %v527_v9 = vmul.f32 %v9437_v11, %v486_v63  ;;  %v528_v17 = vmul.f32 %v9437_v11, %v487_v14  ;;  %v494_v48 = vld [vmem:[%s9423_s30 + $0xb8] sm:$0xff]  ;;  %v495_v59 = vld [vmem:[%s9423_s30 + $0xc0] sm:$0xff] }
  0x30   : > { %2132 = vst.msk [vmem:[#allocation2 + $0x80] sm:$0xff] %vm15489_vm0, %v9506_v40  ;;  %15519 = vst [vmem:[#allocation17_spill] sm:$0xff] %v9525_v47  ;;  %v529_v18 = vmul.f32 %v9437_v11, %v488_v15  ;;  %v530_v27 = vmul.f32 %v9437_v11, %v489_v21  ;;  %v531_v28 = vmul.f32 %v9437_v11, %v490_v22  ;;  %v9662_v50 = vld [vmem:[%s15103_s1 + $0xb8] sm:$0xff]  ;;  %v496_v62 = vld [vmem:[%s9423_s30 + $0xc8] sm:$0xff] }
  0x31   : > { %2133 = vst.msk [vmem:[#allocation2 + $0x98] sm:$0xff] %vm15489_vm0, %v9519_v45  ;;  %15520 = vst [vmem:[#allocation18_spill] sm:$0xff] %v9531_v49  ;;  %739 = vperm.xlu1 %9008, %v9514_v44   ;;  %996 = vperm.xlu0 %9009, %v9514_v44   ;;  %v9587_v10 = vadd.f32 %v9442_v12, %v526_v1  ;;  %v9590_v13 = vadd.f32 %v9442_v12, %v527_v9  ;;  %v9683_v63 = vld [vmem:[%s15103_s1 + $0xc8] sm:$0xff]  ;;  %v9704_v21 = vld [vmem:[%s15103_s1 + $0xd8] sm:$0xff] }
  0x32   : > { %2134 = vst.msk [vmem:[#allocation2 + $0xb0] sm:$0xff] %vm15489_vm0, %v9525_v47  ;;  %15521 = vst [vmem:[#allocation19_spill] sm:$0xff] %v9540_v52  ;;  %v9608_v19 = vadd.f32 %v9442_v12, %v528_v17  ;;  %v9611_v20 = vadd.f32 %v9442_v12, %v529_v18  ;;  %v9629_v32 = vadd.f32 %v9442_v12, %v530_v27  ;;  %v497_v17 = vld [vmem:[%s9423_s30 + $0xd0] sm:$0xff]  ;;  %v498_v18 = vld [vmem:[%s9423_s30 + $0xd8] sm:$0xff] }
  0x33   : > { %2135 = vst.msk [vmem:[#allocation2 + $0xc8] sm:$0xff] %vm15489_vm0, %v9531_v49  ;;  %15522 = vst [vmem:[#allocation20_spill] sm:$0xff] %v9552_v56  ;;  %v9632_v33 = vadd.f32 %v9442_v12, %v531_v28  ;;  %v532_v39 = vmul.f32 %v9437_v11, %v491_v35  ;;  %v533_v41 = vmul.f32 %v9437_v11, %v492_v36  ;;  %v499_v36 = vld [vmem:[%s9423_s30 + $0xe0] sm:$0xff] }
  0x34   : > { %15523 = vst [vmem:[#allocation21_spill] sm:$0xff] %v9555_v57  ;;  %2136 = vst.msk [vmem:[#allocation2 + $0xe0] sm:$0xff] %vm15489_vm0, %v9540_v52  ;;  %v534_v51 = vmul.f32 %v9437_v11, %v493_v46  ;;  %v535_v53 = vmul.f32 %v9437_v11, %v494_v48  ;;  %v536_v1 = vmul.f32 %v9437_v11, %v495_v59  ;;  %v9744_v59 = vld [vmem:[%s15103_s1 + $0xf8] sm:$0xff] }
  0x35   : > { %2137 = vst.msk [vmem:[#allocation2 + $0xf8] sm:$0xff] %vm15489_vm0, %v9552_v56  ;;  %2138 = vst.msk [vmem:[#allocation2 + $0x110] sm:$0xff] %vm15489_vm0, %v9555_v57  ;;  %749 = vperm.xlu1 %9008, %v9547_v55   ;;  %1006 = vperm.xlu0 %9009, %v9547_v55   ;;  %v9650_v42 = vadd.f32 %v9442_v12, %v532_v39  ;;  %v9653_v43 = vadd.f32 %v9442_v12, %v533_v41  ;;  %v500_v39 = vld [vmem:[%s9423_s30 + $0xe8] sm:$0xff] }
  0x36   : > { %15524 = vst [vmem:[#allocation22_spill] sm:$0xff] %v9566_v60  ;;  %15525 = vst [vmem:[#allocation23_spill] sm:$0xff] %v9571_v61  ;;  %v9671_v54 = vadd.f32 %v9442_v12, %v534_v51  ;;  %v9674_v58 = vadd.f32 %v9442_v12, %v535_v53  ;;  %v537_v9 = vmul.f32 %v9437_v11, %v496_v62  ;;  %v9725_v41 = vld [vmem:[%s15103_s1 + $0xe8] sm:$0xff]  ;;  %v9769_v62 = vld [vmem:[%s15103_s1 + $0x30] sm:$0xff] }
  0x37   : > { %2139 = vst.msk [vmem:[#allocation2 + $0x128] sm:$0xff] %vm15489_vm0, %v9566_v60  ;;  %2140 = vst.msk [vmem:[#allocation2 + $0x140] sm:$0xff] %vm15489_vm0, %v9571_v61  ;;  %v9692_v14 = vadd.f32 %v9442_v12, %v536_v1  ;;  %v538_v22 = vmul.f32 %v9437_v11, %v497_v17  ;;  %v539_v27 = vmul.f32 %v9437_v11, %v498_v18  ;;  %v9775_v1 = vld [vmem:[%s15103_s1 + $0x40] sm:$0xff]  ;;  %v9793_v18 = vld [vmem:[%s15103_s1 + $0x70] sm:$0xff] }
  0x38   : > { %15527 = vst [vmem:[#allocation25_spill] sm:$0xff] %v9587_v10  ;;  %15528 = vst [vmem:[#allocation26_spill] sm:$0xff] %v9590_v13  ;;  %v9695_v15 = vadd.f32 %v9442_v12, %v537_v9  ;;  %v540_v46 = vmul.f32 %v9437_v11, %v499_v36  ;;  %v541_v48 = vmul.f32 %v9437_v11, %v500_v39  ;;  %v9755_v11 = vld [vmem:[%s15103_s1 + $0x8] sm:$0xff]  ;;  %v9781_v9 = vld [vmem:[%s15103_s1 + $0x50] sm:$0xff] }
  0x39   : > { %759 = vperm.xlu1 %9008, %v9578_v0   ;;  %1016 = vperm.xlu0 %9009, %v9578_v0   ;;  %15529 = vst [vmem:[#allocation27_spill] sm:$0xff] %v9599_v16  ;;  %2141 = vst.msk [vmem:[#allocation2 + $0x158] sm:$0xff] %vm15489_vm0, %v9587_v10  ;;  %v9713_v28 = vadd.f32 %v9442_v12, %v538_v22  ;;  %v9716_v35 = vadd.f32 %v9442_v12, %v539_v27  ;;  %v9787_v17 = vld [vmem:[%s15103_s1 + $0x60] sm:$0xff]  ;;  %v9805_v27 = vld [vmem:[%s15103_s1 + $0x90] sm:$0xff] }
  0x3a   : > { %2142 = vst.msk [vmem:[#allocation2 + $0x170] sm:$0xff] %vm15489_vm0, %v9590_v13  ;;  %15530 = vst [vmem:[#allocation28_spill] sm:$0xff] %v9608_v19  ;;  %v9734_v51 = vadd.f32 %v9442_v12, %v540_v46  ;;  %v9737_v53 = vadd.f32 %v9442_v12, %v541_v48  ;;  %v9763_v12 = vld [vmem:[%s15103_s1 + $0x20] sm:$0xff]  ;;  %v9817_v39 = vld [vmem:[%s15103_s1 + $0xb0] sm:$0xff] }
  0x3b   : > { %15531 = vst [vmem:[#allocation29_spill] sm:$0xff] %v9611_v20  ;;  %15532 = vst [vmem:[#allocation30_spill] sm:$0xff] %v9620_v23  ;;  %v9799_v22 = vld [vmem:[%s15103_s1 + $0x80] sm:$0xff]  ;;  %v9829_v48 = vld [vmem:[%s15103_s1 + $0xd0] sm:$0xff] }
  0x3c   : > { %2143 = vst.msk [vmem:[#allocation2 + $0x188] sm:$0xff] %vm15489_vm0, %v9608_v19  ;;  %2144 = vst.msk [vmem:[#allocation2 + $0x1a0] sm:$0xff] %vm15489_vm0, %v9611_v20  ;;  %v9811_v36 = vld [vmem:[%s15103_s1 + $0xa0] sm:$0xff] }
  0x3d   : > { %769 = vperm.xlu1 %9008, %v9599_v16   ;;  %1026 = vperm.xlu0 %9009, %v9599_v16   ;;  %15533 = vst [vmem:[#allocation31_spill] sm:$0xff] %v9629_v32  ;;  %15534 = vst [vmem:[#allocation32_spill] sm:$0xff] %v9632_v33  ;;  %v9823_v46 = vld [vmem:[%s15103_s1 + $0xc0] sm:$0xff] }
  0x3e   : > { %15535 = vst [vmem:[#allocation33_spill] sm:$0xff] %v9641_v38  ;;  %2145 = vst.msk [vmem:[#allocation2 + $0x1b8] sm:$0xff] %vm15489_vm0, %v9629_v32 }
  0x3f   : > { %2146 = vst.msk [vmem:[#allocation2 + $0x1d0] sm:$0xff] %vm15489_vm0, %v9632_v33  ;;  %15536 = vst [vmem:[#allocation34_spill] sm:$0xff] %v9650_v42 }
  0x40   : > { %15537 = vst [vmem:[#allocation35_spill] sm:$0xff] %v9653_v43  ;;  %15538 = vst [vmem:[#allocation36_spill] sm:$0xff] %v9662_v50 }
  0x41   : > { %779 = vperm.xlu1 %9008, %v9620_v23   ;;  %1036 = vperm.xlu0 %9009, %v9620_v23   ;;  %2147 = vst.msk [vmem:[#allocation2 + $0x1e8] sm:$0xff] %vm15489_vm0, %v9650_v42  ;;  %2148 = vst.msk [vmem:[#allocation2 + $0x200] sm:$0xff] %vm15489_vm0, %v9653_v43  ;;  %v15135_v23 = vmov 2  }
  0x42   : > { %15539 = vst [vmem:[#allocation37_spill] sm:$0xff] %v9671_v54  ;;  %15540 = vst [vmem:[#allocation38_spill] sm:$0xff] %v9674_v58 }
  0x43   : > { %15541 = vst [vmem:[#allocation39_spill] sm:$0xff] %v9683_v63  ;;  %2149 = vst.msk [vmem:[#allocation2 + $0x218] sm:$0xff] %vm15489_vm0, %v9671_v54 }
  0x44   : > { %2150 = vst.msk [vmem:[#allocation2 + $0x230] sm:$0xff] %vm15489_vm0, %v9674_v58  ;;  %15542 = vst [vmem:[#allocation40_spill] sm:$0xff] %v9692_v14 }
  0x45   : > { %789 = vperm.xlu1 %9008, %v9641_v38   ;;  %1046 = vperm.xlu0 %9009, %v9641_v38   ;;  %15543 = vst [vmem:[#allocation41_spill] sm:$0xff] %v9695_v15  ;;  %15544 = vst [vmem:[#allocation42_spill] sm:$0xff] %v9704_v21 }
  0x46   : > { %2151 = vst.msk [vmem:[#allocation2 + $0x248] sm:$0xff] %vm15489_vm0, %v9692_v14  ;;  %2152 = vst.msk [vmem:[#allocation2 + $0x260] sm:$0xff] %vm15489_vm0, %v9695_v15 }
  0x47   : > { %15545 = vst [vmem:[#allocation43_spill] sm:$0xff] %v9713_v28  ;;  %15546 = vst [vmem:[#allocation44_spill] sm:$0xff] %v9716_v35 }
  0x48   : > { %15547 = vst [vmem:[#allocation45_spill] sm:$0xff] %v9725_v41  ;;  %2153 = vst.msk [vmem:[#allocation2 + $0x278] sm:$0xff] %vm15489_vm0, %v9713_v28 }
  0x49   : > { %799 = vperm.xlu1 %9008, %v9662_v50   ;;  %1056 = vperm.xlu0 %9009, %v9662_v50   ;;  %2154 = vst.msk [vmem:[#allocation2 + $0x290] sm:$0xff] %vm15489_vm0, %v9716_v35  ;;  %15548 = vst [vmem:[#allocation46_spill] sm:$0xff] %v9734_v51 }
  0x4a   : > { %15549 = vst [vmem:[#allocation47_spill] sm:$0xff] %v9737_v53  ;;  %15550 = vst [vmem:[#allocation48_spill] sm:$0xff] %v9744_v59 }
  0x4b   : > { %2155 = vst.msk [vmem:[#allocation2 + $0x2a8] sm:$0xff] %vm15489_vm0, %v9734_v51  ;;  %2156 = vst.msk [vmem:[#allocation2 + $0x2c0] sm:$0xff] %vm15489_vm0, %v9737_v53 }
  0x4c   : > { %15551 = vst [vmem:[#allocation49_spill] sm:$0xff] %v9805_v27  ;;  %15552 = vst [vmem:[#allocation50_spill] sm:$0xff] %v9811_v36 }
  0x4d   : > { %809 = vperm.xlu1 %9008, %v9683_v63   ;;  %1066 = vperm.xlu0 %9009, %v9683_v63   ;;  %15553 = vst [vmem:[#allocation51_spill] sm:$0xff] %v9817_v39  ;;  %15554 = vst [vmem:[#allocation52_spill] sm:$0xff] %v9823_v46  ;;  %v9845_v63 = vld [vmem:[%s15103_s1 + $0xf0] sm:$0xff] }
  0x4e   : > { %15555 = vst [vmem:[#allocation53_spill] sm:$0xff] %v9829_v48  ;;  %15558 = vst [vmem:[#allocation56_spill] sm:$0xff] %v9845_v63 }
  0x51   : > { %819 = vperm.xlu1 %9008, %v9704_v21   ;;  %1076 = vperm.xlu0 %9009, %v9704_v21   ;;  %v15132_v21 = vrot.slane %v9466_v26, 7 }
  0x55   : > { %829 = vperm.xlu1 %9008, %v9725_v41   ;;  %1086 = vperm.xlu0 %9009, %v9725_v41   ;;  %v583_v41 = vrot.slane %v9463_v25, 7 }
  0x59   : > { %839 = vperm.xlu1 %9008, %v9744_v59   ;;  %1096 = vperm.xlu0 %9009, %v9744_v59  }
  0x5d   : > { %9010 = vset.pattern.permute.xlu1 %v15117_v5  ;;  %v615_v5 = vlaneseq  ;;  %9012 = vset.pattern.permute.xlu0 %v15135_v23 }
  0x5e   : > { %946 = vperm.xlu1 %9010, %v9755_v11  }
  0x5f   : > { %v9837_v59 = vshrl.u32 %v615_v5, 7 }
  0x61   : > { %15557 = vst [vmem:[#allocation55_spill] sm:$0xff] %v9837_v59  ;;  %vm617_vm1 = vcmp.lt.s32.totalorder %v9837_v59, 1  ;;  %vm1324_vm3 = vcmp.lt.s32.totalorder %v9837_v59, 7 }
  0x62   : > { %951 = vperm.xlu1 %9010, %v9395_v2   ;;  %v9853_v5 = vsel %vm617_vm1, %v15132_v21, %v583_v41  ;;  %v15138_v21 = vrot.slane %v9477_v31, 7 }
  0x63   : > { %15559 = vst [vmem:[#allocation57_spill] sm:$0xff] %v9853_v5 }
  0x66   : > { %961 = vperm.xlu1 %9010, %v9763_v12  }
  0x6a   : > { %971 = vperm.xlu1 %9010, %v9769_v62  }
  0x6e   : > { %981 = vperm.xlu1 %9010, %v9775_v1  }
  0x72   : > { %991 = vperm.xlu1 %9010, %v9781_v9  }
  0x76   : > { %1001 = vperm.xlu1 %9010, %v9787_v17  }
  0x7a   : > { %1011 = vperm.xlu1 %9010, %v9793_v18  }
  0x7e   : > { %1021 = vperm.xlu1 %9010, %v9799_v22  }
  0x82   : > { %1031 = vperm.xlu1 %9010, %v9805_v27  }
  0x86   : > { %1041 = vperm.xlu1 %9010, %v9811_v36  }
  0x8a   : > { %1051 = vperm.xlu1 %9010, %v9817_v39   ;;  %v15137_v39 = vrot.slane %v9486_v34, 7 }
  0x8e   : > { %1061 = vperm.xlu1 %9010, %v9823_v46  }
  0x92   : > { %1071 = vperm.xlu1 %9010, %v9829_v48  }
  0x96   : > { %1081 = vperm.xlu1 %9010, %v9835_v4   ;;  %v15134_v4 = vrot.slane %v9471_v29, 7 }
  0x9a   : > { %1091 = vperm.xlu1 %9010, %v9845_v63   ;;  %v9863_v63 = vsel %vm617_vm1, %v583_v41, %v15134_v4  ;;  %v9877_v41 = vsel %vm617_vm1, %v15138_v21, %v15137_v39  ;;  %v15142_v4 = vrot.slane %v9497_v37, 7  ;;  %v15146_v39 = vrot.slane %v9519_v45, 7 }
  0x9b   : > { %15560 = vst [vmem:[#allocation58_spill] sm:$0xff] %v9863_v63  ;;  %15561 = vst [vmem:[#allocation59_spill] sm:$0xff] %v9877_v41  ;;  %v15145_v21 = vrot.slane %v9525_v47, 7 }
  0x9c   : > { %v695_v50 = vpop.permute.xlu1 %694  ;;  %v942_v48 = vpop.permute.xlu0 %941 }
  0x9d   : > { %v844_v38 = vmul.f32 %v695_v50, %v9853_v5  ;;  %v1099_v46 = vmul.f32 %v942_v48, %v9474_v30 }
  0x9e   : > { %9011 = vset.pattern.permute.xlu1 %v15135_v23  ;;  %v15141_v23 = vrot.slane %v9506_v40, 7 }
  0x9f   : > { %877 = vst.msk [vmem:[#allocation2 + $0x30] sm:$0xff] %vm15489_vm0, %v844_v38  ;;  %1163 = vrot.lane.b32.xlu1 %v1099_v46, %s15231_s23 }
  0xa0   : > { %v700_v50 = vpop.permute.xlu1 %699 }
  0xa1   : > { %v845_v48 = vmul.f32 %v700_v50, %v9863_v63  ;;  %v9889_v50 = vsel %vm617_vm1, %v15142_v4, %v15141_v23  ;;  %v15150_v23 = vrot.slane %v9531_v49, 7  ;;  %v15149_v4 = vrot.slane %v9540_v52, 7 }
  0xa2   : > { %15562 = vst [vmem:[#allocation60_spill] sm:$0xff] %v9889_v50 }
  0xa3   : > { %878 = vst.msk [vmem:[#allocation2 + $0x48] sm:$0xff] %vm15489_vm0, %v845_v48 }
  0xa4   : > { %v710_v38 = vpop.permute.xlu1 %709 }
  0xa5   : > { %v847_v46 = vmul.f32 %v710_v38, %v9877_v41  ;;  %v9901_v38 = vsel %vm617_vm1, %v15146_v39, %v15145_v21  ;;  %v15154_v21 = vrot.slane %v9552_v56, 7  ;;  %v15153_v39 = vrot.slane %v9555_v57, 7 }
  0xa6   : > { %15563 = vst [vmem:[#allocation61_spill] sm:$0xff] %v9901_v38 }
  0xa7   : > { %880 = vst.msk [vmem:[#allocation2 + $0x78] sm:$0xff] %vm15489_vm0, %v847_v46 }
  0xa8   : > { %v720_v63 = vpop.permute.xlu1 %719 }
  0xa9   : > { %v849_v48 = vmul.f32 %v720_v63, %v9889_v50  ;;  %v9913_v63 = vsel %vm617_vm1, %v15150_v23, %v15149_v4  ;;  %v15158_v4 = vrot.slane %v9566_v60, 7  ;;  %v15157_v23 = vrot.slane %v9571_v61, 7 }
  0xaa   : > { %15564 = vst [vmem:[#allocation62_spill] sm:$0xff] %v9913_v63 }
  0xab   : > { %882 = vst.msk [vmem:[#allocation2 + $0xa8] sm:$0xff] %vm15489_vm0, %v849_v48 }
  0xac   : > { %v730_v41 = vpop.permute.xlu1 %729 }
  0xad   : > { %v851_v46 = vmul.f32 %v730_v41, %v9901_v38  ;;  %v9925_v41 = vsel %vm617_vm1, %v15154_v21, %v15153_v39  ;;  %v15162_v39 = vrot.slane %v9587_v10, 7  ;;  %v15161_v21 = vrot.slane %v9590_v13, 7 }
  0xae   : > { %15565 = vst [vmem:[#allocation63_spill] sm:$0xff] %v9925_v41 }
  0xaf   : > { %884 = vst.msk [vmem:[#allocation2 + $0xd8] sm:$0xff] %vm15489_vm0, %v851_v46 }
  0xb0   : > { %v740_v50 = vpop.permute.xlu1 %739 }
  0xb1   : > { %v853_v48 = vmul.f32 %v740_v50, %v9913_v63  ;;  %v9937_v50 = vsel %vm617_vm1, %v15158_v4, %v15157_v23  ;;  %v15166_v23 = vrot.slane %v9608_v19, 7  ;;  %v15165_v4 = vrot.slane %v9611_v20, 7 }
  0xb2   : > { %15566 = vst [vmem:[#allocation64_spill] sm:$0xff] %v9937_v50 }
  0xb3   : > { %886 = vst.msk [vmem:[#allocation2 + $0x108] sm:$0xff] %vm15489_vm0, %v853_v48 }
  0xb4   : > { %v750_v38 = vpop.permute.xlu1 %749 }
  0xb5   : > { %v855_v46 = vmul.f32 %v750_v38, %v9925_v41  ;;  %v9949_v38 = vsel %vm617_vm1, %v15162_v39, %v15161_v21  ;;  %v15172_v21 = vrot.slane %v9629_v32, 7  ;;  %v15171_v39 = vrot.slane %v9632_v33, 7 }
  0xb6   : > { %15567 = vst [vmem:[#allocation65_spill] sm:$0xff] %v9949_v38 }
  0xb7   : > { %888 = vst.msk [vmem:[#allocation2 + $0x138] sm:$0xff] %vm15489_vm0, %v855_v46 }
  0xb8   : > { %v760_v63 = vpop.permute.xlu1 %759 }
  0xb9   : > { %v857_v48 = vmul.f32 %v760_v63, %v9937_v50  ;;  %v9961_v63 = vsel %vm617_vm1, %v15166_v23, %v15165_v4  ;;  %v15178_v4 = vrot.slane %v9650_v42, 7  ;;  %v15177_v23 = vrot.slane %v9653_v43, 7 }
  0xba   : > { %15568 = vst [vmem:[#allocation66_spill] sm:$0xff] %v9961_v63 }
  0xbb   : > { %890 = vst.msk [vmem:[#allocation2 + $0x168] sm:$0xff] %vm15489_vm0, %v857_v48 }
  0xbc   : > { %v770_v41 = vpop.permute.xlu1 %769 }
  0xbd   : > { %v859_v46 = vmul.f32 %v770_v41, %v9949_v38  ;;  %v9973_v41 = vsel %vm617_vm1, %v15172_v21, %v15171_v39  ;;  %v957_v38 = vpop.permute.xlu0 %956  ;;  %v15182_v39 = vrot.slane %v9671_v54, 7  ;;  %v15181_v21 = vrot.slane %v9674_v58, 7 }
  0xbe   : > { %15569 = vst [vmem:[#allocation67_spill] sm:$0xff] %v9973_v41  ;;  %v1102_v27 = vmul.f32 %v957_v38, %v9471_v29 }
  0xbf   : > { %892 = vst.msk [vmem:[#allocation2 + $0x198] sm:$0xff] %vm15489_vm0, %v859_v46 }
  0xc0   : > { %v780_v50 = vpop.permute.xlu1 %779 }
  0xc1   : > { %v861_v48 = vmul.f32 %v780_v50, %v9961_v63  ;;  %v9985_v50 = vsel %vm617_vm1, %v15178_v4, %v15177_v23  ;;  %v967_v30 = vpop.permute.xlu0 %966  ;;  %v15187_v23 = vrot.slane %v9692_v14, 7  ;;  %v15186_v4 = vrot.slane %v9695_v15, 7 }
  0xc2   : > { %15570 = vst [vmem:[#allocation68_spill] sm:$0xff] %v9985_v50 }
  0xc3   : > { %894 = vst.msk [vmem:[#allocation2 + $0x1c8] sm:$0xff] %vm15489_vm0, %v861_v48 }
  0xc4   : > { %v790_v5 = vpop.permute.xlu1 %789 }
  0xc5   : > { %v863_v46 = vmul.f32 %v790_v5, %v9973_v41  ;;  %v9997_v5 = vsel %vm617_vm1, %v15182_v39, %v15181_v21  ;;  %v15192_v21 = vrot.slane %v9713_v28, 7  ;;  %v15191_v39 = vrot.slane %v9716_v35, 7 }
  0xc6   : > { %15571 = vst [vmem:[#allocation69_spill] sm:$0xff] %v9997_v5 }
  0xc7   : > { %896 = vst.msk [vmem:[#allocation2 + $0x1f8] sm:$0xff] %vm15489_vm0, %v863_v46 }
  0xc8   : > { %v800_v63 = vpop.permute.xlu1 %799 }
  0xc9   : > { %v865_v48 = vmul.f32 %v800_v63, %v9985_v50  ;;  %v10009_v63 = vsel %vm617_vm1, %v15187_v23, %v15186_v4  ;;  %v977_v50 = vpop.permute.xlu0 %976  ;;  %v15200_v4 = vrot.slane %v9734_v51, 7  ;;  %v15199_v23 = vrot.slane %v9737_v53, 7 }
  0xca   : > { %15572 = vst [vmem:[#allocation70_spill] sm:$0xff] %v10009_v63 }
  0xcb   : > { %898 = vst.msk [vmem:[#allocation2 + $0x228] sm:$0xff] %vm15489_vm0, %v865_v48 }
  0xcc   : > { %v810_v41 = vpop.permute.xlu1 %809 }
  0xcd   : > { %v867_v46 = vmul.f32 %v810_v41, %v9997_v5  ;;  %v10021_v41 = vsel %vm617_vm1, %v15192_v21, %v15191_v39  ;;  %v987_v36 = vpop.permute.xlu0 %986 }
  0xce   : > { %15573 = vst [vmem:[#allocation71_spill] sm:$0xff] %v10021_v41 }
  0xcf   : > { %900 = vst.msk [vmem:[#allocation2 + $0x258] sm:$0xff] %vm15489_vm0, %v867_v46 }
  0xd0   : > { %v820_v16 = vpop.permute.xlu1 %819 }
  0xd1   : > { %v869_v48 = vmul.f32 %v820_v16, %v10009_v63  ;;  %v10033_v16 = vsel %vm617_vm1, %v15200_v4, %v15199_v23  ;;  %v997_v63 = vpop.permute.xlu0 %996 }
  0xd2   : > { %15574 = vst [vmem:[#allocation72_spill] sm:$0xff] %v10033_v16 }
  0xd3   : > { %902 = vst.msk [vmem:[#allocation2 + $0x288] sm:$0xff] %vm15489_vm0, %v869_v48 }
  0xd4   : > { %v830_v5 = vpop.permute.xlu1 %829 }
  0xd5   : > { %v871_v46 = vmul.f32 %v830_v5, %v10021_v41  ;;  %v1007_v5 = vpop.permute.xlu0 %1006 }
  0xd7   : > { %904 = vst.msk [vmem:[#allocation2 + $0x2b8] sm:$0xff] %vm15489_vm0, %v871_v46 }
  0xd8   : > { %v840_v39 = vpop.permute.xlu1 %839 }
  0xd9   : > { %v873_v21 = vmul.f32 %v840_v39, %v10033_v16  ;;  %v1104_v39 = vmul.f32 %v967_v30, %v9486_v34  ;;  %v1017_v4 = vpop.permute.xlu0 %1016  ;;  %v1108_v30 = vmul.f32 %v987_v36, %v9525_v47 }
  0xdb   : > { %906 = vst.msk [vmem:[#allocation2 + $0x2e8] sm:$0xff] %vm15489_vm0, %v873_v21 }
  0xdd   : > { %v947_v48 = vpop.permute.xlu1 %946 }
  0xde   : > { %v1100_v0 = vmul.f32 %v947_v48, %v9466_v26  ;;  %v1106_v48 = vmul.f32 %v977_v50, %v9506_v40 }
  0xe0   : > { %1165 = vrot.lane.b32.xlu0 %v1100_v0, %s15231_s23 }
  0xe1   : > { %v952_v41 = vpop.permute.xlu1 %951 }
  0xe2   : > { %v1101_v23 = vmul.f32 %v952_v41, %v9463_v25 }
  0xe4   : > { %1169 = vrot.lane.b32.xlu0 %v1102_v27, %s15231_s23  ;;  %1167 = vrot.lane.b32.xlu1 %v1101_v23, %s15231_s23  ;;  %v1027_v23 = vpop.permute.xlu0 %1026 }
  0xe5   : > { %v962_v46 = vpop.permute.xlu1 %961 }
  0xe6   : > { %v1103_v21 = vmul.f32 %v962_v46, %v9477_v31 }
  0xe8   : > { %1173 = vrot.lane.b32.xlu0 %v1104_v39, %s15231_s23  ;;  %1171 = vrot.lane.b32.xlu1 %v1103_v21, %s15231_s23  ;;  %v1110_v39 = vmul.f32 %v997_v63, %v9540_v52  ;;  %v1037_v21 = vpop.permute.xlu0 %1036  ;;  %v1114_v63 = vmul.f32 %v1017_v4, %v9571_v61 }
  0xe9   : > { %v972_v0 = vpop.permute.xlu1 %971 }
  0xea   : > { %v1105_v38 = vmul.f32 %v972_v0, %v9497_v37 }
  0xec   : > { %1177 = vrot.lane.b32.xlu0 %v1106_v48, %s15231_s23  ;;  %1175 = vrot.lane.b32.xlu1 %v1105_v38, %s15231_s23  ;;  %v1112_v48 = vmul.f32 %v1007_v5, %v9555_v57  ;;  %v1047_v38 = vpop.permute.xlu0 %1046 }
  0xed   : > { %v982_v27 = vpop.permute.xlu1 %981 }
  0xee   : > { %v1107_v41 = vmul.f32 %v982_v27, %v9519_v45 }
  0xf0   : > { %1181 = vrot.lane.b32.xlu0 %v1108_v30, %s15231_s23  ;;  %1179 = vrot.lane.b32.xlu1 %v1107_v41, %s15231_s23 }
  0xf1   : > { %v992_v46 = vpop.permute.xlu1 %991 }
  0xf2   : > { %v1109_v50 = vmul.f32 %v992_v46, %v9531_v49  ;;  %v1116_v46 = vmul.f32 %v1027_v23, %v9590_v13  ;;  %v1120_v23 = vmul.f32 %v1047_v38, %v9632_v33 }
  0xf4   : > { %1185 = vrot.lane.b32.xlu0 %v1110_v39, %s15231_s23  ;;  %1183 = vrot.lane.b32.xlu1 %v1109_v50, %s15231_s23  ;;  %v1057_v39 = vpop.permute.xlu0 %1056 }
  0xf5   : > { %v1002_v0 = vpop.permute.xlu1 %1001 }
  0xf6   : > { %v1111_v36 = vmul.f32 %v1002_v0, %v9552_v56  ;;  %v1118_v0 = vmul.f32 %v1037_v21, %v9611_v20 }
  0xf8   : > { %1189 = vrot.lane.b32.xlu0 %v1112_v48, %s15231_s23  ;;  %1187 = vrot.lane.b32.xlu1 %v1111_v36, %s15231_s23  ;;  %v1067_v48 = vpop.permute.xlu0 %1066 }
  0xf9   : > { %v1012_v27 = vpop.permute.xlu1 %1011 }
  0xfa   : > { %v1113_v30 = vmul.f32 %v1012_v27, %v9566_v60 }
  0xfc   : > { %1193 = vrot.lane.b32.xlu0 %v1114_v63, %s15231_s23  ;;  %1191 = vrot.lane.b32.xlu1 %v1113_v30, %s15231_s23  ;;  %v1122_v30 = vmul.f32 %v1057_v39, %v9653_v43 }
  0xfd   : > { %v1022_v41 = vpop.permute.xlu1 %1021 }
  0xfe   : > { %v1115_v5 = vmul.f32 %v1022_v41, %v9587_v10  ;;  %v1077_v41 = vpop.permute.xlu0 %1076 }
  0xff   : > { %v1126_v39 = vmul.f32 %v1077_v41, %v9695_v15  ;;  %v15589_v41 = vld [vmem:[#allocation56_spill] sm:$0xff] }
 0x100   : > { %1197 = vrot.lane.b32.xlu0 %v1116_v46, %s15231_s23  ;;  %1195 = vrot.lane.b32.xlu1 %v1115_v5, %s15231_s23  ;;  %v1124_v5 = vmul.f32 %v1067_v48, %v9674_v58 }
 0x101   : > { %v1032_v50 = vpop.permute.xlu1 %1031 }
 0x102   : > { %v1117_v4 = vmul.f32 %v1032_v50, %v9608_v19  ;;  %v1087_v50 = vpop.permute.xlu0 %1086 }
 0x104   : > { %1201 = vrot.lane.b32.xlu0 %v1118_v0, %s15231_s23  ;;  %1199 = vrot.lane.b32.xlu1 %v1117_v4, %s15231_s23 }
 0x105   : > { %v1042_v36 = vpop.permute.xlu1 %1041 }
 0x106   : > { %v1119_v27 = vmul.f32 %v1042_v36, %v9629_v32 }
 0x108   : > { %1205 = vrot.lane.b32.xlu0 %v1120_v23, %s15231_s23  ;;  %1203 = vrot.lane.b32.xlu1 %v1119_v27, %s15231_s23  ;;  %v1128_v23 = vmul.f32 %v1087_v50, %v9716_v35  ;;  %v1097_v27 = vpop.permute.xlu0 %1096  ;;  %v15592_v50 = vld [vmem:[#allocation45_spill] sm:$0xff] }
 0x109   : > { %v1052_v63 = vpop.permute.xlu1 %1051 }
 0x10a   : > { %v1121_v21 = vmul.f32 %v1052_v63, %v9650_v42 }
 0x10c   : > { %1209 = vrot.lane.b32.xlu0 %v1122_v30, %s15231_s23  ;;  %1207 = vrot.lane.b32.xlu1 %v1121_v21, %s15231_s23  ;;  %v1130_v30 = vmul.f32 %v1097_v27, %v9737_v53 }
 0x10d   : > { %v1062_v46 = vpop.permute.xlu1 %1061 }
 0x10e   : > { %v1123_v38 = vmul.f32 %v1062_v46, %v9671_v54  ;;  %v15590_v46 = vld [vmem:[#allocation42_spill] sm:$0xff] }
 0x110   : > { %1213 = vrot.lane.b32.xlu0 %v1124_v5, %s15231_s23  ;;  %1211 = vrot.lane.b32.xlu1 %v1123_v38, %s15231_s23 }
 0x111   : > { %v1072_v0 = vpop.permute.xlu1 %1071 }
 0x112   : > { %v1125_v4 = vmul.f32 %v1072_v0, %v9692_v14 }
 0x114   : > { %1217 = vrot.lane.b32.xlu0 %v1126_v39, %s15231_s23  ;;  %1215 = vrot.lane.b32.xlu1 %v1125_v4, %s15231_s23  ;;  %v15594_v4 = vld [vmem:[#allocation48_spill] sm:$0xff] }
 0x115   : > { %v1082_v36 = vpop.permute.xlu1 %1081 }
 0x116   : > { %v1127_v48 = vmul.f32 %v1082_v36, %v9713_v28  ;;  %v15201_v36 = vmov 3  }
 0x118   : > { %1221 = vrot.lane.b32.xlu0 %v1128_v23, %s15231_s23  ;;  %1219 = vrot.lane.b32.xlu1 %v1127_v48, %s15231_s23 }
 0x119   : > { %v1092_v63 = vpop.permute.xlu1 %1091 }
 0x11a   : > { %v1129_v21 = vmul.f32 %v1092_v63, %v9734_v51 }
 0x11c   : > { %1225 = vrot.lane.b32.xlu0 %v1130_v30, %s15231_s23  ;;  %1223 = vrot.lane.b32.xlu1 %v1129_v21, %s15231_s23  ;;  %s8587_s23 = sshll.u32 %s9365_s6, 12 }
 0x120   : > { %1396 = vperm.xlu0 %9012, %v9755_v11   ;;  %1391 = vperm.xlu1 %9011, %v9400_v3   ;;  %v15576_v3 = vld [vmem:[#allocation24_spill] sm:$0xff]  ;;  %v15580_v11 = vld [vmem:[#allocation30_spill] sm:$0xff] }
 0x124   : > { %1411 = vperm.xlu0 %9012, %v9763_v12   ;;  %1401 = vperm.xlu1 %9011, %v9395_v2   ;;  %v15575_v2 = vld [vmem:[#allocation49_spill] sm:$0xff] }
 0x125   : > { %v15582_v12 = vld [vmem:[#allocation33_spill] sm:$0xff] }
 0x128   : > { %1421 = vperm.xlu0 %9012, %v9769_v62   ;;  %1406 = vperm.xlu1 %9011, %v9410_v6   ;;  %v15577_v6 = vld [vmem:[#allocation50_spill] sm:$0xff]  ;;  %v15584_v62 = vld [vmem:[#allocation36_spill] sm:$0xff] }
 0x12c   : > { %1431 = vperm.xlu0 %9012, %v9775_v1   ;;  %1416 = vperm.xlu1 %9011, %v9418_v7   ;;  %v15578_v7 = vld [vmem:[#allocation27_spill] sm:$0xff] }
 0x130   : > { %1441 = vperm.xlu0 %9012, %v9781_v9   ;;  %1426 = vperm.xlu1 %9011, %v9429_v8   ;;  %v15579_v8 = vld [vmem:[#allocation51_spill] sm:$0xff]  ;;  %v15587_v9 = vld [vmem:[#allocation54_spill] sm:$0xff] }
 0x134   : > { %1451 = vperm.xlu0 %9012, %v9787_v17   ;;  %1436 = vperm.xlu1 %9011, %v9459_v24   ;;  %v15581_v24 = vld [vmem:[#allocation52_spill] sm:$0xff]  ;;  %v15588_v17 = vld [vmem:[#allocation39_spill] sm:$0xff] }
 0x138   : > { %1461 = vperm.xlu0 %9012, %v9793_v18   ;;  %1446 = vperm.xlu1 %9011, %v9514_v44   ;;  %v15583_v44 = vld [vmem:[#allocation53_spill] sm:$0xff] }
 0x13c   : > { %1471 = vperm.xlu0 %9012, %v9799_v22   ;;  %1456 = vperm.xlu1 %9011, %v9547_v55   ;;  %v10126_v55 = vpop.permute.xlu1 %1163 }
 0x13d   : > { %15585 = vst [vmem:[#allocation49_spill] sm:$0xff] %v10126_v55  ;;  %v1309_v55 = vrot.slane %v9611_v20, 1 }
 0x140   : > { %1481 = vperm.xlu0 %9012, %v15575_v2   ;;  %1466 = vperm.xlu1 %9011, %v15576_v3  }
 0x144   : > { %1491 = vperm.xlu0 %9012, %v15577_v6   ;;  %1476 = vperm.xlu1 %9011, %v15578_v7  }
 0x148   : > { %1501 = vperm.xlu0 %9012, %v15579_v8   ;;  %1486 = vperm.xlu1 %9011, %v15580_v11  }
 0x14c   : > { %1511 = vperm.xlu0 %9012, %v15581_v24   ;;  %1496 = vperm.xlu1 %9011, %v15582_v12  }
 0x150   : > { %1521 = vperm.xlu0 %9012, %v15583_v44   ;;  %1506 = vperm.xlu1 %9011, %v15584_v62  }
 0x152   : > { %v10128_v1 = vpop.permute.xlu0 %1165 }
 0x153   : > { %15586 = vst [vmem:[#allocation24_spill] sm:$0xff] %v10128_v1  ;;  %v1308_v1 = vrot.slane %v9608_v19, 1 }
 0x154   : > { %1531 = vperm.xlu0 %9012, %v15587_v9   ;;  %1516 = vperm.xlu1 %9011, %v15588_v17  }
 0x156   : > { %v1170_v18 = vpop.permute.xlu0 %1169  ;;  %v1168_v22 = vpop.permute.xlu1 %1167 }
 0x157   : > { %1263 = vst.msk [vmem:[#allocation2 + $0x48] sm:$0xff] %vm1259_vm2, %v1170_v18  ;;  %1262 = vst.msk [vmem:[#allocation2 + $0x30] sm:$0xff] %vm1259_vm2, %v1168_v22 }
 0x158   : > { %1541 = vperm.xlu0 %9012, %v15589_v41   ;;  %1526 = vperm.xlu1 %9011, %v15590_v46  }
 0x15a   : > { %v1174_v5 = vpop.permute.xlu0 %1173  ;;  %v10136_v38 = vpop.permute.xlu1 %1171 }
 0x15b   : > { %15591 = vst [vmem:[#allocation50_spill] sm:$0xff] %v10136_v38  ;;  %1265 = vst.msk [vmem:[#allocation2 + $0x78] sm:$0xff] %vm1259_vm2, %v1174_v5  ;;  %v1307_v38 = vrot.slane %v9590_v13, 1 }
 0x15c   : > { %1536 = vperm.xlu1 %9011, %v15592_v50   ;;  %9013 = vset.pattern.permute.xlu0 %v15201_v36  ;;  %v1323_v50 = vrot.slane %v9466_v26, 1 }
 0x15e   : > { %v1178_v0 = vpop.permute.xlu0 %1177  ;;  %v10140_v39 = vpop.permute.xlu1 %1175 }
 0x15f   : > { %15593 = vst [vmem:[#allocation27_spill] sm:$0xff] %v10140_v39  ;;  %1267 = vst.msk [vmem:[#allocation2 + $0xa8] sm:$0xff] %vm1259_vm2, %v1178_v0  ;;  %v1292_v0 = vrot.slane %v9463_v25, 1  ;;  %v1306_v39 = vrot.slane %v9587_v10, 1  ;;  %v1310_v25 = vrot.slane %v9629_v32, 1 }
 0x160   : > { %1546 = vperm.xlu1 %9011, %v15594_v4   ;;  %v15606_v4 = vld [vmem:[#allocation11_spill] sm:$0xff] }
 0x162   : > { %v1182_v23 = vpop.permute.xlu0 %1181  ;;  %v10145_v48 = vpop.permute.xlu1 %1179 }
 0x163   : > { %15595 = vst [vmem:[#allocation51_spill] sm:$0xff] %v10145_v48  ;;  %1269 = vst.msk [vmem:[#allocation2 + $0xd8] sm:$0xff] %vm1259_vm2, %v1182_v23  ;;  %v15203_v23 = vrot.slane %v15606_v4, 1  ;;  %v1305_v48 = vrot.slane %v9571_v61, 1 }
 0x164   : > { %9014 = vset.pattern.permute.xlu1 %v15201_v36 }
 0x166   : > { %v1186_v27 = vpop.permute.xlu0 %1185  ;;  %v10149_v63 = vpop.permute.xlu1 %1183 }
 0x167   : > { %15596 = vst [vmem:[#allocation30_spill] sm:$0xff] %v10149_v63  ;;  %1271 = vst.msk [vmem:[#allocation2 + $0x108] sm:$0xff] %vm1259_vm2, %v1186_v27  ;;  %v1304_v63 = vrot.slane %v9566_v60, 1 }
 0x16a   : > { %v1190_v30 = vpop.permute.xlu0 %1189  ;;  %v10152_v21 = vpop.permute.xlu1 %1187 }
 0x16b   : > { %15597 = vst [vmem:[#allocation52_spill] sm:$0xff] %v10152_v21  ;;  %1273 = vst.msk [vmem:[#allocation2 + $0x138] sm:$0xff] %vm1259_vm2, %v1190_v30  ;;  %v10188_v30 = vsel %vm1324_vm3, %v1323_v50, %v1292_v0  ;;  %v1303_v21 = vrot.slane %v9555_v57, 1 }
 0x16c   : > { %15608 = vst [vmem:[#allocation73_spill] sm:$0xff] %v10188_v30 }
 0x16e   : > { %v1194_v2 = vpop.permute.xlu0 %1193  ;;  %v10155_v3 = vpop.permute.xlu1 %1191 }
 0x16f   : > { %15598 = vst [vmem:[#allocation33_spill] sm:$0xff] %v10155_v3  ;;  %1275 = vst.msk [vmem:[#allocation2 + $0x168] sm:$0xff] %vm1259_vm2, %v1194_v2  ;;  %v10194_v2 = vsel %vm1324_vm3, %v15203_v23, %v1323_v50  ;;  %v1302_v3 = vrot.slane %v9552_v56, 1 }
 0x170   : > { %15609 = vst [vmem:[#allocation74_spill] sm:$0xff] %v10194_v2 }
 0x172   : > { %v1198_v6 = vpop.permute.xlu0 %1197  ;;  %v10158_v7 = vpop.permute.xlu1 %1195 }
 0x173   : > { %15599 = vst [vmem:[#allocation53_spill] sm:$0xff] %v10158_v7  ;;  %1277 = vst.msk [vmem:[#allocation2 + $0x198] sm:$0xff] %vm1259_vm2, %v1198_v6  ;;  %v1293_v6 = vrot.slane %v9471_v29, 1  ;;  %v1301_v7 = vrot.slane %v9540_v52, 1 }
 0x176   : > { %v1202_v8 = vpop.permute.xlu0 %1201  ;;  %v10162_v11 = vpop.permute.xlu1 %1199 }
 0x177   : > { %1279 = vst.msk [vmem:[#allocation2 + $0x1c8] sm:$0xff] %vm1259_vm2, %v1202_v8  ;;  %15600 = vst [vmem:[#allocation36_spill] sm:$0xff] %v10162_v11  ;;  %v1300_v11 = vrot.slane %v9531_v49, 1 }
 0x17a   : > { %v1206_v24 = vpop.permute.xlu0 %1205  ;;  %v10165_v12 = vpop.permute.xlu1 %1203 }
 0x17b   : > { %1281 = vst.msk [vmem:[#allocation2 + $0x1f8] sm:$0xff] %vm1259_vm2, %v1206_v24  ;;  %15601 = vst [vmem:[#allocation54_spill] sm:$0xff] %v10165_v12 }
 0x17e   : > { %v1210_v44 = vpop.permute.xlu0 %1209  ;;  %v10168_v9 = vpop.permute.xlu1 %1207 }
 0x17f   : > { %1283 = vst.msk [vmem:[#allocation2 + $0x228] sm:$0xff] %vm1259_vm2, %v1210_v44  ;;  %15602 = vst [vmem:[#allocation39_spill] sm:$0xff] %v10168_v9  ;;  %v1299_v9 = vrot.slane %v9525_v47, 1 }
 0x182   : > { %v1214_v62 = vpop.permute.xlu0 %1213  ;;  %v10172_v18 = vpop.permute.xlu1 %1211 }
 0x183   : > { %1285 = vst.msk [vmem:[#allocation2 + $0x258] sm:$0xff] %vm1259_vm2, %v1214_v62  ;;  %15603 = vst [vmem:[#allocation56_spill] sm:$0xff] %v10172_v18  ;;  %v1298_v18 = vrot.slane %v9519_v45, 1 }
 0x185   : > { %v10237_v12 = vsel %vm1324_vm3, %v1298_v18, %v1299_v9 }
 0x186   : > { %v1218_v17 = vpop.permute.xlu0 %1217  ;;  %v10175_v46 = vpop.permute.xlu1 %1215  ;;  %15615 = vst [vmem:[#allocation80_spill] sm:$0xff] %v10237_v12 }
 0x187   : > { %1287 = vst.msk [vmem:[#allocation2 + $0x288] sm:$0xff] %vm1259_vm2, %v1218_v17  ;;  %15604 = vst [vmem:[#allocation42_spill] sm:$0xff] %v10175_v46  ;;  %v1294_v17 = vrot.slane %v9477_v31, 1 }
 0x18a   : > { %v1222_v22 = vpop.permute.xlu0 %1221  ;;  %v10178_v5 = vpop.permute.xlu1 %1219 }
 0x18b   : > { %1289 = vst.msk [vmem:[#allocation2 + $0x2b8] sm:$0xff] %vm1259_vm2, %v1222_v22  ;;  %15605 = vst [vmem:[#allocation45_spill] sm:$0xff] %v10178_v5  ;;  %v1295_v22 = vrot.slane %v9486_v34, 1 }
 0x18e   : > { %v1226_v41 = vpop.permute.xlu0 %1225  ;;  %v10184_v27 = vpop.permute.xlu1 %1223 }
 0x18f   : > { %1291 = vst.msk [vmem:[#allocation2 + $0x2e8] sm:$0xff] %vm1259_vm2, %v1226_v41  ;;  %15607 = vst [vmem:[#allocation48_spill] sm:$0xff] %v10184_v27  ;;  %v10203_v41 = vsel %vm1324_vm3, %v1292_v0, %v1293_v6  ;;  %v1297_v27 = vrot.slane %v9506_v40, 1  ;;  %v10216_v0 = vsel %vm1324_vm3, %v1293_v6, %v1294_v17 }
 0x190   : > { %15610 = vst [vmem:[#allocation75_spill] sm:$0xff] %v10203_v41  ;;  %15612 = vst [vmem:[#allocation77_spill] sm:$0xff] %v10216_v0 }
 0x19f   : > { %v1397_v8 = vpop.permute.xlu0 %1396  ;;  %v1392_v24 = vpop.permute.xlu1 %1391 }
 0x1a0   : > { %v1550_v44 = vmul.f32 %v1397_v8, %v10188_v30  ;;  %v1549_v62 = vmul.f32 %v1392_v24, %v10194_v2  ;;  %v10210_v8 = vsel %vm1324_vm3, %v1294_v17, %v1295_v22  ;;  %v1296_v24 = vrot.slane %v9497_v37, 1 }
 0x1a1   : > { %15611 = vst [vmem:[#allocation76_spill] sm:$0xff] %v10210_v8  ;;  %v1311_v30 = vrot.slane %v9632_v33, 1  ;;  %v1312_v2 = vrot.slane %v9650_v42, 1 }
 0x1a2   : > { %1613 = vrot.lane.b32.xlu0 %v1549_v62, %s15229_s27  ;;  %1615 = vrot.lane.b32.xlu1 %v1550_v44, %s15229_s27  ;;  %v10223_v46 = vsel %vm1324_vm3, %v1296_v24, %v1297_v27  ;;  %v10229_v6 = vsel %vm1324_vm3, %v1295_v22, %v1296_v24  ;;  %v10243_v22 = vsel %vm1324_vm3, %v1297_v27, %v1298_v18 }
 0x1a3   : > { %v1412_v50 = vpop.permute.xlu0 %1411  ;;  %v1402_v36 = vpop.permute.xlu1 %1401  ;;  %15613 = vst [vmem:[#allocation78_spill] sm:$0xff] %v10223_v46  ;;  %15614 = vst [vmem:[#allocation79_spill] sm:$0xff] %v10229_v6  ;;  %v10257_v18 = vsel %vm1324_vm3, %v1299_v9, %v1300_v11 }
 0x1a4   : > { %v1551_v23 = vmul.f32 %v1402_v36, %v10203_v41  ;;  %v1553_v5 = vmul.f32 %v1412_v50, %v10210_v8  ;;  %15616 = vst [vmem:[#allocation81_spill] sm:$0xff] %v10243_v22  ;;  %15618 = vst [vmem:[#allocation83_spill] sm:$0xff] %v10257_v18  ;;  %v10585_v41 = vld [vmem:[%s15103_s1 + $0xd0] sm:$0xff] }
 0x1a5   : > { %15653 = vst [vmem:[#allocation117_spill] sm:$0xff] %v10585_v41 }
 0x1a6   : > { %1617 = vrot.lane.b32.xlu0 %v1551_v23, %s15229_s27 }
 0x1a7   : > { %v1422_v62 = vpop.permute.xlu0 %1421  ;;  %v1407_v44 = vpop.permute.xlu1 %1406 }
 0x1a8   : > { %v1552_v36 = vmul.f32 %v1407_v44, %v10216_v0  ;;  %v1555_v50 = vmul.f32 %v1422_v62, %v10223_v46  ;;  %v10580_v0 = vld [vmem:[%s15103_s1 + $0xe8] sm:$0xff] }
 0x1a9   : > { %15652 = vst [vmem:[#allocation116_spill] sm:$0xff] %v10580_v0 }
 0x1aa   : > { %1621 = vrot.lane.b32.xlu0 %v1553_v5, %s15229_s27  ;;  %1619 = vrot.lane.b32.xlu1 %v1552_v36, %s15229_s27 }
 0x1ab   : > { %v1432_v23 = vpop.permute.xlu0 %1431  ;;  %v1417_v17 = vpop.permute.xlu1 %1416 }
 0x1ac   : > { %v1554_v44 = vmul.f32 %v1417_v17, %v10229_v6  ;;  %v1557_v62 = vmul.f32 %v1432_v23, %v10237_v12  ;;  %v10251_v17 = vsel %vm1324_vm3, %v1300_v11, %v1301_v7  ;;  %v10271_v11 = vsel %vm1324_vm3, %v1301_v7, %v1302_v3  ;;  %v10564_v12 = vld [vmem:[%s15103_s1 + $0xd8] sm:$0xff]  ;;  %v10569_v6 = vld [vmem:[%s15103_s1 + $0xc0] sm:$0xff] }
 0x1ad   : > { %15617 = vst [vmem:[#allocation82_spill] sm:$0xff] %v10251_v17  ;;  %15620 = vst [vmem:[#allocation85_spill] sm:$0xff] %v10271_v11 }
 0x1ae   : > { %1625 = vrot.lane.b32.xlu0 %v1555_v50, %s15229_s27  ;;  %1623 = vrot.lane.b32.xlu1 %v1554_v44, %s15229_s27  ;;  %15648 = vst [vmem:[#allocation112_spill] sm:$0xff] %v10564_v12  ;;  %15649 = vst [vmem:[#allocation113_spill] sm:$0xff] %v10569_v6 }
 0x1af   : > { %v1442_v5 = vpop.permute.xlu0 %1441  ;;  %v1427_v24 = vpop.permute.xlu1 %1426 }
 0x1b0   : > { %v1556_v36 = vmul.f32 %v1427_v24, %v10243_v22  ;;  %v1559_v50 = vmul.f32 %v1442_v5, %v10251_v17  ;;  %v10265_v24 = vsel %vm1324_vm3, %v1302_v3, %v1303_v21  ;;  %v10285_v3 = vsel %vm1324_vm3, %v1303_v21, %v1304_v63  ;;  %v10552_v17 = vld [vmem:[%s15103_s1 + $0xc8] sm:$0xff]  ;;  %v10557_v22 = vld [vmem:[%s15103_s1 + $0xb0] sm:$0xff] }
 0x1b1   : > { %15619 = vst [vmem:[#allocation84_spill] sm:$0xff] %v10265_v24  ;;  %15622 = vst [vmem:[#allocation87_spill] sm:$0xff] %v10285_v3 }
 0x1b2   : > { %1629 = vrot.lane.b32.xlu0 %v1557_v62, %s15229_s27  ;;  %1627 = vrot.lane.b32.xlu1 %v1556_v36, %s15229_s27  ;;  %15646 = vst [vmem:[#allocation110_spill] sm:$0xff] %v10552_v17  ;;  %15647 = vst [vmem:[#allocation111_spill] sm:$0xff] %v10557_v22 }
 0x1b3   : > { %v1452_v27 = vpop.permute.xlu0 %1451  ;;  %v1437_v23 = vpop.permute.xlu1 %1436 }
 0x1b4   : > { %v1558_v44 = vmul.f32 %v1437_v23, %v10257_v18  ;;  %v1561_v62 = vmul.f32 %v1452_v27, %v10265_v24  ;;  %v10279_v23 = vsel %vm1324_vm3, %v1304_v63, %v1305_v48  ;;  %v10299_v63 = vsel %vm1324_vm3, %v1305_v48, %v1306_v39  ;;  %v10540_v24 = vld [vmem:[%s15103_s1 + $0xb8] sm:$0xff]  ;;  %v10545_v18 = vld [vmem:[%s15103_s1 + $0xa0] sm:$0xff] }
 0x1b5   : > { %15621 = vst [vmem:[#allocation86_spill] sm:$0xff] %v10279_v23  ;;  %15624 = vst [vmem:[#allocation89_spill] sm:$0xff] %v10299_v63 }
 0x1b6   : > { %1633 = vrot.lane.b32.xlu0 %v1559_v50, %s15229_s27  ;;  %1631 = vrot.lane.b32.xlu1 %v1558_v44, %s15229_s27  ;;  %15644 = vst [vmem:[#allocation108_spill] sm:$0xff] %v10540_v24  ;;  %15645 = vst [vmem:[#allocation109_spill] sm:$0xff] %v10545_v18 }
 0x1b7   : > { %v1462_v9 = vpop.permute.xlu0 %1461  ;;  %v1447_v5 = vpop.permute.xlu1 %1446 }
 0x1b8   : > { %v1560_v36 = vmul.f32 %v1447_v5, %v10271_v11  ;;  %v1563_v50 = vmul.f32 %v1462_v9, %v10279_v23  ;;  %v10293_v5 = vsel %vm1324_vm3, %v1306_v39, %v1307_v38  ;;  %v10313_v39 = vsel %vm1324_vm3, %v1307_v38, %v1308_v1  ;;  %v10528_v23 = vld [vmem:[%s15103_s1 + $0xa8] sm:$0xff]  ;;  %v10533_v11 = vld [vmem:[%s15103_s1 + $0x90] sm:$0xff] }
 0x1b9   : > { %15623 = vst [vmem:[#allocation88_spill] sm:$0xff] %v10293_v5  ;;  %15626 = vst [vmem:[#allocation91_spill] sm:$0xff] %v10313_v39 }
 0x1ba   : > { %1637 = vrot.lane.b32.xlu0 %v1561_v62, %s15229_s27  ;;  %1635 = vrot.lane.b32.xlu1 %v1560_v36, %s15229_s27  ;;  %15643 = vst [vmem:[#allocation107_spill] sm:$0xff] %v10528_v23 }
 0x1bb   : > { %v1472_v7 = vpop.permute.xlu0 %1471  ;;  %v1457_v27 = vpop.permute.xlu1 %1456 }
 0x1bc   : > { %v1562_v44 = vmul.f32 %v1457_v27, %v10285_v3  ;;  %v1565_v62 = vmul.f32 %v1472_v7, %v10293_v5  ;;  %v10307_v27 = vsel %vm1324_vm3, %v1308_v1, %v1309_v55  ;;  %v10327_v1 = vsel %vm1324_vm3, %v1309_v55, %v1310_v25  ;;  %v10516_v5 = vld [vmem:[%s15103_s1 + $0x98] sm:$0xff]  ;;  %v10521_v3 = vld [vmem:[%s15103_s1 + $0x80] sm:$0xff] }
 0x1bd   : > { %15625 = vst [vmem:[#allocation90_spill] sm:$0xff] %v10307_v27  ;;  %15628 = vst [vmem:[#allocation93_spill] sm:$0xff] %v10327_v1 }
 0x1be   : > { %1641 = vrot.lane.b32.xlu0 %v1563_v50, %s15229_s27  ;;  %1639 = vrot.lane.b32.xlu1 %v1562_v44, %s15229_s27  ;;  %15642 = vst [vmem:[#allocation106_spill] sm:$0xff] %v10516_v5 }
 0x1bf   : > { %v1482_v21 = vpop.permute.xlu0 %1481  ;;  %v1467_v9 = vpop.permute.xlu1 %1466 }
 0x1c0   : > { %v1564_v36 = vmul.f32 %v1467_v9, %v10299_v63  ;;  %v1567_v50 = vmul.f32 %v1482_v21, %v10307_v27  ;;  %v10321_v9 = vsel %vm1324_vm3, %v1310_v25, %v1311_v30  ;;  %v1313_v63 = vrot.slane %v9653_v43, 1 }
 0x1c1   : > { %15627 = vst [vmem:[#allocation92_spill] sm:$0xff] %v10321_v9  ;;  %v1315_v27 = vrot.slane %v9674_v58, 1  ;;  %v10341_v25 = vsel %vm1324_vm3, %v1311_v30, %v1312_v2 }
 0x1c2   : > { %1645 = vrot.lane.b32.xlu0 %v1565_v62, %s15229_s27  ;;  %1643 = vrot.lane.b32.xlu1 %v1564_v36, %s15229_s27  ;;  %15630 = vst [vmem:[#allocation95_spill] sm:$0xff] %v10341_v25 }
 0x1c3   : > { %v1492_v48 = vpop.permute.xlu0 %1491  ;;  %v1477_v7 = vpop.permute.xlu1 %1476 }
 0x1c4   : > { %v1566_v44 = vmul.f32 %v1477_v7, %v10313_v39  ;;  %v1569_v62 = vmul.f32 %v1492_v48, %v10321_v9  ;;  %v10335_v7 = vsel %vm1324_vm3, %v1312_v2, %v1313_v63  ;;  %v1314_v39 = vrot.slane %v9671_v54, 1 }
 0x1c5   : > { %15629 = vst [vmem:[#allocation94_spill] sm:$0xff] %v10335_v7  ;;  %v1317_v9 = vrot.slane %v9695_v15, 1 }
 0x1c6   : > { %1649 = vrot.lane.b32.xlu0 %v1567_v50, %s15229_s27  ;;  %1647 = vrot.lane.b32.xlu1 %v1566_v44, %s15229_s27  ;;  %v10355_v30 = vsel %vm1324_vm3, %v1313_v63, %v1314_v39 }
 0x1c7   : > { %v1502_v38 = vpop.permute.xlu0 %1501  ;;  %v1487_v21 = vpop.permute.xlu1 %1486  ;;  %15632 = vst [vmem:[#allocation97_spill] sm:$0xff] %v10355_v30 }
 0x1c8   : > { %v1568_v36 = vmul.f32 %v1487_v21, %v10327_v1  ;;  %v1571_v50 = vmul.f32 %v1502_v38, %v10335_v7  ;;  %v10349_v21 = vsel %vm1324_vm3, %v1314_v39, %v1315_v27  ;;  %v1316_v1 = vrot.slane %v9692_v14, 1 }
 0x1c9   : > { %15631 = vst [vmem:[#allocation96_spill] sm:$0xff] %v10349_v21  ;;  %v1319_v7 = vrot.slane %v9716_v35, 1 }
 0x1ca   : > { %1653 = vrot.lane.b32.xlu0 %v1569_v62, %s15229_s27  ;;  %1651 = vrot.lane.b32.xlu1 %v1568_v36, %s15229_s27  ;;  %v10369_v63 = vsel %vm1324_vm3, %v1315_v27, %v1316_v1 }
 0x1cb   : > { %v1512_v55 = vpop.permute.xlu0 %1511  ;;  %v1497_v48 = vpop.permute.xlu1 %1496  ;;  %15634 = vst [vmem:[#allocation99_spill] sm:$0xff] %v10369_v63 }
 0x1cc   : > { %v1570_v44 = vmul.f32 %v1497_v48, %v10341_v25  ;;  %v1573_v62 = vmul.f32 %v1512_v55, %v10349_v21  ;;  %v10363_v48 = vsel %vm1324_vm3, %v1316_v1, %v1317_v9  ;;  %v1318_v25 = vrot.slane %v9713_v28, 1 }
 0x1cd   : > { %15633 = vst [vmem:[#allocation98_spill] sm:$0xff] %v10363_v48  ;;  %v1321_v21 = vrot.slane %v9737_v53, 1 }
 0x1ce   : > { %1657 = vrot.lane.b32.xlu0 %v1571_v50, %s15229_s27  ;;  %1655 = vrot.lane.b32.xlu1 %v1570_v44, %s15229_s27  ;;  %v10383_v27 = vsel %vm1324_vm3, %v1317_v9, %v1318_v25 }
 0x1cf   : > { %v1522_v2 = vpop.permute.xlu0 %1521  ;;  %v1507_v38 = vpop.permute.xlu1 %1506  ;;  %15636 = vst [vmem:[#allocation101_spill] sm:$0xff] %v10383_v27 }
 0x1d0   : > { %v1572_v36 = vmul.f32 %v1507_v38, %v10355_v30  ;;  %v1575_v50 = vmul.f32 %v1522_v2, %v10363_v48  ;;  %v10377_v38 = vsel %vm1324_vm3, %v1318_v25, %v1319_v7  ;;  %v1320_v30 = vrot.slane %v9734_v51, 1  ;;  %v10509_v48 = vld [vmem:[%s15103_s1 + $0x70] sm:$0xff] }
 0x1d1   : > { %15635 = vst [vmem:[#allocation100_spill] sm:$0xff] %v10377_v38 }
 0x1d2   : > { %1661 = vrot.lane.b32.xlu0 %v1573_v62, %s15229_s27  ;;  %1659 = vrot.lane.b32.xlu1 %v1572_v36, %s15229_s27  ;;  %v10391_v36 = vsel %vm1324_vm3, %v1320_v30, %v1321_v21 }
 0x1d3   : > { %v1532_v39 = vpop.permute.xlu0 %1531  ;;  %v1517_v55 = vpop.permute.xlu1 %1516  ;;  %15637 = vst [vmem:[#allocation102_spill] sm:$0xff] %v10391_v36 }
 0x1d4   : > { %v1574_v44 = vmul.f32 %v1517_v55, %v10369_v63  ;;  %v1577_v2 = vmul.f32 %v1532_v39, %v10377_v38  ;;  %v10395_v63 = vsel %vm1324_vm3, %v1319_v7, %v1320_v30  ;;  %v10412_v30 = vld [vmem:[%s15103_s1] sm:$0xff]  ;;  %v10504_v38 = vld [vmem:[%s15103_s1 + $0x88] sm:$0xff] }
 0x1d5   : > { %15638 = vst [vmem:[#allocation103_spill] sm:$0xff] %v10395_v63  ;;  %15641 = vst [vmem:[#allocation105_spill] sm:$0xff] %v10504_v38 }
 0x1d6   : > { %1665 = vrot.lane.b32.xlu0 %v1575_v50, %s15229_s27  ;;  %1663 = vrot.lane.b32.xlu1 %v1574_v44, %s15229_s27  ;;  %v15639_v50 = vrot.slane %v15606_v4, 1 }
 0x1d7   : > { %v1527_v1 = vpop.permute.xlu1 %1526  ;;  %v1542_v55 = vpop.permute.xlu0 %1541 }
 0x1d8   : > { %v1576_v62 = vmul.f32 %v1527_v1, %v10383_v27  ;;  %v1579_v25 = vmul.f32 %v1542_v55, %v10391_v36  ;;  %v10405_v44 = vsel %vm1324_vm3, %v1321_v21, %v15639_v50  ;;  %v10420_v21 = vld [vmem:[%s15103_s1 + $0x18] sm:$0xff]  ;;  %v10437_v55 = vld [vmem:[%s15103_s1 + $0x10] sm:$0xff]  ;;  %v10497_v27 = vld [vmem:[%s15103_s1 + $0x60] sm:$0xff] }
 0x1d9   : > { %15640 = vst [vmem:[#allocation104_spill] sm:$0xff] %v10405_v44  ;;  %v10461_v50 = vld [vmem:[%s15103_s1 + $0x30] sm:$0xff]  ;;  %v10492_v36 = vld [vmem:[%s15103_s1 + $0x78] sm:$0xff] }
 0x1da   : > { %1669 = vrot.lane.b32.xlu0 %v1577_v2, %s15229_s27  ;;  %1667 = vrot.lane.b32.xlu1 %v1576_v62, %s15229_s27  ;;  %v10425_v2 = vld [vmem:[%s15103_s1 + $0x8] sm:$0xff] }
 0x1db   : > { %v1537_v9 = vpop.permute.xlu1 %1536  ;;  %v10432_v62 = vld [vmem:[%s15103_s1 + $0x28] sm:$0xff] }
 0x1dc   : > { %v1578_v39 = vmul.f32 %v1537_v9, %v10395_v63  ;;  %v10444_v9 = vld [vmem:[%s15103_s1 + $0x38] sm:$0xff]  ;;  %v10485_v63 = vld [vmem:[%s15103_s1 + $0x50] sm:$0xff] }
 0x1de   : > { %1673 = vrot.lane.b32.xlu0 %v1579_v25, %s15229_s27  ;;  %1671 = vrot.lane.b32.xlu1 %v1578_v39, %s15229_s27  ;;  %v10449_v25 = vld [vmem:[%s15103_s1 + $0x20] sm:$0xff]  ;;  %v10456_v39 = vld [vmem:[%s15103_s1 + $0x48] sm:$0xff] }
 0x1df   : > { %v1547_v7 = vpop.permute.xlu1 %1546 }
 0x1e0   : > { %v1580_v1 = vmul.f32 %v1547_v7, %v10405_v44  ;;  %v10468_v7 = vld [vmem:[%s15103_s1 + $0x58] sm:$0xff]  ;;  %v10480_v44 = vld [vmem:[%s15103_s1 + $0x68] sm:$0xff] }
 0x1e2   : > { %1776 = vperm.xlu0 %9013, %v10412_v30   ;;  %1675 = vrot.lane.b32.xlu1 %v1580_v1, %s15229_s27  ;;  %v10473_v1 = vld [vmem:[%s15103_s1 + $0x40] sm:$0xff] }
 0x1e6   : > { %1791 = vperm.xlu0 %9013, %v10420_v21   ;;  %1781 = vperm.xlu1 %9014, %v10425_v2  }
 0x1ea   : > { %1801 = vperm.xlu0 %9013, %v10432_v62   ;;  %1786 = vperm.xlu1 %9014, %v10437_v55  }
 0x1ee   : > { %1811 = vperm.xlu0 %9013, %v10444_v9   ;;  %1796 = vperm.xlu1 %9014, %v10449_v25  }
 0x1f2   : > { %1821 = vperm.xlu0 %9013, %v10456_v39   ;;  %1806 = vperm.xlu1 %9014, %v10461_v50  }
 0x1f6   : > { %1831 = vperm.xlu0 %9013, %v10468_v7   ;;  %1816 = vperm.xlu1 %9014, %v10473_v1  }
 0x1fa   : > { %1841 = vperm.xlu0 %9013, %v10480_v44   ;;  %1826 = vperm.xlu1 %9014, %v10485_v63  }
 0x1fe   : > { %1851 = vperm.xlu0 %9013, %v10492_v36   ;;  %1836 = vperm.xlu1 %9014, %v10497_v27  }
 0x202   : > { %1861 = vperm.xlu0 %9013, %v10504_v38   ;;  %1846 = vperm.xlu1 %9014, %v10509_v48   ;;  %v15676_v38 = vrot.slane %v9497_v37, 7  ;;  %v15680_v37 = vrot.slane %v9506_v40, 7 }
 0x206   : > { %1871 = vperm.xlu0 %9013, %v10516_v5   ;;  %1856 = vperm.xlu1 %9014, %v10521_v3   ;;  %v15672_v5 = vld [vmem:[#allocation58_spill] sm:$0xff] }
 0x20a   : > { %1881 = vperm.xlu0 %9013, %v10528_v23   ;;  %1866 = vperm.xlu1 %9014, %v10533_v11  }
 0x20e   : > { %1891 = vperm.xlu0 %9013, %v10540_v24   ;;  %1876 = vperm.xlu1 %9014, %v10545_v18  }
 0x212   : > { %1901 = vperm.xlu0 %9013, %v10552_v17   ;;  %1886 = vperm.xlu1 %9014, %v10557_v22   ;;  %v15671_v22 = vld [vmem:[#allocation57_spill] sm:$0xff] }
 0x214   : > { %v10571_v46 = vpop.permute.xlu0 %1613  ;;  %v10575_v8 = vpop.permute.xlu1 %1615 }
 0x215   : > { %15650 = vst [vmem:[#allocation114_spill] sm:$0xff] %v10571_v46  ;;  %15651 = vst [vmem:[#allocation115_spill] sm:$0xff] %v10575_v8  ;;  %v10593_v8 = vld [vmem:[%s15103_s1 + $0xf8] sm:$0xff]  ;;  %v10598_v46 = vld [vmem:[%s15103_s1 + $0xe0] sm:$0xff] }
 0x216   : > { %1911 = vperm.xlu0 %9013, %v10564_v12   ;;  %1896 = vperm.xlu1 %9014, %v10569_v6   ;;  %15654 = vst [vmem:[#allocation118_spill] sm:$0xff] %v10593_v8  ;;  %15655 = vst [vmem:[#allocation119_spill] sm:$0xff] %v10598_v46 }
 0x218   : > { %v1618_v17 = vpop.permute.xlu0 %1617 }
 0x219   : > { %1712 = vst.msk [vmem:[#allocation2 + $0x30] sm:$0xff] %vm1709_vm4, %v1618_v17  ;;  %v10608_v17 = vld [vmem:[%s15103_s1 + $0xf0] sm:$0xff] }
 0x21a   : > { %1921 = vperm.xlu0 %9013, %v10580_v0   ;;  %1906 = vperm.xlu1 %9014, %v10585_v41   ;;  %15657 = vst [vmem:[#allocation121_spill] sm:$0xff] %v10608_v17 }
 0x21c   : > { %v10600_v12 = vpop.permute.xlu0 %1621  ;;  %v1620_v24 = vpop.permute.xlu1 %1619 }
 0x21d   : > { %15656 = vst [vmem:[#allocation120_spill] sm:$0xff] %v10600_v12  ;;  %1713 = vst.msk [vmem:[#allocation2 + $0x48] sm:$0xff] %vm1709_vm4, %v1620_v24  ;;  %v15293_v24 = vmov 5   ;;  %v15735_v59 = vld [vmem:[#allocation119_spill] sm:$0xff] }
 0x21e   : > { %1931 = vperm.xlu0 %9013, %v10593_v8   ;;  %1916 = vperm.xlu1 %9014, %v10598_v46  }
 0x220   : > { %v10610_v0 = vpop.permute.xlu0 %1625  ;;  %v1624_v41 = vpop.permute.xlu1 %1623 }
 0x221   : > { %15658 = vst [vmem:[#allocation122_spill] sm:$0xff] %v10610_v0  ;;  %1715 = vst.msk [vmem:[#allocation2 + $0x78] sm:$0xff] %vm1709_vm4, %v1624_v41 }
 0x222   : > { %1926 = vperm.xlu1 %9014, %v10608_v17   ;;  %9016 = vset.pattern.permute.xlu0 %v15293_v24 }
 0x224   : > { %v10614_v12 = vpop.permute.xlu0 %1629  ;;  %v1628_v6 = vpop.permute.xlu1 %1627 }
 0x225   : > { %15659 = vst [vmem:[#allocation123_spill] sm:$0xff] %v10614_v12  ;;  %1717 = vst.msk [vmem:[#allocation2 + $0xa8] sm:$0xff] %vm1709_vm4, %v1628_v6 }
 0x226   : > { %9015 = vset.pattern.permute.xlu1 %v15293_v24 }
 0x228   : > { %v10619_v8 = vpop.permute.xlu0 %1633  ;;  %v1632_v46 = vpop.permute.xlu1 %1631 }
 0x229   : > { %15660 = vst [vmem:[#allocation124_spill] sm:$0xff] %v10619_v8  ;;  %1719 = vst.msk [vmem:[#allocation2 + $0xd8] sm:$0xff] %vm1709_vm4, %v1632_v46 }
 0x22c   : > { %v10622_v0 = vpop.permute.xlu0 %1637  ;;  %v1636_v41 = vpop.permute.xlu1 %1635 }
 0x22d   : > { %15661 = vst [vmem:[#allocation125_spill] sm:$0xff] %v10622_v0  ;;  %1721 = vst.msk [vmem:[#allocation2 + $0x108] sm:$0xff] %vm1709_vm4, %v1636_v41 }
 0x230   : > { %v10625_v17 = vpop.permute.xlu0 %1641  ;;  %v1640_v12 = vpop.permute.xlu1 %1639 }
 0x231   : > { %15662 = vst [vmem:[#allocation126_spill] sm:$0xff] %v10625_v17  ;;  %1723 = vst.msk [vmem:[#allocation2 + $0x138] sm:$0xff] %vm1709_vm4, %v1640_v12 }
 0x234   : > { %v10628_v6 = vpop.permute.xlu0 %1645  ;;  %v1644_v23 = vpop.permute.xlu1 %1643 }
 0x235   : > { %15663 = vst [vmem:[#allocation127_spill] sm:$0xff] %v10628_v6  ;;  %1725 = vst.msk [vmem:[#allocation2 + $0x168] sm:$0xff] %vm1709_vm4, %v1644_v23 }
 0x238   : > { %v1648_v24 = vpop.permute.xlu1 %1647  ;;  %v10631_v8 = vpop.permute.xlu0 %1649 }
 0x239   : > { %15664 = vst [vmem:[#allocation128_spill] sm:$0xff] %v10631_v8  ;;  %1727 = vst.msk [vmem:[#allocation2 + $0x198] sm:$0xff] %vm1709_vm4, %v1648_v24 }
 0x23c   : > { %v1652_v46 = vpop.permute.xlu1 %1651  ;;  %v10635_v0 = vpop.permute.xlu0 %1653 }
 0x23d   : > { %1729 = vst.msk [vmem:[#allocation2 + $0x1c8] sm:$0xff] %vm1709_vm4, %v1652_v46  ;;  %15665 = vst [vmem:[#allocation129_spill] sm:$0xff] %v10635_v0 }
 0x240   : > { %v1656_v41 = vpop.permute.xlu1 %1655  ;;  %v10638_v12 = vpop.permute.xlu0 %1657 }
 0x241   : > { %1731 = vst.msk [vmem:[#allocation2 + $0x1f8] sm:$0xff] %vm1709_vm4, %v1656_v41  ;;  %15666 = vst [vmem:[#allocation130_spill] sm:$0xff] %v10638_v12 }
 0x244   : > { %v1660_v17 = vpop.permute.xlu1 %1659  ;;  %v10642_v23 = vpop.permute.xlu0 %1661 }
 0x245   : > { %1733 = vst.msk [vmem:[#allocation2 + $0x228] sm:$0xff] %vm1709_vm4, %v1660_v17  ;;  %15667 = vst [vmem:[#allocation131_spill] sm:$0xff] %v10642_v23 }
 0x248   : > { %v1664_v6 = vpop.permute.xlu1 %1663  ;;  %v10645_v46 = vpop.permute.xlu0 %1665 }
 0x249   : > { %1735 = vst.msk [vmem:[#allocation2 + $0x258] sm:$0xff] %vm1709_vm4, %v1664_v6  ;;  %15668 = vst [vmem:[#allocation132_spill] sm:$0xff] %v10645_v46  ;;  %v15673_v46 = vrot.slane %v9477_v31, 7 }
 0x24c   : > { %v1668_v8 = vpop.permute.xlu1 %1667  ;;  %v10649_v41 = vpop.permute.xlu0 %1669 }
 0x24d   : > { %1737 = vst.msk [vmem:[#allocation2 + $0x288] sm:$0xff] %vm1709_vm4, %v1668_v8  ;;  %15669 = vst [vmem:[#allocation133_spill] sm:$0xff] %v10649_v41 }
 0x250   : > { %v1672_v24 = vpop.permute.xlu1 %1671  ;;  %v10651_v12 = vpop.permute.xlu0 %1673 }
 0x251   : > { %1739 = vst.msk [vmem:[#allocation2 + $0x2b8] sm:$0xff] %vm1709_vm4, %v1672_v24  ;;  %15670 = vst [vmem:[#allocation134_spill] sm:$0xff] %v10651_v12  ;;  %v15674_v24 = vrot.slane %v9471_v29, 7 }
 0x254   : > { %v1676_v0 = vpop.permute.xlu1 %1675 }
 0x255   : > { %1741 = vst.msk [vmem:[#allocation2 + $0x2e8] sm:$0xff] %vm1709_vm4, %v1676_v0  ;;  %v10662_v0 = vsel %vm617_vm1, %v15674_v24, %v15673_v46  ;;  %v15678_v24 = vld [vmem:[#allocation60_spill] sm:$0xff] }
 0x261   : > { %v1777_v17 = vpop.permute.xlu0 %1776 }
 0x262   : > { %v1934_v6 = vmul.f32 %v1777_v17, %v15671_v22  ;;  %v15675_v17 = vld [vmem:[#allocation59_spill] sm:$0xff] }
 0x264   : > { %1998 = vrot.lane.b32.xlu1 %v1934_v6, %s15355_s28 }
 0x265   : > { %v1792_v23 = vpop.permute.xlu0 %1791  ;;  %v1782_v8 = vpop.permute.xlu1 %1781 }
 0x266   : > { %v1935_v18 = vmul.f32 %v1782_v8, %v15672_v5  ;;  %v1937_v22 = vmul.f32 %v1792_v23, %v15675_v17  ;;  %v15677_v8 = vrot.slane %v9486_v34, 7  ;;  %v15737_v5 = vld [vmem:[#allocation121_spill] sm:$0xff] }
 0x268   : > { %2000 = vrot.lane.b32.xlu0 %v1935_v18, %s15355_s28  ;;  %v10673_v31 = vsel %vm617_vm1, %v15677_v8, %v15676_v38 }
 0x269   : > { %v1802_v12 = vpop.permute.xlu0 %1801  ;;  %v1787_v41 = vpop.permute.xlu1 %1786 }
 0x26a   : > { %v1936_v6 = vmul.f32 %v1787_v41, %v10662_v0  ;;  %v1939_v29 = vmul.f32 %v1802_v12, %v15678_v24  ;;  %v15679_v41 = vrot.slane %v9519_v45, 7  ;;  %v15683_v45 = vrot.slane %v9525_v47, 7 }
 0x26c   : > { %2002 = vrot.lane.b32.xlu1 %v1936_v6, %s15355_s28  ;;  %2004 = vrot.lane.b32.xlu0 %v1937_v22, %s15355_s28  ;;  %v10685_v34 = vsel %vm617_vm1, %v15680_v37, %v15679_v41  ;;  %v15681_v6 = vld [vmem:[#allocation61_spill] sm:$0xff] }
 0x26d   : > { %v1812_v46 = vpop.permute.xlu0 %1811  ;;  %v1797_v18 = vpop.permute.xlu1 %1796 }
 0x26e   : > { %v1938_v23 = vmul.f32 %v1797_v18, %v10673_v31  ;;  %v1941_v8 = vmul.f32 %v1812_v46, %v15681_v6  ;;  %v15682_v18 = vrot.slane %v9531_v49, 7  ;;  %v15686_v49 = vrot.slane %v9540_v52, 7 }
 0x270   : > { %2006 = vrot.lane.b32.xlu1 %v1938_v23, %s15355_s28  ;;  %2008 = vrot.lane.b32.xlu0 %v1939_v29, %s15355_s28  ;;  %v10697_v40 = vsel %vm617_vm1, %v15683_v45, %v15682_v18  ;;  %v15684_v23 = vld [vmem:[#allocation62_spill] sm:$0xff] }
 0x271   : > { %v1822_v38 = vpop.permute.xlu0 %1821  ;;  %v1807_v22 = vpop.permute.xlu1 %1806 }
 0x272   : > { %v1940_v12 = vmul.f32 %v1807_v22, %v10685_v34  ;;  %v1943_v41 = vmul.f32 %v1822_v38, %v15684_v23  ;;  %v15685_v22 = vrot.slane %v9552_v56, 7  ;;  %v15689_v56 = vrot.slane %v9555_v57, 7 }
 0x274   : > { %2010 = vrot.lane.b32.xlu1 %v1940_v12, %s15355_s28  ;;  %2012 = vrot.lane.b32.xlu0 %v1941_v8, %s15355_s28  ;;  %v10709_v47 = vsel %vm617_vm1, %v15686_v49, %v15685_v22  ;;  %v15687_v12 = vld [vmem:[#allocation63_spill] sm:$0xff] }
 0x275   : > { %v1832_v37 = vpop.permute.xlu0 %1831  ;;  %v1817_v29 = vpop.permute.xlu1 %1816 }
 0x276   : > { %v1942_v46 = vmul.f32 %v1817_v29, %v10697_v40  ;;  %v1945_v18 = vmul.f32 %v1832_v37, %v15687_v12  ;;  %v15688_v29 = vrot.slane %v9566_v60, 7  ;;  %v15692_v60 = vrot.slane %v9571_v61, 7 }
 0x278   : > { %2014 = vrot.lane.b32.xlu1 %v1942_v46, %s15355_s28  ;;  %2016 = vrot.lane.b32.xlu0 %v1943_v41, %s15355_s28  ;;  %v10721_v52 = vsel %vm617_vm1, %v15689_v56, %v15688_v29  ;;  %v15690_v46 = vld [vmem:[#allocation64_spill] sm:$0xff] }
 0x279   : > { %v1842_v45 = vpop.permute.xlu0 %1841  ;;  %v1827_v8 = vpop.permute.xlu1 %1826 }
 0x27a   : > { %v1944_v38 = vmul.f32 %v1827_v8, %v10709_v47  ;;  %v1947_v22 = vmul.f32 %v1842_v45, %v15690_v46  ;;  %v15691_v8 = vrot.slane %v9587_v10, 7  ;;  %v15695_v10 = vrot.slane %v9590_v13, 7 }
 0x27c   : > { %2018 = vrot.lane.b32.xlu1 %v1944_v38, %s15355_s28  ;;  %2020 = vrot.lane.b32.xlu0 %v1945_v18, %s15355_s28  ;;  %v10733_v57 = vsel %vm617_vm1, %v15692_v60, %v15691_v8  ;;  %v15693_v38 = vld [vmem:[#allocation65_spill] sm:$0xff] }
 0x27d   : > { %v1852_v49 = vpop.permute.xlu0 %1851  ;;  %v1837_v41 = vpop.permute.xlu1 %1836 }
 0x27e   : > { %v1946_v37 = vmul.f32 %v1837_v41, %v10721_v52  ;;  %v1949_v29 = vmul.f32 %v1852_v49, %v15693_v38  ;;  %v15694_v41 = vrot.slane %v9608_v19, 7  ;;  %v15698_v19 = vrot.slane %v9611_v20, 7 }
 0x280   : > { %2022 = vrot.lane.b32.xlu1 %v1946_v37, %s15355_s28  ;;  %2024 = vrot.lane.b32.xlu0 %v1947_v22, %s15355_s28  ;;  %v10745_v61 = vsel %vm617_vm1, %v15695_v10, %v15694_v41  ;;  %v15696_v37 = vld [vmem:[#allocation66_spill] sm:$0xff] }
 0x281   : > { %v1862_v56 = vpop.permute.xlu0 %1861  ;;  %v1847_v18 = vpop.permute.xlu1 %1846 }
 0x282   : > { %v1948_v45 = vmul.f32 %v1847_v18, %v10733_v57  ;;  %v1951_v8 = vmul.f32 %v1862_v56, %v15696_v37  ;;  %v15697_v18 = vrot.slane %v9629_v32, 7  ;;  %v15702_v32 = vrot.slane %v9632_v33, 7 }
 0x284   : > { %2026 = vrot.lane.b32.xlu1 %v1948_v45, %s15355_s28  ;;  %2028 = vrot.lane.b32.xlu0 %v1949_v29, %s15355_s28  ;;  %v10757_v13 = vsel %vm617_vm1, %v15698_v19, %v15697_v18  ;;  %v15700_v45 = vld [vmem:[#allocation67_spill] sm:$0xff] }
 0x285   : > { %v1872_v60 = vpop.permute.xlu0 %1871  ;;  %v1857_v22 = vpop.permute.xlu1 %1856  ;;  %15699 = vst [vmem:[#allocation59_spill] sm:$0xff] %v10757_v13 }
 0x286   : > { %v1950_v49 = vmul.f32 %v1857_v22, %v10745_v61  ;;  %v1953_v41 = vmul.f32 %v1872_v60, %v15700_v45  ;;  %v15701_v22 = vrot.slane %v9650_v42, 7  ;;  %v15706_v42 = vrot.slane %v9653_v43, 7 }
 0x288   : > { %2030 = vrot.lane.b32.xlu1 %v1950_v49, %s15355_s28  ;;  %2032 = vrot.lane.b32.xlu0 %v1951_v8, %s15355_s28  ;;  %v10769_v20 = vsel %vm617_vm1, %v15702_v32, %v15701_v22  ;;  %v15704_v49 = vld [vmem:[#allocation68_spill] sm:$0xff] }
 0x289   : > { %v1882_v10 = vpop.permute.xlu0 %1881  ;;  %v1867_v29 = vpop.permute.xlu1 %1866  ;;  %15703 = vst [vmem:[#allocation60_spill] sm:$0xff] %v10769_v20 }
 0x28a   : > { %v1952_v56 = vmul.f32 %v1867_v29, %v10757_v13  ;;  %v1955_v18 = vmul.f32 %v1882_v10, %v15704_v49  ;;  %v15705_v29 = vrot.slane %v9671_v54, 7  ;;  %v15710_v54 = vrot.slane %v9674_v58, 7  ;;  %v15758_v49 = vld [vmem:[#allocation78_spill] sm:$0xff]  ;;  %v15759_v13 = vld [vmem:[#allocation79_spill] sm:$0xff] }
 0x28c   : > { %2034 = vrot.lane.b32.xlu1 %v1952_v56, %s15355_s28  ;;  %2036 = vrot.lane.b32.xlu0 %v1953_v41, %s15355_s28  ;;  %v10781_v33 = vsel %vm617_vm1, %v15706_v42, %v15705_v29  ;;  %v15708_v56 = vld [vmem:[#allocation69_spill] sm:$0xff] }
 0x28d   : > { %v1892_v19 = vpop.permute.xlu0 %1891  ;;  %v1877_v8 = vpop.permute.xlu1 %1876  ;;  %15707 = vst [vmem:[#allocation61_spill] sm:$0xff] %v10781_v33 }
 0x28e   : > { %v1954_v60 = vmul.f32 %v1877_v8, %v10769_v20  ;;  %v1957_v22 = vmul.f32 %v1892_v19, %v15708_v56  ;;  %v15709_v8 = vrot.slane %v9692_v14, 7  ;;  %v15714_v14 = vrot.slane %v9695_v15, 7  ;;  %v15755_v56 = vld [vmem:[#allocation77_spill] sm:$0xff]  ;;  %v15757_v20 = vld [vmem:[#allocation76_spill] sm:$0xff] }
 0x28f   : > { %v15718_v15 = vrot.slane %v9716_v35, 7  ;;  %v15722_v35 = vrot.slane %v9737_v53, 7 }
 0x290   : > { %2038 = vrot.lane.b32.xlu1 %v1954_v60, %s15355_s28  ;;  %2040 = vrot.lane.b32.xlu0 %v1955_v18, %s15355_s28  ;;  %v10793_v43 = vsel %vm617_vm1, %v15710_v54, %v15709_v8  ;;  %v15712_v60 = vld [vmem:[#allocation70_spill] sm:$0xff] }
 0x291   : > { %v1902_v32 = vpop.permute.xlu0 %1901  ;;  %v1887_v41 = vpop.permute.xlu1 %1886  ;;  %15711 = vst [vmem:[#allocation62_spill] sm:$0xff] %v10793_v43 }
 0x292   : > { %v1956_v10 = vmul.f32 %v1887_v41, %v10781_v33  ;;  %v1959_v29 = vmul.f32 %v1902_v32, %v15712_v60  ;;  %v15713_v41 = vrot.slane %v9713_v28, 7  ;;  %v15717_v28 = vrot.slane %v9734_v51, 7  ;;  %v15736_v51 = vld [vmem:[#allocation112_spill] sm:$0xff] }
 0x294   : > { %2042 = vrot.lane.b32.xlu1 %v1956_v10, %s15355_s28  ;;  %2044 = vrot.lane.b32.xlu0 %v1957_v22, %s15355_s28  ;;  %v10805_v58 = vsel %vm617_vm1, %v15714_v14, %v15713_v41  ;;  %v15716_v10 = vld [vmem:[#allocation71_spill] sm:$0xff]  ;;  %v10818_v14 = vsel %vm617_vm1, %v15718_v15, %v15717_v28  ;;  %v15720_v41 = vrot.slane %v9466_v26, 7 }
 0x295   : > { %v1912_v42 = vpop.permute.xlu0 %1911  ;;  %v1897_v18 = vpop.permute.xlu1 %1896  ;;  %15715 = vst [vmem:[#allocation63_spill] sm:$0xff] %v10805_v58  ;;  %15719 = vst [vmem:[#allocation64_spill] sm:$0xff] %v10818_v14 }
 0x296   : > { %v1958_v19 = vmul.f32 %v1897_v18, %v10793_v43  ;;  %v1961_v8 = vmul.f32 %v1912_v42, %v15716_v10  ;;  %v613_v18 = vrot.slane %v15606_v4, 7 }
 0x298   : > { %2046 = vrot.lane.b32.xlu1 %v1958_v19, %s15355_s28  ;;  %2048 = vrot.lane.b32.xlu0 %v1959_v29, %s15355_s28  ;;  %v10834_v15 = vsel %vm617_vm1, %v15722_v35, %v613_v18  ;;  %v15724_v35 = vld [vmem:[#allocation105_spill] sm:$0xff] }
 0x299   : > { %v1922_v54 = vpop.permute.xlu0 %1921  ;;  %v1907_v22 = vpop.permute.xlu1 %1906  ;;  %15723 = vst [vmem:[#allocation66_spill] sm:$0xff] %v10834_v15 }
 0x29a   : > { %v1960_v32 = vmul.f32 %v1907_v22, %v10805_v58  ;;  %v1963_v19 = vmul.f32 %v1922_v54, %v10033_v16  ;;  %v10828_v22 = vsel %vm617_vm1, %v613_v18, %v15720_v41  ;;  %v15727_v18 = vld [vmem:[#allocation111_spill] sm:$0xff]  ;;  %v15731_v41 = vld [vmem:[#allocation117_spill] sm:$0xff]  ;;  %v15741_v16 = vld [vmem:[#allocation118_spill] sm:$0xff] }
 0x29b   : > { %15721 = vst [vmem:[#allocation65_spill] sm:$0xff] %v10828_v22 }
 0x29c   : > { %2050 = vrot.lane.b32.xlu1 %v1960_v32, %s15355_s28  ;;  %2052 = vrot.lane.b32.xlu0 %v1961_v8, %s15355_s28  ;;  %v15726_v32 = vld [vmem:[#allocation106_spill] sm:$0xff] }
 0x29d   : > { %v1917_v29 = vpop.permute.xlu1 %1916  ;;  %v1932_v4 = vpop.permute.xlu0 %1931 }
 0x29e   : > { %v1962_v42 = vmul.f32 %v1917_v29, %v10818_v14  ;;  %v1965_v54 = vmul.f32 %v1932_v4, %v10828_v22  ;;  %v15725_v4 = vld [vmem:[#allocation109_spill] sm:$0xff]  ;;  %v15728_v29 = vld [vmem:[#allocation107_spill] sm:$0xff] }
 0x2a0   : > { %2054 = vrot.lane.b32.xlu1 %v1962_v42, %s15355_s28  ;;  %2056 = vrot.lane.b32.xlu0 %v1963_v19, %s15355_s28  ;;  %v15729_v19 = vld [vmem:[#allocation113_spill] sm:$0xff]  ;;  %v15730_v42 = vld [vmem:[#allocation108_spill] sm:$0xff] }
 0x2a1   : > { %v1927_v28 = vpop.permute.xlu1 %1926 }
 0x2a2   : > { %v1964_v8 = vmul.f32 %v1927_v28, %v10834_v15 }
 0x2a4   : > { %2058 = vrot.lane.b32.xlu1 %v1964_v8, %s15355_s28  ;;  %2060 = vrot.lane.b32.xlu0 %v1965_v54, %s15355_s28  ;;  %v15734_v8 = vld [vmem:[#allocation110_spill] sm:$0xff]  ;;  %s15007_s28 = scalar_lea.hbm %s15115_s14, %s8587_s23 }
 0x2a8   : > { %2193 = vperm.xlu1 %9015, %v10412_v30   ;;  %2198 = vperm.xlu0 %9016, %v10425_v2  }
 0x2ac   : > { %2203 = vperm.xlu1 %9015, %v10437_v55   ;;  %2213 = vperm.xlu0 %9016, %v10449_v25  }
 0x2b0   : > { %2208 = vperm.xlu1 %9015, %v10420_v21   ;;  %2223 = vperm.xlu0 %9016, %v10461_v50  }
 0x2b4   : > { %2218 = vperm.xlu1 %9015, %v10432_v62   ;;  %2233 = vperm.xlu0 %9016, %v10473_v1  }
 0x2b8   : > { %2228 = vperm.xlu1 %9015, %v10444_v9   ;;  %2243 = vperm.xlu0 %9016, %v10485_v63  }
 0x2bc   : > { %2238 = vperm.xlu1 %9015, %v10456_v39   ;;  %2253 = vperm.xlu0 %9016, %v10497_v27  }
 0x2c0   : > { %2248 = vperm.xlu1 %9015, %v10468_v7   ;;  %2263 = vperm.xlu0 %9016, %v10509_v48  }
 0x2c4   : > { %2258 = vperm.xlu1 %9015, %v10480_v44   ;;  %2273 = vperm.xlu0 %9016, %v10521_v3  }
 0x2c8   : > { %2268 = vperm.xlu1 %9015, %v10492_v36   ;;  %2283 = vperm.xlu0 %9016, %v10533_v11  }
 0x2cc   : > { %2278 = vperm.xlu1 %9015, %v15724_v35   ;;  %2293 = vperm.xlu0 %9016, %v15725_v4  }
 0x2d0   : > { %2288 = vperm.xlu1 %9015, %v15726_v32   ;;  %2303 = vperm.xlu0 %9016, %v15727_v18  }
 0x2d4   : > { %2298 = vperm.xlu1 %9015, %v15728_v29   ;;  %2313 = vperm.xlu0 %9016, %v15729_v19  }
 0x2d6   : > { %v10868_v28 = vpop.permute.xlu1 %1998 }
 0x2d7   : > { %15732 = vst [vmem:[#allocation105_spill] sm:$0xff] %v10868_v28 }
 0x2d8   : > { %2308 = vperm.xlu1 %9015, %v15730_v42   ;;  %2323 = vperm.xlu0 %9016, %v15731_v41  }
 0x2da   : > { %v10870_v54 = vpop.permute.xlu0 %2000 }
 0x2db   : > { %15733 = vst [vmem:[#allocation109_spill] sm:$0xff] %v10870_v54  ;;  %v15739_v54 = vld [vmem:[#allocation116_spill] sm:$0xff] }
 0x2dc   : > { %2318 = vperm.xlu1 %9015, %v15734_v8   ;;  %2333 = vperm.xlu0 %9016, %v15735_v59  }
 0x2de   : > { %v2003_v26 = vpop.permute.xlu1 %2002  ;;  %v2005_v53 = vpop.permute.xlu0 %2004 }
 0x2df   : > { %2097 = vst.msk [vmem:[#allocation2 + $0x30] sm:$0xff] %vm2094_vm5, %v2003_v26  ;;  %2098 = vst.msk [vmem:[#allocation2 + $0x48] sm:$0xff] %vm2094_vm5, %v2005_v53  ;;  %v15347_v26 = vmov 6  }
 0x2e0   : > { %2328 = vperm.xlu1 %9015, %v15736_v51   ;;  %2343 = vperm.xlu0 %9016, %v15737_v5  }
 0x2e2   : > { %v10878_v15 = vpop.permute.xlu1 %2006  ;;  %v2009_v28 = vpop.permute.xlu0 %2008 }
 0x2e3   : > { %15738 = vst [vmem:[#allocation106_spill] sm:$0xff] %v10878_v15  ;;  %2100 = vst.msk [vmem:[#allocation2 + $0x78] sm:$0xff] %vm2094_vm5, %v2009_v28 }
 0x2e4   : > { %2338 = vperm.xlu1 %9015, %v15739_v54   ;;  %9017 = vset.pattern.permute.xlu0 %v15347_v26 }
 0x2e6   : > { %v10882_v22 = vpop.permute.xlu1 %2010  ;;  %v2013_v14 = vpop.permute.xlu0 %2012 }
 0x2e7   : > { %15740 = vst [vmem:[#allocation111_spill] sm:$0xff] %v10882_v22  ;;  %2102 = vst.msk [vmem:[#allocation2 + $0xa8] sm:$0xff] %vm2094_vm5, %v2013_v14 }
 0x2e8   : > { %2348 = vperm.xlu1 %9015, %v15741_v16  }
 0x2ea   : > { %v10887_v53 = vpop.permute.xlu1 %2014  ;;  %v2017_v58 = vpop.permute.xlu0 %2016 }
 0x2eb   : > { %15742 = vst [vmem:[#allocation107_spill] sm:$0xff] %v10887_v53  ;;  %2104 = vst.msk [vmem:[#allocation2 + $0xd8] sm:$0xff] %vm2094_vm5, %v2017_v58 }
 0x2ec   : > { %9018 = vset.pattern.permute.xlu1 %v15347_v26 }
 0x2ee   : > { %v10891_v28 = vpop.permute.xlu1 %2018  ;;  %v2021_v15 = vpop.permute.xlu0 %2020 }
 0x2ef   : > { %15743 = vst [vmem:[#allocation113_spill] sm:$0xff] %v10891_v28  ;;  %2106 = vst.msk [vmem:[#allocation2 + $0x108] sm:$0xff] %vm2094_vm5, %v2021_v15 }
 0x2f2   : > { %v10894_v22 = vpop.permute.xlu1 %2022  ;;  %v2025_v14 = vpop.permute.xlu0 %2024 }
 0x2f3   : > { %15744 = vst [vmem:[#allocation108_spill] sm:$0xff] %v10894_v22  ;;  %2108 = vst.msk [vmem:[#allocation2 + $0x138] sm:$0xff] %vm2094_vm5, %v2025_v14 }
 0x2f6   : > { %v10897_v10 = vpop.permute.xlu1 %2026  ;;  %v2029_v43 = vpop.permute.xlu0 %2028 }
 0x2f7   : > { %15745 = vst [vmem:[#allocation117_spill] sm:$0xff] %v10897_v10  ;;  %2110 = vst.msk [vmem:[#allocation2 + $0x168] sm:$0xff] %vm2094_vm5, %v2029_v43 }
 0x2fa   : > { %v10900_v53 = vpop.permute.xlu1 %2030  ;;  %v2033_v58 = vpop.permute.xlu0 %2032 }
 0x2fb   : > { %15746 = vst [vmem:[#allocation110_spill] sm:$0xff] %v10900_v53  ;;  %2112 = vst.msk [vmem:[#allocation2 + $0x198] sm:$0xff] %vm2094_vm5, %v2033_v58 }
 0x2fe   : > { %v2037_v26 = vpop.permute.xlu0 %2036  ;;  %v10903_v28 = vpop.permute.xlu1 %2034 }
 0x2ff   : > { %15747 = vst [vmem:[#allocation119_spill] sm:$0xff] %v10903_v28  ;;  %2114 = vst.msk [vmem:[#allocation2 + $0x1c8] sm:$0xff] %vm2094_vm5, %v2037_v26 }
 0x302   : > { %v2041_v15 = vpop.permute.xlu0 %2040  ;;  %v10907_v22 = vpop.permute.xlu1 %2038 }
 0x303   : > { %2116 = vst.msk [vmem:[#allocation2 + $0x1f8] sm:$0xff] %vm2094_vm5, %v2041_v15  ;;  %15748 = vst [vmem:[#allocation112_spill] sm:$0xff] %v10907_v22 }
 0x306   : > { %v2045_v14 = vpop.permute.xlu0 %2044  ;;  %v10910_v43 = vpop.permute.xlu1 %2042 }
 0x307   : > { %2118 = vst.msk [vmem:[#allocation2 + $0x228] sm:$0xff] %vm2094_vm5, %v2045_v14  ;;  %15749 = vst [vmem:[#allocation121_spill] sm:$0xff] %v10910_v43 }
 0x30a   : > { %v2049_v10 = vpop.permute.xlu0 %2048  ;;  %v10914_v58 = vpop.permute.xlu1 %2046 }
 0x30b   : > { %2120 = vst.msk [vmem:[#allocation2 + $0x258] sm:$0xff] %vm2094_vm5, %v2049_v10  ;;  %15750 = vst [vmem:[#allocation116_spill] sm:$0xff] %v10914_v58  ;;  %v15754_v10 = vld [vmem:[#allocation75_spill] sm:$0xff] }
 0x30e   : > { %v2053_v53 = vpop.permute.xlu0 %2052  ;;  %v10917_v15 = vpop.permute.xlu1 %2050 }
 0x30f   : > { %2122 = vst.msk [vmem:[#allocation2 + $0x288] sm:$0xff] %vm2094_vm5, %v2053_v53  ;;  %15751 = vst [vmem:[#allocation118_spill] sm:$0xff] %v10917_v15 }
 0x312   : > { %v2057_v28 = vpop.permute.xlu0 %2056  ;;  %v10920_v22 = vpop.permute.xlu1 %2054 }
 0x313   : > { %2124 = vst.msk [vmem:[#allocation2 + $0x2b8] sm:$0xff] %vm2094_vm5, %v2057_v28  ;;  %15752 = vst [vmem:[#allocation135_spill] sm:$0xff] %v10920_v22 }
 0x316   : > { %v2061_v26 = vpop.permute.xlu0 %2060  ;;  %v10922_v14 = vpop.permute.xlu1 %2058 }
 0x317   : > { %2126 = vst.msk [vmem:[#allocation2 + $0x2e8] sm:$0xff] %vm2094_vm5, %v2061_v26  ;;  %15753 = vst [vmem:[#allocation136_spill] sm:$0xff] %v10922_v14 }
 0x327   : > { %v2194_v43 = vpop.permute.xlu1 %2193  ;;  %v2199_v60 = vpop.permute.xlu0 %2198 }
 0x328   : > { %v2351_v33 = vmul.f32 %v2194_v43, %v15754_v10  ;;  %v2352_v53 = vmul.f32 %v2199_v60, %v15755_v56  ;;  %v15760_v43 = vld [vmem:[#allocation80_spill] sm:$0xff]  ;;  %v15761_v10 = vld [vmem:[#allocation81_spill] sm:$0xff] }
 0x32a   : > { %2415 = vrot.lane.b32.xlu0 %v2351_v33, %s15756_s29  ;;  %2417 = vrot.lane.b32.xlu1 %v2352_v53, %s15756_s29 }
 0x32b   : > { %v2204_v28 = vpop.permute.xlu1 %2203  ;;  %v2214_v58 = vpop.permute.xlu0 %2213 }
 0x32c   : > { %v2353_v15 = vmul.f32 %v2204_v28, %v15757_v20  ;;  %v2355_v14 = vmul.f32 %v2214_v58, %v15758_v49  ;;  %v15762_v20 = vld [vmem:[#allocation82_spill] sm:$0xff]  ;;  %v15763_v49 = vld [vmem:[#allocation83_spill] sm:$0xff] }
 0x32e   : > { %2419 = vrot.lane.b32.xlu0 %v2353_v15, %s15756_s29 }
 0x32f   : > { %v2209_v26 = vpop.permute.xlu1 %2208  ;;  %v2224_v22 = vpop.permute.xlu0 %2223 }
 0x330   : > { %v2354_v45 = vmul.f32 %v2209_v26, %v15759_v13  ;;  %v2357_v53 = vmul.f32 %v2224_v22, %v15760_v43  ;;  %v15764_v13 = vld [vmem:[#allocation84_spill] sm:$0xff]  ;;  %v15765_v43 = vld [vmem:[#allocation85_spill] sm:$0xff] }
 0x332   : > { %2421 = vrot.lane.b32.xlu1 %v2354_v45, %s15756_s29  ;;  %2423 = vrot.lane.b32.xlu0 %v2355_v14, %s15756_s29 }
 0x333   : > { %v2219_v60 = vpop.permute.xlu1 %2218  ;;  %v2234_v33 = vpop.permute.xlu0 %2233 }
 0x334   : > { %v2356_v56 = vmul.f32 %v2219_v60, %v15761_v10  ;;  %v2359_v58 = vmul.f32 %v2234_v33, %v15762_v20  ;;  %v15766_v10 = vld [vmem:[#allocation86_spill] sm:$0xff]  ;;  %v15767_v20 = vld [vmem:[#allocation87_spill] sm:$0xff] }
 0x336   : > { %2425 = vrot.lane.b32.xlu1 %v2356_v56, %s15756_s29  ;;  %2427 = vrot.lane.b32.xlu0 %v2357_v53, %s15756_s29 }
 0x337   : > { %v2229_v15 = vpop.permute.xlu1 %2228  ;;  %v2244_v28 = vpop.permute.xlu0 %2243 }
 0x338   : > { %v2358_v26 = vmul.f32 %v2229_v15, %v15763_v49  ;;  %v2361_v22 = vmul.f32 %v2244_v28, %v15764_v13  ;;  %v15768_v49 = vld [vmem:[#allocation88_spill] sm:$0xff]  ;;  %v15769_v13 = vld [vmem:[#allocation89_spill] sm:$0xff] }
 0x33a   : > { %2429 = vrot.lane.b32.xlu1 %v2358_v26, %s15756_s29  ;;  %2431 = vrot.lane.b32.xlu0 %v2359_v58, %s15756_s29 }
 0x33b   : > { %v2239_v45 = vpop.permute.xlu1 %2238  ;;  %v2254_v14 = vpop.permute.xlu0 %2253 }
 0x33c   : > { %v2360_v60 = vmul.f32 %v2239_v45, %v15765_v43  ;;  %v2363_v33 = vmul.f32 %v2254_v14, %v15766_v10  ;;  %v15770_v43 = vld [vmem:[#allocation90_spill] sm:$0xff]  ;;  %v15771_v10 = vld [vmem:[#allocation91_spill] sm:$0xff] }
 0x33e   : > { %2433 = vrot.lane.b32.xlu1 %v2360_v60, %s15756_s29  ;;  %2435 = vrot.lane.b32.xlu0 %v2361_v22, %s15756_s29 }
 0x33f   : > { %v2249_v56 = vpop.permute.xlu1 %2248  ;;  %v2264_v53 = vpop.permute.xlu0 %2263 }
 0x340   : > { %v2362_v15 = vmul.f32 %v2249_v56, %v15767_v20  ;;  %v2365_v28 = vmul.f32 %v2264_v53, %v15768_v49  ;;  %v15772_v20 = vld [vmem:[#allocation92_spill] sm:$0xff]  ;;  %v15773_v49 = vld [vmem:[#allocation93_spill] sm:$0xff] }
 0x342   : > { %2437 = vrot.lane.b32.xlu1 %v2362_v15, %s15756_s29  ;;  %2439 = vrot.lane.b32.xlu0 %v2363_v33, %s15756_s29 }
 0x343   : > { %v2259_v58 = vpop.permute.xlu1 %2258  ;;  %v2274_v26 = vpop.permute.xlu0 %2273 }
 0x344   : > { %v2364_v45 = vmul.f32 %v2259_v58, %v15769_v13  ;;  %v2367_v14 = vmul.f32 %v2274_v26, %v15770_v43  ;;  %v15774_v13 = vld [vmem:[#allocation94_spill] sm:$0xff]  ;;  %v15775_v43 = vld [vmem:[#allocation95_spill] sm:$0xff] }
 0x346   : > { %2441 = vrot.lane.b32.xlu1 %v2364_v45, %s15756_s29  ;;  %2443 = vrot.lane.b32.xlu0 %v2365_v28, %s15756_s29 }
 0x347   : > { %v2269_v22 = vpop.permute.xlu1 %2268  ;;  %v2284_v60 = vpop.permute.xlu0 %2283 }
 0x348   : > { %v2366_v56 = vmul.f32 %v2269_v22, %v15771_v10  ;;  %v2369_v53 = vmul.f32 %v2284_v60, %v15772_v20  ;;  %v15776_v10 = vld [vmem:[#allocation96_spill] sm:$0xff]  ;;  %v15777_v20 = vld [vmem:[#allocation97_spill] sm:$0xff] }
 0x34a   : > { %2445 = vrot.lane.b32.xlu1 %v2366_v56, %s15756_s29  ;;  %2447 = vrot.lane.b32.xlu0 %v2367_v14, %s15756_s29 }
 0x34b   : > { %v2279_v33 = vpop.permute.xlu1 %2278  ;;  %v2294_v15 = vpop.permute.xlu0 %2293 }
 0x34c   : > { %v2368_v58 = vmul.f32 %v2279_v33, %v15773_v49  ;;  %v2371_v26 = vmul.f32 %v2294_v15, %v15774_v13  ;;  %v15778_v49 = vld [vmem:[#allocation98_spill] sm:$0xff]  ;;  %v15779_v13 = vld [vmem:[#allocation99_spill] sm:$0xff] }
 0x34e   : > { %2449 = vrot.lane.b32.xlu1 %v2368_v58, %s15756_s29  ;;  %2451 = vrot.lane.b32.xlu0 %v2369_v53, %s15756_s29 }
 0x34f   : > { %v2289_v28 = vpop.permute.xlu1 %2288  ;;  %v2304_v45 = vpop.permute.xlu0 %2303 }
 0x350   : > { %v2370_v22 = vmul.f32 %v2289_v28, %v15775_v43  ;;  %v2373_v60 = vmul.f32 %v2304_v45, %v15776_v10  ;;  %v15780_v43 = vld [vmem:[#allocation100_spill] sm:$0xff]  ;;  %v15781_v10 = vld [vmem:[#allocation101_spill] sm:$0xff] }
 0x352   : > { %2453 = vrot.lane.b32.xlu1 %v2370_v22, %s15756_s29  ;;  %2455 = vrot.lane.b32.xlu0 %v2371_v26, %s15756_s29 }
 0x353   : > { %v2299_v14 = vpop.permute.xlu1 %2298  ;;  %v2314_v56 = vpop.permute.xlu0 %2313 }
 0x354   : > { %v2372_v33 = vmul.f32 %v2299_v14, %v15777_v20  ;;  %v2375_v15 = vmul.f32 %v2314_v56, %v15778_v49  ;;  %v15783_v56 = vld [vmem:[#allocation103_spill] sm:$0xff] }
 0x356   : > { %2457 = vrot.lane.b32.xlu1 %v2372_v33, %s15756_s29  ;;  %2459 = vrot.lane.b32.xlu0 %v2373_v60, %s15756_s29  ;;  %v15782_v33 = vld [vmem:[#allocation102_spill] sm:$0xff] }
 0x357   : > { %v2309_v53 = vpop.permute.xlu1 %2308  ;;  %v2324_v58 = vpop.permute.xlu0 %2323 }
 0x358   : > { %v2374_v28 = vmul.f32 %v2309_v53, %v15779_v13  ;;  %v2377_v45 = vmul.f32 %v2324_v58, %v15780_v43  ;;  %v15785_v58 = vld [vmem:[#allocation104_spill] sm:$0xff] }
 0x35a   : > { %2461 = vrot.lane.b32.xlu1 %v2374_v28, %s15756_s29  ;;  %2463 = vrot.lane.b32.xlu0 %v2375_v15, %s15756_s29  ;;  %v15784_v28 = vld [vmem:[#allocation74_spill] sm:$0xff] }
 0x35b   : > { %v2319_v26 = vpop.permute.xlu1 %2318  ;;  %v2334_v22 = vpop.permute.xlu0 %2333 }
 0x35c   : > { %v2376_v14 = vmul.f32 %v2319_v26, %v15781_v10  ;;  %v2379_v20 = vmul.f32 %v2334_v22, %v15782_v33 }
 0x35e   : > { %2465 = vrot.lane.b32.xlu1 %v2376_v14, %s15756_s29  ;;  %2467 = vrot.lane.b32.xlu0 %v2377_v45, %s15756_s29  ;;  %v15786_v45 = vld [vmem:[#allocation73_spill] sm:$0xff] }
 0x35f   : > { %v2329_v60 = vpop.permute.xlu1 %2328  ;;  %v2344_v53 = vpop.permute.xlu0 %2343 }
 0x360   : > { %v2378_v49 = vmul.f32 %v2329_v60, %v15783_v56  ;;  %v2381_v13 = vmul.f32 %v2344_v53, %v15784_v28 }
 0x362   : > { %2469 = vrot.lane.b32.xlu1 %v2378_v49, %s15756_s29  ;;  %2471 = vrot.lane.b32.xlu0 %v2379_v20, %s15756_s29 }
 0x363   : > { %v2339_v15 = vpop.permute.xlu1 %2338 }
 0x364   : > { %v2380_v43 = vmul.f32 %v2339_v15, %v15785_v58 }
 0x366   : > { %2473 = vrot.lane.b32.xlu1 %v2380_v43, %s15756_s29  ;;  %2475 = vrot.lane.b32.xlu0 %v2381_v13, %s15756_s29 }
 0x367   : > { %v2349_v26 = vpop.permute.xlu1 %2348 }
 0x368   : > { %v2382_v14 = vmul.f32 %v2349_v26, %v15786_v45 }
 0x36a   : > { %2477 = vrot.lane.b32.xlu1 %v2382_v14, %s15756_s29  ;;  %2577 = vperm.xlu0 %9017, %v10412_v30  }
 0x36e   : > { %2582 = vperm.xlu1 %9018, %v10425_v2   ;;  %2592 = vperm.xlu0 %9017, %v10420_v21  }
 0x372   : > { %2587 = vperm.xlu1 %9018, %v10437_v55   ;;  %2602 = vperm.xlu0 %9017, %v10432_v62  }
 0x376   : > { %2597 = vperm.xlu1 %9018, %v10449_v25   ;;  %2612 = vperm.xlu0 %9017, %v10444_v9  }
 0x37a   : > { %2607 = vperm.xlu1 %9018, %v10461_v50   ;;  %2622 = vperm.xlu0 %9017, %v10456_v39  }
 0x37e   : > { %2617 = vperm.xlu1 %9018, %v10473_v1   ;;  %2632 = vperm.xlu0 %9017, %v10468_v7  }
 0x382   : > { %2627 = vperm.xlu1 %9018, %v10485_v63   ;;  %2642 = vperm.xlu0 %9017, %v10480_v44   ;;  %v15359_v44 = vmov 7  }
 0x386   : > { %2637 = vperm.xlu1 %9018, %v10497_v27   ;;  %2652 = vperm.xlu0 %9017, %v10492_v36  }
 0x38a   : > { %2647 = vperm.xlu1 %9018, %v10509_v48   ;;  %2662 = vperm.xlu0 %9017, %v15724_v35  }
 0x38e   : > { %2657 = vperm.xlu1 %9018, %v10521_v3   ;;  %2672 = vperm.xlu0 %9017, %v15726_v32  }
 0x392   : > { %2667 = vperm.xlu1 %9018, %v10533_v11   ;;  %2682 = vperm.xlu0 %9017, %v15728_v29  }
 0x396   : > { %2677 = vperm.xlu1 %9018, %v15725_v4   ;;  %2692 = vperm.xlu0 %9017, %v15730_v42  }
 0x39a   : > { %2687 = vperm.xlu1 %9018, %v15727_v18   ;;  %2702 = vperm.xlu0 %9017, %v15734_v8  }
 0x39c   : > { %v2416_v13 = vpop.permute.xlu0 %2415  ;;  %v2418_v20 = vpop.permute.xlu1 %2417 }
 0x39d   : > { %2511 = vst.msk [vmem:[#allocation2 + $0x8] sm:$0xff] %vm1259_vm2, %v2416_v13  ;;  %2512 = vst.msk [vmem:[#allocation2 + $0x20] sm:$0xff] %vm1259_vm2, %v2418_v20 }
 0x39e   : > { %2697 = vperm.xlu1 %9018, %v15729_v19   ;;  %2712 = vperm.xlu0 %9017, %v15736_v51  }
 0x3a0   : > { %v2420_v11 = vpop.permute.xlu0 %2419 }
 0x3a1   : > { %2513 = vst.msk [vmem:[#allocation2 + $0x38] sm:$0xff] %vm1259_vm2, %v2420_v11 }
 0x3a2   : > { %2707 = vperm.xlu1 %9018, %v15731_v41   ;;  %2722 = vperm.xlu0 %9017, %v15739_v54  }
 0x3a4   : > { %v2422_v3 = vpop.permute.xlu1 %2421  ;;  %v2424_v48 = vpop.permute.xlu0 %2423 }
 0x3a5   : > { %2514 = vst.msk [vmem:[#allocation2 + $0x50] sm:$0xff] %vm1259_vm2, %v2422_v3  ;;  %2515 = vst.msk [vmem:[#allocation2 + $0x68] sm:$0xff] %vm1259_vm2, %v2424_v48 }
 0x3a6   : > { %2717 = vperm.xlu1 %9018, %v15735_v59   ;;  %2732 = vperm.xlu0 %9017, %v15741_v16  }
 0x3a8   : > { %v2426_v63 = vpop.permute.xlu1 %2425  ;;  %v2428_v27 = vpop.permute.xlu0 %2427 }
 0x3a9   : > { %2516 = vst.msk [vmem:[#allocation2 + $0x80] sm:$0xff] %vm1259_vm2, %v2426_v63  ;;  %2517 = vst.msk [vmem:[#allocation2 + $0x98] sm:$0xff] %vm1259_vm2, %v2428_v27 }
 0x3aa   : > { %2727 = vperm.xlu1 %9018, %v15737_v5   ;;  %9020 = vset.pattern.permute.xlu0 %v15359_v44 }
 0x3ac   : > { %v2430_v51 = vpop.permute.xlu1 %2429  ;;  %v2432_v36 = vpop.permute.xlu0 %2431 }
 0x3ad   : > { %2518 = vst.msk [vmem:[#allocation2 + $0xb0] sm:$0xff] %vm1259_vm2, %v2430_v51  ;;  %2519 = vst.msk [vmem:[#allocation2 + $0xc8] sm:$0xff] %vm1259_vm2, %v2432_v36 }
 0x3ae   : > { %9019 = vset.pattern.permute.xlu1 %v15359_v44 }
 0x3b0   : > { %v2434_v59 = vpop.permute.xlu1 %2433  ;;  %v2436_v16 = vpop.permute.xlu0 %2435 }
 0x3b1   : > { %2520 = vst.msk [vmem:[#allocation2 + $0xe0] sm:$0xff] %vm1259_vm2, %v2434_v59  ;;  %2521 = vst.msk [vmem:[#allocation2 + $0xf8] sm:$0xff] %vm1259_vm2, %v2436_v16 }
 0x3b4   : > { %v2438_v30 = vpop.permute.xlu1 %2437  ;;  %v2440_v21 = vpop.permute.xlu0 %2439 }
 0x3b5   : > { %2522 = vst.msk [vmem:[#allocation2 + $0x110] sm:$0xff] %vm1259_vm2, %v2438_v30  ;;  %2523 = vst.msk [vmem:[#allocation2 + $0x128] sm:$0xff] %vm1259_vm2, %v2440_v21 }
 0x3b8   : > { %v2442_v5 = vpop.permute.xlu1 %2441  ;;  %v2444_v2 = vpop.permute.xlu0 %2443 }
 0x3b9   : > { %2524 = vst.msk [vmem:[#allocation2 + $0x140] sm:$0xff] %vm1259_vm2, %v2442_v5  ;;  %2525 = vst.msk [vmem:[#allocation2 + $0x158] sm:$0xff] %vm1259_vm2, %v2444_v2 }
 0x3bc   : > { %v2446_v62 = vpop.permute.xlu1 %2445  ;;  %v2448_v55 = vpop.permute.xlu0 %2447 }
 0x3bd   : > { %2526 = vst.msk [vmem:[#allocation2 + $0x170] sm:$0xff] %vm1259_vm2, %v2446_v62  ;;  %2527 = vst.msk [vmem:[#allocation2 + $0x188] sm:$0xff] %vm1259_vm2, %v2448_v55 }
 0x3c0   : > { %v2450_v9 = vpop.permute.xlu1 %2449  ;;  %v2452_v25 = vpop.permute.xlu0 %2451 }
 0x3c1   : > { %2528 = vst.msk [vmem:[#allocation2 + $0x1a0] sm:$0xff] %vm1259_vm2, %v2450_v9  ;;  %2529 = vst.msk [vmem:[#allocation2 + $0x1b8] sm:$0xff] %vm1259_vm2, %v2452_v25 }
 0x3c4   : > { %v2454_v39 = vpop.permute.xlu1 %2453  ;;  %v2456_v50 = vpop.permute.xlu0 %2455 }
 0x3c5   : > { %2530 = vst.msk [vmem:[#allocation2 + $0x1d0] sm:$0xff] %vm1259_vm2, %v2454_v39  ;;  %2531 = vst.msk [vmem:[#allocation2 + $0x1e8] sm:$0xff] %vm1259_vm2, %v2456_v50  ;;  %v15788_v50 = vld [vmem:[#allocation67_spill] sm:$0xff] }
 0x3c8   : > { %v2458_v7 = vpop.permute.xlu1 %2457  ;;  %v2460_v1 = vpop.permute.xlu0 %2459 }
 0x3c9   : > { %2532 = vst.msk [vmem:[#allocation2 + $0x200] sm:$0xff] %vm1259_vm2, %v2458_v7  ;;  %2533 = vst.msk [vmem:[#allocation2 + $0x218] sm:$0xff] %vm1259_vm2, %v2460_v1  ;;  %v15789_v7 = vld [vmem:[#allocation59_spill] sm:$0xff] }
 0x3cc   : > { %v2462_v49 = vpop.permute.xlu1 %2461  ;;  %v2464_v35 = vpop.permute.xlu0 %2463 }
 0x3cd   : > { %2534 = vst.msk [vmem:[#allocation2 + $0x230] sm:$0xff] %vm1259_vm2, %v2462_v49  ;;  %2535 = vst.msk [vmem:[#allocation2 + $0x248] sm:$0xff] %vm1259_vm2, %v2464_v35 }
 0x3d0   : > { %v2466_v4 = vpop.permute.xlu1 %2465  ;;  %v2468_v32 = vpop.permute.xlu0 %2467 }
 0x3d1   : > { %2536 = vst.msk [vmem:[#allocation2 + $0x260] sm:$0xff] %vm1259_vm2, %v2466_v4  ;;  %2537 = vst.msk [vmem:[#allocation2 + $0x278] sm:$0xff] %vm1259_vm2, %v2468_v32  ;;  %v15790_v4 = vld [vmem:[#allocation68_spill] sm:$0xff] }
 0x3d2   : > { %v15791_v32 = vld [vmem:[#allocation60_spill] sm:$0xff] }
 0x3d4   : > { %v2470_v18 = vpop.permute.xlu1 %2469  ;;  %v2472_v29 = vpop.permute.xlu0 %2471 }
 0x3d5   : > { %2538 = vst.msk [vmem:[#allocation2 + $0x290] sm:$0xff] %vm1259_vm2, %v2470_v18  ;;  %2539 = vst.msk [vmem:[#allocation2 + $0x2a8] sm:$0xff] %vm1259_vm2, %v2472_v29 }
 0x3d8   : > { %v2474_v19 = vpop.permute.xlu1 %2473  ;;  %v2476_v42 = vpop.permute.xlu0 %2475 }
 0x3d9   : > { %2540 = vst.msk [vmem:[#allocation2 + $0x2c0] sm:$0xff] %vm1259_vm2, %v2474_v19  ;;  %2541 = vst.msk [vmem:[#allocation2 + $0x2d8] sm:$0xff] %vm1259_vm2, %v2476_v42  ;;  %v15792_v42 = vld [vmem:[#allocation69_spill] sm:$0xff] }
 0x3dc   : > { %v2478_v41 = vpop.permute.xlu1 %2477 }
 0x3dd   : > { %2542 = vst.msk [vmem:[#allocation2 + $0x2f0] sm:$0xff] %vm1259_vm2, %v2478_v41 }
 0x3e9   : > { %v2578_v54 = vpop.permute.xlu0 %2577 }
 0x3ea   : > { %v2735_v8 = vmul.f32 %v2578_v54, %v10662_v0  ;;  %v15793_v54 = vld [vmem:[#allocation61_spill] sm:$0xff] }
 0x3ec   : > { %2799 = vrot.lane.b32.xlu1 %v2735_v8, %s15787_s15 }
 0x3ed   : > { %v2583_v43 = vpop.permute.xlu1 %2582  ;;  %v2593_v22 = vpop.permute.xlu0 %2592 }
 0x3ee   : > { %v2736_v60 = vmul.f32 %v2583_v43, %v15675_v17  ;;  %v2738_v26 = vmul.f32 %v2593_v22, %v15678_v24 }
 0x3f0   : > { %2801 = vrot.lane.b32.xlu0 %v2736_v60, %s15787_s15  ;;  %v15794_v60 = vld [vmem:[#allocation70_spill] sm:$0xff] }
 0x3f1   : > { %v2588_v53 = vpop.permute.xlu1 %2587  ;;  %v2603_v15 = vpop.permute.xlu0 %2602 }
 0x3f2   : > { %v2737_v14 = vmul.f32 %v2588_v53, %v10673_v31  ;;  %v2740_v11 = vmul.f32 %v2603_v15, %v15681_v6  ;;  %v15795_v15 = vld [vmem:[#allocation62_spill] sm:$0xff] }
 0x3f4   : > { %2803 = vrot.lane.b32.xlu1 %v2737_v14, %s15787_s15  ;;  %2805 = vrot.lane.b32.xlu0 %v2738_v26, %s15787_s15 }
 0x3f5   : > { %v2598_v13 = vpop.permute.xlu1 %2597  ;;  %v2613_v20 = vpop.permute.xlu0 %2612 }
 0x3f6   : > { %v2739_v3 = vmul.f32 %v2598_v13, %v10685_v34  ;;  %v2742_v24 = vmul.f32 %v2613_v20, %v15684_v23  ;;  %v15796_v20 = vld [vmem:[#allocation71_spill] sm:$0xff] }
 0x3f8   : > { %2807 = vrot.lane.b32.xlu1 %v2739_v3, %s15787_s15  ;;  %2809 = vrot.lane.b32.xlu0 %v2740_v11, %s15787_s15  ;;  %v15797_v3 = vld [vmem:[#allocation63_spill] sm:$0xff] }
 0x3f9   : > { %v2608_v17 = vpop.permute.xlu1 %2607  ;;  %v2623_v48 = vpop.permute.xlu0 %2622 }
 0x3fa   : > { %v2741_v63 = vmul.f32 %v2608_v17, %v10697_v40  ;;  %v2744_v6 = vmul.f32 %v2623_v48, %v15687_v12 }
 0x3fc   : > { %2811 = vrot.lane.b32.xlu1 %v2741_v63, %s15787_s15  ;;  %2813 = vrot.lane.b32.xlu0 %v2742_v24, %s15787_s15  ;;  %v15798_v63 = vld [vmem:[#allocation72_spill] sm:$0xff] }
 0x3fd   : > { %v2618_v27 = vpop.permute.xlu1 %2617  ;;  %v2633_v51 = vpop.permute.xlu0 %2632 }
 0x3fe   : > { %v2743_v36 = vmul.f32 %v2618_v27, %v10709_v47  ;;  %v2746_v23 = vmul.f32 %v2633_v51, %v15690_v46  ;;  %v15799_v51 = vld [vmem:[#allocation64_spill] sm:$0xff] }
 0x400   : > { %2815 = vrot.lane.b32.xlu1 %v2743_v36, %s15787_s15  ;;  %2817 = vrot.lane.b32.xlu0 %v2744_v6, %s15787_s15 }
 0x401   : > { %v2628_v59 = vpop.permute.xlu1 %2627  ;;  %v2643_v16 = vpop.permute.xlu0 %2642 }
 0x402   : > { %v2745_v30 = vmul.f32 %v2628_v59, %v10721_v52  ;;  %v2748_v12 = vmul.f32 %v2643_v16, %v15693_v38  ;;  %v15800_v59 = vld [vmem:[#allocation65_spill] sm:$0xff] }
 0x404   : > { %2819 = vrot.lane.b32.xlu1 %v2745_v30, %s15787_s15  ;;  %2821 = vrot.lane.b32.xlu0 %v2746_v23, %s15787_s15  ;;  %v15801_v23 = vld [vmem:[#allocation66_spill] sm:$0xff] }
 0x405   : > { %v2638_v21 = vpop.permute.xlu1 %2637  ;;  %v2653_v5 = vpop.permute.xlu0 %2652 }
 0x406   : > { %v2747_v2 = vmul.f32 %v2638_v21, %v10733_v57  ;;  %v2750_v46 = vmul.f32 %v2653_v5, %v15696_v37 }
 0x408   : > { %2823 = vrot.lane.b32.xlu1 %v2747_v2, %s15787_s15  ;;  %2825 = vrot.lane.b32.xlu0 %v2748_v12, %s15787_s15  ;;  %v15802_v12 = vld [vmem:[#allocation58_spill] sm:$0xff] }
 0x409   : > { %v2648_v62 = vpop.permute.xlu1 %2647  ;;  %v2663_v55 = vpop.permute.xlu0 %2662 }
 0x40a   : > { %v2749_v9 = vmul.f32 %v2648_v62, %v10745_v61  ;;  %v2752_v38 = vmul.f32 %v2663_v55, %v15788_v50  ;;  %v15803_v62 = vld [vmem:[#allocation57_spill] sm:$0xff]  ;;  %v11145_v50 = vld [vmem:[%s15103_s1 + $0x18] sm:$0xff] }
 0x40c   : > { %2827 = vrot.lane.b32.xlu1 %v2749_v9, %s15787_s15  ;;  %2829 = vrot.lane.b32.xlu0 %v2750_v46, %s15787_s15  ;;  %v11121_v46 = vld [vmem:[%s15103_s1] sm:$0xff]  ;;  %v11126_v9 = vld [vmem:[%s15103_s1 + $0x8] sm:$0xff] }
 0x40d   : > { %v2658_v25 = vpop.permute.xlu1 %2657  ;;  %v2673_v39 = vpop.permute.xlu0 %2672 }
 0x40e   : > { %v2751_v1 = vmul.f32 %v2658_v25, %v15789_v7  ;;  %v2754_v37 = vmul.f32 %v2673_v39, %v15790_v4  ;;  %v11133_v25 = vld [vmem:[%s15103_s1 + $0x10] sm:$0xff]  ;;  %v11138_v39 = vld [vmem:[%s15103_s1 + $0x20] sm:$0xff] }
 0x40f   : > { %v11174_v4 = vld [vmem:[%s15103_s1 + $0x50] sm:$0xff] }
 0x410   : > { %2831 = vrot.lane.b32.xlu1 %v2751_v1, %s15787_s15  ;;  %2833 = vrot.lane.b32.xlu0 %v2752_v38, %s15787_s15  ;;  %v11150_v38 = vld [vmem:[%s15103_s1 + $0x30] sm:$0xff]  ;;  %v11157_v1 = vld [vmem:[%s15103_s1 + $0x28] sm:$0xff] }
 0x411   : > { %v2668_v49 = vpop.permute.xlu1 %2667  ;;  %v2683_v35 = vpop.permute.xlu0 %2682 }
 0x412   : > { %v2753_v18 = vmul.f32 %v2668_v49, %v15791_v32  ;;  %v2756_v41 = vmul.f32 %v2683_v35, %v15792_v42  ;;  %v11162_v49 = vld [vmem:[%s15103_s1 + $0x40] sm:$0xff]  ;;  %v11169_v35 = vld [vmem:[%s15103_s1 + $0x38] sm:$0xff]  ;;  %v11205_v42 = vld [vmem:[%s15103_s1 + $0x68] sm:$0xff] }
 0x413   : > { %v15809_v32 = vld [vmem:[#allocation15_spill] sm:$0xff] }
 0x414   : > { %2835 = vrot.lane.b32.xlu1 %v2753_v18, %s15787_s15  ;;  %2837 = vrot.lane.b32.xlu0 %v2754_v37, %s15787_s15  ;;  %v11181_v37 = vld [vmem:[%s15103_s1 + $0x48] sm:$0xff]  ;;  %v11186_v18 = vld [vmem:[%s15103_s1 + $0x60] sm:$0xff] }
 0x415   : > { %v2678_v29 = vpop.permute.xlu1 %2677  ;;  %v2693_v19 = vpop.permute.xlu0 %2692 }
 0x416   : > { %v2755_v8 = vmul.f32 %v2678_v29, %v15793_v54  ;;  %v2758_v53 = vmul.f32 %v2693_v19, %v15794_v60  ;;  %v11193_v29 = vld [vmem:[%s15103_s1 + $0x58] sm:$0xff]  ;;  %v11198_v19 = vld [vmem:[%s15103_s1 + $0x70] sm:$0xff]  ;;  %v11234_v60 = vld [vmem:[%s15103_s1 + $0xa0] sm:$0xff] }
 0x417   : > { %v15808_v54 = vld [vmem:[#allocation16_spill] sm:$0xff] }
 0x418   : > { %2839 = vrot.lane.b32.xlu1 %v2755_v8, %s15787_s15  ;;  %2841 = vrot.lane.b32.xlu0 %v2756_v41, %s15787_s15  ;;  %v11210_v41 = vld [vmem:[%s15103_s1 + $0x80] sm:$0xff]  ;;  %v11217_v8 = vld [vmem:[%s15103_s1 + $0x78] sm:$0xff] }
 0x419   : > { %v2688_v43 = vpop.permute.xlu1 %2687  ;;  %v2703_v22 = vpop.permute.xlu0 %2702 }
 0x41a   : > { %v2757_v26 = vmul.f32 %v2688_v43, %v15795_v15  ;;  %v2760_v11 = vmul.f32 %v2703_v22, %v15796_v20  ;;  %v11222_v43 = vld [vmem:[%s15103_s1 + $0x90] sm:$0xff]  ;;  %v11229_v22 = vld [vmem:[%s15103_s1 + $0x88] sm:$0xff]  ;;  %v11265_v20 = vld [vmem:[%s15103_s1 + $0xb8] sm:$0xff] }
 0x41c   : > { %2843 = vrot.lane.b32.xlu1 %v2757_v26, %s15787_s15  ;;  %2845 = vrot.lane.b32.xlu0 %v2758_v53, %s15787_s15  ;;  %v11241_v53 = vld [vmem:[%s15103_s1 + $0x98] sm:$0xff]  ;;  %v11246_v26 = vld [vmem:[%s15103_s1 + $0xb0] sm:$0xff] }
 0x41d   : > { %v2698_v14 = vpop.permute.xlu1 %2697  ;;  %v2713_v13 = vpop.permute.xlu0 %2712 }
 0x41e   : > { %v2759_v17 = vmul.f32 %v2698_v14, %v15797_v3  ;;  %v2762_v27 = vmul.f32 %v2713_v13, %v15798_v63  ;;  %v11253_v14 = vld [vmem:[%s15103_s1 + $0xa8] sm:$0xff]  ;;  %v11258_v13 = vld [vmem:[%s15103_s1 + $0xc0] sm:$0xff]  ;;  %v15807_v3 = vld [vmem:[#allocation14_spill] sm:$0xff] }
 0x420   : > { %2847 = vrot.lane.b32.xlu1 %v2759_v17, %s15787_s15  ;;  %2849 = vrot.lane.b32.xlu0 %v2760_v11, %s15787_s15  ;;  %v11270_v11 = vld [vmem:[%s15103_s1 + $0xd0] sm:$0xff] }
 0x421   : > { %v2708_v48 = vpop.permute.xlu1 %2707  ;;  %v2723_v24 = vpop.permute.xlu0 %2722 }
 0x422   : > { %v2761_v6 = vmul.f32 %v2708_v48, %v15799_v51  ;;  %v2764_v16 = vmul.f32 %v2723_v24, %v15800_v59  ;;  %v11278_v48 = vld [vmem:[%s15103_s1 + $0xc8] sm:$0xff]  ;;  %v11283_v24 = vld [vmem:[%s15103_s1 + $0xe0] sm:$0xff] }
 0x423   : > { %v15805_v51 = vld [vmem:[#allocation13_spill] sm:$0xff] }
 0x424   : > { %2851 = vrot.lane.b32.xlu1 %v2761_v6, %s15787_s15  ;;  %2853 = vrot.lane.b32.xlu0 %v2762_v27, %s15787_s15  ;;  %v11291_v27 = vld [vmem:[%s15103_s1 + $0xd8] sm:$0xff]  ;;  %v11296_v6 = vld [vmem:[%s15103_s1 + $0xf0] sm:$0xff] }
 0x425   : > { %v2718_v36 = vpop.permute.xlu1 %2717  ;;  %v2733_v21 = vpop.permute.xlu0 %2732 }
 0x426   : > { %v2763_v30 = vmul.f32 %v2718_v36, %v15801_v23  ;;  %v2766_v2 = vmul.f32 %v2733_v21, %v15802_v12  ;;  %v11313_v12 = vld [vmem:[%s15103_s1 + $0xf8] sm:$0xff] }
 0x428   : > { %2855 = vrot.lane.b32.xlu1 %v2763_v30, %s15787_s15  ;;  %2857 = vrot.lane.b32.xlu0 %v2764_v16, %s15787_s15  ;;  %v11305_v30 = vld [vmem:[%s15103_s1 + $0xe8] sm:$0xff] }
 0x429   : > { %v2728_v5 = vpop.permute.xlu1 %2727 }
 0x42a   : > { %v2765_v55 = vmul.f32 %v2728_v5, %v15803_v62 }
 0x42c   : > { %2859 = vrot.lane.b32.xlu1 %v2765_v55, %s15787_s15  ;;  %2861 = vrot.lane.b32.xlu0 %v2766_v2, %s15787_s15  ;;  %v15357_v55 = vmov 8  }
 0x430   : > { %2961 = vperm.xlu1 %9019, %v11121_v46   ;;  %2966 = vperm.xlu0 %9020, %v11126_v9  }
 0x434   : > { %2971 = vperm.xlu1 %9019, %v11133_v25   ;;  %2981 = vperm.xlu0 %9020, %v11138_v39  }
 0x438   : > { %2976 = vperm.xlu1 %9019, %v11145_v50   ;;  %2991 = vperm.xlu0 %9020, %v11150_v38  }
 0x43c   : > { %2986 = vperm.xlu1 %9019, %v11157_v1   ;;  %3001 = vperm.xlu0 %9020, %v11162_v49  }
 0x440   : > { %2996 = vperm.xlu1 %9019, %v11169_v35   ;;  %3011 = vperm.xlu0 %9020, %v11174_v4  }
 0x444   : > { %3006 = vperm.xlu1 %9019, %v11181_v37   ;;  %3021 = vperm.xlu0 %9020, %v11186_v18  }
 0x448   : > { %3016 = vperm.xlu1 %9019, %v11193_v29   ;;  %3031 = vperm.xlu0 %9020, %v11198_v19  }
 0x44c   : > { %3026 = vperm.xlu1 %9019, %v11205_v42   ;;  %3041 = vperm.xlu0 %9020, %v11210_v41  }
 0x450   : > { %3036 = vperm.xlu1 %9019, %v11217_v8   ;;  %3051 = vperm.xlu0 %9020, %v11222_v43  }
 0x454   : > { %3046 = vperm.xlu1 %9019, %v11229_v22   ;;  %3061 = vperm.xlu0 %9020, %v11234_v60  }
 0x458   : > { %3056 = vperm.xlu1 %9019, %v11241_v53   ;;  %3071 = vperm.xlu0 %9020, %v11246_v26  }
 0x45c   : > { %3066 = vperm.xlu1 %9019, %v11253_v14   ;;  %3081 = vperm.xlu0 %9020, %v11258_v13  }
 0x45e   : > { %v2800_v17 = vpop.permute.xlu1 %2799 }
 0x45f   : > { %2895 = vst.msk [vmem:[#allocation2 + $0x8] sm:$0xff] %vm1709_vm4, %v2800_v17 }
 0x460   : > { %3076 = vperm.xlu1 %9019, %v11265_v20   ;;  %3091 = vperm.xlu0 %9020, %v11270_v11  }
 0x462   : > { %v2802_v63 = vpop.permute.xlu0 %2801 }
 0x463   : > { %2896 = vst.msk [vmem:[#allocation2 + $0x20] sm:$0xff] %vm1709_vm4, %v2802_v63 }
 0x464   : > { %3086 = vperm.xlu1 %9019, %v11278_v48   ;;  %3101 = vperm.xlu0 %9020, %v11283_v24  }
 0x466   : > { %v2804_v36 = vpop.permute.xlu1 %2803  ;;  %v2806_v16 = vpop.permute.xlu0 %2805 }
 0x467   : > { %2897 = vst.msk [vmem:[#allocation2 + $0x38] sm:$0xff] %vm1709_vm4, %v2804_v36  ;;  %2898 = vst.msk [vmem:[#allocation2 + $0x50] sm:$0xff] %vm1709_vm4, %v2806_v16 }
 0x468   : > { %3096 = vperm.xlu1 %9019, %v11291_v27   ;;  %3111 = vperm.xlu0 %9020, %v11296_v6  }
 0x46a   : > { %v2808_v21 = vpop.permute.xlu1 %2807  ;;  %v2810_v5 = vpop.permute.xlu0 %2809 }
 0x46b   : > { %2899 = vst.msk [vmem:[#allocation2 + $0x68] sm:$0xff] %vm1709_vm4, %v2808_v21  ;;  %2900 = vst.msk [vmem:[#allocation2 + $0x80] sm:$0xff] %vm1709_vm4, %v2810_v5 }
 0x46c   : > { %3106 = vperm.xlu1 %9019, %v11305_v30   ;;  %9021 = vset.pattern.permute.xlu0 %v15357_v55 }
 0x46e   : > { %v2812_v2 = vpop.permute.xlu1 %2811  ;;  %v2814_v62 = vpop.permute.xlu0 %2813 }
 0x46f   : > { %2901 = vst.msk [vmem:[#allocation2 + $0x98] sm:$0xff] %vm1709_vm4, %v2812_v2  ;;  %2902 = vst.msk [vmem:[#allocation2 + $0xb0] sm:$0xff] %vm1709_vm4, %v2814_v62 }
 0x470   : > { %3116 = vperm.xlu1 %9019, %v11313_v12  }
 0x472   : > { %v2816_v17 = vpop.permute.xlu1 %2815  ;;  %v2818_v63 = vpop.permute.xlu0 %2817 }
 0x473   : > { %2903 = vst.msk [vmem:[#allocation2 + $0xc8] sm:$0xff] %vm1709_vm4, %v2816_v17  ;;  %2904 = vst.msk [vmem:[#allocation2 + $0xe0] sm:$0xff] %vm1709_vm4, %v2818_v63 }
 0x474   : > { %9022 = vset.pattern.permute.xlu1 %v15357_v55  ;;  %v15804_v55 = vld [vmem:[#allocation12_spill] sm:$0xff] }
 0x476   : > { %v2820_v36 = vpop.permute.xlu1 %2819  ;;  %v2822_v16 = vpop.permute.xlu0 %2821 }
 0x477   : > { %2905 = vst.msk [vmem:[#allocation2 + $0xf8] sm:$0xff] %vm1709_vm4, %v2820_v36  ;;  %2906 = vst.msk [vmem:[#allocation2 + $0x110] sm:$0xff] %vm1709_vm4, %v2822_v16 }
 0x47a   : > { %v2824_v21 = vpop.permute.xlu1 %2823  ;;  %v2826_v5 = vpop.permute.xlu0 %2825 }
 0x47b   : > { %2907 = vst.msk [vmem:[#allocation2 + $0x128] sm:$0xff] %vm1709_vm4, %v2824_v21  ;;  %2908 = vst.msk [vmem:[#allocation2 + $0x140] sm:$0xff] %vm1709_vm4, %v2826_v5 }
 0x47e   : > { %v2828_v2 = vpop.permute.xlu1 %2827  ;;  %v2830_v62 = vpop.permute.xlu0 %2829 }
 0x47f   : > { %2909 = vst.msk [vmem:[#allocation2 + $0x158] sm:$0xff] %vm1709_vm4, %v2828_v2  ;;  %2910 = vst.msk [vmem:[#allocation2 + $0x170] sm:$0xff] %vm1709_vm4, %v2830_v62 }
 0x482   : > { %v2832_v17 = vpop.permute.xlu1 %2831  ;;  %v2834_v63 = vpop.permute.xlu0 %2833 }
 0x483   : > { %2911 = vst.msk [vmem:[#allocation2 + $0x188] sm:$0xff] %vm1709_vm4, %v2832_v17  ;;  %2912 = vst.msk [vmem:[#allocation2 + $0x1a0] sm:$0xff] %vm1709_vm4, %v2834_v63 }
 0x486   : > { %v2836_v36 = vpop.permute.xlu1 %2835  ;;  %v2838_v16 = vpop.permute.xlu0 %2837 }
 0x487   : > { %2913 = vst.msk [vmem:[#allocation2 + $0x1b8] sm:$0xff] %vm1709_vm4, %v2836_v36  ;;  %2914 = vst.msk [vmem:[#allocation2 + $0x1d0] sm:$0xff] %vm1709_vm4, %v2838_v16 }
 0x48a   : > { %v2840_v21 = vpop.permute.xlu1 %2839  ;;  %v2842_v5 = vpop.permute.xlu0 %2841 }
 0x48b   : > { %2915 = vst.msk [vmem:[#allocation2 + $0x1e8] sm:$0xff] %vm1709_vm4, %v2840_v21  ;;  %2916 = vst.msk [vmem:[#allocation2 + $0x200] sm:$0xff] %vm1709_vm4, %v2842_v5 }
 0x48e   : > { %v2844_v2 = vpop.permute.xlu1 %2843  ;;  %v2846_v62 = vpop.permute.xlu0 %2845 }
 0x48f   : > { %2917 = vst.msk [vmem:[#allocation2 + $0x218] sm:$0xff] %vm1709_vm4, %v2844_v2  ;;  %2918 = vst.msk [vmem:[#allocation2 + $0x230] sm:$0xff] %vm1709_vm4, %v2846_v62 }
 0x492   : > { %v2848_v17 = vpop.permute.xlu1 %2847  ;;  %v2850_v63 = vpop.permute.xlu0 %2849 }
 0x493   : > { %2919 = vst.msk [vmem:[#allocation2 + $0x248] sm:$0xff] %vm1709_vm4, %v2848_v17  ;;  %2920 = vst.msk [vmem:[#allocation2 + $0x260] sm:$0xff] %vm1709_vm4, %v2850_v63 }
 0x496   : > { %v2852_v36 = vpop.permute.xlu1 %2851  ;;  %v2854_v16 = vpop.permute.xlu0 %2853 }
 0x497   : > { %2921 = vst.msk [vmem:[#allocation2 + $0x278] sm:$0xff] %vm1709_vm4, %v2852_v36  ;;  %2922 = vst.msk [vmem:[#allocation2 + $0x290] sm:$0xff] %vm1709_vm4, %v2854_v16 }
 0x49a   : > { %v2856_v21 = vpop.permute.xlu1 %2855  ;;  %v2858_v5 = vpop.permute.xlu0 %2857 }
 0x49b   : > { %2923 = vst.msk [vmem:[#allocation2 + $0x2a8] sm:$0xff] %vm1709_vm4, %v2856_v21  ;;  %2924 = vst.msk [vmem:[#allocation2 + $0x2c0] sm:$0xff] %vm1709_vm4, %v2858_v5 }
 0x49e   : > { %v2860_v2 = vpop.permute.xlu1 %2859  ;;  %v2862_v62 = vpop.permute.xlu0 %2861 }
 0x49f   : > { %2925 = vst.msk [vmem:[#allocation2 + $0x2d8] sm:$0xff] %vm1709_vm4, %v2860_v2  ;;  %2926 = vst.msk [vmem:[#allocation2 + $0x2f0] sm:$0xff] %vm1709_vm4, %v2862_v62 }
 0x4af   : > { %v2962_v17 = vpop.permute.xlu1 %2961  ;;  %v2967_v63 = vpop.permute.xlu0 %2966 }
 0x4b0   : > { %v3119_v44 = vmul.f32 %v2962_v17, %v15804_v55  ;;  %v3120_v36 = vmul.f32 %v2967_v63, %v15805_v51  ;;  %v15810_v55 = vld [vmem:[#allocation18_spill] sm:$0xff]  ;;  %v15811_v63 = vld [vmem:[#allocation17_spill] sm:$0xff] }
 0x4b2   : > { %3183 = vrot.lane.b32.xlu0 %v3119_v44, %s15806_s16  ;;  %3185 = vrot.lane.b32.xlu1 %v3120_v36, %s15806_s16 }
 0x4b3   : > { %v2972_v16 = vpop.permute.xlu1 %2971  ;;  %v2982_v21 = vpop.permute.xlu0 %2981 }
 0x4b4   : > { %v3121_v5 = vmul.f32 %v2972_v16, %v15807_v3  ;;  %v3123_v62 = vmul.f32 %v2982_v21, %v15808_v54  ;;  %v15813_v21 = vld [vmem:[#allocation19_spill] sm:$0xff] }
 0x4b6   : > { %3187 = vrot.lane.b32.xlu0 %v3121_v5, %s15806_s16  ;;  %v15812_v5 = vld [vmem:[#allocation20_spill] sm:$0xff] }
 0x4b7   : > { %v2977_v15 = vpop.permute.xlu1 %2976  ;;  %v2992_v2 = vpop.permute.xlu0 %2991 }
 0x4b8   : > { %v3122_v7 = vmul.f32 %v2977_v15, %v15809_v32  ;;  %v3125_v17 = vmul.f32 %v2992_v2, %v15810_v55  ;;  %v15815_v55 = vld [vmem:[#allocation21_spill] sm:$0xff] }
 0x4ba   : > { %3189 = vrot.lane.b32.xlu1 %v3122_v7, %s15806_s16  ;;  %3191 = vrot.lane.b32.xlu0 %v3123_v62, %s15806_s16  ;;  %v15814_v62 = vld [vmem:[#allocation22_spill] sm:$0xff] }
 0x4bb   : > { %v2987_v51 = vpop.permute.xlu1 %2986  ;;  %v3002_v44 = vpop.permute.xlu0 %3001 }
 0x4bc   : > { %v3124_v36 = vmul.f32 %v2987_v51, %v15811_v63  ;;  %v3127_v54 = vmul.f32 %v3002_v44, %v15812_v5  ;;  %v15817_v5 = vld [vmem:[#allocation23_spill] sm:$0xff] }
 0x4be   : > { %3193 = vrot.lane.b32.xlu1 %v3124_v36, %s15806_s16  ;;  %3195 = vrot.lane.b32.xlu0 %v3125_v17, %s15806_s16  ;;  %v15816_v36 = vld [vmem:[#allocation25_spill] sm:$0xff] }
 0x4bf   : > { %v2997_v3 = vpop.permute.xlu1 %2996  ;;  %v3012_v16 = vpop.permute.xlu0 %3011 }
 0x4c0   : > { %v3126_v32 = vmul.f32 %v2997_v3, %v15813_v21  ;;  %v3129_v2 = vmul.f32 %v3012_v16, %v15814_v62  ;;  %v15819_v62 = vld [vmem:[#allocation26_spill] sm:$0xff] }
 0x4c2   : > { %3197 = vrot.lane.b32.xlu1 %v3126_v32, %s15806_s16  ;;  %3199 = vrot.lane.b32.xlu0 %v3127_v54, %s15806_s16  ;;  %v15818_v32 = vld [vmem:[#allocation28_spill] sm:$0xff] }
 0x4c3   : > { %v3007_v7 = vpop.permute.xlu1 %3006  ;;  %v3022_v15 = vpop.permute.xlu0 %3021 }
 0x4c4   : > { %v3128_v51 = vmul.f32 %v3007_v7, %v15815_v55  ;;  %v3131_v44 = vmul.f32 %v3022_v15, %v15816_v36  ;;  %v15821_v36 = vld [vmem:[#allocation29_spill] sm:$0xff] }
 0x4c6   : > { %3201 = vrot.lane.b32.xlu1 %v3128_v51, %s15806_s16  ;;  %3203 = vrot.lane.b32.xlu0 %v3129_v2, %s15806_s16  ;;  %v15820_v51 = vld [vmem:[#allocation31_spill] sm:$0xff] }
 0x4c7   : > { %v3017_v17 = vpop.permute.xlu1 %3016  ;;  %v3032_v63 = vpop.permute.xlu0 %3031 }
 0x4c8   : > { %v3130_v3 = vmul.f32 %v3017_v17, %v15817_v5  ;;  %v3133_v16 = vmul.f32 %v3032_v63, %v15818_v32  ;;  %v15823_v32 = vld [vmem:[#allocation32_spill] sm:$0xff] }
 0x4ca   : > { %3205 = vrot.lane.b32.xlu1 %v3130_v3, %s15806_s16  ;;  %3207 = vrot.lane.b32.xlu0 %v3131_v44, %s15806_s16  ;;  %v15822_v3 = vld [vmem:[#allocation34_spill] sm:$0xff] }
 0x4cb   : > { %v3027_v54 = vpop.permute.xlu1 %3026  ;;  %v3042_v21 = vpop.permute.xlu0 %3041 }
 0x4cc   : > { %v3132_v7 = vmul.f32 %v3027_v54, %v15819_v62  ;;  %v3135_v15 = vmul.f32 %v3042_v21, %v15820_v51  ;;  %v15825_v51 = vld [vmem:[#allocation35_spill] sm:$0xff] }
 0x4ce   : > { %3209 = vrot.lane.b32.xlu1 %v3132_v7, %s15806_s16  ;;  %3211 = vrot.lane.b32.xlu0 %v3133_v16, %s15806_s16  ;;  %v15824_v7 = vld [vmem:[#allocation37_spill] sm:$0xff] }
 0x4cf   : > { %v3037_v2 = vpop.permute.xlu1 %3036  ;;  %v3052_v55 = vpop.permute.xlu0 %3051 }
 0x4d0   : > { %v3134_v17 = vmul.f32 %v3037_v2, %v15821_v36  ;;  %v3137_v63 = vmul.f32 %v3052_v55, %v15822_v3  ;;  %v15827_v3 = vld [vmem:[#allocation38_spill] sm:$0xff] }
 0x4d2   : > { %3213 = vrot.lane.b32.xlu1 %v3134_v17, %s15806_s16  ;;  %3215 = vrot.lane.b32.xlu0 %v3135_v15, %s15806_s16  ;;  %v15826_v17 = vld [vmem:[#allocation40_spill] sm:$0xff] }
 0x4d3   : > { %v3047_v44 = vpop.permute.xlu1 %3046  ;;  %v3062_v5 = vpop.permute.xlu0 %3061 }
 0x4d4   : > { %v3136_v54 = vmul.f32 %v3047_v44, %v15823_v32  ;;  %v3139_v21 = vmul.f32 %v3062_v5, %v15824_v7  ;;  %v15829_v7 = vld [vmem:[#allocation41_spill] sm:$0xff] }
 0x4d6   : > { %3217 = vrot.lane.b32.xlu1 %v3136_v54, %s15806_s16  ;;  %3219 = vrot.lane.b32.xlu0 %v3137_v63, %s15806_s16  ;;  %v15828_v54 = vld [vmem:[#allocation43_spill] sm:$0xff] }
 0x4d7   : > { %v3057_v16 = vpop.permute.xlu1 %3056  ;;  %v3072_v62 = vpop.permute.xlu0 %3071 }
 0x4d8   : > { %v3138_v2 = vmul.f32 %v3057_v16, %v15825_v51  ;;  %v3141_v55 = vmul.f32 %v3072_v62, %v15826_v17  ;;  %v15831_v17 = vld [vmem:[#allocation44_spill] sm:$0xff] }
 0x4da   : > { %3221 = vrot.lane.b32.xlu1 %v3138_v2, %s15806_s16  ;;  %3223 = vrot.lane.b32.xlu0 %v3139_v21, %s15806_s16  ;;  %v15830_v2 = vld [vmem:[#allocation46_spill] sm:$0xff] }
 0x4db   : > { %v3067_v15 = vpop.permute.xlu1 %3066  ;;  %v3082_v36 = vpop.permute.xlu0 %3081 }
 0x4dc   : > { %v3140_v44 = vmul.f32 %v3067_v15, %v15827_v3  ;;  %v3143_v5 = vmul.f32 %v3082_v36, %v15828_v54  ;;  %v15832_v3 = vld [vmem:[#allocation11_spill] sm:$0xff] }
 0x4dd   : > { %v15833_v36 = vld [vmem:[#allocation47_spill] sm:$0xff] }
 0x4de   : > { %3225 = vrot.lane.b32.xlu1 %v3140_v44, %s15806_s16  ;;  %3227 = vrot.lane.b32.xlu0 %v3141_v55, %s15806_s16 }
 0x4df   : > { %v3077_v63 = vpop.permute.xlu1 %3076  ;;  %v3092_v32 = vpop.permute.xlu0 %3091 }
 0x4e0   : > { %v3142_v16 = vmul.f32 %v3077_v63, %v15829_v7  ;;  %v3145_v62 = vmul.f32 %v3092_v32, %v15830_v2  ;;  %v15834_v7 = vld [vmem:[#allocation8_spill] sm:$0xff]  ;;  %v15835_v32 = vld [vmem:[#allocation9_spill] sm:$0xff] }
 0x4e2   : > { %3229 = vrot.lane.b32.xlu1 %v3142_v16, %s15806_s16  ;;  %3231 = vrot.lane.b32.xlu0 %v3143_v5, %s15806_s16 }
 0x4e3   : > { %v3087_v21 = vpop.permute.xlu1 %3086  ;;  %v3102_v51 = vpop.permute.xlu0 %3101 }
 0x4e4   : > { %v3144_v15 = vmul.f32 %v3087_v21, %v15831_v17  ;;  %v3147_v44 = vmul.f32 %v3102_v51, %v15832_v3  ;;  %v9105_v51 = vld [vmem:[%s15837_s4 + $0x80] sm:$0xff]  }
 0x4e5   : > { %8855 = vmatprep.subr.bf16.mxu1 %v9105_v51  ;;  %v9107_v3 = vld [vmem:[%s15837_s4 + $0x40] sm:$0xff]  }
 0x4e6   : > { %3233 = vrot.lane.b32.xlu1 %v3144_v15, %s15806_s16  ;;  %3235 = vrot.lane.b32.xlu0 %v3145_v62, %s15806_s16  ;;  %v15836_v62 = vld [vmem:[#allocation10_spill] sm:$0xff]  ;;  %v9106_v15 = vld [vmem:[%s15837_s4 + $0x88] sm:$0xff]  }
 0x4e7   : > { %v3097_v55 = vpop.permute.xlu1 %3096  ;;  %v3112_v63 = vpop.permute.xlu0 %3111  ;;  %8856 = vmatpush3.bf16.msra.mxu1 %v9105_v51  ;;  %8588 = vmatprep.subr.bf16.mxu0 %v9107_v3 }
 0x4e8   : > { %v3146_v54 = vmul.f32 %v3097_v55, %v15833_v36  ;;  %v3149_v16 = vmul.f32 %v3112_v63, %v15834_v7  ;;  %8857 = vmatprep.subr.bf16.mxu1 %v9106_v15  ;;  %v9110_v63 = vld [vmem:[%s15837_s4 + $0x8] sm:$0xff]  }
 0x4ea   : > { %3237 = vrot.lane.b32.xlu1 %v3146_v54, %s15806_s16  ;;  %3239 = vrot.lane.b32.xlu0 %v3147_v44, %s15806_s16  ;;  %v9108_v44 = vld [vmem:[%s15837_s4] sm:$0xff]   ;;  %v9109_v54 = vld [vmem:[%s15837_s4 + $0x48] sm:$0xff]  }
 0x4eb   : > { %v3107_v5 = vpop.permute.xlu1 %3106  ;;  %8858 = vmatpush3.bf16.msra.mxu1 %v9106_v15  ;;  %8589 = vmatpush3.bf16.msra.mxu0 %v9108_v44  ;;  %v9113_v15 = vld [vmem:[%s15837_s4 + $0x58] sm:$0xff]   ;;  %v9115_v44 = vld [vmem:[%s15837_s4 + $0x60] sm:$0xff]  }
 0x4ec   : > { %v3148_v2 = vmul.f32 %v3107_v5, %v15835_v32  ;;  %8590 = vmatprep.subr.bf16.mxu0 %v9109_v54 }
 0x4ee   : > { %3241 = vrot.lane.b32.xlu1 %v3148_v2, %s15806_s16  ;;  %3243 = vrot.lane.b32.xlu0 %v3149_v16, %s15806_s16  ;;  %v9111_v2 = vld [vmem:[%s15837_s4 + $0x50] sm:$0xff]  }
 0x4ef   : > { %v3117_v21 = vpop.permute.xlu1 %3116  ;;  %8591 = vmatpush3.bf16.msra.mxu0 %v9110_v63 }
 0x4f0   : > { %v3150_v17 = vmul.f32 %v3117_v21, %v15836_v62  ;;  %v9112_v62 = vld [vmem:[%s15837_s4 + $0x10] sm:$0xff]   ;;  %8592 = vmatprep.subr.bf16.mxu0 %v9111_v2 }
 0x4f1   : > { %v9120_v2 = vld [vmem:[%s15837_s4 + $0x30] sm:$0xff]  }
 0x4f2   : > { %3245 = vrot.lane.b32.xlu1 %v3150_v17, %s15806_s16  ;;  %3345 = vperm.xlu0 %9021, %v11121_v46  }
 0x4f3   : > { %8593 = vmatpush3.bf16.msra.mxu0 %v9112_v62  ;;  %v9121_v62 = vld [vmem:[%s15837_s4 + $0x78] sm:$0xff]  }
 0x4f4   : > { %8594 = vmatprep.subr.bf16.mxu0 %v9113_v15 }
 0x4f6   : > { %3350 = vperm.xlu1 %9022, %v11126_v9   ;;  %3360 = vperm.xlu0 %9021, %v11145_v50  }
 0x4fa   : > { %3355 = vperm.xlu1 %9022, %v11133_v25   ;;  %3370 = vperm.xlu0 %9021, %v11157_v1  }
 0x4fe   : > { %3365 = vperm.xlu1 %9022, %v11138_v39   ;;  %3380 = vperm.xlu0 %9021, %v11169_v35  }
 0x502   : > { %3375 = vperm.xlu1 %9022, %v11150_v38   ;;  %3390 = vperm.xlu0 %9021, %v11181_v37  }
 0x506   : > { %3385 = vperm.xlu1 %9022, %v11162_v49   ;;  %3400 = vperm.xlu0 %9021, %v11193_v29  }
 0x50a   : > { %3395 = vperm.xlu1 %9022, %v11174_v4   ;;  %3410 = vperm.xlu0 %9021, %v11205_v42  }
 0x50e   : > { %3405 = vperm.xlu1 %9022, %v11186_v18   ;;  %3420 = vperm.xlu0 %9021, %v11217_v8  }
 0x512   : > { %3415 = vperm.xlu1 %9022, %v11198_v19   ;;  %3430 = vperm.xlu0 %9021, %v11229_v22  }
 0x516   : > { %3425 = vperm.xlu1 %9022, %v11210_v41   ;;  %3440 = vperm.xlu0 %9021, %v11241_v53  }
 0x51a   : > { %3435 = vperm.xlu1 %9022, %v11222_v43   ;;  %3450 = vperm.xlu0 %9021, %v11253_v14  }
 0x51e   : > { %3445 = vperm.xlu1 %9022, %v11234_v60   ;;  %3460 = vperm.xlu0 %9021, %v11265_v20  }
 0x522   : > { %3455 = vperm.xlu1 %9022, %v11246_v26   ;;  %3470 = vperm.xlu0 %9021, %v11278_v48  }
 0x524   : > { %v3186_v25 = vpop.permute.xlu1 %3185  ;;  %v3184_v55 = vpop.permute.xlu0 %3183 }
 0x525   : > { %3280 = vst.msk [vmem:[#allocation2 + $0x20] sm:$0xff] %vm2094_vm5, %v3186_v25  ;;  %3279 = vst.msk [vmem:[#allocation2 + $0x8] sm:$0xff] %vm2094_vm5, %v3184_v55  ;;  %v9114_v25 = vld [vmem:[%s15837_s4 + $0x18] sm:$0xff]  }
 0x526   : > { %3465 = vperm.xlu1 %9022, %v11258_v13   ;;  %3480 = vperm.xlu0 %9021, %v11291_v27  }
 0x527   : > { %8595 = vmatpush3.bf16.msra.mxu0 %v9114_v25 }
 0x528   : > { %v3188_v36 = vpop.permute.xlu0 %3187  ;;  %8596 = vmatprep.subr.bf16.mxu0 %v9115_v44 }
 0x529   : > { %3281 = vst.msk [vmem:[#allocation2 + $0x38] sm:$0xff] %vm2094_vm5, %v3188_v36  ;;  %v9116_v36 = vld [vmem:[%s15837_s4 + $0x20] sm:$0xff]  }
 0x52a   : > { %3475 = vperm.xlu1 %9022, %v11270_v11   ;;  %3490 = vperm.xlu0 %9021, %v11305_v30  }
 0x52b   : > { %8597 = vmatpush3.bf16.msra.mxu0 %v9116_v36 }
 0x52c   : > { %v3190_v5 = vpop.permute.xlu1 %3189  ;;  %v3192_v7 = vpop.permute.xlu0 %3191  ;;  %v3568_v16 = vld [vmem:[#allocation2 + $0x8] sm:$0xff]  ;;  %v3571_v32 = vld [vmem:[#allocation2 + $0x20] sm:$0xff] }
 0x52d   : > { %3282 = vst.msk [vmem:[#allocation2 + $0x50] sm:$0xff] %vm2094_vm5, %v3190_v5  ;;  %3283 = vst.msk [vmem:[#allocation2 + $0x68] sm:$0xff] %vm2094_vm5, %v3192_v7  ;;  %v3664_v21 = vpack.c.bf16 %v3571_v32, %v3568_v16  ;;  %v9117_v5 = vld [vmem:[%s15837_s4 + $0x68] sm:$0xff]   ;;  %v9119_v32 = vld [vmem:[%s15837_s4 + $0x70] sm:$0xff]  }
 0x52e   : > { %3485 = vperm.xlu1 %9022, %v11283_v24   ;;  %3500 = vperm.xlu0 %9021, %v11313_v12   ;;  %v15838_v12 = vmov 0   ;;  %v9118_v7 = vld [vmem:[%s15837_s4 + $0x28] sm:$0xff]  }
 0x52f   : > { %3942 = vmatprep.mubr.bf16.mxu0 %v3664_v21  ;;  %8598 = vmatprep.subr.bf16.mxu0 %v9117_v5  ;;  %v11537_v5 = vld [vmem:[%s15103_s1 + $0x8] sm:$0xff] }
 0x530   : > { %v3194_v17 = vpop.permute.xlu1 %3193  ;;  %v3196_v51 = vpop.permute.xlu0 %3195  ;;  %8599 = vmatpush3.bf16.msra.mxu0 %v9118_v7 }
 0x531   : > { %3284 = vst.msk [vmem:[#allocation2 + $0x80] sm:$0xff] %vm2094_vm5, %v3194_v17  ;;  %3285 = vst.msk [vmem:[#allocation2 + $0x98] sm:$0xff] %vm2094_vm5, %v3196_v51  ;;  %8600 = vmatprep.subr.bf16.mxu0 %v9119_v32  ;;  %v9122_v17 = vld [vmem:[%s15837_s4 + $0x38] sm:$0xff]  }
 0x532   : > { %3495 = vperm.xlu1 %9022, %v11296_v6   ;;  %9023 = vset.pattern.permute.xlu0 %v15838_v12 }
 0x533   : > { %684 = vperm.xlu0 %9023, %v11121_v46  }
 0x534   : > { %v3198_v55 = vpop.permute.xlu1 %3197  ;;  %v3200_v3 = vpop.permute.xlu0 %3199  ;;  %8601 = vmatpush3.bf16.msra.mxu0 %v9120_v2  ;;  %v15839_v2 = vld [vmem:[#allocation76_spill] sm:$0xff] }
 0x535   : > { %3286 = vst.msk [vmem:[#allocation2 + $0xb0] sm:$0xff] %vm2094_vm5, %v3198_v55  ;;  %3287 = vst.msk [vmem:[#allocation2 + $0xc8] sm:$0xff] %vm2094_vm5, %v3200_v3  ;;  %8602 = vmatprep.subr.bf16.mxu0 %v9121_v62  ;;  %v15840_v62 = vld [vmem:[#allocation79_spill] sm:$0xff] }
 0x536   : > { %9024 = vset.pattern.permute.xlu1 %v15838_v12 }
 0x537   : > { %689 = vperm.xlu0 %9023, %v11126_v9  }
 0x538   : > { %v3202_v54 = vpop.permute.xlu1 %3201  ;;  %v3204_v63 = vpop.permute.xlu0 %3203  ;;  %8603 = vmatpush3.bf16.msra.mxu0 %v9122_v17 }
 0x539   : > { %3288 = vst.msk [vmem:[#allocation2 + $0xe0] sm:$0xff] %vm2094_vm5, %v3202_v54  ;;  %3289 = vst.msk [vmem:[#allocation2 + $0xf8] sm:$0xff] %vm2094_vm5, %v3204_v63  ;;  %v8541_v63 = vld [vmem:[#allocation3] ss:$0 sm:$0xff] }
 0x53a   : > { %4270 = vperm.xlu1 %9024, %v8541_v63   ;;  %v15845_v63 = vld [vmem:[#allocation85_spill] sm:$0xff] }
 0x53b   : > { %704 = vperm.xlu0 %9023, %v11138_v39  }
 0x53c   : > { %v3206_v16 = vpop.permute.xlu1 %3205  ;;  %v3208_v9 = vpop.permute.xlu0 %3207 }
 0x53d   : > { %3290 = vst.msk [vmem:[#allocation2 + $0x110] sm:$0xff] %vm2094_vm5, %v3206_v16  ;;  %3291 = vst.msk [vmem:[#allocation2 + $0x128] sm:$0xff] %vm2094_vm5, %v3208_v9  ;;  %v11563_v9 = vld [vmem:[%s15103_s1 + $0x30] sm:$0xff] }
 0x53e   : > { %4440 = vperm.xlu1 %9024, %v11537_v5  }
 0x53f   : > { %714 = vperm.xlu0 %9023, %v11150_v38  }
 0x540   : > { %v3210_v21 = vpop.permute.xlu1 %3209  ;;  %v3212_v39 = vpop.permute.xlu0 %3211 }
 0x541   : > { %3292 = vst.msk [vmem:[#allocation2 + $0x140] sm:$0xff] %vm2094_vm5, %v3210_v21  ;;  %3293 = vst.msk [vmem:[#allocation2 + $0x158] sm:$0xff] %vm2094_vm5, %v3212_v39 }
 0x543   : > { %724 = vperm.xlu0 %9023, %v11162_v49  }
 0x544   : > { %v3214_v51 = vpop.permute.xlu1 %3213  ;;  %v3216_v38 = vpop.permute.xlu0 %3215 }
 0x545   : > { %3294 = vst.msk [vmem:[#allocation2 + $0x170] sm:$0xff] %vm2094_vm5, %v3214_v51  ;;  %3295 = vst.msk [vmem:[#allocation2 + $0x188] sm:$0xff] %vm2094_vm5, %v3216_v38  ;;  %v15841_v51 = vld [vmem:[#allocation81_spill] sm:$0xff] }
 0x547   : > { %734 = vperm.xlu0 %9023, %v11174_v4  }
 0x548   : > { %v3218_v15 = vpop.permute.xlu1 %3217  ;;  %v3220_v25 = vpop.permute.xlu0 %3219 }
 0x549   : > { %3296 = vst.msk [vmem:[#allocation2 + $0x1a0] sm:$0xff] %vm2094_vm5, %v3218_v15  ;;  %3297 = vst.msk [vmem:[#allocation2 + $0x1b8] sm:$0xff] %vm2094_vm5, %v3220_v25 }
 0x54b   : > { %744 = vperm.xlu0 %9023, %v11186_v18  }
 0x54c   : > { %v3222_v55 = vpop.permute.xlu1 %3221  ;;  %v3224_v3 = vpop.permute.xlu0 %3223 }
 0x54d   : > { %3298 = vst.msk [vmem:[#allocation2 + $0x1d0] sm:$0xff] %vm2094_vm5, %v3222_v55  ;;  %3299 = vst.msk [vmem:[#allocation2 + $0x1e8] sm:$0xff] %vm2094_vm5, %v3224_v3  ;;  %v15842_v55 = vld [vmem:[#allocation78_spill] sm:$0xff] }
 0x54f   : > { %754 = vperm.xlu0 %9023, %v11198_v19  }
 0x550   : > { %v3226_v49 = vpop.permute.xlu1 %3225  ;;  %v3228_v44 = vpop.permute.xlu0 %3227 }
 0x551   : > { %3300 = vst.msk [vmem:[#allocation2 + $0x200] sm:$0xff] %vm2094_vm5, %v3226_v49  ;;  %3301 = vst.msk [vmem:[#allocation2 + $0x218] sm:$0xff] %vm2094_vm5, %v3228_v44  ;;  %v15843_v49 = vld [vmem:[#allocation83_spill] sm:$0xff] }
 0x553   : > { %764 = vperm.xlu0 %9023, %v11210_v41  }
 0x554   : > { %v3230_v4 = vpop.permute.xlu1 %3229  ;;  %v3232_v36 = vpop.permute.xlu0 %3231 }
 0x555   : > { %3302 = vst.msk [vmem:[#allocation2 + $0x230] sm:$0xff] %vm2094_vm5, %v3230_v4  ;;  %3303 = vst.msk [vmem:[#allocation2 + $0x248] sm:$0xff] %vm2094_vm5, %v3232_v36 }
 0x557   : > { %774 = vperm.xlu0 %9023, %v11222_v43  }
 0x558   : > { %v3234_v18 = vpop.permute.xlu1 %3233  ;;  %v3236_v54 = vpop.permute.xlu0 %3235 }
 0x559   : > { %3304 = vst.msk [vmem:[#allocation2 + $0x260] sm:$0xff] %vm2094_vm5, %v3234_v18  ;;  %3305 = vst.msk [vmem:[#allocation2 + $0x278] sm:$0xff] %vm2094_vm5, %v3236_v54  ;;  %v15844_v18 = vld [vmem:[#allocation80_spill] sm:$0xff] }
 0x55b   : > { %784 = vperm.xlu0 %9023, %v11234_v60   ;;  %v11546_v60 = vld [vmem:[%s15103_s1 + $0x10] sm:$0xff] }
 0x55c   : > { %v3238_v19 = vpop.permute.xlu1 %3237  ;;  %v3240_v41 = vpop.permute.xlu0 %3239  ;;  %4445 = vperm.xlu1 %9024, %v11546_v60  }
 0x55d   : > { %3306 = vst.msk [vmem:[#allocation2 + $0x290] sm:$0xff] %vm2094_vm5, %v3238_v19  ;;  %3307 = vst.msk [vmem:[#allocation2 + $0x2a8] sm:$0xff] %vm2094_vm5, %v3240_v41 }
 0x55f   : > { %794 = vperm.xlu0 %9023, %v11246_v26   ;;  %v11555_v26 = vld [vmem:[%s15103_s1 + $0x20] sm:$0xff] }
 0x560   : > { %v3242_v43 = vpop.permute.xlu1 %3241  ;;  %v3244_v7 = vpop.permute.xlu0 %3243  ;;  %4455 = vperm.xlu1 %9024, %v11555_v26  }
 0x561   : > { %3308 = vst.msk [vmem:[#allocation2 + $0x2c0] sm:$0xff] %vm2094_vm5, %v3242_v43  ;;  %3309 = vst.msk [vmem:[#allocation2 + $0x2d8] sm:$0xff] %vm2094_vm5, %v3244_v7 }
 0x563   : > { %804 = vperm.xlu0 %9023, %v11258_v13   ;;  %v11570_v13 = vld [vmem:[%s15103_s1 + $0x40] sm:$0xff] }
 0x564   : > { %v3246_v16 = vpop.permute.xlu1 %3245  ;;  %4465 = vperm.xlu1 %9024, %v11563_v9  }
 0x565   : > { %3310 = vst.msk [vmem:[#allocation2 + $0x2f0] sm:$0xff] %vm2094_vm5, %v3246_v16 }
 0x567   : > { %814 = vperm.xlu0 %9023, %v11270_v11   ;;  %v11577_v11 = vld [vmem:[%s15103_s1 + $0x50] sm:$0xff] }
 0x568   : > { %4475 = vperm.xlu1 %9024, %v11570_v13  }
 0x56b   : > { %824 = vperm.xlu0 %9023, %v11283_v24   ;;  %v11586_v24 = vld [vmem:[%s15103_s1 + $0x60] sm:$0xff] }
 0x56c   : > { %4485 = vperm.xlu1 %9024, %v11577_v11  }
 0x56f   : > { %834 = vperm.xlu0 %9023, %v11296_v6  }
 0x570   : > { %4495 = vperm.xlu1 %9024, %v11586_v24  }
 0x571   : > { %v3346_v32 = vpop.permute.xlu0 %3345 }
 0x572   : > { %v3503_v21 = vmul.f32 %v3346_v32, %v15839_v2  ;;  %v15846_v2 = vld [vmem:[#allocation82_spill] sm:$0xff] }
 0x573   : > { %4435 = vperm.xlu0 %9023, %v11121_v46   ;;  %v11595_v46 = vld [vmem:[%s15103_s1 + $0x70] sm:$0xff] }
 0x574   : > { %3535 = vst.msk [vmem:[#allocation2 + $0x10] sm:$0xff] %vm15489_vm0, %v3503_v21  ;;  %4505 = vperm.xlu1 %9024, %v11595_v46  }
 0x575   : > { %v3351_v6 = vpop.permute.xlu1 %3350  ;;  %v3361_v39 = vpop.permute.xlu0 %3360 }
 0x576   : > { %v3504_v17 = vmul.f32 %v3351_v6, %v15840_v62  ;;  %v3506_v38 = vmul.f32 %v3361_v39, %v15841_v51  ;;  %v15847_v6 = vld [vmem:[#allocation87_spill] sm:$0xff] }
 0x577   : > { %4450 = vperm.xlu0 %9023, %v11145_v50   ;;  %v11605_v50 = vld [vmem:[%s15103_s1 + $0x80] sm:$0xff] }
 0x578   : > { %3536 = vst.msk [vmem:[#allocation2 + $0x28] sm:$0xff] %vm15489_vm0, %v3504_v17  ;;  %3538 = vst.msk [vmem:[#allocation2 + $0x58] sm:$0xff] %vm15489_vm0, %v3506_v38  ;;  %4515 = vperm.xlu1 %9024, %v11605_v50   ;;  %v11628_v39 = vld [vmem:[%s15103_s1 + $0xa0] sm:$0xff] }
 0x579   : > { %v3356_v15 = vpop.permute.xlu1 %3355  ;;  %v3371_v25 = vpop.permute.xlu0 %3370 }
 0x57a   : > { %v3505_v3 = vmul.f32 %v3356_v15, %v15842_v55  ;;  %v3508_v44 = vmul.f32 %v3371_v25, %v15843_v49  ;;  %v15848_v25 = vld [vmem:[#allocation84_spill] sm:$0xff] }
 0x57b   : > { %4460 = vperm.xlu0 %9023, %v11157_v1   ;;  %v3569_v41 = vld [vmem:[#allocation2 + $0x10] sm:$0xff] }
 0x57c   : > { %3537 = vst.msk [vmem:[#allocation2 + $0x40] sm:$0xff] %vm15489_vm0, %v3505_v3  ;;  %3540 = vst.msk [vmem:[#allocation2 + $0x88] sm:$0xff] %vm15489_vm0, %v3508_v44  ;;  %v11617_v1 = vld [vmem:[%s15103_s1 + $0x90] sm:$0xff] }
 0x57d   : > { %v3366_v4 = vpop.permute.xlu1 %3365  ;;  %v3381_v36 = vpop.permute.xlu0 %3380  ;;  %4525 = vperm.xlu1 %9024, %v11617_v1   ;;  %v15849_v3 = vld [vmem:[#allocation89_spill] sm:$0xff] }
 0x57e   : > { %v3507_v54 = vmul.f32 %v3366_v4, %v15844_v18  ;;  %v3510_v19 = vmul.f32 %v3381_v36, %v15845_v63  ;;  %v11641_v4 = vld [vmem:[%s15103_s1 + $0xb0] sm:$0xff] }
 0x57f   : > { %4470 = vperm.xlu0 %9023, %v11169_v35   ;;  %v3572_v43 = vld [vmem:[#allocation2 + $0x28] sm:$0xff]  ;;  %v3578_v17 = vld [vmem:[#allocation2 + $0x58] sm:$0xff] }
 0x580   : > { %3539 = vst.msk [vmem:[#allocation2 + $0x70] sm:$0xff] %vm15489_vm0, %v3507_v54  ;;  %3542 = vst.msk [vmem:[#allocation2 + $0xb8] sm:$0xff] %vm15489_vm0, %v3510_v19  ;;  %v3665_v7 = vpack.c.bf16 %v3572_v43, %v3569_v41  ;;  %v15850_v63 = vld [vmem:[#allocation86_spill] sm:$0xff]  ;;  %v15851_v41 = vld [vmem:[#allocation91_spill] sm:$0xff] }
 0x581   : > { %v3376_v16 = vpop.permute.xlu1 %3375  ;;  %v3391_v32 = vpop.permute.xlu0 %3390  ;;  %4535 = vperm.xlu1 %9024, %v11628_v39   ;;  %v11652_v43 = vld [vmem:[%s15103_s1 + $0xc0] sm:$0xff] }
 0x582   : > { %v3509_v21 = vmul.f32 %v3376_v16, %v15846_v2  ;;  %v3512_v35 = vmul.f32 %v3391_v32, %v15847_v6  ;;  %8859 = vmatprep.mubr.msk.bf16.mxu1 %vm15489_vm0, %v3665_v7  ;;  %v15852_v6 = vld [vmem:[#allocation88_spill] sm:$0xff] }
 0x583   : > { %4480 = vperm.xlu0 %9023, %v11181_v37   ;;  %v3575_v62 = vld [vmem:[#allocation2 + $0x40] sm:$0xff]  ;;  %v3584_v44 = vld [vmem:[#allocation2 + $0x88] sm:$0xff] }
 0x584   : > { %3541 = vst.msk [vmem:[#allocation2 + $0xa0] sm:$0xff] %vm15489_vm0, %v3509_v21  ;;  %3544 = vst.msk [vmem:[#allocation2 + $0xe8] sm:$0xff] %vm15489_vm0, %v3512_v35  ;;  %v3668_v51 = vpack.c.bf16 %v3578_v17, %v3575_v62  ;;  %v15853_v62 = vld [vmem:[#allocation93_spill] sm:$0xff] }
 0x585   : > { %v3386_v38 = vpop.permute.xlu1 %3385  ;;  %v3401_v15 = vpop.permute.xlu0 %3400  ;;  %4545 = vperm.xlu1 %9024, %v11641_v4  }
 0x586   : > { %v3511_v55 = vmul.f32 %v3386_v38, %v15848_v25  ;;  %v3514_v49 = vmul.f32 %v3401_v15, %v15849_v3  ;;  %8860 = vmatmul.mubr.msk.bf16.vlgmr.msra.gmra.mrb[0].mxu1 %vm15489_vm0, %v3668_v51  ;;  %v11665_v38 = vld [vmem:[%s15103_s1 + $0xd0] sm:$0xff] }
 0x587   : > { %4490 = vperm.xlu0 %9023, %v11193_v29   ;;  %v3581_v37 = vld [vmem:[#allocation2 + $0x70] sm:$0xff]  ;;  %v3590_v16 = vld [vmem:[#allocation2 + $0xb8] sm:$0xff] }
 0x588   : > { %3543 = vst.msk [vmem:[#allocation2 + $0xd0] sm:$0xff] %vm15489_vm0, %v3511_v55  ;;  %3546 = vst.msk [vmem:[#allocation2 + $0x118] sm:$0xff] %vm15489_vm0, %v3514_v49  ;;  %v3671_v36 = vpack.c.bf16 %v3584_v44, %v3581_v37  ;;  %v15854_v3 = vld [vmem:[#allocation90_spill] sm:$0xff]  ;;  %v15855_v37 = vld [vmem:[#allocation95_spill] sm:$0xff] }
 0x589   : > { %v3396_v18 = vpop.permute.xlu1 %3395  ;;  %v3411_v54 = vpop.permute.xlu0 %3410  ;;  %4555 = vperm.xlu1 %9024, %v11652_v43   ;;  %v11676_v44 = vld [vmem:[%s15103_s1 + $0xe0] sm:$0xff] }
 0x58a   : > { %v3513_v19 = vmul.f32 %v3396_v18, %v15850_v63  ;;  %v3516_v29 = vmul.f32 %v3411_v54, %v15851_v41  ;;  %8863 = vmatprep.mubr.msk.bf16.mxu1 %vm15489_vm0, %v3671_v36  ;;  %v15856_v41 = vld [vmem:[#allocation92_spill] sm:$0xff] }
 0x58b   : > { %4500 = vperm.xlu0 %9023, %v11205_v42   ;;  %v3587_v7 = vld [vmem:[#allocation2 + $0xa0] sm:$0xff]  ;;  %v3596_v51 = vld [vmem:[#allocation2 + $0xe8] sm:$0xff] }
 0x58c   : > { %3545 = vst.msk [vmem:[#allocation2 + $0x100] sm:$0xff] %vm15489_vm0, %v3513_v19  ;;  %3548 = vst.msk [vmem:[#allocation2 + $0x148] sm:$0xff] %vm15489_vm0, %v3516_v29  ;;  %v3674_v32 = vpack.c.bf16 %v3590_v16, %v3587_v7  ;;  %v15857_v7 = vld [vmem:[#allocation97_spill] sm:$0xff] }
 0x58d   : > { %v3406_v2 = vpop.permute.xlu1 %3405  ;;  %v3421_v21 = vpop.permute.xlu0 %3420  ;;  %4565 = vperm.xlu1 %9024, %v11665_v38  }
 0x58e   : > { %v3515_v35 = vmul.f32 %v3406_v2, %v15852_v6  ;;  %v3518_v17 = vmul.f32 %v3421_v21, %v15853_v62  ;;  %8864 = vmatmul.mubr.msk.bf16.gmra.mrb[4].mxu1 %vm15489_vm0, %v3674_v32  ;;  %v11689_v2 = vld [vmem:[%s15103_s1 + $0xf0] sm:$0xff] }
 0x58f   : > { %4510 = vperm.xlu0 %9023, %v11217_v8   ;;  %v3593_v42 = vld [vmem:[#allocation2 + $0xd0] sm:$0xff]  ;;  %v3602_v18 = vld [vmem:[#allocation2 + $0x118] sm:$0xff] }
 0x590   : > { %3547 = vst.msk [vmem:[#allocation2 + $0x130] sm:$0xff] %vm15489_vm0, %v3515_v35  ;;  %3550 = vst.msk [vmem:[#allocation2 + $0x178] sm:$0xff] %vm15489_vm0, %v3518_v17  ;;  %v3677_v15 = vpack.c.bf16 %v3596_v51, %v3593_v42  ;;  %v15858_v62 = vld [vmem:[#allocation94_spill] sm:$0xff]  ;;  %v15859_v42 = vld [vmem:[#allocation99_spill] sm:$0xff] }
 0x591   : > { %v3416_v25 = vpop.permute.xlu1 %3415  ;;  %v3431_v55 = vpop.permute.xlu0 %3430  ;;  %4575 = vperm.xlu1 %9024, %v11676_v44  }
 0x592   : > { %v3517_v49 = vmul.f32 %v3416_v25, %v15854_v3  ;;  %v3520_v8 = vmul.f32 %v3431_v55, %v15855_v37  ;;  %8867 = vmatprep.mubr.msk.bf16.mxu1 %vm15489_vm0, %v3677_v15  ;;  %v4657_v25 = vld [vmem:[%s15103_s1] sm:$0xff]  ;;  %v15860_v37 = vmov 1  }
 0x593   : > { %4520 = vperm.xlu0 %9023, %v11229_v22   ;;  %v3599_v36 = vld [vmem:[#allocation2 + $0x100] sm:$0xff]  ;;  %v3608_v32 = vld [vmem:[#allocation2 + $0x148] sm:$0xff] }
 0x594   : > { %3549 = vst.msk [vmem:[#allocation2 + $0x160] sm:$0xff] %vm15489_vm0, %v3517_v49  ;;  %3552 = vst.msk [vmem:[#allocation2 + $0x1a8] sm:$0xff] %vm15489_vm0, %v3520_v8  ;;  %v3680_v54 = vpack.c.bf16 %v3602_v18, %v3599_v36  ;;  %v15861_v8 = vld [vmem:[#allocation96_spill] sm:$0xff] }
 0x595   : > { %v3426_v63 = vpop.permute.xlu1 %3425  ;;  %v3441_v19 = vpop.permute.xlu0 %3440  ;;  %4585 = vperm.xlu1 %9024, %v11689_v2  }
 0x596   : > { %v3519_v29 = vmul.f32 %v3426_v63, %v15856_v41  ;;  %v3522_v16 = vmul.f32 %v3441_v19, %v15857_v7  ;;  %8868 = vmatmul.mubr.msk.bf16.gmra.mrb[8].mxu1 %vm15489_vm0, %v3680_v54 }
 0x597   : > { %4530 = vperm.xlu0 %9023, %v11241_v53   ;;  %v3605_v22 = vld [vmem:[#allocation2 + $0x130] sm:$0xff]  ;;  %v3614_v15 = vld [vmem:[#allocation2 + $0x178] sm:$0xff] }
 0x598   : > { %3551 = vst.msk [vmem:[#allocation2 + $0x190] sm:$0xff] %vm15489_vm0, %v3519_v29  ;;  %3554 = vst.msk [vmem:[#allocation2 + $0x1d8] sm:$0xff] %vm15489_vm0, %v3522_v16  ;;  %v3683_v21 = vpack.c.bf16 %v3608_v32, %v3605_v22  ;;  %v15862_v29 = vld [vmem:[#allocation98_spill] sm:$0xff] }
 0x599   : > { %v3436_v6 = vpop.permute.xlu1 %3435  ;;  %v3451_v35 = vpop.permute.xlu0 %3450  ;;  %9025 = vset.pattern.permute.xlu1 %v15860_v37  ;;  %v4660_v22 = vld [vmem:[%s15103_s1 + $0x18] sm:$0xff] }
 0x59a   : > { %v3521_v17 = vmul.f32 %v3436_v6, %v15858_v62  ;;  %v3524_v53 = vmul.f32 %v3451_v35, %v15859_v42  ;;  %8871 = vmatprep.mubr.msk.bf16.mxu1 %vm15489_vm0, %v3683_v21  ;;  %4691 = vperm.xlu1 %9025, %v4657_v25  }
 0x59b   : > { %4540 = vperm.xlu0 %9023, %v11253_v14   ;;  %v3611_v51 = vld [vmem:[#allocation2 + $0x160] sm:$0xff]  ;;  %v3620_v54 = vld [vmem:[#allocation2 + $0x1a8] sm:$0xff] }
 0x59c   : > { %3553 = vst.msk [vmem:[#allocation2 + $0x1c0] sm:$0xff] %vm15489_vm0, %v3521_v17  ;;  %3556 = vst.msk [vmem:[#allocation2 + $0x208] sm:$0xff] %vm15489_vm0, %v3524_v53  ;;  %v3686_v55 = vpack.c.bf16 %v3614_v15, %v3611_v51 }
 0x59d   : > { %v3446_v3 = vpop.permute.xlu1 %3445  ;;  %v3461_v49 = vpop.permute.xlu0 %3460 }
 0x59e   : > { %v3523_v36 = vmul.f32 %v3446_v3, %v15861_v8  ;;  %v3526_v18 = vmul.f32 %v3461_v49, %v15781_v10  ;;  %8872 = vmatmul.mubr.msk.bf16.gmra.mrb[12].mxu1 %vm15489_vm0, %v3686_v55  ;;  %4701 = vperm.xlu1 %9025, %v11546_v60   ;;  %v15864_v8 = vld [vmem:[#allocation77_spill] sm:$0xff] }
 0x59f   : > { %4550 = vperm.xlu0 %9023, %v11265_v20   ;;  %v3617_v14 = vld [vmem:[#allocation2 + $0x190] sm:$0xff]  ;;  %v3626_v20 = vld [vmem:[#allocation2 + $0x1d8] sm:$0xff] }
 0x5a0   : > { %3555 = vst.msk [vmem:[#allocation2 + $0x1f0] sm:$0xff] %vm15489_vm0, %v3523_v36  ;;  %3558 = vst.msk [vmem:[#allocation2 + $0x238] sm:$0xff] %vm15489_vm0, %v3526_v18  ;;  %v3689_v63 = vpack.c.bf16 %v3620_v54, %v3617_v14  ;;  %v4664_v14 = vld [vmem:[%s15103_s1 + $0x38] sm:$0xff] }
 0x5a1   : > { %v3456_v19 = vpop.permute.xlu1 %3455  ;;  %v3471_v41 = vpop.permute.xlu0 %3470 }
 0x5a2   : > { %v3525_v7 = vmul.f32 %v3456_v19, %v15862_v29  ;;  %v3528_v16 = vmul.f32 %v3471_v41, %v15783_v56  ;;  %8875 = vmatprep.mubr.msk.bf16.mxu1 %vm15489_vm0, %v3689_v63  ;;  %v15863_v56 = vld [vmem:[#allocation100_spill] sm:$0xff]  ;;  %4706 = vperm.xlu1 %9025, %v4660_v22  }
 0x5a3   : > { %4560 = vperm.xlu0 %9023, %v11278_v48   ;;  %v3623_v10 = vld [vmem:[#allocation2 + $0x1c0] sm:$0xff]  ;;  %v3632_v60 = vld [vmem:[#allocation2 + $0x208] sm:$0xff] }
 0x5a4   : > { %3557 = vst.msk [vmem:[#allocation2 + $0x220] sm:$0xff] %vm15489_vm0, %v3525_v7  ;;  %3560 = vst.msk [vmem:[#allocation2 + $0x268] sm:$0xff] %vm15489_vm0, %v3528_v16  ;;  %v3692_v32 = vpack.c.bf16 %v3626_v20, %v3623_v10  ;;  %v15866_v20 = vld [vmem:[#allocation49_spill] sm:$0xff] }
 0x5a5   : > { %v3466_v21 = vpop.permute.xlu1 %3465  ;;  %v3481_v6 = vpop.permute.xlu0 %3480 }
 0x5a6   : > { %v3527_v35 = vmul.f32 %v3466_v21, %v15863_v56  ;;  %v3530_v62 = vmul.f32 %v3481_v6, %v15785_v58  ;;  %8876 = vmatmul.mubr.msk.bf16.gmra.mrb[16].mxu1 %vm15489_vm0, %v3692_v32  ;;  %v4662_v58 = vld [vmem:[%s15103_s1 + $0x28] sm:$0xff]  ;;  %v15867_v32 = vld [vmem:[#allocation114_spill] sm:$0xff] }
 0x5a7   : > { %4570 = vperm.xlu0 %9023, %v11291_v27   ;;  %v3629_v48 = vld [vmem:[#allocation2 + $0x1f0] sm:$0xff]  ;;  %v3638_v25 = vld [vmem:[#allocation2 + $0x238] sm:$0xff]  ;;  %4716 = vperm.xlu1 %9025, %v4662_v58   ;;  %v4666_v6 = vld [vmem:[%s15103_s1 + $0x48] sm:$0xff] }
 0x5a8   : > { %3559 = vst.msk [vmem:[#allocation2 + $0x250] sm:$0xff] %vm15489_vm0, %v3527_v35  ;;  %3562 = vst.msk [vmem:[#allocation2 + $0x298] sm:$0xff] %vm15489_vm0, %v3530_v62  ;;  %v3695_v17 = vpack.c.bf16 %v3632_v60, %v3629_v48  ;;  %v15869_v35 = vld [vmem:[#allocation24_spill] sm:$0xff]  ;;  %v15870_v62 = vld [vmem:[#allocation115_spill] sm:$0xff] }
 0x5a9   : > { %v3476_v42 = vpop.permute.xlu1 %3475  ;;  %v3491_v53 = vpop.permute.xlu0 %3490 }
 0x5aa   : > { %v3529_v51 = vmul.f32 %v3476_v42, %v15782_v33  ;;  %v3532_v15 = vmul.f32 %v3491_v53, %v15786_v45  ;;  %8879 = vmatprep.mubr.msk.bf16.mxu1 %vm15489_vm0, %v3695_v17  ;;  %v11738_v33 = vld [vmem:[%s15103_s1 + $0xf8] sm:$0xff]  ;;  %v15871_v42 = vld [vmem:[#allocation109_spill] sm:$0xff] }
 0x5ab   : > { %4580 = vperm.xlu0 %9023, %v11305_v30   ;;  %v3635_v27 = vld [vmem:[#allocation2 + $0x220] sm:$0xff]  ;;  %v3644_v18 = vld [vmem:[#allocation2 + $0x268] sm:$0xff]  ;;  %4726 = vperm.xlu1 %9025, %v4664_v14   ;;  %v15872_v53 = vld [vmem:[#allocation50_spill] sm:$0xff] }
 0x5ac   : > { %3561 = vst.msk [vmem:[#allocation2 + $0x280] sm:$0xff] %vm15489_vm0, %v3529_v51  ;;  %3564 = vst.msk [vmem:[#allocation2 + $0x2c8] sm:$0xff] %vm15489_vm0, %v3532_v15  ;;  %v3698_v55 = vpack.c.bf16 %v3638_v25, %v3635_v27  ;;  %v15873_v15 = vld [vmem:[#allocation120_spill] sm:$0xff]  ;;  %v15874_v27 = vld [vmem:[#allocation106_spill] sm:$0xff] }
 0x5ad   : > { %v3486_v45 = vpop.permute.xlu1 %3485  ;;  %v3501_v3 = vpop.permute.xlu0 %3500  ;;  %v15875_v25 = vld [vmem:[#allocation27_spill] sm:$0xff] }
 0x5ae   : > { %v3531_v49 = vmul.f32 %v3486_v45, %v15784_v28  ;;  %v3534_v36 = vmul.f32 %v3501_v3, %v15864_v8  ;;  %8880 = vmatmul.mubr.msk.bf16.gmra.mrb[20].mxu1 %vm15489_vm0, %v3698_v55  ;;  %v15865_v28 = vld [vmem:[#allocation75_spill] sm:$0xff]  ;;  %v3577_v45 = vld [vmem:[#allocation2 + $0x50] sm:$0xff] }
 0x5af   : > { %4590 = vperm.xlu0 %9023, %v11738_v33   ;;  %v3641_v30 = vld [vmem:[#allocation2 + $0x250] sm:$0xff]  ;;  %v3650_v16 = vld [vmem:[#allocation2 + $0x298] sm:$0xff]  ;;  %4736 = vperm.xlu1 %9025, %v4666_v6   ;;  %v15886_v6 = vld [vmem:[#allocation108_spill] sm:$0xff] }
 0x5b0   : > { %3563 = vst.msk [vmem:[#allocation2 + $0x2b0] sm:$0xff] %vm15489_vm0, %v3531_v49  ;;  %3566 = vst.msk [vmem:[#allocation2 + $0x2f8] sm:$0xff] %vm15489_vm0, %v3534_v36  ;;  %v3701_v54 = vpack.c.bf16 %v3644_v18, %v3641_v30  ;;  %v15876_v3 = vld [vmem:[#allocation122_spill] sm:$0xff] }
 0x5b1   : > { %v3496_v63 = vpop.permute.xlu1 %3495  ;;  %v3574_v30 = vld [vmem:[#allocation2 + $0x38] sm:$0xff] }
 0x5b2   : > { %v3533_v19 = vmul.f32 %v3496_v63, %v15865_v28  ;;  %8883 = vmatprep.mubr.msk.bf16.mxu1 %vm15489_vm0, %v3701_v54  ;;  %v685_v41 = vpop.permute.xlu0 %684  ;;  %v4672_v18 = vld [vmem:[%s15103_s1 + $0x78] sm:$0xff]  ;;  %v3667_v14 = vpack.c.bf16 %v3577_v45, %v3574_v30 }
 0x5b3   : > { %v842_v29 = vmul.f32 %v685_v41, %v15801_v23  ;;  %v3647_v7 = vld [vmem:[#allocation2 + $0x280] sm:$0xff]  ;;  %9026 = vset.pattern.permute.xlu0 %v15860_v37  ;;  %v3656_v37 = vld [vmem:[#allocation2 + $0x2c8] sm:$0xff] }
 0x5b4   : > { %3565 = vst.msk [vmem:[#allocation2 + $0x2e0] sm:$0xff] %vm15489_vm0, %v3533_v19  ;;  %v3704_v10 = vpack.c.bf16 %v3650_v16, %v3647_v7  ;;  %4696 = vperm.xlu0 %9026, %v11537_v5   ;;  %v15868_v5 = vld [vmem:[#allocation105_spill] sm:$0xff]  ;;  %v15878_v54 = vld [vmem:[#allocation51_spill] sm:$0xff] }
 0x5b5   : > { %875 = vst.msk [vmem:[#allocation2] sm:$0xff] %vm15489_vm0, %v842_v29  ;;  %v15879_v63 = vld [vmem:[#allocation123_spill] sm:$0xff]  ;;  %v3573_v19 = vld [vmem:[#allocation2 + $0x30] sm:$0xff]  ;;  %v3576_v41 = vld [vmem:[#allocation2 + $0x48] sm:$0xff] }
 0x5b6   : > { %1260 = vst.msk [vmem:[#allocation2] sm:$0xff] %vm1259_vm2, %v15866_v20  ;;  %8884 = vmatmul.mubr.msk.bf16.gmra.mrb[24].mxu1 %vm15489_vm0, %v3704_v10  ;;  %v690_v22 = vpop.permute.xlu0 %689  ;;  %v15881_v29 = vld [vmem:[#allocation30_spill] sm:$0xff]  ;;  %v3583_v16 = vld [vmem:[#allocation2 + $0x80] sm:$0xff]  ;;  %v15883_v20 = vld [vmem:[#allocation113_spill] sm:$0xff] }
 0x5b7   : > { %1710 = vst.msk [vmem:[#allocation2] sm:$0xff] %vm1709_vm4, %v15867_v32  ;;  %v843_v23 = vmul.f32 %v690_v22, %v15800_v59  ;;  %v3653_v21 = vld [vmem:[#allocation2 + $0x2b0] sm:$0xff]  ;;  %v3662_v17 = vld [vmem:[#allocation2 + $0x2f8] sm:$0xff]  ;;  %v15882_v10 = vld [vmem:[#allocation124_spill] sm:$0xff]  ;;  %v3666_v22 = vpack.c.bf16 %v3576_v41, %v3573_v19 }
 0x5b8   : > { %2095 = vst.msk [vmem:[#allocation2] sm:$0xff] %vm2094_vm5, %v15868_v5  ;;  %v3707_v56 = vpack.c.bf16 %v3656_v37, %v3653_v21  ;;  %4711 = vperm.xlu0 %9026, %v11555_v26   ;;  %v3580_v32 = vld [vmem:[#allocation2 + $0x68] sm:$0xff]  ;;  %v3594_v19 = vld [vmem:[#allocation2 + $0xd8] sm:$0xff] }
 0x5b9   : > { %876 = vst.msk [vmem:[#allocation2 + $0x18] sm:$0xff] %vm15489_vm0, %v843_v23  ;;  %v15884_v23 = vld [vmem:[#allocation52_spill] sm:$0xff]  ;;  %v15885_v37 = vld [vmem:[#allocation125_spill] sm:$0xff] }
 0x5ba   : > { %1261 = vst.msk [vmem:[#allocation2 + $0x18] sm:$0xff] %vm1259_vm2, %v15869_v35  ;;  %8887 = vmatprep.mubr.msk.bf16.mxu1 %vm15489_vm0, %v3707_v56  ;;  %v705_v59 = vpop.permute.xlu0 %704  ;;  %v15887_v5 = vld [vmem:[#allocation33_spill] sm:$0xff] }
 0x5bb   : > { %1711 = vst.msk [vmem:[#allocation2 + $0x18] sm:$0xff] %vm1709_vm4, %v15870_v62  ;;  %v846_v48 = vmul.f32 %v705_v59, %v10662_v0  ;;  %v3659_v60 = vld [vmem:[#allocation2 + $0x2e0] sm:$0xff]  ;;  %v4668_v0 = vld [vmem:[%s15103_s1 + $0x58] sm:$0xff]  ;;  %v3589_v35 = vld [vmem:[#allocation2 + $0xb0] sm:$0xff] }
 0x5bc   : > { %2096 = vst.msk [vmem:[#allocation2 + $0x18] sm:$0xff] %vm2094_vm5, %v15871_v42  ;;  %v3710_v26 = vpack.c.bf16 %v3662_v17, %v3659_v60  ;;  %4721 = vperm.xlu0 %9026, %v11563_v9   ;;  %4746 = vperm.xlu1 %9025, %v4668_v0   ;;  %v4670_v9 = vld [vmem:[%s15103_s1 + $0x68] sm:$0xff]  ;;  %v15888_v59 = vld [vmem:[#allocation126_spill] sm:$0xff] }
 0x5bd   : > { %879 = vst.msk [vmem:[#allocation2 + $0x60] sm:$0xff] %vm15489_vm0, %v846_v48  ;;  %v15889_v48 = vld [vmem:[#allocation117_spill] sm:$0xff]  ;;  %v3586_v17 = vld [vmem:[#allocation2 + $0x98] sm:$0xff]  ;;  %v15893_v0 = vld [vmem:[#allocation36_spill] sm:$0xff] }
 0x5be   : > { %1264 = vst.msk [vmem:[#allocation2 + $0x60] sm:$0xff] %vm1259_vm2, %v15872_v53  ;;  %8888 = vmatmul.mubr.msk.bf16.gmra.mrb[28].mxu1 %vm15489_vm0, %v3710_v26  ;;  %v715_v51 = vpop.permute.xlu0 %714  ;;  %v15890_v42 = vld [vmem:[#allocation53_spill] sm:$0xff]  ;;  %v15891_v53 = vld [vmem:[#allocation127_spill] sm:$0xff] }
 0x5bf   : > { %1714 = vst.msk [vmem:[#allocation2 + $0x60] sm:$0xff] %vm1709_vm4, %v15873_v15  ;;  %v848_v58 = vmul.f32 %v715_v51, %v10673_v31  ;;  %v3567_v49 = vld [vmem:[#allocation2] sm:$0xff]  ;;  %v15892_v51 = vld [vmem:[#allocation110_spill] sm:$0xff]  ;;  %v15904_v41 = vld [vmem:[#allocation121_spill] sm:$0xff] }
 0x5c0   : > { %2099 = vst.msk [vmem:[#allocation2 + $0x60] sm:$0xff] %vm2094_vm5, %v15874_v27  ;;  %4731 = vperm.xlu0 %9026, %v11570_v13   ;;  %4756 = vperm.xlu1 %9025, %v4670_v9   ;;  %v15877_v13 = vld [vmem:[#allocation111_spill] sm:$0xff]  ;;  %v15894_v27 = vld [vmem:[#allocation128_spill] sm:$0xff] }
 0x5c1   : > { %881 = vst.msk [vmem:[#allocation2 + $0x90] sm:$0xff] %vm15489_vm0, %v848_v58  ;;  %v3595_v58 = vld [vmem:[#allocation2 + $0xe0] sm:$0xff] }
 0x5c2   : > { %1266 = vst.msk [vmem:[#allocation2 + $0x90] sm:$0xff] %vm1259_vm2, %v15875_v25  ;;  %v725_v55 = vpop.permute.xlu0 %724  ;;  %v15895_v9 = vld [vmem:[#allocation59_spill] sm:$0xff] }
 0x5c3   : > { %1716 = vst.msk [vmem:[#allocation2 + $0x90] sm:$0xff] %vm1709_vm4, %v15876_v3  ;;  %v850_v31 = vmul.f32 %v725_v55, %v10685_v34  ;;  %v3570_v8 = vld [vmem:[#allocation2 + $0x18] sm:$0xff]  ;;  %v3592_v3 = vld [vmem:[#allocation2 + $0xc8] sm:$0xff] }
 0x5c4   : > { %2101 = vst.msk [vmem:[#allocation2 + $0x90] sm:$0xff] %vm2094_vm5, %v15877_v13  ;;  %v3663_v36 = vpack.c.bf16 %v3570_v8, %v3567_v49  ;;  %4741 = vperm.xlu0 %9026, %v11577_v11   ;;  %4766 = vperm.xlu1 %9025, %v4672_v18   ;;  %v15880_v11 = vld [vmem:[#allocation107_spill] sm:$0xff]  ;;  %v15897_v49 = vld [vmem:[#allocation54_spill] sm:$0xff]  ;;  %v15898_v13 = vld [vmem:[#allocation129_spill] sm:$0xff] }
 0x5c5   : > { %883 = vst.msk [vmem:[#allocation2 + $0xc0] sm:$0xff] %vm15489_vm0, %v850_v31  ;;  %v15896_v55 = vld [vmem:[#allocation119_spill] sm:$0xff]  ;;  %v3676_v31 = vpack.c.bf16 %v3595_v58, %v3592_v3  ;;  %v15900_v18 = vld [vmem:[#allocation112_spill] sm:$0xff] }
 0x5c6   : > { %1268 = vst.msk [vmem:[#allocation2 + $0xc0] sm:$0xff] %vm1259_vm2, %v15878_v54  ;;  %3943 = vmatmul.mubr.bf16.vlgmr.msra.gmra.mrb[0].mxu0 %v3663_v36  ;;  %v735_v34 = vpop.permute.xlu0 %734  ;;  %v15899_v36 = vld [vmem:[#allocation60_spill] sm:$0xff]  ;;  %v3610_v58 = vld [vmem:[#allocation2 + $0x158] sm:$0xff] }
 0x5c7   : > { %1718 = vst.msk [vmem:[#allocation2 + $0xc0] sm:$0xff] %vm1709_vm4, %v15879_v63  ;;  %v852_v28 = vmul.f32 %v735_v34, %v10697_v40  ;;  %3950 = vmatprep.mubr.bf16.mxu0 %v3667_v14  ;;  %v15901_v14 = vld [vmem:[#allocation39_spill] sm:$0xff]  ;;  %v3601_v34 = vld [vmem:[#allocation2 + $0x110] sm:$0xff]  ;;  %v3616_v3 = vld [vmem:[#allocation2 + $0x188] sm:$0xff] }
 0x5c8   : > { %2103 = vst.msk [vmem:[#allocation2 + $0xc0] sm:$0xff] %vm2094_vm5, %v15880_v11  ;;  %4751 = vperm.xlu0 %9026, %v11586_v24   ;;  %v3670_v24 = vpack.c.bf16 %v3583_v16, %v3580_v32  ;;  %v15902_v63 = vld [vmem:[#allocation130_spill] sm:$0xff] }
 0x5c9   : > { %885 = vst.msk [vmem:[#allocation2 + $0xf0] sm:$0xff] %vm15489_vm0, %v852_v28  ;;  %v15903_v28 = vld [vmem:[#allocation61_spill] sm:$0xff] }
 0x5ca   : > { %1270 = vst.msk [vmem:[#allocation2 + $0xf0] sm:$0xff] %vm1259_vm2, %v15881_v29  ;;  %v745_v7 = vpop.permute.xlu0 %744 }
 0x5cb   : > { %1720 = vst.msk [vmem:[#allocation2 + $0xf0] sm:$0xff] %vm1709_vm4, %v15882_v10  ;;  %v854_v40 = vmul.f32 %v745_v7, %v10709_v47  ;;  %v3598_v7 = vld [vmem:[#allocation2 + $0xf8] sm:$0xff]  ;;  %v15905_v10 = vld [vmem:[#allocation56_spill] sm:$0xff] }
 0x5cc   : > { %2105 = vst.msk [vmem:[#allocation2 + $0xf0] sm:$0xff] %vm2094_vm5, %v15883_v20  ;;  %4761 = vperm.xlu0 %9026, %v11595_v46   ;;  %v3579_v46 = vld [vmem:[#allocation2 + $0x60] sm:$0xff]  ;;  %v3679_v16 = vpack.c.bf16 %v3601_v34, %v3598_v7  ;;  %v3624_v34 = vld [vmem:[#allocation2 + $0x1c8] sm:$0xff]  ;;  %v3630_v7 = vld [vmem:[#allocation2 + $0x1f8] sm:$0xff] }
 0x5cd   : > { %887 = vst.msk [vmem:[#allocation2 + $0x120] sm:$0xff] %vm15489_vm0, %v854_v40  ;;  %v15906_v20 = vld [vmem:[#allocation131_spill] sm:$0xff] }
 0x5ce   : > { %1272 = vst.msk [vmem:[#allocation2 + $0x120] sm:$0xff] %vm1259_vm2, %v15884_v23  ;;  %v755_v21 = vpop.permute.xlu0 %754  ;;  %3951 = vmatmul.mubr.bf16.gmra.mrb[4].mxu0 %v3666_v22  ;;  %v15907_v22 = vld [vmem:[#allocation62_spill] sm:$0xff] }
 0x5cf   : > { %1722 = vst.msk [vmem:[#allocation2 + $0x120] sm:$0xff] %vm1709_vm4, %v15885_v37  ;;  %v856_v47 = vmul.f32 %v755_v21, %v10721_v52  ;;  %3958 = vmatprep.mubr.bf16.mxu0 %v3670_v24  ;;  %v3582_v52 = vld [vmem:[#allocation2 + $0x78] sm:$0xff]  ;;  %v15908_v24 = vld [vmem:[#allocation116_spill] sm:$0xff] }
 0x5d0   : > { %2107 = vst.msk [vmem:[#allocation2 + $0x120] sm:$0xff] %vm2094_vm5, %v15886_v6  ;;  %4771 = vperm.xlu0 %9026, %v11605_v50   ;;  %v3669_v60 = vpack.c.bf16 %v3582_v52, %v3579_v46  ;;  %v3673_v50 = vpack.c.bf16 %v3589_v35, %v3586_v17  ;;  %v15909_v23 = vld [vmem:[#allocation42_spill] sm:$0xff]  ;;  %v3607_v37 = vld [vmem:[#allocation2 + $0x140] sm:$0xff]  ;;  %v15913_v52 = vld [vmem:[#allocation45_spill] sm:$0xff] }
 0x5d1   : > { %889 = vst.msk [vmem:[#allocation2 + $0x150] sm:$0xff] %vm15489_vm0, %v856_v47  ;;  %v15910_v47 = vld [vmem:[#allocation132_spill] sm:$0xff]  ;;  %v15911_v6 = vld [vmem:[#allocation63_spill] sm:$0xff] }
 0x5d2   : > { %1274 = vst.msk [vmem:[#allocation2 + $0x150] sm:$0xff] %vm1259_vm2, %v15887_v5  ;;  %v765_v56 = vpop.permute.xlu0 %764  ;;  %v3600_v5 = vld [vmem:[#allocation2 + $0x108] sm:$0xff] }
 0x5d3   : > { %1724 = vst.msk [vmem:[#allocation2 + $0x150] sm:$0xff] %vm1709_vm4, %v15888_v59  ;;  %v858_v62 = vmul.f32 %v765_v56, %v10733_v57  ;;  %v15912_v56 = vld [vmem:[#allocation118_spill] sm:$0xff]  ;;  %v3604_v59 = vld [vmem:[#allocation2 + $0x128] sm:$0xff] }
 0x5d4   : > { %2109 = vst.msk [vmem:[#allocation2 + $0x150] sm:$0xff] %vm2094_vm5, %v15889_v48  ;;  %4781 = vperm.xlu0 %9026, %v11617_v1   ;;  %v3585_v1 = vld [vmem:[#allocation2 + $0x90] sm:$0xff]  ;;  %v15915_v17 = vld [vmem:[#allocation64_spill] sm:$0xff] }
 0x5d5   : > { %891 = vst.msk [vmem:[#allocation2 + $0x180] sm:$0xff] %vm15489_vm0, %v858_v62  ;;  %v3682_v62 = vpack.c.bf16 %v3607_v37, %v3604_v59  ;;  %v3652_v59 = vld [vmem:[#allocation2 + $0x2a8] sm:$0xff] }
 0x5d6   : > { %1276 = vst.msk [vmem:[#allocation2 + $0x180] sm:$0xff] %vm1259_vm2, %v15890_v42  ;;  %v775_v26 = vpop.permute.xlu0 %774  ;;  %3959 = vmatmul.mubr.bf16.gmra.mrb[8].mxu0 %v3669_v60  ;;  %v15914_v60 = vld [vmem:[#allocation133_spill] sm:$0xff]  ;;  %v15916_v42 = vld [vmem:[#allocation135_spill] sm:$0xff] }
 0x5d7   : > { %1726 = vst.msk [vmem:[#allocation2 + $0x180] sm:$0xff] %vm1709_vm4, %v15891_v53  ;;  %v860_v57 = vmul.f32 %v775_v26, %v10745_v61  ;;  %3966 = vmatprep.mubr.bf16.mxu0 %v3673_v50  ;;  %v3588_v61 = vld [vmem:[#allocation2 + $0xa8] sm:$0xff]  ;;  %v15917_v26 = vmov 2  }
 0x5d8   : > { %2111 = vst.msk [vmem:[#allocation2 + $0x180] sm:$0xff] %vm2094_vm5, %v15892_v51  ;;  %4791 = vperm.xlu0 %9026, %v11628_v39   ;;  %v3672_v45 = vpack.c.bf16 %v3588_v61, %v3585_v1  ;;  %v4674_v39 = vld [vmem:[%s15103_s1 + $0x88] sm:$0xff]  ;;  %v15919_v51 = vld [vmem:[#allocation134_spill] sm:$0xff]  ;;  %v3619_v61 = vld [vmem:[#allocation2 + $0x1a0] sm:$0xff] }
 0x5d9   : > { %893 = vst.msk [vmem:[#allocation2 + $0x1b0] sm:$0xff] %vm15489_vm0, %v860_v57  ;;  %4776 = vperm.xlu1 %9025, %v4674_v39   ;;  %v15918_v53 = vld [vmem:[#allocation48_spill] sm:$0xff]  ;;  %v3613_v57 = vld [vmem:[#allocation2 + $0x170] sm:$0xff]  ;;  %v3606_v1 = vld [vmem:[#allocation2 + $0x138] sm:$0xff] }
 0x5da   : > { %1278 = vst.msk [vmem:[#allocation2 + $0x1b0] sm:$0xff] %vm1259_vm2, %v15893_v0  ;;  %v785_v15 = vpop.permute.xlu0 %784  ;;  %v15920_v0 = vld [vmem:[#allocation136_spill] sm:$0xff] }
 0x5db   : > { %1728 = vst.msk [vmem:[#allocation2 + $0x1b0] sm:$0xff] %vm1709_vm4, %v15894_v27  ;;  %v862_v25 = vmul.f32 %v785_v15, %v15895_v9  ;;  %v4680_v27 = vld [vmem:[%s15103_s1 + $0xb8] sm:$0xff]  ;;  %v3685_v9 = vpack.c.bf16 %v3613_v57, %v3610_v58  ;;  %v4682_v39 = vld [vmem:[%s15103_s1 + $0xc8] sm:$0xff] }
 0x5dc   : > { %2113 = vst.msk [vmem:[#allocation2 + $0x1b0] sm:$0xff] %vm2094_vm5, %v15896_v55  ;;  %4801 = vperm.xlu0 %9026, %v11641_v4   ;;  %v3591_v4 = vld [vmem:[#allocation2 + $0xc0] sm:$0xff]  ;;  %v3612_v55 = vld [vmem:[#allocation2 + $0x168] sm:$0xff] }
 0x5dd   : > { %895 = vst.msk [vmem:[#allocation2 + $0x1e0] sm:$0xff] %vm15489_vm0, %v862_v25  ;;  %v3675_v29 = vpack.c.bf16 %v3594_v19, %v3591_v4  ;;  %v3609_v25 = vld [vmem:[#allocation2 + $0x150] sm:$0xff] }
 0x5de   : > { %1280 = vst.msk [vmem:[#allocation2 + $0x1e0] sm:$0xff] %vm1259_vm2, %v15897_v49  ;;  %v795_v8 = vpop.permute.xlu0 %794  ;;  %3967 = vmatmul.mubr.bf16.gmra.mrb[12].mxu0 %v3672_v45  ;;  %v3684_v45 = vpack.c.bf16 %v3612_v55, %v3609_v25 }
 0x5df   : > { %1730 = vst.msk [vmem:[#allocation2 + $0x1e0] sm:$0xff] %vm1709_vm4, %v15898_v13  ;;  %v864_v30 = vmul.f32 %v795_v8, %v15899_v36  ;;  %3974 = vmatprep.mubr.bf16.mxu0 %v3676_v31  ;;  %v3688_v31 = vpack.c.bf16 %v3619_v61, %v3616_v3  ;;  %v3615_v49 = vld [vmem:[#allocation2 + $0x180] sm:$0xff]  ;;  %v3625_v8 = vld [vmem:[#allocation2 + $0x1d0] sm:$0xff]  ;;  %v3618_v13 = vld [vmem:[#allocation2 + $0x198] sm:$0xff] }
 0x5e0   : > { %2115 = vst.msk [vmem:[#allocation2 + $0x1e0] sm:$0xff] %vm2094_vm5, %v15900_v18  ;;  %4811 = vperm.xlu0 %9026, %v11652_v43   ;;  %v4676_v43 = vld [vmem:[%s15103_s1 + $0x98] sm:$0xff]  ;;  %v3687_v36 = vpack.c.bf16 %v3618_v13, %v3615_v49 }
 0x5e1   : > { %897 = vst.msk [vmem:[#allocation2 + $0x210] sm:$0xff] %vm15489_vm0, %v864_v30  ;;  %4786 = vperm.xlu1 %9025, %v4676_v43   ;;  %v3622_v30 = vld [vmem:[#allocation2 + $0x1b8] sm:$0xff] }
 0x5e2   : > { %1282 = vst.msk [vmem:[#allocation2 + $0x210] sm:$0xff] %vm1259_vm2, %v15901_v14  ;;  %v805_v54 = vpop.permute.xlu0 %804  ;;  %v4684_v18 = vld [vmem:[%s15103_s1 + $0xd8] sm:$0xff]  ;;  %v3691_v4 = vpack.c.bf16 %v3625_v8, %v3622_v30 }
 0x5e3   : > { %1732 = vst.msk [vmem:[#allocation2 + $0x210] sm:$0xff] %vm1709_vm4, %v15902_v63  ;;  %v866_v11 = vmul.f32 %v805_v54, %v15903_v28  ;;  %v3621_v14 = vld [vmem:[#allocation2 + $0x1b0] sm:$0xff]  ;;  %v3631_v54 = vld [vmem:[#allocation2 + $0x200] sm:$0xff]  ;;  %v3628_v28 = vld [vmem:[#allocation2 + $0x1e8] sm:$0xff] }
 0x5e4   : > { %2117 = vst.msk [vmem:[#allocation2 + $0x210] sm:$0xff] %vm2094_vm5, %v15904_v41  ;;  %4821 = vperm.xlu0 %9026, %v11665_v38   ;;  %v3597_v38 = vld [vmem:[#allocation2 + $0xf0] sm:$0xff]  ;;  %v3690_v63 = vpack.c.bf16 %v3624_v34, %v3621_v14  ;;  %v3694_v19 = vpack.c.bf16 %v3631_v54, %v3628_v28 }
 0x5e5   : > { %899 = vst.msk [vmem:[#allocation2 + $0x240] sm:$0xff] %vm15489_vm0, %v866_v11  ;;  %v3678_v35 = vpack.c.bf16 %v3600_v5, %v3597_v38  ;;  %v4686_v11 = vld [vmem:[%s15103_s1 + $0xe8] sm:$0xff]  ;;  %v3655_v5 = vld [vmem:[#allocation2 + $0x2c0] sm:$0xff] }
 0x5e6   : > { %1284 = vst.msk [vmem:[#allocation2 + $0x240] sm:$0xff] %vm1259_vm2, %v15905_v10  ;;  %v815_v40 = vpop.permute.xlu0 %814  ;;  %3975 = vmatmul.mubr.bf16.gmra.mrb[16].mxu0 %v3675_v29  ;;  %v3637_v29 = vld [vmem:[#allocation2 + $0x230] sm:$0xff] }
 0x5e7   : > { %1734 = vst.msk [vmem:[#allocation2 + $0x240] sm:$0xff] %vm1709_vm4, %v15906_v20  ;;  %v868_v32 = vmul.f32 %v815_v40, %v15907_v22  ;;  %3982 = vmatprep.mubr.bf16.mxu0 %v3679_v16  ;;  %v3627_v41 = vld [vmem:[#allocation2 + $0x1e0] sm:$0xff]  ;;  %v3634_v16 = vld [vmem:[#allocation2 + $0x218] sm:$0xff]  ;;  %v3636_v22 = vld [vmem:[#allocation2 + $0x228] sm:$0xff] }
 0x5e8   : > { %2119 = vst.msk [vmem:[#allocation2 + $0x240] sm:$0xff] %vm2094_vm5, %v15908_v24  ;;  %4831 = vperm.xlu0 %9026, %v11676_v44   ;;  %v4678_v44 = vld [vmem:[%s15103_s1 + $0xa8] sm:$0xff]  ;;  %v3693_v43 = vpack.c.bf16 %v3630_v7, %v3627_v41  ;;  %v3697_v10 = vpack.c.bf16 %v3637_v29, %v3634_v16  ;;  %v3643_v20 = vld [vmem:[#allocation2 + $0x260] sm:$0xff] }
 0x5e9   : > { %901 = vst.msk [vmem:[#allocation2 + $0x270] sm:$0xff] %vm15489_vm0, %v868_v32  ;;  %4796 = vperm.xlu1 %9025, %v4678_v44   ;;  %v3640_v24 = vld [vmem:[#allocation2 + $0x248] sm:$0xff]  ;;  %v3706_v44 = vpack.c.bf16 %v3655_v5, %v3652_v59  ;;  %v11998_v16 = vld [vmem:[%s15921_s5] ss:$0 sm:$0xff] }
 0x5ea   : > { %1286 = vst.msk [vmem:[#allocation2 + $0x270] sm:$0xff] %vm1259_vm2, %v15909_v23  ;;  %v825_v21 = vpop.permute.xlu0 %824  ;;  %v3700_v38 = vpack.c.bf16 %v3643_v20, %v3640_v24 }
 0x5eb   : > { %1736 = vst.msk [vmem:[#allocation2 + $0x270] sm:$0xff] %vm1709_vm4, %v15910_v47  ;;  %v870_v46 = vmul.f32 %v825_v21, %v15911_v6  ;;  %v3633_v40 = vld [vmem:[#allocation2 + $0x210] sm:$0xff]  ;;  %v3646_v47 = vld [vmem:[#allocation2 + $0x278] sm:$0xff] }
 0x5ec   : > { %2121 = vst.msk [vmem:[#allocation2 + $0x270] sm:$0xff] %vm2094_vm5, %v15912_v56  ;;  %4841 = vperm.xlu0 %9026, %v11689_v2   ;;  %v3603_v2 = vld [vmem:[#allocation2 + $0x120] sm:$0xff]  ;;  %v3696_v32 = vpack.c.bf16 %v3636_v22, %v3633_v40  ;;  %v3649_v21 = vld [vmem:[#allocation2 + $0x290] sm:$0xff]  ;;  %v3648_v56 = vld [vmem:[#allocation2 + $0x288] sm:$0xff]  ;;  %v12000_v40 = vpop.permute.xlu1 %4270 }
 0x5ed   : > { %903 = vst.msk [vmem:[#allocation2 + $0x2a0] sm:$0xff] %vm15489_vm0, %v870_v46  ;;  %v3681_v15 = vpack.c.bf16 %v3606_v1, %v3603_v2  ;;  %4806 = vperm.xlu1 %9025, %v4680_v27   ;;  %v3703_v6 = vpack.c.bf16 %v3649_v21, %v3646_v47  ;;  %v3660_v2 = vld [vmem:[#allocation2 + $0x2e8] sm:$0xff]  ;;  %15922 = vst [vmem:[#allocation101_spill] sm:$0xff] %v12000_v40 }
 0x5ee   : > { %1288 = vst.msk [vmem:[#allocation2 + $0x2a0] sm:$0xff] %vm1259_vm2, %v15913_v52  ;;  %v835_v48 = vpop.permute.xlu0 %834  ;;  %3983 = vmatmul.mubr.bf16.gmra.mrb[20].mxu0 %v3678_v35  ;;  %v3661_v52 = vld [vmem:[#allocation2 + $0x2f0] sm:$0xff] }
 0x5ef   : > { %1738 = vst.msk [vmem:[#allocation2 + $0x2a0] sm:$0xff] %vm1709_vm4, %v15914_v60  ;;  %v872_v50 = vmul.f32 %v835_v48, %v15915_v17  ;;  %3990 = vmatprep.mubr.bf16.mxu0 %v3682_v62  ;;  %v3639_v23 = vld [vmem:[#allocation2 + $0x240] sm:$0xff]  ;;  %v3654_v48 = vld [vmem:[#allocation2 + $0x2b8] sm:$0xff] }
 0x5f0   : > { %2123 = vst.msk [vmem:[#allocation2 + $0x2a0] sm:$0xff] %vm2094_vm5, %v15916_v42  ;;  %9027 = vset.pattern.permute.xlu0 %v15917_v26  ;;  %v3658_v17 = vld [vmem:[#allocation2 + $0x2d8] sm:$0xff] }
 0x5f1   : > { %905 = vst.msk [vmem:[#allocation2 + $0x2d0] sm:$0xff] %vm15489_vm0, %v872_v50  ;;  %4816 = vperm.xlu1 %9025, %v4682_v39   ;;  %v3709_v50 = vpack.c.bf16 %v3661_v52, %v3658_v17 }
 0x5f2   : > { %1290 = vst.msk [vmem:[#allocation2 + $0x2d0] sm:$0xff] %vm1259_vm2, %v15918_v53 }
 0x5f3   : > { %1740 = vst.msk [vmem:[#allocation2 + $0x2d0] sm:$0xff] %vm1709_vm4, %v15919_v51  ;;  %v3645_v46 = vld [vmem:[#allocation2 + $0x270] sm:$0xff] }
 0x5f4   : > { %2125 = vst.msk [vmem:[#allocation2 + $0x2d0] sm:$0xff] %vm2094_vm5, %v15920_v0  ;;  %v3702_v35 = vpack.c.bf16 %v3648_v56, %v3645_v46  ;;  %v12007_v46 = vpop.permute.xlu0 %4435 }
 0x5f5   : > { %4826 = vperm.xlu1 %9025, %v4684_v18  }
 0x5f6   : > { %3991 = vmatmul.mubr.bf16.gmra.mrb[24].mxu0 %v3681_v15 }
 0x5f7   : > { %3998 = vmatprep.mubr.bf16.mxu0 %v3685_v9  ;;  %v3651_v62 = vld [vmem:[#allocation2 + $0x2a0] sm:$0xff] }
 0x5f8   : > { %v3705_v60 = vpack.c.bf16 %v3654_v48, %v3651_v62 }
 0x5f9   : > { %4836 = vperm.xlu1 %9025, %v4686_v11  }
 0x5fb   : > { %v3657_v42 = vld [vmem:[#allocation2 + $0x2d0] sm:$0xff] }
 0x5fc   : > { %v3708_v53 = vpack.c.bf16 %v3660_v2, %v3657_v42 }
 0x5fd   : > { %4846 = vperm.xlu1 %9025, %v11738_v33   ;;  %v3642_v33 = vld [vmem:[#allocation2 + $0x258] sm:$0xff] }
 0x5fe   : > { %3999 = vmatmul.mubr.bf16.gmra.mrb[28].mxu0 %v3684_v45  ;;  %v3699_v37 = vpack.c.bf16 %v3642_v33, %v3639_v23  ;;  %v12004_v33 = vpop.permute.xlu1 %4440 }
 0x5ff   : > { %4006 = vmatprep.mubr.bf16.mxu0 %v3688_v31 }
 0x601   : > { %9028 = vset.pattern.permute.xlu1 %v15917_v26 }
 0x606   : > { %4007 = vmatmul.mubr.bf16.gmra.mrb[32].mxu0 %v3687_v36 }
 0x607   : > { %4014 = vmatprep.mubr.bf16.mxu0 %v3691_v4 }
 0x60e   : > { %4015 = vmatmul.mubr.bf16.gmra.mrb[36].mxu0 %v3690_v63 }
 0x60f   : > { %4022 = vmatprep.mubr.bf16.mxu0 %v3694_v19 }
 0x616   : > { %4023 = vmatmul.mubr.bf16.gmra.mrb[40].mxu0 %v3693_v43 }
 0x617   : > { %4030 = vmatprep.mubr.bf16.mxu0 %v3697_v10 }
 0x61e   : > { %4031 = vmatmul.mubr.bf16.gmra.mrb[44].mxu0 %v3696_v32 }
 0x61f   : > { %4038 = vmatprep.mubr.bf16.mxu0 %v3700_v38 }
 0x626   : > { %4039 = vmatmul.mubr.bf16.gmra.mrb[48].mxu0 %v3699_v37 }
 0x627   : > { %4046 = vmatprep.mubr.bf16.mxu0 %v3703_v6 }
 0x62e   : > { %4047 = vmatmul.mubr.bf16.gmra.mrb[52].mxu0 %v3702_v35 }
 0x62f   : > { %4054 = vmatprep.mubr.bf16.mxu0 %v3706_v44 }
 0x636   : > { %4055 = vmatmul.mubr.bf16.gmra.mrb[56].mxu0 %v3705_v60 }
 0x637   : > { %4062 = vmatprep.mubr.bf16.mxu0 %v3709_v50 }
 0x63e   : > { %4063 = vmatmul.mubr.bf16.gmra.mrb[60].mxu0 %v3708_v53  ;;  %v4451_v53 = vpop.permute.xlu0 %4450 }
 0x659   : > { %v11935_v57 = vpop.f32.mrb[0].mxu1 }
 0x65a   : > { %v4105_v51 = vpop.f32.mrb[1].mxu1 }
 0x65b   : > { %v11937_v1 = vpop.f32.mrb[2].mxu1 }
 0x65c   : > { %v4108_v0 = vpop.f32.mrb[3].mxu1 }
 0x661   : > { %v11939_v15 = vpop.f32.mrb[4].mxu1 }
 0x662   : > { %v11941_v58 = vpop.f32.mrb[5].mxu1 }
 0x663   : > { %v11943_v27 = vpop.f32.mrb[6].mxu1 }
 0x664   : > { %v11945_v9 = vpop.f32.mrb[7].mxu1 }
 0x669   : > { %v11947_v25 = vpop.f32.mrb[8].mxu1 }
 0x66a   : > { %v11949_v61 = vpop.f32.mrb[9].mxu1 }
 0x66b   : > { %v11951_v55 = vpop.f32.mrb[10].mxu1 }
 0x66c   : > { %v11953_v45 = vpop.f32.mrb[11].mxu1 }
 0x671   : > { %v11955_v3 = vpop.f32.mrb[12].mxu1 }
 0x672   : > { %v11957_v39 = vpop.f32.mrb[13].mxu1 }
 0x673   : > { %v11959_v31 = vpop.f32.mrb[14].mxu1 }
 0x674   : > { %v11961_v49 = vpop.f32.mrb[15].mxu1 }
 0x679   : > { %v11963_v8 = vpop.f32.mrb[16].mxu1 }
 0x67a   : > { %v11965_v13 = vpop.f32.mrb[17].mxu1 }
 0x67b   : > { %v11967_v36 = vpop.f32.mrb[18].mxu1 }
 0x67c   : > { %v11969_v30 = vpop.f32.mrb[19].mxu1 }
 0x681   : > { %v11971_v18 = vpop.f32.mrb[20].mxu1 }
 0x682   : > { %v11973_v4 = vpop.f32.mrb[21].mxu1 }
 0x683   : > { %v11975_v14 = vpop.f32.mrb[22].mxu1 }
 0x684   : > { %v11977_v54 = vpop.f32.mrb[23].mxu1 }
 0x689   : > { %v11979_v34 = vpop.f32.mrb[24].mxu1 }
 0x68a   : > { %v11981_v63 = vpop.f32.mrb[25].mxu1 }
 0x68b   : > { %v11983_v28 = vpop.f32.mrb[26].mxu1 }
 0x68c   : > { %v11985_v11 = vpop.f32.mrb[27].mxu1 }
 0x691   : > { %v11987_v19 = vpop.f32.mrb[28].mxu1 }
 0x692   : > { %v11989_v41 = vpop.f32.mrb[29].mxu1 }
 0x693   : > { %v11991_v29 = vpop.f32.mrb[30].mxu1 }
 0x694   : > { %v11993_v7 = vpop.f32.mrb[31].mxu1 }
 0x699   : > { %v8604_v43 = vpop.f32.mrb[0].mxu0 }
 0x69a   : > { %v8605_v10 = vpop.f32.mrb[1].mxu0 }
 0x69b   : > { %v8606_v20 = vadd.f32 %v8605_v10, %v8604_v43  ;;  %v8607_v22 = vpop.f32.mrb[2].mxu0 }
 0x69c   : > { %v8608_v32 = vpop.f32.mrb[3].mxu0 }
 0x69d   : > { %v3945_v24 = vadd.f32 %v8606_v20, %v11998_v16  ;;  %v8609_v38 = vadd.f32 %v8608_v32, %v8607_v22 }
 0x69f   : > { %v4106_v23 = vadd.f32 %v4105_v51, %v3945_v24  ;;  %v3948_v21 = vadd.f32 %v8609_v38, %v11998_v16  ;;  %v12023_v51 = vpop.permute.xlu1 %4445 }
 0x6a1   : > { %vm4232_vm6 = vcmp.gt.f32.partialorder %v4106_v23, 0.0  ;;  %v4273_v37 = vmul.f32 %v12000_v40, %v4106_v23  ;;  %v4109_v47 = vadd.f32 %v4108_v0, %v3948_v21  ;;  %v8610_v6 = vpop.f32.mrb[4].mxu0  ;;  %v15925_v0 = vld [vmem:[#allocation55_spill] sm:$0xff] }
 0x6a2   : > { %v8611_v5 = vpop.f32.mrb[5].mxu0 }
 0x6a3   : > { %vm4233_vm7 = vcmp.gt.f32.partialorder %v4109_v47, 0.0  ;;  %v4274_v56 = vmul.f32 %v12000_v40, %v4109_v47  ;;  %v12010_v35 = vsel %vm4232_vm6, %v4106_v23, %v4273_v37  ;;  %v8612_v59 = vadd.f32 %v8611_v5, %v8610_v6  ;;  %v8613_v44 = vpop.f32.mrb[6].mxu0 }
 0x6a4   : > { %15923 = vst [vmem:[#allocation102_spill] sm:$0xff] %v12010_v35  ;;  %5873 = vst.msk [vmem:[#allocation2 + $0x8] sm:$0xff] %vm15489_vm0, %v12010_v35  ;;  %v8614_v62 = vpop.f32.mrb[7].mxu0  ;;  %v15363_v17 = vrot.slane %v12010_v35, 7 }
 0x6a5   : > { %v3953_v52 = vadd.f32 %v8612_v59, %v11998_v16  ;;  %v8615_v48 = vadd.f32 %v8614_v62, %v8613_v44  ;;  %v12015_v60 = vsel %vm4233_vm7, %v4109_v47, %v4274_v56  ;;  %v4456_v56 = vpop.permute.xlu1 %4455 }
 0x6a6   : > { %15924 = vst [vmem:[#allocation103_spill] sm:$0xff] %v12015_v60  ;;  %v4338_v50 = vrot.slane %v12015_v60, 7  ;;  %5874 = vst.msk [vmem:[#allocation2 + $0x20] sm:$0xff] %vm15489_vm0, %v12015_v60 }
 0x6a7   : > { %v4114_v42 = vadd.f32 %v11935_v57, %v3953_v52  ;;  %v3956_v2 = vadd.f32 %v8615_v48, %v11998_v16 }
 0x6a8   : > { %v12029_v43 = vsel %vm617_vm1, %v15363_v17, %v4338_v50 }
 0x6a9   : > { %15926 = vst [vmem:[#allocation74_spill] sm:$0xff] %v12029_v43  ;;  %vm4234_vm8 = vcmp.gt.f32.partialorder %v4114_v42, 0.0  ;;  %v4275_v10 = vmul.f32 %v12000_v40, %v4114_v42  ;;  %v4117_v20 = vadd.f32 %v11937_v1, %v3956_v2  ;;  %v8616_v22 = vpop.f32.mrb[8].mxu0  ;;  %v4596_v32 = vmul.f32 %v4451_v53, %v12029_v43 }
 0x6aa   : > { %v8617_v57 = vpop.f32.mrb[9].mxu0 }
 0x6ab   : > { %vm4235_vm9 = vcmp.gt.f32.partialorder %v4117_v20, 0.0  ;;  %v4276_v24 = vmul.f32 %v12000_v40, %v4117_v20  ;;  %v8618_v38 = vadd.f32 %v8617_v57, %v8616_v22  ;;  %v12035_v23 = vsel %vm4234_vm8, %v4114_v42, %v4275_v10  ;;  %v8619_v21 = vpop.f32.mrb[10].mxu0  ;;  %4628 = vst.msk [vmem:[#allocation2 + $0x48] sm:$0xff] %vm15489_vm0, %v4596_v32  ;;  %v4461_v42 = vpop.permute.xlu0 %4460 }
 0x6ac   : > { %v4339_v37 = vrot.slane %v12035_v23, 7  ;;  %5875 = vst.msk [vmem:[#allocation2 + $0x38] sm:$0xff] %vm15489_vm0, %v12035_v23  ;;  %v8620_v47 = vpop.f32.mrb[11].mxu0 }
 0x6ad   : > { %v3961_v1 = vadd.f32 %v8618_v38, %v11998_v16  ;;  %v8621_v6 = vadd.f32 %v8620_v47, %v8619_v21  ;;  %v12042_v5 = vsel %vm4235_vm9, %v4117_v20, %v4276_v24 }
 0x6ae   : > { %v4340_v59 = vrot.slane %v12042_v5, 7  ;;  %5876 = vst.msk [vmem:[#allocation2 + $0x50] sm:$0xff] %vm15489_vm0, %v12042_v5  ;;  %v12049_v44 = vsel %vm617_vm1, %v4338_v50, %v4339_v37 }
 0x6af   : > { %v4122_v62 = vadd.f32 %v11941_v58, %v3961_v1  ;;  %v3964_v52 = vadd.f32 %v8621_v6, %v11998_v16  ;;  %v4597_v48 = vmul.f32 %v4456_v56, %v12049_v44  ;;  %v4466_v1 = vpop.permute.xlu1 %4465 }
 0x6b0   : > { %v12056_v2 = vsel %vm617_vm1, %v4339_v37, %v4340_v59 }
 0x6b1   : > { %vm4236_vm10 = vcmp.gt.f32.partialorder %v4122_v62, 0.0  ;;  %v4277_v53 = vmul.f32 %v12000_v40, %v4122_v62  ;;  %v4125_v10 = vadd.f32 %v11945_v9, %v3964_v52  ;;  %v8622_v20 = vpop.f32.mrb[12].mxu0  ;;  %4629 = vst.msk [vmem:[#allocation2 + $0x60] sm:$0xff] %vm15489_vm0, %v4597_v48  ;;  %v4598_v50 = vmul.f32 %v4461_v42, %v12056_v2 }
 0x6b2   : > { %v8623_v58 = vpop.f32.mrb[13].mxu0 }
 0x6b3   : > { %vm4237_vm11 = vcmp.gt.f32.partialorder %v4125_v10, 0.0  ;;  %v4278_v22 = vmul.f32 %v12000_v40, %v4125_v10  ;;  %v8624_v32 = vadd.f32 %v8623_v58, %v8622_v20  ;;  %v12063_v57 = vsel %vm4236_vm10, %v4122_v62, %v4277_v53  ;;  %v8625_v24 = vpop.f32.mrb[14].mxu0  ;;  %4630 = vst.msk [vmem:[#allocation2 + $0x78] sm:$0xff] %vm15489_vm0, %v4598_v50  ;;  %v4471_v53 = vpop.permute.xlu0 %4470 }
 0x6b4   : > { %v4341_v38 = vrot.slane %v12063_v57, 7  ;;  %5877 = vst.msk [vmem:[#allocation2 + $0x68] sm:$0xff] %vm15489_vm0, %v12063_v57  ;;  %v8626_v9 = vpop.f32.mrb[15].mxu0  ;;  %v15362_v20 = vrot.slane %v12063_v57, 1 }
 0x6b5   : > { %v3969_v21 = vadd.f32 %v8624_v32, %v11998_v16  ;;  %v8627_v37 = vadd.f32 %v8626_v9, %v8625_v24  ;;  %v12070_v47 = vsel %vm4237_vm11, %v4125_v10, %v4278_v22 }
 0x6b6   : > { %v4342_v6 = vrot.slane %v12070_v47, 7  ;;  %5878 = vst.msk [vmem:[#allocation2 + $0x80] sm:$0xff] %vm15489_vm0, %v12070_v47  ;;  %v12077_v56 = vsel %vm617_vm1, %v4340_v59, %v4341_v38  ;;  %v15361_v42 = vrot.slane %v12070_v47, 1 }
 0x6b7   : > { %v4130_v62 = vadd.f32 %v11939_v15, %v3969_v21  ;;  %v3972_v52 = vadd.f32 %v8627_v37, %v11998_v16  ;;  %v4599_v48 = vmul.f32 %v4466_v1, %v12077_v56 }
 0x6b8   : > { %v12085_v10 = vsel %vm617_vm1, %v4341_v38, %v4342_v6  ;;  %v12098_v32 = vsel %vm1324_vm3, %v15362_v20, %v15361_v42 }
 0x6b9   : > { %15927 = vst [vmem:[#allocation104_spill] sm:$0xff] %v12085_v10  ;;  %vm4238_vm12 = vcmp.gt.f32.partialorder %v4130_v62, 0.0  ;;  %v4279_v50 = vmul.f32 %v12000_v40, %v4130_v62  ;;  %v4133_v59 = vadd.f32 %v11943_v27, %v3972_v52  ;;  %v8628_v58 = vpop.f32.mrb[16].mxu0  ;;  %4631 = vst.msk [vmem:[#allocation2 + $0x90] sm:$0xff] %vm15489_vm0, %v4599_v48  ;;  %v4600_v15 = vmul.f32 %v4471_v53, %v12085_v10  ;;  %v4476_v53 = vpop.permute.xlu1 %4475 }
 0x6ba   : > { %v8629_v22 = vpop.f32.mrb[17].mxu0  ;;  %15928 = vst [vmem:[#allocation73_spill] sm:$0xff] %v12098_v32 }
 0x6bb   : > { %vm4239_vm13 = vcmp.gt.f32.partialorder %v4133_v59, 0.0  ;;  %v4280_v24 = vmul.f32 %v12000_v40, %v4133_v59  ;;  %v8630_v38 = vadd.f32 %v8629_v22, %v8628_v58  ;;  %v12101_v9 = vsel %vm4238_vm12, %v4130_v62, %v4279_v50  ;;  %v8631_v27 = vpop.f32.mrb[18].mxu0  ;;  %4632 = vst.msk [vmem:[#allocation2 + $0xa8] sm:$0xff] %vm15489_vm0, %v4600_v15  ;;  %v4481_v22 = vpop.permute.xlu0 %4480 }
 0x6bc   : > { %v4343_v21 = vrot.slane %v12101_v9, 7  ;;  %5879 = vst.msk [vmem:[#allocation2 + $0x98] sm:$0xff] %vm15489_vm0, %v12101_v9  ;;  %v8632_v37 = vpop.f32.mrb[19].mxu0 }
 0x6bd   : > { %v3977_v1 = vadd.f32 %v8630_v38, %v11998_v16  ;;  %v8633_v52 = vadd.f32 %v8632_v37, %v8631_v27  ;;  %v12108_v48 = vsel %vm4239_vm13, %v4133_v59, %v4280_v24  ;;  %v4486_v20 = vpop.permute.xlu1 %4485 }
 0x6be   : > { %v4344_v42 = vrot.slane %v12108_v48, 7  ;;  %5880 = vst.msk [vmem:[#allocation2 + $0xb0] sm:$0xff] %vm15489_vm0, %v12108_v48  ;;  %v12115_v62 = vsel %vm617_vm1, %v4342_v6, %v4343_v21 }
 0x6bf   : > { %15929 = vst [vmem:[#allocation67_spill] sm:$0xff] %v12115_v62  ;;  %v4138_v50 = vadd.f32 %v11949_v61, %v3977_v1  ;;  %v3980_v58 = vadd.f32 %v8633_v52, %v11998_v16  ;;  %v4601_v15 = vmul.f32 %v4476_v53, %v12115_v62 }
 0x6c0   : > { %v12122_v59 = vsel %vm617_vm1, %v4343_v21, %v4344_v42 }
 0x6c1   : > { %vm4240_vm14 = vcmp.gt.f32.partialorder %v4138_v50, 0.0  ;;  %v4281_v24 = vmul.f32 %v12000_v40, %v4138_v50  ;;  %v4141_v38 = vadd.f32 %v11953_v45, %v3980_v58  ;;  %v8634_v27 = vpop.f32.mrb[20].mxu0  ;;  %4633 = vst.msk [vmem:[#allocation2 + $0xc0] sm:$0xff] %vm15489_vm0, %v4601_v15  ;;  %v4602_v6 = vmul.f32 %v4481_v22, %v12122_v59 }
 0x6c2   : > { %v8635_v61 = vpop.f32.mrb[21].mxu0 }
 0x6c3   : > { %vm4241_vm15 = vcmp.gt.f32.partialorder %v4141_v38, 0.0  ;;  %v4282_v37 = vmul.f32 %v12000_v40, %v4141_v38  ;;  %v8636_v1 = vadd.f32 %v8635_v61, %v8634_v27  ;;  %v12129_v52 = vsel %vm4240_vm14, %v4138_v50, %v4281_v24  ;;  %v8637_v53 = vpop.f32.mrb[22].mxu0  ;;  %4634 = vst.msk [vmem:[#allocation2 + $0xd8] sm:$0xff] %vm15489_vm0, %v4602_v6 }
 0x6c4   : > { %v4345_v21 = vrot.slane %v12129_v52, 7  ;;  %5881 = vst.msk [vmem:[#allocation2 + $0xc8] sm:$0xff] %vm15489_vm0, %v12129_v52  ;;  %v8638_v45 = vpop.f32.mrb[23].mxu0 }
 0x6c5   : > { %v3985_v58 = vadd.f32 %v8636_v1, %v11998_v16  ;;  %v8639_v15 = vadd.f32 %v8638_v45, %v8637_v53  ;;  %v12136_v22 = vsel %vm4241_vm15, %v4141_v38, %v4282_v37  ;;  %v4491_v38 = vpop.permute.xlu0 %4490  ;;  %v15367_v1 = vrot.slane %v12129_v52, 1 }
 0x6c6   : > { %v4346_v17 = vrot.slane %v12136_v22, 7  ;;  %5882 = vst.msk [vmem:[#allocation2 + $0xe0] sm:$0xff] %vm15489_vm0, %v12136_v22  ;;  %v12143_v50 = vsel %vm617_vm1, %v4344_v42, %v4345_v21  ;;  %v15366_v61 = vrot.slane %v12136_v22, 1 }
 0x6c7   : > { %15930 = vst [vmem:[#allocation68_spill] sm:$0xff] %v12143_v50  ;;  %v4146_v24 = vadd.f32 %v11947_v25, %v3985_v58  ;;  %v3988_v27 = vadd.f32 %v8639_v15, %v11998_v16  ;;  %v4603_v6 = vmul.f32 %v4486_v20, %v12143_v50 }
 0x6c8   : > { %v12151_v37 = vsel %vm617_vm1, %v4345_v21, %v4346_v17  ;;  %v12164_v21 = vsel %vm1324_vm3, %v15367_v1, %v15366_v61  ;;  %v4496_v1 = vpop.permute.xlu1 %4495 }
 0x6c9   : > { %vm4242_vm6 = vcmp.gt.f32.partialorder %v4146_v24, 0.0  ;;  %v4283_v53 = vmul.f32 %v12000_v40, %v4146_v24  ;;  %v4149_v42 = vadd.f32 %v11951_v55, %v3988_v27  ;;  %v8640_v45 = vpop.f32.mrb[24].mxu0  ;;  %4635 = vst.msk [vmem:[#allocation2 + $0xf0] sm:$0xff] %vm15489_vm0, %v4603_v6  ;;  %v4604_v25 = vmul.f32 %v4491_v38, %v12151_v37  ;;  %15931 = vst [vmem:[#allocation69_spill] sm:$0xff] %v12164_v21 }
 0x6ca   : > { %v8641_v20 = vpop.f32.mrb[25].mxu0 }
 0x6cb   : > { %vm4243_vm7 = vcmp.gt.f32.partialorder %v4149_v42, 0.0  ;;  %v4284_v58 = vmul.f32 %v12000_v40, %v4149_v42  ;;  %v8642_v15 = vadd.f32 %v8641_v20, %v8640_v45  ;;  %v12167_v12 = vsel %vm4242_vm6, %v4146_v24, %v4283_v53  ;;  %v8643_v55 = vpop.f32.mrb[26].mxu0  ;;  %4636 = vst.msk [vmem:[#allocation2 + $0x108] sm:$0xff] %vm15489_vm0, %v4604_v25  ;;  %v4501_v20 = vpop.permute.xlu0 %4500 }
 0x6cc   : > { %v4347_v27 = vrot.slane %v12167_v12, 7  ;;  %5883 = vst.msk [vmem:[#allocation2 + $0xf8] sm:$0xff] %vm15489_vm0, %v12167_v12  ;;  %v8644_v6 = vpop.f32.mrb[27].mxu0  ;;  %v4506_v32 = vpop.permute.xlu1 %4505 }
 0x6cd   : > { %v3993_v38 = vadd.f32 %v8642_v15, %v11998_v16  ;;  %v8645_v26 = vadd.f32 %v8644_v6, %v8643_v55  ;;  %v12174_v61 = vsel %vm4243_vm7, %v4149_v42, %v4284_v58 }
 0x6ce   : > { %v4348_v21 = vrot.slane %v12174_v61, 7  ;;  %5884 = vst.msk [vmem:[#allocation2 + $0x110] sm:$0xff] %vm15489_vm0, %v12174_v61  ;;  %v12181_v24 = vsel %vm617_vm1, %v4346_v17, %v4347_v27 }
 0x6cf   : > { %v4154_v53 = vadd.f32 %v11957_v39, %v3993_v38  ;;  %v3996_v45 = vadd.f32 %v8645_v26, %v11998_v16  ;;  %v4605_v25 = vmul.f32 %v4496_v1, %v12181_v24 }
 0x6d0   : > { %v12188_v42 = vsel %vm617_vm1, %v4347_v27, %v4348_v21 }
 0x6d1   : > { %15932 = vst [vmem:[#allocation70_spill] sm:$0xff] %v12188_v42  ;;  %vm4244_vm8 = vcmp.gt.f32.partialorder %v4154_v53, 0.0  ;;  %v4285_v58 = vmul.f32 %v12000_v40, %v4154_v53  ;;  %v4157_v15 = vadd.f32 %v11961_v49, %v3996_v45  ;;  %v8646_v55 = vpop.f32.mrb[28].mxu0  ;;  %4637 = vst.msk [vmem:[#allocation2 + $0x120] sm:$0xff] %vm15489_vm0, %v4605_v25  ;;  %v4606_v17 = vmul.f32 %v4501_v20, %v12188_v42 }
 0x6d2   : > { %v8647_v39 = vpop.f32.mrb[29].mxu0 }
 0x6d3   : > { %vm4245_vm9 = vcmp.gt.f32.partialorder %v4157_v15, 0.0  ;;  %v4286_v26 = vmul.f32 %v12000_v40, %v4157_v15  ;;  %v8648_v1 = vadd.f32 %v8647_v39, %v8646_v55  ;;  %v12195_v6 = vsel %vm4244_vm8, %v4154_v53, %v4285_v58  ;;  %v8649_v38 = vpop.f32.mrb[30].mxu0  ;;  %4638 = vst.msk [vmem:[#allocation2 + $0x138] sm:$0xff] %vm15489_vm0, %v4606_v17  ;;  %v4511_v39 = vpop.permute.xlu0 %4510 }
 0x6d4   : > { %v4349_v27 = vrot.slane %v12195_v6, 7  ;;  %5885 = vst.msk [vmem:[#allocation2 + $0x128] sm:$0xff] %vm15489_vm0, %v12195_v6  ;;  %v8650_v49 = vpop.f32.mrb[31].mxu0 }
 0x6d5   : > { %v4001_v45 = vadd.f32 %v8648_v1, %v11998_v16  ;;  %v8651_v25 = vadd.f32 %v8650_v49, %v8649_v38  ;;  %v12202_v20 = vsel %vm4245_vm9, %v4157_v15, %v4286_v26 }
 0x6d6   : > { %v4350_v42 = vrot.slane %v12202_v20, 7  ;;  %5886 = vst.msk [vmem:[#allocation2 + $0x140] sm:$0xff] %vm15489_vm0, %v12202_v20  ;;  %v12209_v53 = vsel %vm617_vm1, %v4348_v21, %v4349_v27 }
 0x6d7   : > { %15933 = vst [vmem:[#allocation71_spill] sm:$0xff] %v12209_v53  ;;  %v4162_v58 = vadd.f32 %v11955_v3, %v4001_v45  ;;  %v4004_v55 = vadd.f32 %v8651_v25, %v11998_v16  ;;  %v4607_v17 = vmul.f32 %v4506_v32, %v12209_v53 }
 0x6d8   : > { %v12216_v15 = vsel %vm617_vm1, %v4349_v27, %v4350_v42 }
 0x6d9   : > { %15934 = vst [vmem:[#allocation72_spill] sm:$0xff] %v12216_v15  ;;  %vm4246_vm10 = vcmp.gt.f32.partialorder %v4162_v58, 0.0  ;;  %v4287_v26 = vmul.f32 %v12000_v40, %v4162_v58  ;;  %v4165_v1 = vadd.f32 %v11959_v31, %v4004_v55  ;;  %v8652_v38 = vpop.f32.mrb[32].mxu0  ;;  %4639 = vst.msk [vmem:[#allocation2 + $0x150] sm:$0xff] %vm15489_vm0, %v4607_v17  ;;  %v4608_v21 = vmul.f32 %v4511_v39, %v12216_v15 }
 0x6da   : > { %v8653_v3 = vpop.f32.mrb[33].mxu0  ;;  %v15378_v55 = vrot.slane %v12202_v20, 1 }
 0x6db   : > { %vm4247_vm11 = vcmp.gt.f32.partialorder %v4165_v1, 0.0  ;;  %v4288_v49 = vmul.f32 %v12000_v40, %v4165_v1  ;;  %v8654_v32 = vadd.f32 %v8653_v3, %v8652_v38  ;;  %v12223_v45 = vsel %vm4246_vm10, %v4162_v58, %v4287_v26  ;;  %v8655_v25 = vpop.f32.mrb[34].mxu0  ;;  %4640 = vst.msk [vmem:[#allocation2 + $0x168] sm:$0xff] %vm15489_vm0, %v4608_v21  ;;  %v4516_v58 = vpop.permute.xlu1 %4515 }
 0x6dc   : > { %15935 = vst [vmem:[#allocation65_spill] sm:$0xff] %v12223_v45  ;;  %v4351_v27 = vrot.slane %v12223_v45, 7  ;;  %5887 = vst.msk [vmem:[#allocation2 + $0x158] sm:$0xff] %vm15489_vm0, %v12223_v45  ;;  %v8656_v31 = vpop.f32.mrb[35].mxu0  ;;  %v15379_v17 = vrot.slane %v12223_v45, 1 }
 0x6dd   : > { %v4009_v39 = vadd.f32 %v8654_v32, %v11998_v16  ;;  %v8657_v53 = vadd.f32 %v8656_v31, %v8655_v25  ;;  %v12232_v15 = vsel %vm4247_vm11, %v4165_v1, %v4288_v49  ;;  %v4521_v32 = vpop.permute.xlu0 %4520 }
 0x6de   : > { %15936 = vst [vmem:[#allocation66_spill] sm:$0xff] %v12232_v15  ;;  %v4352_v26 = vrot.slane %v12232_v15, 7  ;;  %5888 = vst.msk [vmem:[#allocation2 + $0x170] sm:$0xff] %vm15489_vm0, %v12232_v15  ;;  %v12239_v38 = vsel %vm617_vm1, %v4350_v42, %v4351_v27  ;;  %v12247_v21 = vsel %vm1324_vm3, %v15378_v55, %v15379_v17 }
 0x6df   : > { %15937 = vst [vmem:[#allocation58_spill] sm:$0xff] %v12239_v38  ;;  %15938 = vst [vmem:[#allocation57_spill] sm:$0xff] %v12247_v21  ;;  %v4170_v1 = vadd.f32 %v11965_v13, %v4009_v39  ;;  %v4012_v3 = vadd.f32 %v8657_v53, %v11998_v16  ;;  %v4609_v49 = vmul.f32 %v4516_v58, %v12239_v38 }
 0x6e0   : > { %v12254_v25 = vsel %vm617_vm1, %v4351_v27, %v4352_v26 }
 0x6e1   : > { %15939 = vst [vmem:[#allocation12_spill] sm:$0xff] %v12254_v25  ;;  %vm4248_vm12 = vcmp.gt.f32.partialorder %v4170_v1, 0.0  ;;  %v4289_v42 = vmul.f32 %v12000_v40, %v4170_v1  ;;  %v4173_v31 = vadd.f32 %v11969_v30, %v4012_v3  ;;  %v8658_v50 = vpop.f32.mrb[36].mxu0  ;;  %4641 = vst.msk [vmem:[#allocation2 + $0x180] sm:$0xff] %vm15489_vm0, %v4609_v49  ;;  %v4610_v55 = vmul.f32 %v4521_v32, %v12254_v25  ;;  %v4526_v25 = vpop.permute.xlu1 %4525 }
 0x6e2   : > { %v8659_v13 = vpop.f32.mrb[37].mxu0 }
 0x6e3   : > { %vm4249_vm13 = vcmp.gt.f32.partialorder %v4173_v31, 0.0  ;;  %v4290_v53 = vmul.f32 %v12000_v40, %v4173_v31  ;;  %v8660_v39 = vadd.f32 %v8659_v13, %v8658_v50  ;;  %v12261_v58 = vsel %vm4248_vm12, %v4170_v1, %v4289_v42  ;;  %v8661_v17 = vpop.f32.mrb[38].mxu0  ;;  %4642 = vst.msk [vmem:[#allocation2 + $0x198] sm:$0xff] %vm15489_vm0, %v4610_v55  ;;  %v4531_v13 = vpop.permute.xlu0 %4530 }
 0x6e4   : > { %15940 = vst [vmem:[#allocation13_spill] sm:$0xff] %v12261_v58  ;;  %v4353_v27 = vrot.slane %v12261_v58, 7  ;;  %5889 = vst.msk [vmem:[#allocation2 + $0x188] sm:$0xff] %vm15489_vm0, %v12261_v58  ;;  %v8662_v30 = vpop.f32.mrb[39].mxu0 }
 0x6e5   : > { %v4017_v3 = vadd.f32 %v8660_v39, %v11998_v16  ;;  %v8663_v49 = vadd.f32 %v8662_v30, %v8661_v17  ;;  %v12268_v32 = vsel %vm4249_vm13, %v4173_v31, %v4290_v53 }
 0x6e6   : > { %15941 = vst [vmem:[#allocation14_spill] sm:$0xff] %v12268_v32  ;;  %v4354_v21 = vrot.slane %v12268_v32, 7  ;;  %5890 = vst.msk [vmem:[#allocation2 + $0x1a0] sm:$0xff] %vm15489_vm0, %v12268_v32  ;;  %v12275_v50 = vsel %vm617_vm1, %v4352_v26, %v4353_v27 }
 0x6e7   : > { %15942 = vst [vmem:[#allocation16_spill] sm:$0xff] %v12275_v50  ;;  %v4178_v55 = vadd.f32 %v11963_v8, %v4017_v3  ;;  %v4020_v1 = vadd.f32 %v8663_v49, %v11998_v16  ;;  %v4611_v42 = vmul.f32 %v4526_v25, %v12275_v50 }
 0x6e8   : > { %v12282_v17 = vsel %vm617_vm1, %v4353_v27, %v4354_v21 }
 0x6e9   : > { %15943 = vst [vmem:[#allocation15_spill] sm:$0xff] %v12282_v17  ;;  %vm4250_vm14 = vcmp.gt.f32.partialorder %v4178_v55, 0.0  ;;  %v4291_v31 = vmul.f32 %v12000_v40, %v4178_v55  ;;  %v4181_v53 = vadd.f32 %v11967_v36, %v4020_v1  ;;  %v8664_v39 = vpop.f32.mrb[40].mxu0  ;;  %4643 = vst.msk [vmem:[#allocation2 + $0x1b0] sm:$0xff] %vm15489_vm0, %v4611_v42  ;;  %v4612_v26 = vmul.f32 %v4531_v13, %v12282_v17  ;;  %v4536_v17 = vpop.permute.xlu1 %4535 }
 0x6ea   : > { %v8665_v8 = vpop.f32.mrb[41].mxu0 }
 0x6eb   : > { %vm4251_vm15 = vcmp.gt.f32.partialorder %v4181_v53, 0.0  ;;  %v4292_v30 = vmul.f32 %v12000_v40, %v4181_v53  ;;  %v8666_v25 = vadd.f32 %v8665_v8, %v8664_v39  ;;  %v12289_v3 = vsel %vm4250_vm14, %v4178_v55, %v4291_v31  ;;  %v8667_v49 = vpop.f32.mrb[42].mxu0  ;;  %4644 = vst.msk [vmem:[#allocation2 + $0x1c8] sm:$0xff] %vm15489_vm0, %v4612_v26  ;;  %v4541_v8 = vpop.permute.xlu0 %4540 }
 0x6ec   : > { %15944 = vst [vmem:[#allocation18_spill] sm:$0xff] %v12289_v3  ;;  %v4355_v27 = vrot.slane %v12289_v3, 7  ;;  %5891 = vst.msk [vmem:[#allocation2 + $0x1b8] sm:$0xff] %vm15489_vm0, %v12289_v3  ;;  %v8668_v36 = vpop.f32.mrb[43].mxu0 }
 0x6ed   : > { %v4025_v1 = vadd.f32 %v8666_v25, %v11998_v16  ;;  %v8669_v42 = vadd.f32 %v8668_v36, %v8667_v49  ;;  %v12296_v13 = vsel %vm4251_vm15, %v4181_v53, %v4292_v30 }
 0x6ee   : > { %15945 = vst [vmem:[#allocation17_spill] sm:$0xff] %v12296_v13  ;;  %v4356_v50 = vrot.slane %v12296_v13, 7  ;;  %5892 = vst.msk [vmem:[#allocation2 + $0x1d0] sm:$0xff] %vm15489_vm0, %v12296_v13  ;;  %v12303_v55 = vsel %vm617_vm1, %v4354_v21, %v4355_v27 }
 0x6ef   : > { %15946 = vst [vmem:[#allocation20_spill] sm:$0xff] %v12303_v55  ;;  %v4186_v31 = vadd.f32 %v11973_v4, %v4025_v1  ;;  %v4028_v39 = vadd.f32 %v8669_v42, %v11998_v16  ;;  %v4613_v26 = vmul.f32 %v4536_v17, %v12303_v55 }
 0x6f0   : > { %v12310_v53 = vsel %vm617_vm1, %v4355_v27, %v4356_v50 }
 0x6f1   : > { %15947 = vst [vmem:[#allocation19_spill] sm:$0xff] %v12310_v53  ;;  %vm4252_vm6 = vcmp.gt.f32.partialorder %v4186_v31, 0.0  ;;  %v4293_v30 = vmul.f32 %v12000_v40, %v4186_v31  ;;  %v4189_v25 = vadd.f32 %v11977_v54, %v4028_v39  ;;  %v8670_v49 = vpop.f32.mrb[44].mxu0  ;;  %4645 = vst.msk [vmem:[#allocation2 + $0x1e0] sm:$0xff] %vm15489_vm0, %v4613_v26  ;;  %v4614_v21 = vmul.f32 %v4541_v8, %v12310_v53  ;;  %v4546_v39 = vpop.permute.xlu1 %4545 }
 0x6f2   : > { %v8671_v4 = vpop.f32.mrb[45].mxu0 }
 0x6f3   : > { %vm4253_vm7 = vcmp.gt.f32.partialorder %v4189_v25, 0.0  ;;  %v4294_v36 = vmul.f32 %v12000_v40, %v4189_v25  ;;  %v8672_v17 = vadd.f32 %v8671_v4, %v8670_v49  ;;  %v12317_v1 = vsel %vm4252_vm6, %v4186_v31, %v4293_v30  ;;  %v8673_v42 = vpop.f32.mrb[46].mxu0  ;;  %4646 = vst.msk [vmem:[#allocation2 + $0x1f8] sm:$0xff] %vm15489_vm0, %v4614_v21  ;;  %v4551_v4 = vpop.permute.xlu0 %4550 }
 0x6f4   : > { %15948 = vst [vmem:[#allocation22_spill] sm:$0xff] %v12317_v1  ;;  %v4357_v27 = vrot.slane %v12317_v1, 7  ;;  %5893 = vst.msk [vmem:[#allocation2 + $0x1e8] sm:$0xff] %vm15489_vm0, %v12317_v1  ;;  %v8674_v54 = vpop.f32.mrb[47].mxu0 }
 0x6f5   : > { %v4033_v26 = vadd.f32 %v8672_v17, %v11998_v16  ;;  %v8675_v8 = vadd.f32 %v8674_v54, %v8673_v42  ;;  %v12324_v53 = vsel %vm4253_vm7, %v4189_v25, %v4294_v36  ;;  %v4556_v54 = vpop.permute.xlu1 %4555 }
 0x6f6   : > { %15949 = vst [vmem:[#allocation21_spill] sm:$0xff] %v12324_v53  ;;  %v4358_v55 = vrot.slane %v12324_v53, 7  ;;  %5894 = vst.msk [vmem:[#allocation2 + $0x200] sm:$0xff] %vm15489_vm0, %v12324_v53  ;;  %v12331_v31 = vsel %vm617_vm1, %v4356_v50, %v4357_v27 }
 0x6f7   : > { %15950 = vst [vmem:[#allocation25_spill] sm:$0xff] %v12331_v31  ;;  %v4194_v30 = vadd.f32 %v11971_v18, %v4033_v26  ;;  %v4036_v49 = vadd.f32 %v8675_v8, %v11998_v16  ;;  %v4615_v21 = vmul.f32 %v4546_v39, %v12331_v31 }
 0x6f8   : > { %v12338_v25 = vsel %vm617_vm1, %v4357_v27, %v4358_v55 }
 0x6f9   : > { %15951 = vst [vmem:[#allocation23_spill] sm:$0xff] %v12338_v25  ;;  %vm4254_vm8 = vcmp.gt.f32.partialorder %v4194_v30, 0.0  ;;  %v4295_v36 = vmul.f32 %v12000_v40, %v4194_v30  ;;  %v4197_v17 = vadd.f32 %v11975_v14, %v4036_v49  ;;  %v8676_v42 = vpop.f32.mrb[48].mxu0  ;;  %4647 = vst.msk [vmem:[#allocation2 + $0x210] sm:$0xff] %vm15489_vm0, %v4615_v21  ;;  %v4616_v50 = vmul.f32 %v4551_v4, %v12338_v25 }
 0x6fa   : > { %v8677_v18 = vpop.f32.mrb[49].mxu0 }
 0x6fb   : > { %vm4255_vm9 = vcmp.gt.f32.partialorder %v4197_v17, 0.0  ;;  %v4296_v39 = vmul.f32 %v12000_v40, %v4197_v17  ;;  %v8678_v26 = vadd.f32 %v8677_v18, %v8676_v42  ;;  %v12345_v8 = vsel %vm4254_vm8, %v4194_v30, %v4295_v36  ;;  %v8679_v27 = vpop.f32.mrb[50].mxu0  ;;  %4648 = vst.msk [vmem:[#allocation2 + $0x228] sm:$0xff] %vm15489_vm0, %v4616_v50  ;;  %v4561_v18 = vpop.permute.xlu0 %4560 }
 0x6fc   : > { %15952 = vst [vmem:[#allocation28_spill] sm:$0xff] %v12345_v8  ;;  %v4359_v31 = vrot.slane %v12345_v8, 7  ;;  %5895 = vst.msk [vmem:[#allocation2 + $0x218] sm:$0xff] %vm15489_vm0, %v12345_v8  ;;  %v8680_v14 = vpop.f32.mrb[51].mxu0 }
 0x6fd   : > { %v4041_v49 = vadd.f32 %v8678_v26, %v11998_v16  ;;  %v8681_v21 = vadd.f32 %v8680_v14, %v8679_v27  ;;  %v12352_v4 = vsel %vm4255_vm9, %v4197_v17, %v4296_v39  ;;  %v4566_v39 = vpop.permute.xlu1 %4565 }
 0x6fe   : > { %15953 = vst [vmem:[#allocation26_spill] sm:$0xff] %v12352_v4  ;;  %v4360_v25 = vrot.slane %v12352_v4, 7  ;;  %5896 = vst.msk [vmem:[#allocation2 + $0x230] sm:$0xff] %vm15489_vm0, %v12352_v4  ;;  %v12359_v30 = vsel %vm617_vm1, %v4358_v55, %v4359_v31 }
 0x6ff   : > { %15954 = vst [vmem:[#allocation31_spill] sm:$0xff] %v12359_v30  ;;  %v4202_v36 = vadd.f32 %v11981_v63, %v4041_v49  ;;  %v4044_v42 = vadd.f32 %v8681_v21, %v11998_v16  ;;  %v4617_v50 = vmul.f32 %v4556_v54, %v12359_v30 }
 0x700   : > { %v12366_v17 = vsel %vm617_vm1, %v4359_v31, %v4360_v25 }
 0x701   : > { %15955 = vst [vmem:[#allocation29_spill] sm:$0xff] %v12366_v17  ;;  %vm4256_vm10 = vcmp.gt.f32.partialorder %v4202_v36, 0.0  ;;  %v4297_v26 = vmul.f32 %v12000_v40, %v4202_v36  ;;  %v4205_v27 = vadd.f32 %v11985_v11, %v4044_v42  ;;  %v8682_v14 = vpop.f32.mrb[52].mxu0  ;;  %4649 = vst.msk [vmem:[#allocation2 + $0x240] sm:$0xff] %vm15489_vm0, %v4617_v50  ;;  %v4618_v63 = vmul.f32 %v4561_v18, %v12366_v17 }
 0x702   : > { %v8683_v55 = vpop.f32.mrb[53].mxu0 }
 0x703   : > { %vm4257_vm11 = vcmp.gt.f32.partialorder %v4205_v27, 0.0  ;;  %v4298_v54 = vmul.f32 %v12000_v40, %v4205_v27  ;;  %v8684_v49 = vadd.f32 %v8683_v55, %v8682_v14  ;;  %v12373_v21 = vsel %vm4256_vm10, %v4202_v36, %v4297_v26  ;;  %v8685_v31 = vpop.f32.mrb[54].mxu0  ;;  %4650 = vst.msk [vmem:[#allocation2 + $0x258] sm:$0xff] %vm15489_vm0, %v4618_v63  ;;  %v4576_v26 = vpop.permute.xlu1 %4575 }
 0x704   : > { %15956 = vst [vmem:[#allocation34_spill] sm:$0xff] %v12373_v21  ;;  %v4361_v30 = vrot.slane %v12373_v21, 7  ;;  %5897 = vst.msk [vmem:[#allocation2 + $0x248] sm:$0xff] %vm15489_vm0, %v12373_v21  ;;  %v8686_v11 = vpop.f32.mrb[55].mxu0 }
 0x705   : > { %v4049_v42 = vadd.f32 %v8684_v49, %v11998_v16  ;;  %v8687_v50 = vadd.f32 %v8686_v11, %v8685_v31  ;;  %v12380_v18 = vsel %vm4257_vm11, %v4205_v27, %v4298_v54  ;;  %v4571_v49 = vpop.permute.xlu0 %4570 }
 0x706   : > { %15957 = vst [vmem:[#allocation32_spill] sm:$0xff] %v12380_v18  ;;  %v4362_v17 = vrot.slane %v12380_v18, 7  ;;  %5898 = vst.msk [vmem:[#allocation2 + $0x260] sm:$0xff] %vm15489_vm0, %v12380_v18  ;;  %v12387_v36 = vsel %vm617_vm1, %v4360_v25, %v4361_v30 }
 0x707   : > { %15958 = vst [vmem:[#allocation37_spill] sm:$0xff] %v12387_v36  ;;  %v4210_v14 = vadd.f32 %v11979_v34, %v4049_v42  ;;  %v4052_v63 = vadd.f32 %v8687_v50, %v11998_v16  ;;  %v4619_v55 = vmul.f32 %v4566_v39, %v12387_v36 }
 0x708   : > { %v12394_v27 = vsel %vm617_vm1, %v4361_v30, %v4362_v17 }
 0x709   : > { %15959 = vst [vmem:[#allocation35_spill] sm:$0xff] %v12394_v27  ;;  %vm4258_vm12 = vcmp.gt.f32.partialorder %v4210_v14, 0.0  ;;  %v4299_v54 = vmul.f32 %v12000_v40, %v4210_v14  ;;  %v4213_v31 = vadd.f32 %v11983_v28, %v4052_v63  ;;  %v8688_v11 = vpop.f32.mrb[56].mxu0  ;;  %4651 = vst.msk [vmem:[#allocation2 + $0x270] sm:$0xff] %vm15489_vm0, %v4619_v55  ;;  %v4620_v25 = vmul.f32 %v4571_v49, %v12394_v27  ;;  %v4586_v63 = vpop.permute.xlu1 %4585 }
 0x70a   : > { %v8689_v34 = vpop.f32.mrb[57].mxu0 }
 0x70b   : > { %vm4259_vm13 = vcmp.gt.f32.partialorder %v4213_v31, 0.0  ;;  %v4300_v42 = vmul.f32 %v12000_v40, %v4213_v31  ;;  %v8690_v39 = vadd.f32 %v8689_v34, %v8688_v11  ;;  %v12401_v50 = vsel %vm4258_vm12, %v4210_v14, %v4299_v54  ;;  %v8691_v36 = vpop.f32.mrb[58].mxu0  ;;  %4652 = vst.msk [vmem:[#allocation2 + $0x288] sm:$0xff] %vm15489_vm0, %v4620_v25  ;;  %v4581_v34 = vpop.permute.xlu0 %4580 }
 0x70c   : > { %15960 = vst [vmem:[#allocation40_spill] sm:$0xff] %v12401_v50  ;;  %v4363_v30 = vrot.slane %v12401_v50, 7  ;;  %5899 = vst.msk [vmem:[#allocation2 + $0x278] sm:$0xff] %vm15489_vm0, %v12401_v50  ;;  %v8692_v28 = vpop.f32.mrb[59].mxu0 }
 0x70d   : > { %v4057_v55 = vadd.f32 %v8690_v39, %v11998_v16  ;;  %v8693_v49 = vadd.f32 %v8692_v28, %v8691_v36  ;;  %v12408_v27 = vsel %vm4259_vm13, %v4213_v31, %v4300_v42  ;;  %v4692_v28 = vpop.permute.xlu1 %4691 }
 0x70e   : > { %15961 = vst [vmem:[#allocation38_spill] sm:$0xff] %v12408_v27  ;;  %v4364_v38 = vrot.slane %v12408_v27, 7  ;;  %5900 = vst.msk [vmem:[#allocation2 + $0x290] sm:$0xff] %vm15489_vm0, %v12408_v27  ;;  %v12415_v14 = vsel %vm617_vm1, %v4362_v17, %v4363_v30 }
 0x70f   : > { %15962 = vst [vmem:[#allocation43_spill] sm:$0xff] %v12415_v14  ;;  %v4218_v54 = vadd.f32 %v11989_v41, %v4057_v55  ;;  %v4060_v11 = vadd.f32 %v8693_v49, %v11998_v16  ;;  %v4621_v25 = vmul.f32 %v4576_v26, %v12415_v14 }
 0x710   : > { %v12422_v36 = vsel %vm617_vm1, %v4363_v30, %v4364_v38 }
 0x711   : > { %15963 = vst [vmem:[#allocation41_spill] sm:$0xff] %v12422_v36  ;;  %vm4260_vm14 = vcmp.gt.f32.partialorder %v4218_v54, 0.0  ;;  %v4301_v31 = vmul.f32 %v12000_v40, %v4218_v54  ;;  %v4221_v42 = vadd.f32 %v11993_v7, %v4060_v11  ;;  %v8694_v39 = vpop.f32.mrb[60].mxu0  ;;  %4653 = vst.msk [vmem:[#allocation2 + $0x2a0] sm:$0xff] %vm15489_vm0, %v4621_v25  ;;  %v4622_v17 = vmul.f32 %v4581_v34, %v12422_v36 }
 0x712   : > { %v8695_v41 = vpop.f32.mrb[61].mxu0 }
 0x713   : > { %vm4261_vm15 = vcmp.gt.f32.partialorder %v4221_v42, 0.0  ;;  %v4302_v26 = vmul.f32 %v12000_v40, %v4221_v42  ;;  %v8696_v55 = vadd.f32 %v8695_v41, %v8694_v39  ;;  %v12429_v49 = vsel %vm4260_vm14, %v4218_v54, %v4301_v31  ;;  %v8697_v30 = vpop.f32.mrb[62].mxu0  ;;  %4654 = vst.msk [vmem:[#allocation2 + $0x2b8] sm:$0xff] %vm15489_vm0, %v4622_v17  ;;  %v4591_v31 = vpop.permute.xlu0 %4590 }
 0x714   : > { %15964 = vst [vmem:[#allocation46_spill] sm:$0xff] %v12429_v49  ;;  %v4365_v14 = vrot.slane %v12429_v49, 7  ;;  %5901 = vst.msk [vmem:[#allocation2 + $0x2a8] sm:$0xff] %vm15489_vm0, %v12429_v49  ;;  %v8698_v7 = vpop.f32.mrb[63].mxu0 }
 0x715   : > { %v4065_v11 = vadd.f32 %v8696_v55, %v11998_v16  ;;  %v8699_v25 = vadd.f32 %v8698_v7, %v8697_v30  ;;  %v12436_v34 = vsel %vm4261_vm15, %v4221_v42, %v4302_v26  ;;  %v4702_v26 = vpop.permute.xlu1 %4701 }
 0x716   : > { %15965 = vst [vmem:[#allocation44_spill] sm:$0xff] %v12436_v34  ;;  %v4366_v36 = vrot.slane %v12436_v34, 7  ;;  %5902 = vst.msk [vmem:[#allocation2 + $0x2c0] sm:$0xff] %vm15489_vm0, %v12436_v34  ;;  %v12443_v54 = vsel %vm617_vm1, %v4364_v38, %v4365_v14 }
 0x717   : > { %15966 = vst [vmem:[#allocation11_spill] sm:$0xff] %v12443_v54  ;;  %v4226_v39 = vadd.f32 %v11987_v19, %v4065_v11  ;;  %v4068_v17 = vadd.f32 %v8699_v25, %v11998_v16  ;;  %v4623_v41 = vmul.f32 %v4586_v63, %v12443_v54  ;;  %v4697_v7 = vpop.permute.xlu0 %4696  ;;  %v5124_v54 = vld [vmem:[%s15103_s1 + $0x98] sm:$0xff] }
 0x718   : > { %v12450_v42 = vsel %vm617_vm1, %v4365_v14, %v4366_v36 }
 0x719   : > { %15967 = vst [vmem:[#allocation47_spill] sm:$0xff] %v12450_v42  ;;  %vm4262_vm6 = vcmp.gt.f32.partialorder %v4226_v39, 0.0  ;;  %v4303_v55 = vmul.f32 %v12000_v40, %v4226_v39  ;;  %v4229_v30 = vadd.f32 %v11991_v29, %v4068_v17  ;;  %4655 = vst.msk [vmem:[#allocation2 + $0x2d0] sm:$0xff] %vm15489_vm0, %v4623_v41  ;;  %v4624_v38 = vmul.f32 %v4591_v31, %v12450_v42 }
 0x71b   : > { %v12456_v19 = vsel %vm4262_vm6, %v4226_v39, %v4303_v55  ;;  %vm4263_vm7 = vcmp.gt.f32.partialorder %v4229_v30, 0.0  ;;  %v4304_v16 = vmul.f32 %v12000_v40, %v4229_v30  ;;  %4656 = vst.msk [vmem:[#allocation2 + $0x2e8] sm:$0xff] %vm15489_vm0, %v4624_v38  ;;  %v4707_v39 = vpop.permute.xlu1 %4706  ;;  %v15972_v55 = vrot.slane %v12010_v35, 7  ;;  %v5122_v40 = vld [vmem:[%s15103_s1 + $0x88] sm:$0xff] }
 0x71c   : > { %15968 = vst [vmem:[#allocation8_spill] sm:$0xff] %v12456_v19  ;;  %v4367_v63 = vrot.slane %v12456_v19, 7  ;;  %5903 = vst.msk [vmem:[#allocation2 + $0x2d8] sm:$0xff] %vm15489_vm0, %v12456_v19  ;;  %v4849_v14 = vmul.f32 %v4692_v28, %v12456_v19  ;;  %v4851_v28 = vmul.f32 %v4702_v26, %v12010_v35  ;;  %v4852_v38 = vmul.f32 %v4707_v39, %v12015_v60 }
 0x71d   : > { %v12464_v29 = vsel %vm4263_vm7, %v4229_v30, %v4304_v16 }
 0x71e   : > { %15969 = vst [vmem:[#allocation9_spill] sm:$0xff] %v12464_v29  ;;  %v4368_v11 = vrot.slane %v12464_v29, 7  ;;  %5904 = vst.msk [vmem:[#allocation2 + $0x2f0] sm:$0xff] %vm15489_vm0, %v12464_v29  ;;  %4913 = vrot.lane.b32.xlu0 %v4849_v14, %s15756_s29  ;;  %v4850_v25 = vmul.f32 %v4697_v7, %v12464_v29  ;;  %v12473_v31 = vsel %vm617_vm1, %v4366_v36, %v4367_v63  ;;  %v4712_v36 = vpop.permute.xlu0 %4711 }
 0x71f   : > { %15970 = vst [vmem:[#allocation10_spill] sm:$0xff] %v12473_v31  ;;  %v4593_v17 = vmul.f32 %v12007_v46, %v12473_v31  ;;  %v4717_v7 = vpop.permute.xlu1 %4716  ;;  %v4853_v16 = vmul.f32 %v4712_v36, %v12035_v23  ;;  %v5121_v31 = vld [vmem:[%s15103_s1 + $0x80] sm:$0xff] }
 0x720   : > { %4915 = vrot.lane.b32.xlu1 %v4850_v25, %s15756_s29  ;;  %v12481_v41 = vsel %vm617_vm1, %v4367_v63, %v4368_v11  ;;  %v12487_v30 = vsel %vm617_vm1, %v4368_v11, %v15972_v55  ;;  %v4854_v14 = vmul.f32 %v4717_v7, %v12042_v5  ;;  %vm9258_vm1 = vmmov 0  }
 0x721   : > { %15971 = vst [vmem:[#allocation76_spill] sm:$0xff] %v12481_v41  ;;  %15973 = vst [vmem:[#allocation79_spill] sm:$0xff] %v12487_v30  ;;  %v4594_v46 = vmul.f32 %v12004_v33, %v12481_v41  ;;  %v4595_v26 = vmul.f32 %v12023_v51, %v12487_v30  ;;  %v5123_v41 = vld [vmem:[%s15103_s1 + $0x90] sm:$0xff] }
 0x722   : > { %4625 = vst.msk [vmem:[#allocation2] sm:$0xff] %vm15489_vm0, %v4593_v17  ;;  %4917 = vrot.lane.b32.xlu0 %v4851_v28, %s15756_s29  ;;  %v4722_v63 = vpop.permute.xlu0 %4721 }
 0x723   : > { %4626 = vst.msk [vmem:[#allocation2 + $0x18] sm:$0xff] %vm15489_vm0, %v4594_v46  ;;  %4627 = vst.msk [vmem:[#allocation2 + $0x30] sm:$0xff] %vm15489_vm0, %v4595_v26  ;;  %v4727_v33 = vpop.permute.xlu1 %4726  ;;  %v4855_v51 = vmul.f32 %v4722_v63, %v12063_v57 }
 0x724   : > { %4919 = vrot.lane.b32.xlu1 %v4852_v38, %s15756_s29  ;;  %v4856_v25 = vmul.f32 %v4727_v33, %v12070_v47 }
 0x726   : > { %4921 = vrot.lane.b32.xlu0 %v4853_v16, %s15756_s29  ;;  %v4732_v11 = vpop.permute.xlu0 %4731 }
 0x727   : > { %v4737_v39 = vpop.permute.xlu1 %4736  ;;  %v4857_v17 = vmul.f32 %v4732_v11, %v12101_v9 }
 0x728   : > { %4923 = vrot.lane.b32.xlu1 %v4854_v14, %s15756_s29  ;;  %v4858_v55 = vmul.f32 %v4737_v39, %v12108_v48 }
 0x72a   : > { %4925 = vrot.lane.b32.xlu0 %v4855_v51, %s15756_s29  ;;  %v4742_v28 = vpop.permute.xlu0 %4741 }
 0x72b   : > { %v4747_v36 = vpop.permute.xlu1 %4746  ;;  %v4859_v46 = vmul.f32 %v4742_v28, %v12129_v52 }
 0x72c   : > { %4927 = vrot.lane.b32.xlu1 %v4856_v25, %s15756_s29  ;;  %v4860_v38 = vmul.f32 %v4747_v36, %v12136_v22 }
 0x72e   : > { %4929 = vrot.lane.b32.xlu0 %v4857_v17, %s15756_s29  ;;  %v4752_v26 = vpop.permute.xlu0 %4751 }
 0x72f   : > { %v4757_v7 = vpop.permute.xlu1 %4756  ;;  %v4861_v16 = vmul.f32 %v4752_v26, %v12167_v12 }
 0x730   : > { %4931 = vrot.lane.b32.xlu1 %v4858_v55, %s15756_s29  ;;  %v4862_v14 = vmul.f32 %v4757_v7, %v12174_v61 }
 0x732   : > { %4933 = vrot.lane.b32.xlu0 %v4859_v46, %s15756_s29  ;;  %v4762_v63 = vpop.permute.xlu0 %4761 }
 0x733   : > { %v4767_v33 = vpop.permute.xlu1 %4766  ;;  %v4863_v51 = vmul.f32 %v4762_v63, %v12195_v6 }
 0x734   : > { %4935 = vrot.lane.b32.xlu1 %v4860_v38, %s15756_s29  ;;  %v4864_v25 = vmul.f32 %v4767_v33, %v12202_v20 }
 0x736   : > { %4937 = vrot.lane.b32.xlu0 %v4861_v16, %s15756_s29  ;;  %v4772_v11 = vpop.permute.xlu0 %4771 }
 0x737   : > { %v4777_v39 = vpop.permute.xlu1 %4776  ;;  %v4865_v17 = vmul.f32 %v4772_v11, %v12223_v45  ;;  %v12964_v45 = vld [vmem:[%s15103_s1 + $0x78] sm:$0xff] }
 0x738   : > { %4939 = vrot.lane.b32.xlu1 %v4862_v14, %s15756_s29  ;;  %v4866_v55 = vmul.f32 %v4777_v39, %v12232_v15 }
 0x73a   : > { %4941 = vrot.lane.b32.xlu0 %v4863_v51, %s15756_s29  ;;  %v4782_v28 = vpop.permute.xlu0 %4781 }
 0x73b   : > { %v4787_v36 = vpop.permute.xlu1 %4786  ;;  %v4867_v46 = vmul.f32 %v4782_v28, %v12261_v58 }
 0x73c   : > { %4943 = vrot.lane.b32.xlu1 %v4864_v25, %s15756_s29  ;;  %v4868_v38 = vmul.f32 %v4787_v36, %v12268_v32 }
 0x73e   : > { %4945 = vrot.lane.b32.xlu0 %v4865_v17, %s15756_s29  ;;  %v4792_v26 = vpop.permute.xlu0 %4791 }
 0x73f   : > { %v4797_v7 = vpop.permute.xlu1 %4796  ;;  %v4869_v16 = vmul.f32 %v4792_v26, %v12289_v3 }
 0x740   : > { %4947 = vrot.lane.b32.xlu1 %v4866_v55, %s15756_s29  ;;  %v4870_v14 = vmul.f32 %v4797_v7, %v12296_v13 }
 0x742   : > { %4949 = vrot.lane.b32.xlu0 %v4867_v46, %s15756_s29  ;;  %v4802_v63 = vpop.permute.xlu0 %4801 }
 0x743   : > { %v4807_v33 = vpop.permute.xlu1 %4806  ;;  %v4871_v51 = vmul.f32 %v4802_v63, %v12317_v1 }
 0x744   : > { %4951 = vrot.lane.b32.xlu1 %v4868_v38, %s15756_s29  ;;  %v4872_v25 = vmul.f32 %v4807_v33, %v12324_v53 }
 0x746   : > { %4953 = vrot.lane.b32.xlu0 %v4869_v16, %s15756_s29  ;;  %v4812_v11 = vpop.permute.xlu0 %4811 }
 0x747   : > { %v4817_v39 = vpop.permute.xlu1 %4816  ;;  %v4873_v17 = vmul.f32 %v4812_v11, %v12345_v8 }
 0x748   : > { %4955 = vrot.lane.b32.xlu1 %v4870_v14, %s15756_s29  ;;  %v4874_v55 = vmul.f32 %v4817_v39, %v12352_v4  ;;  %v12563_v39 = vld [vmem:[%s15103_s1 + $0x8] sm:$0xff] }
 0x74a   : > { %4957 = vrot.lane.b32.xlu0 %v4871_v51, %s15756_s29  ;;  %v4822_v28 = vpop.permute.xlu0 %4821 }
 0x74b   : > { %v4827_v36 = vpop.permute.xlu1 %4826  ;;  %v4875_v46 = vmul.f32 %v4822_v28, %v12373_v21  ;;  %v12575_v28 = vld [vmem:[%s15103_s1 + $0x10] sm:$0xff] }
 0x74c   : > { %4959 = vrot.lane.b32.xlu1 %v4872_v25, %s15756_s29  ;;  %v4876_v38 = vmul.f32 %v4827_v36, %v12380_v18  ;;  %v12557_v25 = vld [vmem:[%s15103_s1] sm:$0xff] }
 0x74d   : > { %v12587_v36 = vld [vmem:[%s15103_s1 + $0x20] sm:$0xff] }
 0x74e   : > { %4961 = vrot.lane.b32.xlu0 %v4873_v17, %s15756_s29  ;;  %v4832_v26 = vpop.permute.xlu0 %4831  ;;  %v12569_v17 = vld [vmem:[%s15103_s1 + $0x18] sm:$0xff] }
 0x74f   : > { %v4837_v7 = vpop.permute.xlu1 %4836  ;;  %v4877_v16 = vmul.f32 %v4832_v26, %v12401_v50  ;;  %v12599_v26 = vld [vmem:[%s15103_s1 + $0x30] sm:$0xff] }
 0x750   : > { %4963 = vrot.lane.b32.xlu1 %v4874_v55, %s15756_s29  ;;  %v4878_v14 = vmul.f32 %v4837_v7, %v12408_v27  ;;  %v12581_v55 = vld [vmem:[%s15103_s1 + $0x28] sm:$0xff]  ;;  %v12611_v7 = vld [vmem:[%s15103_s1 + $0x40] sm:$0xff] }
 0x752   : > { %4965 = vrot.lane.b32.xlu0 %v4875_v46, %s15756_s29  ;;  %v4842_v63 = vpop.permute.xlu0 %4841  ;;  %v12593_v46 = vld [vmem:[%s15103_s1 + $0x38] sm:$0xff] }
 0x753   : > { %v4847_v33 = vpop.permute.xlu1 %4846  ;;  %v4879_v51 = vmul.f32 %v4842_v63, %v12429_v49  ;;  %v12623_v63 = vld [vmem:[%s15103_s1 + $0x50] sm:$0xff] }
 0x754   : > { %4967 = vrot.lane.b32.xlu1 %v4876_v38, %s15756_s29  ;;  %v4880_v11 = vmul.f32 %v4847_v33, %v12436_v34  ;;  %v12605_v38 = vld [vmem:[%s15103_s1 + $0x48] sm:$0xff]  ;;  %v12635_v33 = vld [vmem:[%s15103_s1 + $0x60] sm:$0xff] }
 0x755   : > { %v9145_v34 = vld [vmem:[%s15103_s1 + $0xa8] sm:$0xff] }
 0x756   : > { %4969 = vrot.lane.b32.xlu0 %v4877_v16, %s15756_s29  ;;  %v12617_v16 = vld [vmem:[%s15103_s1 + $0x58] sm:$0xff] }
 0x758   : > { %4971 = vrot.lane.b32.xlu1 %v4878_v14, %s15756_s29  ;;  %v12629_v14 = vld [vmem:[%s15103_s1 + $0x68] sm:$0xff] }
 0x75a   : > { %4973 = vrot.lane.b32.xlu0 %v4879_v51, %s15756_s29  ;;  %v12641_v51 = vld [vmem:[%s15103_s1 + $0x78] sm:$0xff] }
 0x75c   : > { %4975 = vrot.lane.b32.xlu1 %v4880_v11, %s15756_s29  ;;  %v5119_v11 = vld [vmem:[%s15103_s1 + $0x70] sm:$0xff] }
 0x75e   : > { %5139 = vperm.xlu0 %9027, %v12557_v25  }
 0x760   : > { %5144 = vperm.xlu1 %9028, %v12563_v39  }
 0x762   : > { %5154 = vperm.xlu0 %9027, %v12569_v17  }
 0x764   : > { %5149 = vperm.xlu1 %9028, %v12575_v28  }
 0x766   : > { %5164 = vperm.xlu0 %9027, %v12581_v55  }
 0x768   : > { %5159 = vperm.xlu1 %9028, %v12587_v36  }
 0x76a   : > { %5174 = vperm.xlu0 %9027, %v12593_v46  }
 0x76c   : > { %5169 = vperm.xlu1 %9028, %v12599_v26  }
 0x76e   : > { %5184 = vperm.xlu0 %9027, %v12605_v38  }
 0x770   : > { %5179 = vperm.xlu1 %9028, %v12611_v7  }
 0x772   : > { %5194 = vperm.xlu0 %9027, %v12617_v16  }
 0x774   : > { %5189 = vperm.xlu1 %9028, %v12623_v63  }
 0x776   : > { %5204 = vperm.xlu0 %9027, %v12629_v14  }
 0x778   : > { %5199 = vperm.xlu1 %9028, %v12635_v33  }
 0x77a   : > { %5214 = vperm.xlu0 %9027, %v12641_v51  }
 0x77c   : > { %5209 = vperm.xlu1 %9028, %v5119_v11   ;;  %v5125_v11 = vld [vmem:[%s15103_s1 + $0xa0] sm:$0xff] }
 0x77e   : > { %5224 = vperm.xlu0 %9027, %v5122_v40   ;;  %v5127_v40 = vld [vmem:[%s15103_s1 + $0xb0] sm:$0xff] }
 0x780   : > { %5219 = vperm.xlu1 %9028, %v5121_v31   ;;  %v9146_v31 = vld [vmem:[%s15103_s1 + $0xb8] sm:$0xff] }
 0x782   : > { %5234 = vperm.xlu0 %9027, %v5124_v54   ;;  %v5129_v54 = vld [vmem:[%s15103_s1 + $0xc0] sm:$0xff] }
 0x784   : > { %5229 = vperm.xlu1 %9028, %v5123_v41   ;;  %v9147_v41 = vld [vmem:[%s15103_s1 + $0xc8] sm:$0xff] }
 0x786   : > { %5244 = vperm.xlu0 %9027, %v9145_v34  }
 0x788   : > { %5239 = vperm.xlu1 %9028, %v5125_v11   ;;  %v5131_v11 = vld [vmem:[%s15103_s1 + $0xd0] sm:$0xff] }
 0x78a   : > { %5254 = vperm.xlu0 %9027, %v9146_v31  }
 0x78c   : > { %5249 = vperm.xlu1 %9028, %v5127_v40   ;;  %v9148_v40 = vld [vmem:[%s15103_s1 + $0xd8] sm:$0xff] }
 0x78e   : > { %5264 = vperm.xlu0 %9027, %v9147_v41  }
 0x790   : > { %v4914_v34 = vpop.permute.xlu0 %4913  ;;  %5259 = vperm.xlu1 %9028, %v5129_v54   ;;  %v5133_v54 = vld [vmem:[%s15103_s1 + $0xe0] sm:$0xff] }
 0x791   : > { %5009 = vst.msk [vmem:[#allocation2] sm:$0xff] %vm1259_vm2, %v4914_v34  ;;  %v9149_v34 = vld [vmem:[%s15103_s1 + $0xe8] sm:$0xff] }
 0x792   : > { %v4916_v42 = vpop.permute.xlu1 %4915  ;;  %5274 = vperm.xlu0 %9027, %v9148_v40  }
 0x793   : > { %5010 = vst.msk [vmem:[#allocation2 + $0x18] sm:$0xff] %vm1259_vm2, %v4916_v42  ;;  %v5135_v42 = vld [vmem:[%s15103_s1 + $0xf0] sm:$0xff] }
 0x794   : > { %v4918_v31 = vpop.permute.xlu0 %4917  ;;  %5269 = vperm.xlu1 %9028, %v5131_v11  }
 0x795   : > { %5011 = vst.msk [vmem:[#allocation2 + $0x30] sm:$0xff] %vm1259_vm2, %v4918_v31  ;;  %v15974_v31 = vmov 5  }
 0x796   : > { %v4920_v41 = vpop.permute.xlu1 %4919  ;;  %5284 = vperm.xlu0 %9027, %v9149_v34  }
 0x797   : > { %5012 = vst.msk [vmem:[#allocation2 + $0x48] sm:$0xff] %vm1259_vm2, %v4920_v41 }
 0x798   : > { %5279 = vperm.xlu1 %9028, %v5133_v54   ;;  %v4922_v40 = vpop.permute.xlu0 %4921 }
 0x799   : > { %5013 = vst.msk [vmem:[#allocation2 + $0x60] sm:$0xff] %vm1259_vm2, %v4922_v40 }
 0x79a   : > { %v4924_v11 = vpop.permute.xlu1 %4923  ;;  %9029 = vset.pattern.permute.xlu0 %v15974_v31 }
 0x79b   : > { %5014 = vst.msk [vmem:[#allocation2 + $0x78] sm:$0xff] %vm1259_vm2, %v4924_v11  ;;  %5939 = vperm.xlu0 %9029, %v12557_v25  }
 0x79c   : > { %5289 = vperm.xlu1 %9028, %v5135_v42   ;;  %v4926_v49 = vpop.permute.xlu0 %4925 }
 0x79d   : > { %5015 = vst.msk [vmem:[#allocation2 + $0x90] sm:$0xff] %vm1259_vm2, %v4926_v49  ;;  %v15975_v49 = vmov 6  }
 0x79e   : > { %v4928_v41 = vpop.permute.xlu1 %4927 }
 0x79f   : > { %5016 = vst.msk [vmem:[#allocation2 + $0xa8] sm:$0xff] %vm1259_vm2, %v4928_v41  ;;  %5954 = vperm.xlu0 %9029, %v12569_v17   ;;  %v15976_v41 = vmov 7  }
 0x7a0   : > { %9030 = vset.pattern.permute.xlu1 %v15974_v31  ;;  %v4930_v54 = vpop.permute.xlu0 %4929 }
 0x7a1   : > { %5017 = vst.msk [vmem:[#allocation2 + $0xc0] sm:$0xff] %vm1259_vm2, %v4930_v54  ;;  %5944 = vperm.xlu1 %9030, %v12563_v39  }
 0x7a2   : > { %v4932_v34 = vpop.permute.xlu1 %4931 }
 0x7a3   : > { %5018 = vst.msk [vmem:[#allocation2 + $0xd8] sm:$0xff] %vm1259_vm2, %v4932_v34  ;;  %5969 = vperm.xlu0 %9029, %v12599_v26  }
 0x7a4   : > { %v4934_v40 = vpop.permute.xlu0 %4933 }
 0x7a5   : > { %5019 = vst.msk [vmem:[#allocation2 + $0xf0] sm:$0xff] %vm1259_vm2, %v4934_v40  ;;  %9031 = vset.pattern.permute.xlu1 %v15975_v49 }
 0x7a6   : > { %6323 = vperm.xlu1 %9031, %v12557_v25   ;;  %v4936_v42 = vpop.permute.xlu1 %4935 }
 0x7a7   : > { %5020 = vst.msk [vmem:[#allocation2 + $0x108] sm:$0xff] %vm1259_vm2, %v4936_v42  ;;  %5984 = vperm.xlu0 %9029, %v12605_v38  }
 0x7a8   : > { %v4938_v11 = vpop.permute.xlu0 %4937 }
 0x7a9   : > { %5021 = vst.msk [vmem:[#allocation2 + $0x120] sm:$0xff] %vm1259_vm2, %v4938_v11 }
 0x7aa   : > { %9032 = vset.pattern.permute.xlu1 %v15976_v41  ;;  %v4940_v54 = vpop.permute.xlu1 %4939 }
 0x7ab   : > { %5022 = vst.msk [vmem:[#allocation2 + $0x138] sm:$0xff] %vm1259_vm2, %v4940_v54  ;;  %6707 = vperm.xlu1 %9032, %v12557_v25   ;;  %9047 = vset.pattern.permute.xlu0 %v15976_v41  ;;  %v15977_v54 = vmov 3  }
 0x7ac   : > { %6717 = vperm.xlu0 %9047, %v12575_v28   ;;  %v4942_v34 = vpop.permute.xlu0 %4941 }
 0x7ad   : > { %5023 = vst.msk [vmem:[#allocation2 + $0x150] sm:$0xff] %vm1259_vm2, %v4942_v34 }
 0x7ae   : > { %v4944_v40 = vpop.permute.xlu1 %4943 }
 0x7af   : > { %5024 = vst.msk [vmem:[#allocation2 + $0x168] sm:$0xff] %vm1259_vm2, %v4944_v40  ;;  %6712 = vperm.xlu1 %9032, %v12563_v39  }
 0x7b0   : > { %6732 = vperm.xlu0 %9047, %v12581_v55   ;;  %v4946_v42 = vpop.permute.xlu0 %4945 }
 0x7b1   : > { %5025 = vst.msk [vmem:[#allocation2 + $0x180] sm:$0xff] %vm1259_vm2, %v4946_v42 }
 0x7b2   : > { %v4948_v11 = vpop.permute.xlu1 %4947 }
 0x7b3   : > { %5026 = vst.msk [vmem:[#allocation2 + $0x198] sm:$0xff] %vm1259_vm2, %v4948_v11  ;;  %9033 = vset.pattern.permute.xlu1 %v15977_v54 }
 0x7b4   : > { %5528 = vperm.xlu1 %9033, %v12563_v39   ;;  %6747 = vperm.xlu0 %9047, %v12611_v7   ;;  %v4950_v34 = vpop.permute.xlu0 %4949 }
 0x7b5   : > { %5027 = vst.msk [vmem:[#allocation2 + $0x1b0] sm:$0xff] %vm1259_vm2, %v4950_v34 }
 0x7b6   : > { %v4952_v40 = vpop.permute.xlu1 %4951 }
 0x7b7   : > { %5028 = vst.msk [vmem:[#allocation2 + $0x1c8] sm:$0xff] %vm1259_vm2, %v4952_v40 }
 0x7b8   : > { %9034 = vset.pattern.permute.xlu1 %v15974_v31  ;;  %6762 = vperm.xlu0 %9047, %v12617_v16   ;;  %v4954_v42 = vpop.permute.xlu0 %4953 }
 0x7b9   : > { %5029 = vst.msk [vmem:[#allocation2 + $0x1e0] sm:$0xff] %vm1259_vm2, %v4954_v42  ;;  %5949 = vperm.xlu1 %9034, %v12575_v28  }
 0x7ba   : > { %v4956_v11 = vpop.permute.xlu1 %4955 }
 0x7bb   : > { %5030 = vst.msk [vmem:[#allocation2 + $0x1f8] sm:$0xff] %vm1259_vm2, %v4956_v11 }
 0x7bc   : > { %9054 = vset.pattern.permute.xlu0 %v15975_v49  ;;  %v4958_v27 = vpop.permute.xlu0 %4957 }
 0x7bd   : > { %5031 = vst.msk [vmem:[#allocation2 + $0x210] sm:$0xff] %vm1259_vm2, %v4958_v27  ;;  %9035 = vset.pattern.permute.xlu1 %v15975_v49  ;;  %6328 = vperm.xlu0 %9054, %v12563_v39  }
 0x7be   : > { %6333 = vperm.xlu1 %9035, %v12575_v28   ;;  %v4960_v34 = vpop.permute.xlu1 %4959 }
 0x7bf   : > { %5032 = vst.msk [vmem:[#allocation2 + $0x228] sm:$0xff] %vm1259_vm2, %v4960_v34 }
 0x7c0   : > { %v4962_v40 = vpop.permute.xlu0 %4961 }
 0x7c1   : > { %5033 = vst.msk [vmem:[#allocation2 + $0x240] sm:$0xff] %vm1259_vm2, %v4962_v40  ;;  %6343 = vperm.xlu0 %9054, %v12587_v36  }
 0x7c2   : > { %6338 = vperm.xlu1 %9035, %v12569_v17   ;;  %v4964_v42 = vpop.permute.xlu1 %4963 }
 0x7c3   : > { %5034 = vst.msk [vmem:[#allocation2 + $0x258] sm:$0xff] %vm1259_vm2, %v4964_v42 }
 0x7c4   : > { %v4966_v27 = vpop.permute.xlu0 %4965 }
 0x7c5   : > { %5035 = vst.msk [vmem:[#allocation2 + $0x270] sm:$0xff] %vm1259_vm2, %v4966_v27  ;;  %6358 = vperm.xlu0 %9054, %v12593_v46  }
 0x7c6   : > { %9036 = vset.pattern.permute.xlu1 %v15976_v41  ;;  %v4968_v39 = vpop.permute.xlu1 %4967 }
 0x7c7   : > { %5036 = vst.msk [vmem:[#allocation2 + $0x288] sm:$0xff] %vm1259_vm2, %v4968_v39  ;;  %6722 = vperm.xlu1 %9036, %v12569_v17  }
 0x7c8   : > { %v4970_v11 = vpop.permute.xlu0 %4969 }
 0x7c9   : > { %5037 = vst.msk [vmem:[#allocation2 + $0x2a0] sm:$0xff] %vm1259_vm2, %v4970_v11  ;;  %6373 = vperm.xlu0 %9054, %v12623_v63  }
 0x7ca   : > { %v4972_v34 = vpop.permute.xlu1 %4971 }
 0x7cb   : > { %5038 = vst.msk [vmem:[#allocation2 + $0x2b8] sm:$0xff] %vm1259_vm2, %v4972_v34  ;;  %9037 = vset.pattern.permute.xlu1 %v15977_v54 }
 0x7cc   : > { %5533 = vperm.xlu1 %9037, %v12575_v28   ;;  %v4974_v40 = vpop.permute.xlu0 %4973 }
 0x7cd   : > { %5039 = vst.msk [vmem:[#allocation2 + $0x2d0] sm:$0xff] %vm1259_vm2, %v4974_v40  ;;  %6388 = vperm.xlu0 %9054, %v12629_v14  }
 0x7ce   : > { %v4976_v42 = vpop.permute.xlu1 %4975 }
 0x7cf   : > { %5040 = vst.msk [vmem:[#allocation2 + $0x2e8] sm:$0xff] %vm1259_vm2, %v4976_v42 }
 0x7d0   : > { %9038 = vset.pattern.permute.xlu1 %v15974_v31 }
 0x7d1   : > { %5959 = vperm.xlu1 %9038, %v12587_v36   ;;  %9058 = vset.pattern.permute.xlu0 %v15977_v54 }
 0x7d2   : > { %5523 = vperm.xlu0 %9058, %v12557_v25  }
 0x7d5   : > { %5964 = vperm.xlu1 %9038, %v12581_v55  }
 0x7d6   : > { %5538 = vperm.xlu0 %9058, %v12569_v17  }
 0x7d9   : > { %9039 = vset.pattern.permute.xlu1 %v15975_v49 }
 0x7da   : > { %6348 = vperm.xlu1 %9039, %v12581_v55   ;;  %5553 = vperm.xlu0 %9058, %v12599_v26  }
 0x7dd   : > { %v12768_v28 = vpop.permute.xlu0 %5139 }
 0x7de   : > { %9040 = vset.pattern.permute.xlu1 %v15976_v41  ;;  %5568 = vperm.xlu0 %9058, %v12605_v38  }
 0x7df   : > { %6727 = vperm.xlu1 %9040, %v12587_v36   ;;  %v12773_v27 = vpop.permute.xlu1 %5144 }
 0x7e1   : > { %v12775_v25 = vpop.permute.xlu0 %5154 }
 0x7e2   : > { %5583 = vperm.xlu0 %9058, %v12635_v33  }
 0x7e3   : > { %9041 = vset.pattern.permute.xlu1 %v15977_v54  ;;  %v12779_v17 = vpop.permute.xlu1 %5149 }
 0x7e4   : > { %5543 = vperm.xlu1 %9041, %v12587_v36  }
 0x7e5   : > { %v12782_v39 = vpop.permute.xlu0 %5164 }
 0x7e6   : > { %15978 = vst [vmem:[#allocation81_spill] sm:$0xff] %v12782_v39  ;;  %5598 = vperm.xlu0 %9058, %v12641_v51  }
 0x7e7   : > { %v12785_v11 = vpop.permute.xlu1 %5159 }
 0x7e8   : > { %5548 = vperm.xlu1 %9041, %v12581_v55  }
 0x7e9   : > { %v12788_v34 = vpop.permute.xlu0 %5174 }
 0x7eb   : > { %v12790_v40 = vpop.permute.xlu1 %5169 }
 0x7ec   : > { %15979 = vst [vmem:[#allocation78_spill] sm:$0xff] %v12790_v40  ;;  %9042 = vset.pattern.permute.xlu1 %v15974_v31 }
 0x7ed   : > { %5974 = vperm.xlu1 %9042, %v12593_v46   ;;  %v12794_v42 = vpop.permute.xlu0 %5184 }
 0x7ee   : > { %15980 = vst [vmem:[#allocation83_spill] sm:$0xff] %v12794_v42 }
 0x7ef   : > { %v12796_v50 = vpop.permute.xlu1 %5179 }
 0x7f1   : > { %9043 = vset.pattern.permute.xlu1 %v15975_v49  ;;  %v12799_v36 = vpop.permute.xlu0 %5194 }
 0x7f2   : > { %6353 = vperm.xlu1 %9043, %v12599_v26  }
 0x7f3   : > { %v12802_v51 = vpop.permute.xlu1 %5189 }
 0x7f4   : > { %15981 = vst [vmem:[#allocation80_spill] sm:$0xff] %v12802_v51 }
 0x7f5   : > { %v12804_v55 = vpop.permute.xlu0 %5204 }
 0x7f6   : > { %15982 = vst [vmem:[#allocation85_spill] sm:$0xff] %v12804_v55  ;;  %9044 = vset.pattern.permute.xlu1 %v15976_v41 }
 0x7f7   : > { %6737 = vperm.xlu1 %9044, %v12599_v26   ;;  %v12808_v18 = vpop.permute.xlu1 %5199 }
 0x7f8   : > { %15983 = vst [vmem:[#allocation82_spill] sm:$0xff] %v12808_v18 }
 0x7f9   : > { %v12810_v21 = vpop.permute.xlu0 %5214 }
 0x7fa   : > { %15984 = vst [vmem:[#allocation87_spill] sm:$0xff] %v12810_v21 }
 0x7fb   : > { %6742 = vperm.xlu1 %9044, %v12593_v46   ;;  %v12813_v4 = vpop.permute.xlu1 %5209 }
 0x7fc   : > { %15985 = vst [vmem:[#allocation84_spill] sm:$0xff] %v12813_v4 }
 0x7fd   : > { %v12815_v8 = vpop.permute.xlu0 %5224 }
 0x7fe   : > { %15986 = vst [vmem:[#allocation89_spill] sm:$0xff] %v12815_v8 }
 0x7ff   : > { %9045 = vset.pattern.permute.xlu1 %v15977_v54  ;;  %v12818_v53 = vpop.permute.xlu1 %5219 }
 0x800   : > { %15987 = vst [vmem:[#allocation86_spill] sm:$0xff] %v12818_v53  ;;  %5558 = vperm.xlu1 %9045, %v12593_v46  }
 0x801   : > { %v12821_v3 = vpop.permute.xlu0 %5234 }
 0x802   : > { %15988 = vst [vmem:[#allocation91_spill] sm:$0xff] %v12821_v3 }
 0x803   : > { %v12823_v1 = vpop.permute.xlu1 %5229 }
 0x804   : > { %15989 = vst [vmem:[#allocation88_spill] sm:$0xff] %v12823_v1  ;;  %9046 = vset.pattern.permute.xlu1 %v15974_v31 }
 0x805   : > { %5979 = vperm.xlu1 %9046, %v12611_v7   ;;  %v12827_v26 = vpop.permute.xlu0 %5244 }
 0x806   : > { %15990 = vst [vmem:[#allocation93_spill] sm:$0xff] %v12827_v26 }
 0x807   : > { %v12829_v21 = vpop.permute.xlu1 %5239 }
 0x808   : > { %15991 = vst [vmem:[#allocation90_spill] sm:$0xff] %v12829_v21 }
 0x809   : > { %9048 = vset.pattern.permute.xlu1 %v15975_v49  ;;  %v12832_v13 = vpop.permute.xlu0 %5254 }
 0x80a   : > { %15992 = vst [vmem:[#allocation95_spill] sm:$0xff] %v12832_v13  ;;  %6363 = vperm.xlu1 %9048, %v12611_v7   ;;  %v15444_v13 = vrot.slane %v12015_v60, 1 }
 0x80b   : > { %v12835_v53 = vpop.permute.xlu1 %5249 }
 0x80c   : > { %15993 = vst [vmem:[#allocation92_spill] sm:$0xff] %v12835_v53 }
 0x80d   : > { %v12837_v46 = vpop.permute.xlu0 %5264 }
 0x80e   : > { %15994 = vst [vmem:[#allocation97_spill] sm:$0xff] %v12837_v46  ;;  %6368 = vperm.xlu1 %9048, %v12605_v38   ;;  %v15443_v46 = vrot.slane %v12010_v35, 1 }
 0x80f   : > { %v12840_v1 = vpop.permute.xlu1 %5259 }
 0x810   : > { %15995 = vst [vmem:[#allocation94_spill] sm:$0xff] %v12840_v1 }
 0x811   : > { %v12842_v3 = vpop.permute.xlu0 %5274 }
 0x812   : > { %15996 = vst [vmem:[#allocation99_spill] sm:$0xff] %v12842_v3  ;;  %9049 = vset.pattern.permute.xlu1 %v15976_v41 }
 0x813   : > { %6752 = vperm.xlu1 %9049, %v12605_v38   ;;  %v12846_v21 = vpop.permute.xlu1 %5269  ;;  %v12862_v38 = vsel %vm1324_vm3, %v15443_v46, %v15444_v13  ;;  %v15450_v46 = vrot.slane %v12464_v29, 1 }
 0x814   : > { %15997 = vst [vmem:[#allocation96_spill] sm:$0xff] %v12846_v21  ;;  %16000 = vst [vmem:[#allocation77_spill] sm:$0xff] %v12862_v38 }
 0x815   : > { %v12848_v26 = vpop.permute.xlu0 %5284 }
 0x816   : > { %15998 = vst [vmem:[#allocation98_spill] sm:$0xff] %v12848_v26 }
 0x817   : > { %9050 = vset.pattern.permute.xlu1 %v15977_v54  ;;  %v12852_v53 = vpop.permute.xlu1 %5279 }
 0x818   : > { %15999 = vst [vmem:[#allocation100_spill] sm:$0xff] %v12852_v53  ;;  %5563 = vperm.xlu1 %9050, %v12611_v7  }
 0x81a   : > { %v5940_v21 = vpop.permute.xlu0 %5939 }
 0x81b   : > { %v6097_v26 = vmul.f32 %v5940_v21, %v12862_v38  ;;  %v12865_v1 = vpop.permute.xlu1 %5289 }
 0x81c   : > { %16001 = vst [vmem:[#allocation75_spill] sm:$0xff] %v12865_v1  ;;  %9051 = vset.pattern.permute.xlu1 %v15974_v31 }
 0x81d   : > { %5989 = vperm.xlu1 %9051, %v12623_v63   ;;  %6161 = vrot.lane.b32.xlu0 %v6097_v26, %s15756_s29  ;;  %v15449_v26 = vrot.slane %v12456_v19, 1 }
 0x81e   : > { %v12870_v7 = vpop.permute.xlu0 %5954 }
 0x81f   : > { %v12891_v8 = vsel %vm1324_vm3, %v15449_v26, %v15450_v46 }
 0x820   : > { %v12872_v53 = vpop.permute.xlu1 %5944  ;;  %16004 = vst [vmem:[#allocation105_spill] sm:$0xff] %v12891_v8  ;;  %v5297_v32 = vmul.f32 %v12768_v28, %v12891_v8 }
 0x821   : > { %5994 = vperm.xlu1 %9051, %v12617_v16  }
 0x822   : > { %v12875_v3 = vpop.permute.xlu0 %5969 }
 0x823   : > { %16002 = vst [vmem:[#allocation49_spill] sm:$0xff] %v12875_v3 }
 0x825   : > { %9052 = vset.pattern.permute.xlu1 %v15975_v49  ;;  %v6324_v21 = vpop.permute.xlu1 %6323 }
 0x826   : > { %v6481_v13 = vmul.f32 %v6324_v21, %v12049_v44  ;;  %6378 = vperm.xlu1 %9052, %v12617_v16   ;;  %v12881_v1 = vpop.permute.xlu0 %5984 }
 0x827   : > { %16003 = vst [vmem:[#allocation114_spill] sm:$0xff] %v12881_v1  ;;  %v5502_v1 = vld [vmem:[%s15103_s1 + $0x68] sm:$0xff] }
 0x828   : > { %6545 = vrot.lane.b32.xlu0 %v6481_v13, %s15787_s15 }
 0x82a   : > { %9053 = vset.pattern.permute.xlu1 %v15976_v41  ;;  %v6708_v21 = vpop.permute.xlu1 %6707 }
 0x82b   : > { %6757 = vperm.xlu1 %9053, %v12623_v63   ;;  %v12897_v55 = vpop.permute.xlu0 %6717  ;;  %v6865_v13 = vmul.f32 %v6708_v21, %v12035_v23 }
 0x82c   : > { %5361 = vrot.lane.b32.xlu0 %v5297_v32, %s15787_s15 }
 0x82e   : > { %v12901_v58 = vpop.permute.xlu1 %6712 }
 0x82f   : > { %9055 = vset.pattern.permute.xlu1 %v15977_v54  ;;  %v12904_v26 = vpop.permute.xlu0 %6732 }
 0x830   : > { %16005 = vst [vmem:[#allocation24_spill] sm:$0xff] %v12904_v26  ;;  %5573 = vperm.xlu1 %9055, %v12623_v63   ;;  %6929 = vrot.lane.b32.xlu0 %v6865_v13, %s15806_s16  ;;  %v5043_v26 = vrot.slane %v12035_v23, 1 }
 0x833   : > { %v12908_v28 = vpop.permute.xlu1 %5528  ;;  %v12910_v46 = vpop.permute.xlu0 %6747 }
 0x834   : > { %5578 = vperm.xlu1 %9055, %v12617_v16  }
 0x837   : > { %v12913_v8 = vpop.permute.xlu0 %6762 }
 0x838   : > { %9056 = vset.pattern.permute.xlu1 %v15974_v31  ;;  %v12916_v32 = vpop.permute.xlu1 %5949 }
 0x839   : > { %6004 = vperm.xlu1 %9056, %v12629_v14  }
 0x83c   : > { %v12919_v21 = vpop.permute.xlu0 %6328 }
 0x83d   : > { %9057 = vset.pattern.permute.xlu1 %v15975_v49  ;;  %v12922_v63 = vpop.permute.xlu1 %6333 }
 0x83e   : > { %6383 = vperm.xlu1 %9057, %v12635_v33  }
 0x840   : > { %v6344_v13 = vpop.permute.xlu0 %6343 }
 0x841   : > { %v6339_v19 = vpop.permute.xlu1 %6338 }
 0x842   : > { %9059 = vset.pattern.permute.xlu1 %v15976_v41  ;;  %v6484_v39 = vmul.f32 %v6339_v19, %v12085_v10 }
 0x843   : > { %6767 = vperm.xlu1 %9059, %v12635_v33   ;;  %v12943_v33 = vld [vmem:[%s15103_s1 + $0x70] sm:$0xff] }
 0x844   : > { %v12927_v16 = vpop.permute.xlu0 %6358  ;;  %16008 = vst [vmem:[#allocation50_spill] sm:$0xff] %v12943_v33 }
 0x846   : > { %v6723_v51 = vpop.permute.xlu1 %6722 }
 0x847   : > { %6772 = vperm.xlu1 %9059, %v12629_v14   ;;  %v6868_v19 = vmul.f32 %v6723_v51, %v12070_v47  ;;  %v13010_v51 = vld [vmem:[%s15103_s1 + $0x88] sm:$0xff] }
 0x848   : > { %v12930_v42 = vpop.permute.xlu0 %6373  ;;  %16015 = vst [vmem:[#allocation111_spill] sm:$0xff] %v13010_v51 }
 0x849   : > { %16006 = vst [vmem:[#allocation115_spill] sm:$0xff] %v12930_v42 }
 0x84b   : > { %9060 = vset.pattern.permute.xlu1 %v15977_v54  ;;  %v12936_v4 = vpop.permute.xlu1 %5533 }
 0x84c   : > { %5588 = vperm.xlu1 %9060, %v5502_v1   ;;  %v12938_v15 = vpop.permute.xlu0 %6388  ;;  %v12957_v1 = vld [vmem:[%s15103_s1 + $0x90] sm:$0xff] }
 0x84d   : > { %16007 = vst [vmem:[#allocation109_spill] sm:$0xff] %v12938_v15  ;;  %v5044_v15 = vrot.slane %v12042_v5, 1 }
 0x850   : > { %9061 = vset.pattern.permute.xlu1 %v15974_v31  ;;  %v12946_v14 = vpop.permute.xlu1 %5959 }
 0x851   : > { %6009 = vperm.xlu1 %9061, %v12943_v33   ;;  %v5524_v42 = vpop.permute.xlu0 %5523 }
 0x852   : > { %v5681_v40 = vmul.f32 %v5524_v42, %v12487_v30 }
 0x854   : > { %v12950_v3 = vpop.permute.xlu1 %5964  ;;  %5745 = vrot.lane.b32.xlu0 %v5681_v40, %s15806_s16  ;;  %v16010_v40 = vrot.slane %v12063_v57, 1 }
 0x855   : > { %16009 = vst [vmem:[#allocation120_spill] sm:$0xff] %v12950_v3  ;;  %9062 = vset.pattern.permute.xlu1 %v15975_v49 }
 0x856   : > { %6393 = vperm.xlu1 %9062, %v12943_v33   ;;  %v12971_v42 = vsel %vm1324_vm3, %v5044_v15, %v16010_v40  ;;  %v16012_v40 = vrot.slane %v12015_v60, 1  ;;  %v5539_v60 = vpop.permute.xlu0 %5538 }
 0x857   : > { %16011 = vst [vmem:[#allocation106_spill] sm:$0xff] %v12971_v42  ;;  %v6100_v18 = vmul.f32 %v12870_v7, %v12971_v42 }
 0x858   : > { %5613 = vperm.xlu0 %9058, %v12957_v1   ;;  %v12988_v7 = vsel %vm1324_vm3, %v16012_v40, %v5043_v26 }
 0x859   : > { %v12973_v30 = vpop.permute.xlu1 %6348  ;;  %16013 = vst [vmem:[#allocation27_spill] sm:$0xff] %v12988_v7 }
 0x85a   : > { %6398 = vperm.xlu1 %9062, %v12964_v45  }
 0x85c   : > { %6167 = vrot.lane.b32.xlu0 %v6100_v18, %s15756_s29  ;;  %v5300_v18 = vmul.f32 %v12775_v25, %v12988_v7  ;;  %v5684_v25 = vmul.f32 %v5539_v60, %v12056_v2 }
 0x85e   : > { %9063 = vset.pattern.permute.xlu1 %v15976_v41  ;;  %v6728_v3 = vpop.permute.xlu1 %6727 }
 0x85f   : > { %6782 = vperm.xlu1 %9063, %v12964_v45  }
 0x860   : > { %6551 = vrot.lane.b32.xlu0 %v6484_v39, %s15787_s15  ;;  %v12999_v39 = vld [vmem:[%s15103_s1 + $0x80] sm:$0xff] }
 0x863   : > { %9064 = vset.pattern.permute.xlu1 %v15977_v54  ;;  %v5544_v23 = vpop.permute.xlu1 %5543 }
 0x864   : > { %5593 = vperm.xlu1 %9064, %v12943_v33   ;;  %5367 = vrot.lane.b32.xlu0 %v5300_v18, %s15787_s15  ;;  %v13017_v33 = vld [vmem:[%s15103_s1 + $0xa8] sm:$0xff] }
 0x867   : > { %v13001_v40 = vpop.permute.xlu1 %5548 }
 0x868   : > { %16014 = vst [vmem:[#allocation122_spill] sm:$0xff] %v13001_v40  ;;  %9065 = vset.pattern.permute.xlu1 %v15974_v31  ;;  %6935 = vrot.lane.b32.xlu0 %v6868_v19, %s15806_s16  ;;  %v6485_v19 = vmul.f32 %v6344_v13, %v12115_v62  ;;  %v13037_v13 = vpop.permute.xlu0 %5553  ;;  %v6869_v62 = vmul.f32 %v6728_v3, %v12101_v9 }
 0x869   : > { %6019 = vperm.xlu1 %9065, %v12999_v39   ;;  %16017 = vst [vmem:[#allocation123_spill] sm:$0xff] %v13037_v13  ;;  %v9125_v13 = vld [vmem:[%s15109_s7 + $0x48] sm:$0xff]  }
 0x86c   : > { %v5975_v18 = vpop.permute.xlu1 %5974  ;;  %5751 = vrot.lane.b32.xlu0 %v5684_v25, %s15806_s16  ;;  %v13028_v25 = vsel %vm1324_vm3, %v5043_v26, %v5044_v15  ;;  %v9123_v15 = vld [vmem:[%s15109_s7 + $0x40] sm:$0xff]   ;;  %v5685_v26 = vmul.f32 %v5544_v23, %v12077_v56  ;;  %v6098_v23 = vmul.f32 %v12872_v53, %v12988_v7 }
 0x86d   : > { %6024 = vperm.xlu1 %9065, %v13010_v51   ;;  %16016 = vst [vmem:[#allocation51_spill] sm:$0xff] %v13028_v25  ;;  %v5301_v40 = vmul.f32 %v12785_v11, %v13028_v25  ;;  %v9124_v11 = vld [vmem:[%s15109_s7] sm:$0xff]   ;;  %8718 = vmatprep.subr.bf16.mxu1 %v9123_v15  ;;  %v9126_v15 = vld [vmem:[%s15109_s7 + $0x8] sm:$0xff]  }
 0x86e   : > { %8719 = vmatpush3.bf16.msra.mxu1 %v9124_v11  ;;  %v16020_v11 = vrot.slane %v12129_v52, 1 }
 0x86f   : > { %8720 = vmatprep.subr.bf16.mxu1 %v9125_v13  ;;  %v9127_v13 = vld [vmem:[%s15109_s7 + $0x50] sm:$0xff]  }
 0x870   : > { %5628 = vperm.xlu0 %9058, %v13017_v33  }
 0x871   : > { %9066 = vset.pattern.permute.xlu1 %v15975_v49  ;;  %v13021_v60 = vpop.permute.xlu1 %6353 }
 0x872   : > { %6408 = vperm.xlu1 %9066, %v13010_v51   ;;  %8721 = vmatpush3.bf16.msra.mxu1 %v9126_v15  ;;  %v16022_v15 = vrot.slane %v12010_v35, 1  ;;  %v16031_v35 = vld [vmem:[#allocation72_spill] sm:$0xff] }
 0x873   : > { %8722 = vmatprep.subr.bf16.mxu1 %v9127_v13 }
 0x874   : > { %6553 = vrot.lane.b32.xlu0 %v6485_v19, %s15787_s15 }
 0x876   : > { %9067 = vset.pattern.permute.xlu1 %v15976_v41  ;;  %v13033_v10 = vpop.permute.xlu1 %6737 }
 0x877   : > { %6787 = vperm.xlu1 %9067, %v12999_v39  }
 0x878   : > { %5369 = vrot.lane.b32.xlu0 %v5301_v40, %s15787_s15  ;;  %v13050_v40 = vpop.permute.xlu0 %5568 }
 0x879   : > { %16018 = vst [vmem:[#allocation107_spill] sm:$0xff] %v13050_v40  ;;  %v15466_v40 = vrot.slane %v12108_v48, 1 }
 0x87a   : > { %v6743_v19 = vpop.permute.xlu1 %6742 }
 0x87b   : > { %9068 = vset.pattern.permute.xlu1 %v15977_v54  ;;  %v13078_v53 = vsel %vm1324_vm3, %v15466_v40, %v16020_v11  ;;  %v16023_v11 = vrot.slane %v12464_v29, 1 }
 0x87c   : > { %5603 = vperm.xlu1 %9068, %v12999_v39   ;;  %6937 = vrot.lane.b32.xlu0 %v6869_v62, %s15806_s16  ;;  %v13057_v62 = vld [vmem:[%s15103_s1 + $0xb0] sm:$0xff]  ;;  %16021 = vst [vmem:[#allocation124_spill] sm:$0xff] %v13078_v53  ;;  %v13080_v7 = vpop.permute.xlu0 %5583 }
 0x87d   : > { %v13100_v40 = vsel %vm1324_vm3, %v16023_v11, %v16022_v15 }
 0x87e   : > { %16024 = vst [vmem:[#allocation113_spill] sm:$0xff] %v13100_v40  ;;  %v5298_v13 = vmul.f32 %v12773_v27, %v13100_v40 }
 0x87f   : > { %v5559_v3 = vpop.permute.xlu1 %5558 }
 0x880   : > { %5608 = vperm.xlu1 %9068, %v13010_v51   ;;  %5753 = vrot.lane.b32.xlu0 %v5685_v26, %s15806_s16  ;;  %v9128_v51 = vld [vmem:[%s15109_s7 + $0x10] sm:$0xff]   ;;  %v13113_v15 = vpop.permute.xlu0 %5598 }
 0x881   : > { %8723 = vmatpush3.bf16.msra.mxu1 %v9128_v51 }
 0x884   : > { %v13068_v26 = vpop.permute.xlu1 %5979  ;;  %6163 = vrot.lane.b32.xlu1 %v6098_v23, %s15756_s29  ;;  %5633 = vperm.xlu0 %9058, %v13057_v62   ;;  %v6482_v23 = vmul.f32 %v12919_v21, %v12056_v2  ;;  %v5047_v2 = vrot.slane %v12101_v9, 1  ;;  %v16025_v9 = vrot.slane %v12070_v47, 1  ;;  %v9132_v47 = vld [vmem:[%s15109_s7 + $0x20] sm:$0xff]  }
 0x885   : > { %16019 = vst [vmem:[#allocation30_spill] sm:$0xff] %v13068_v26  ;;  %9069 = vset.pattern.permute.xlu1 %v15974_v31  ;;  %v6104_v26 = vmul.f32 %v5975_v18, %v13078_v53  ;;  %v9129_v18 = vld [vmem:[%s15109_s7 + $0x58] sm:$0xff]  }
 0x886   : > { %8724 = vmatprep.subr.bf16.mxu1 %v9129_v18  ;;  %v13121_v51 = vsel %vm1324_vm3, %v16025_v9, %v5047_v2  ;;  %v6866_v18 = vmul.f32 %v12901_v58, %v12042_v5  ;;  %v5682_v5 = vmul.f32 %v12908_v28, %v12029_v43  ;;  %v6872_v58 = vmul.f32 %v6743_v19, %v12136_v22  ;;  %v13154_v9 = vld [vmem:[%s15103_s1 + $0x98] sm:$0xff]  ;;  %v9135_v28 = vld [vmem:[%s15109_s7 + $0x70] sm:$0xff]  }
 0x887   : > { %16026 = vst [vmem:[#allocation52_spill] sm:$0xff] %v13121_v51  ;;  %v5304_v11 = vmul.f32 %v12788_v34, %v13121_v51  ;;  %v9133_v34 = vld [vmem:[%s15109_s7 + $0x68] sm:$0xff]   ;;  %v5688_v19 = vmul.f32 %v5559_v3, %v12122_v59  ;;  %v9137_v3 = vld [vmem:[%s15109_s7 + $0x78] sm:$0xff]  }
 0x888   : > { %6547 = vrot.lane.b32.xlu1 %v6482_v23, %s15787_s15  ;;  %6175 = vrot.lane.b32.xlu0 %v6104_v26, %s15756_s29  ;;  %v6488_v26 = vmul.f32 %v12927_v16, %v12151_v37  ;;  %v9130_v23 = vld [vmem:[%s15109_s7 + $0x18] sm:$0xff]   ;;  %v9131_v16 = vld [vmem:[%s15109_s7 + $0x60] sm:$0xff]  }
 0x889   : > { %v6364_v21 = vpop.permute.xlu1 %6363  ;;  %8725 = vmatpush3.bf16.msra.mxu1 %v9130_v23  ;;  %v9134_v23 = vld [vmem:[%s15109_s7 + $0x28] sm:$0xff]  }
 0x88a   : > { %8726 = vmatprep.subr.bf16.mxu1 %v9131_v16  ;;  %v9136_v16 = vld [vmem:[%s15109_s7 + $0x30] sm:$0xff]  }
 0x88c   : > { %5363 = vrot.lane.b32.xlu1 %v5298_v13, %s15787_s15  ;;  %6559 = vrot.lane.b32.xlu0 %v6488_v26, %s15787_s15 }
 0x88d   : > { %v13123_v27 = vpop.permute.xlu1 %6368  ;;  %8727 = vmatpush3.bf16.msra.mxu1 %v9132_v47 }
 0x88e   : > { %8728 = vmatprep.subr.bf16.mxu1 %v9133_v34 }
 0x88f   : > { %v6162_v13 = vpop.permute.xlu0 %6161 }
 0x890   : > { %6257 = vst.msk [vmem:[#allocation2 + $0x8] sm:$0xff] %vm1259_vm2, %v6162_v13  ;;  %6931 = vrot.lane.b32.xlu1 %v6866_v18, %s15806_s16  ;;  %5375 = vrot.lane.b32.xlu0 %v5304_v11, %s15787_s15  ;;  %v13168_v18 = vld [vmem:[%s15103_s1 + $0xc8] sm:$0xff]  ;;  %v9138_v13 = vld [vmem:[%s15109_s7 + $0x38] sm:$0xff]  }
 0x891   : > { %8729 = vmatpush3.bf16.msra.mxu1 %v9134_v23 }
 0x892   : > { %v13144_v26 = vpop.permute.xlu1 %6752  ;;  %8730 = vmatprep.subr.bf16.mxu1 %v9135_v28  ;;  %v16027_v28 = vrot.slane %v12108_v48, 1 }
 0x894   : > { %5747 = vrot.lane.b32.xlu1 %v5682_v5, %s15806_s16  ;;  %6943 = vrot.lane.b32.xlu0 %v6872_v58, %s15806_s16  ;;  %v6489_v5 = vmul.f32 %v6364_v21, %v12181_v24 }
 0x895   : > { %8731 = vmatpush3.bf16.msra.mxu1 %v9136_v16 }
 0x896   : > { %8732 = vmatprep.subr.bf16.mxu1 %v9137_v3 }
 0x897   : > { %v5564_v11 = vpop.permute.xlu1 %5563 }
 0x898   : > { %6034 = vperm.xlu1 %9069, %v13154_v9   ;;  %5759 = vrot.lane.b32.xlu0 %v5688_v19, %s15806_s16  ;;  %v13189_v19 = vsel %vm1324_vm3, %v5047_v2, %v16027_v28  ;;  %v16029_v2 = vld [vmem:[#allocation68_spill] sm:$0xff] }
 0x899   : > { %8733 = vmatpush3.bf16.msra.mxu1 %v9138_v13  ;;  %16028 = vst [vmem:[#allocation125_spill] sm:$0xff] %v13189_v19  ;;  %v5305_v16 = vmul.f32 %v12796_v50, %v13189_v19  ;;  %v5689_v13 = vmul.f32 %v5564_v11, %v16029_v2  ;;  %v15469_v50 = vrot.slane %v12195_v6, 1  ;;  %v15471_v11 = vrot.slane %v12174_v61, 1 }
 0x89a   : > { %v6546_v47 = vpop.permute.xlu0 %6545 }
 0x89b   : > { %6641 = vst.msk [vmem:[#allocation2 + $0x8] sm:$0xff] %vm1709_vm4, %v6546_v47  ;;  %v6873_v47 = vmul.f32 %v12910_v46, %v12167_v12  ;;  %v13213_v46 = vld [vmem:[%s15103_s1 + $0xd0] sm:$0xff] }
 0x89c   : > { %v13177_v34 = vpop.permute.xlu1 %5989  ;;  %9070 = vset.pattern.permute.xlu1 %v15975_v49  ;;  %5648 = vperm.xlu0 %9058, %v13168_v18  }
 0x89d   : > { %6413 = vperm.xlu1 %9070, %v12957_v1  }
 0x89e   : > { %v5362_v58 = vpop.permute.xlu0 %5361 }
 0x89f   : > { %5457 = vst.msk [vmem:[#allocation2] sm:$0xff] %vm1709_vm4, %v5362_v58  ;;  %v6099_v58 = vmul.f32 %v12916_v32, %v13028_v25  ;;  %v13227_v32 = vsel %vm1324_vm3, %v15471_v11, %v15469_v50  ;;  %v16042_v11 = vld [vmem:[#allocation122_spill] sm:$0xff] }
 0x8a0   : > { %v5995_v23 = vpop.permute.xlu1 %5994  ;;  %6561 = vrot.lane.b32.xlu0 %v6489_v5, %s15787_s15  ;;  %16030 = vst [vmem:[#allocation108_spill] sm:$0xff] %v13227_v32 }
 0x8a1   : > { %9071 = vset.pattern.permute.xlu1 %v15976_v41 }
 0x8a2   : > { %v6930_v3 = vpop.permute.xlu0 %6929  ;;  %6797 = vperm.xlu1 %9071, %v12957_v1  }
 0x8a3   : > { %7025 = vst.msk [vmem:[#allocation2 + $0x8] sm:$0xff] %vm2094_vm5, %v6930_v3  ;;  %v6108_v3 = vmul.f32 %v5995_v23, %v13227_v32 }
 0x8a4   : > { %5377 = vrot.lane.b32.xlu0 %v5305_v16, %s15787_s15  ;;  %v6483_v16 = vmul.f32 %v12922_v63, %v12077_v56  ;;  %v16032_v56 = vrot.slane %v12136_v22, 1  ;;  %v6876_v22 = vmul.f32 %v12913_v8, %v12202_v20 }
 0x8a5   : > { %v6379_v21 = vpop.permute.xlu1 %6378 }
 0x8a6   : > { %6802 = vperm.xlu1 %9071, %v13154_v9   ;;  %v6492_v43 = vmul.f32 %v6379_v21, %v16031_v35 }
 0x8a8   : > { %6945 = vrot.lane.b32.xlu0 %v6873_v47, %s15806_s16 }
 0x8aa   : > { %v13202_v5 = vpop.permute.xlu1 %6757  ;;  %9072 = vset.pattern.permute.xlu1 %v15977_v54 }
 0x8ab   : > { %5618 = vperm.xlu1 %9072, %v13154_v9  }
 0x8ac   : > { %5761 = vrot.lane.b32.xlu0 %v5689_v13, %s15806_s16  ;;  %v5299_v13 = vmul.f32 %v12779_v17, %v12862_v38  ;;  %v6867_v17 = vmul.f32 %v12897_v55, %v12063_v57  ;;  %v13265_v57 = vld [vmem:[%s15103_s1 + $0xa0] sm:$0xff] }
 0x8af   : > { %v13216_v28 = vpop.permute.xlu1 %5573  ;;  %6165 = vrot.lane.b32.xlu1 %v6099_v58, %s15756_s29  ;;  %v15470_v58 = vrot.slane %v12167_v12, 1 }
 0x8b0   : > { %5653 = vperm.xlu0 %9058, %v13213_v46   ;;  %9073 = vset.pattern.permute.xlu1 %v15974_v31 }
 0x8b1   : > { %v13248_v63 = vsel %vm1324_vm3, %v16032_v56, %v15470_v58 }
 0x8b2   : > { %16033 = vst [vmem:[#allocation33_spill] sm:$0xff] %v13248_v63  ;;  %v5308_v23 = vmul.f32 %v12799_v36, %v13248_v63  ;;  %v16034_v36 = vld [vmem:[#allocation70_spill] sm:$0xff] }
 0x8b3   : > { %v5579_v47 = vpop.permute.xlu1 %5578  ;;  %6549 = vrot.lane.b32.xlu1 %v6483_v16, %s15787_s15 }
 0x8b4   : > { %6183 = vrot.lane.b32.xlu0 %v6108_v3, %s15756_s29  ;;  %v5692_v55 = vmul.f32 %v5579_v47, %v16034_v36  ;;  %v5917_v3 = vld [vmem:[%s15103_s1 + $0x60] sm:$0xff] }
 0x8b7   : > { %5365 = vrot.lane.b32.xlu1 %v5299_v13, %s15787_s15 }
 0x8b8   : > { %v13239_v50 = vpop.permute.xlu1 %6004  ;;  %6567 = vrot.lane.b32.xlu0 %v6492_v43, %s15787_s15  ;;  %v5683_v43 = vmul.f32 %v12936_v4, %v12049_v44  ;;  %v13275_v44 = vld [vmem:[%s15103_s1 + $0xe8] sm:$0xff] }
 0x8bb   : > { %6933 = vrot.lane.b32.xlu1 %v6867_v17, %s15806_s16 }
 0x8bc   : > { %5383 = vrot.lane.b32.xlu0 %v5308_v23, %s15787_s15  ;;  %v16036_v23 = vld [vmem:[#allocation73_spill] sm:$0xff] }
 0x8bd   : > { %v6384_v21 = vpop.permute.xlu1 %6383 }
 0x8bf   : > { %5749 = vrot.lane.b32.xlu1 %v5683_v43, %s15806_s16  ;;  %v6101_v43 = vmul.f32 %v12946_v14, %v16036_v23 }
 0x8c0   : > { %6951 = vrot.lane.b32.xlu0 %v6876_v22, %s15806_s16 }
 0x8c2   : > { %v13268_v16 = vpop.permute.xlu1 %6767 }
 0x8c3   : > { %6039 = vperm.xlu1 %9073, %v13265_v57  }
 0x8c4   : > { %5767 = vrot.lane.b32.xlu0 %v5692_v55, %s15806_s16  ;;  %v16037_v55 = vld [vmem:[#allocation120_spill] sm:$0xff] }
 0x8c6   : > { %v13277_v8 = vpop.permute.xlu1 %6772  ;;  %v5746_v4 = vpop.permute.xlu0 %5745 }
 0x8c7   : > { %5841 = vst.msk [vmem:[#allocation2] sm:$0xff] %vm2094_vm5, %v5746_v4  ;;  %9074 = vset.pattern.permute.xlu1 %v15975_v49  ;;  %v6102_v4 = vmul.f32 %v16037_v55, %v13121_v51 }
 0x8c8   : > { %6423 = vperm.xlu1 %9074, %v13265_v57   ;;  %5668 = vperm.xlu0 %9058, %v13275_v44  }
 0x8cb   : > { %v13286_v47 = vpop.permute.xlu1 %5588 }
 0x8cc   : > { %6428 = vperm.xlu1 %9074, %v13017_v33   ;;  %9093 = vset.pattern.permute.xlu0 %v15974_v31 }
 0x8cd   : > { %5999 = vperm.xlu0 %9093, %v5917_v3  }
 0x8d0   : > { %v13290_v13 = vpop.permute.xlu1 %6009  ;;  %9075 = vset.pattern.permute.xlu1 %v15976_v41 }
 0x8d1   : > { %6812 = vperm.xlu1 %9075, %v13017_v33   ;;  %6014 = vperm.xlu0 %9093, %v12964_v45  }
 0x8d5   : > { %v13295_v56 = vpop.permute.xlu1 %6393  ;;  %9076 = vset.pattern.permute.xlu1 %v15977_v54  ;;  %6029 = vperm.xlu0 %9093, %v12957_v1  }
 0x8d6   : > { %5623 = vperm.xlu1 %9076, %v13265_v57  }
 0x8d7   : > { %v13300_v17 = vpop.permute.xlu0 %5613 }
 0x8d8   : > { %16035 = vst [vmem:[#allocation126_spill] sm:$0xff] %v13300_v17 }
 0x8d9   : > { %v13304_v22 = vpop.permute.xlu1 %6398  ;;  %6044 = vperm.xlu0 %9093, %v13017_v33   ;;  %v6486_v33 = vmul.f32 %v12973_v30, %v12122_v59  ;;  %v16039_v59 = vld [vmem:[#allocation24_spill] sm:$0xff] }
 0x8da   : > { %6169 = vrot.lane.b32.xlu1 %v6101_v43, %s15756_s29  ;;  %v6870_v30 = vmul.f32 %v16039_v59, %v12108_v48  ;;  %v16043_v48 = vrot.slane %v12174_v61, 1 }
 0x8db   : > { %v6168_v45 = vpop.permute.xlu0 %6167  ;;  %9077 = vset.pattern.permute.xlu1 %v15974_v31 }
 0x8dc   : > { %6260 = vst.msk [vmem:[#allocation2 + $0x50] sm:$0xff] %vm1259_vm2, %v6168_v45  ;;  %v16038_v45 = vld [vmem:[#allocation81_spill] sm:$0xff] }
 0x8dd   : > { %6049 = vperm.xlu0 %9093, %v13057_v62   ;;  %v5302_v55 = vmul.f32 %v16038_v45, %v12971_v42 }
 0x8de   : > { %v13313_v1 = vpop.permute.xlu1 %6782  ;;  %6171 = vrot.lane.b32.xlu1 %v6102_v4, %s15756_s29 }
 0x8df   : > { %v6552_v14 = vpop.permute.xlu0 %6551 }
 0x8e0   : > { %6644 = vst.msk [vmem:[#allocation2 + $0x50] sm:$0xff] %vm1709_vm4, %v6552_v14 }
 0x8e1   : > { %6064 = vperm.xlu0 %9093, %v13168_v18  }
 0x8e2   : > { %6555 = vrot.lane.b32.xlu1 %v6486_v33, %s15787_s15  ;;  %v16040_v33 = vld [vmem:[#allocation58_spill] sm:$0xff] }
 0x8e3   : > { %v13321_v3 = vpop.permute.xlu1 %5593  ;;  %v5368_v43 = vpop.permute.xlu0 %5367  ;;  %v6493_v45 = vmul.f32 %v6384_v21, %v16040_v33  ;;  %v16046_v21 = vld [vmem:[#allocation82_spill] sm:$0xff] }
 0x8e4   : > { %5460 = vst.msk [vmem:[#allocation2 + $0x48] sm:$0xff] %vm1709_vm4, %v5368_v43  ;;  %v16041_v43 = vld [vmem:[#allocation104_spill] sm:$0xff] }
 0x8e5   : > { %6069 = vperm.xlu0 %9093, %v13213_v46   ;;  %v5686_v38 = vmul.f32 %v16042_v11, %v16041_v43 }
 0x8e6   : > { %5371 = vrot.lane.b32.xlu1 %v5302_v55, %s15787_s15 }
 0x8e7   : > { %v6936_v4 = vpop.permute.xlu0 %6935 }
 0x8e8   : > { %7028 = vst.msk [vmem:[#allocation2 + $0x50] sm:$0xff] %vm2094_vm5, %v6936_v4  ;;  %v13331_v14 = vpop.permute.xlu1 %6019  ;;  %v16044_v4 = vrot.slane %v12167_v12, 1  ;;  %v16048_v12 = vld [vmem:[#allocation65_spill] sm:$0xff] }
 0x8e9   : > { %6084 = vperm.xlu0 %9093, %v13275_v44   ;;  %v6877_v43 = vmul.f32 %v13268_v16, %v16048_v12  ;;  %v13377_v16 = vld [vmem:[%s15103_s1 + $0xf0] sm:$0xff] }
 0x8ea   : > { %6939 = vrot.lane.b32.xlu1 %v6870_v30, %s15806_s16  ;;  %v13348_v59 = vsel %vm1324_vm3, %v16044_v4, %v16043_v48  ;;  %v16049_v4 = vld [vmem:[#allocation71_spill] sm:$0xff] }
 0x8eb   : > { %v5752_v58 = vpop.permute.xlu0 %5751  ;;  %16045 = vst [vmem:[#allocation117_spill] sm:$0xff] %v13348_v59  ;;  %v5309_v30 = vmul.f32 %v16046_v21, %v13348_v59  ;;  %v5693_v21 = vmul.f32 %v13080_v7, %v16049_v4 }
 0x8ec   : > { %5844 = vst.msk [vmem:[#allocation2 + $0x48] sm:$0xff] %vm2094_vm5, %v5752_v58  ;;  %v13339_v55 = vpop.permute.xlu1 %6024  ;;  %v5928_v58 = vld [vmem:[%s15103_s1 + $0xb8] sm:$0xff] }
 0x8ed   : > { %6569 = vrot.lane.b32.xlu0 %v6493_v45, %s15787_s15 }
 0x8ee   : > { %5755 = vrot.lane.b32.xlu1 %v5686_v38, %s15806_s16 }
 0x8ef   : > { %v13353_v11 = vpop.permute.xlu0 %5628 }
 0x8f0   : > { %16047 = vst [vmem:[#allocation53_spill] sm:$0xff] %v13353_v11 }
 0x8f1   : > { %v13358_v45 = vpop.permute.xlu1 %6408  ;;  %5385 = vrot.lane.b32.xlu0 %v5309_v30, %s15787_s15 }
 0x8f2   : > { %6054 = vperm.xlu1 %9077, %v5928_v58  }
 0x8f3   : > { %v13363_v48 = vpop.permute.xlu0 %6553 }
 0x8f5   : > { %6953 = vrot.lane.b32.xlu0 %v6877_v43, %s15806_s16 }
 0x8f6   : > { %v13366_v38 = vpop.permute.xlu1 %6787  ;;  %9078 = vset.pattern.permute.xlu1 %v15975_v49 }
 0x8f7   : > { %6433 = vperm.xlu1 %9078, %v13057_v62   ;;  %v5370_v40 = vpop.permute.xlu0 %5369 }
 0x8f8   : > { %5461 = vst.msk [vmem:[#allocation2 + $0x60] sm:$0xff] %vm1709_vm4, %v5370_v40 }
 0x8f9   : > { %5769 = vrot.lane.b32.xlu0 %v5693_v21, %s15806_s16 }
 0x8fb   : > { %v13379_v30 = vpop.permute.xlu1 %5603  ;;  %9079 = vset.pattern.permute.xlu1 %v15976_v41  ;;  %v13382_v43 = vpop.permute.xlu0 %6937 }
 0x8fc   : > { %6817 = vperm.xlu1 %9079, %v13057_v62   ;;  %v16051_v62 = vld [vmem:[#allocation49_spill] sm:$0xff] }
 0x8fd   : > { %6089 = vperm.xlu0 %9093, %v13377_v16   ;;  %v6103_v29 = vmul.f32 %v16051_v62, %v13189_v19  ;;  %v7314_v19 = vld [vmem:[#allocation2 + $0x8] sm:$0xff] }
 0x8ff   : > { %v13386_v7 = vpop.permute.xlu1 %5608  ;;  %v5754_v40 = vpop.permute.xlu0 %5753 }
 0x900   : > { %5845 = vst.msk [vmem:[#allocation2 + $0x60] sm:$0xff] %vm2094_vm5, %v5754_v40  ;;  %6822 = vperm.xlu1 %9079, %v5928_v58  }
 0x901   : > { %9094 = vset.pattern.permute.xlu0 %v15975_v49 }
 0x902   : > { %6403 = vperm.xlu0 %9094, %v12999_v39   ;;  %v6487_v39 = vmul.f32 %v13021_v60, %v16029_v2  ;;  %v13418_v2 = vld [vmem:[%s15103_s1 + $0xf8] sm:$0xff] }
 0x903   : > { %v6164_v21 = vpop.permute.xlu1 %6163  ;;  %v13391_v42 = vpop.permute.xlu0 %5633 }
 0x904   : > { %16050 = vst [vmem:[#allocation127_spill] sm:$0xff] %v13391_v42  ;;  %6258 = vst.msk [vmem:[#allocation2 + $0x20] sm:$0xff] %vm1259_vm2, %v6164_v21  ;;  %9080 = vset.pattern.permute.xlu1 %v15977_v54 }
 0x905   : > { %5638 = vperm.xlu1 %9080, %v5928_v58  }
 0x906   : > { %6418 = vperm.xlu0 %9094, %v13154_v9   ;;  %v13407_v9 = vld [vmem:[%s15103_s1 + $0xd8] sm:$0xff] }
 0x907   : > { %v6548_v51 = vpop.permute.xlu1 %6547  ;;  %v6176_v40 = vpop.permute.xlu0 %6175 }
 0x908   : > { %6642 = vst.msk [vmem:[#allocation2 + $0x20] sm:$0xff] %vm1709_vm4, %v6548_v51 }
 0x909   : > { %6264 = vst.msk [vmem:[#allocation2 + $0xb0] sm:$0xff] %vm1259_vm2, %v6176_v40  ;;  %6173 = vrot.lane.b32.xlu1 %v6103_v29, %s15756_s29  ;;  %v16052_v29 = vld [vmem:[#allocation78_spill] sm:$0xff] }
 0x90a   : > { %6438 = vperm.xlu0 %9094, %v5928_v58   ;;  %9081 = vset.pattern.permute.xlu1 %v15974_v31  ;;  %v5303_v51 = vmul.f32 %v16052_v29, %v16036_v23 }
 0x90b   : > { %v5364_v21 = vpop.permute.xlu1 %5363  ;;  %v6560_v42 = vpop.permute.xlu0 %6559 }
 0x90c   : > { %5458 = vst.msk [vmem:[#allocation2 + $0x18] sm:$0xff] %vm1709_vm4, %v5364_v21  ;;  %6648 = vst.msk [vmem:[#allocation2 + $0xb0] sm:$0xff] %vm1709_vm4, %v6560_v42  ;;  %v6871_v42 = vmul.f32 %v13033_v10, %v12129_v52  ;;  %v16054_v21 = vld [vmem:[#allocation123_spill] sm:$0xff] }
 0x90d   : > { %6557 = vrot.lane.b32.xlu1 %v6487_v39, %s15787_s15  ;;  %v16053_v39 = vld [vmem:[#allocation67_spill] sm:$0xff] }
 0x90e   : > { %6458 = vperm.xlu0 %9094, %v13407_v9   ;;  %v5687_v29 = vmul.f32 %v16054_v21, %v16053_v39  ;;  %v7313_v39 = vld [vmem:[#allocation2] sm:$0xff] }
 0x90f   : > { %v6932_v58 = vpop.permute.xlu1 %6931  ;;  %v5376_v60 = vpop.permute.xlu0 %5375 }
 0x910   : > { %7026 = vst.msk [vmem:[#allocation2 + $0x20] sm:$0xff] %vm2094_vm5, %v6932_v58 }
 0x911   : > { %5464 = vst.msk [vmem:[#allocation2 + $0xa8] sm:$0xff] %vm1709_vm4, %v5376_v60  ;;  %5373 = vrot.lane.b32.xlu1 %v5303_v51, %s15787_s15  ;;  %v16055_v51 = vld [vmem:[#allocation50_spill] sm:$0xff] }
 0x912   : > { %6478 = vperm.xlu0 %9094, %v13418_v2  }
 0x913   : > { %v5748_v62 = vpop.permute.xlu1 %5747  ;;  %v6944_v40 = vpop.permute.xlu0 %6943 }
 0x914   : > { %5842 = vst.msk [vmem:[#allocation2 + $0x18] sm:$0xff] %vm2094_vm5, %v5748_v62  ;;  %7032 = vst.msk [vmem:[#allocation2 + $0xb0] sm:$0xff] %vm2094_vm5, %v6944_v40  ;;  %v16056_v62 = vld [vmem:[#allocation111_spill] sm:$0xff] }
 0x915   : > { %6941 = vrot.lane.b32.xlu1 %v6871_v42, %s15806_s16  ;;  %v5929_v42 = vld [vmem:[%s15103_s1 + $0xc0] sm:$0xff] }
 0x916   : > { %9097 = vset.pattern.permute.xlu0 %v15976_v41 }
 0x917   : > { %v13432_v58 = vpop.permute.xlu1 %6034  ;;  %6777 = vperm.xlu0 %9097, %v16055_v51   ;;  %v5760_v60 = vpop.permute.xlu0 %5759  ;;  %v7317_v10 = vld [vmem:[#allocation2 + $0x20] sm:$0xff] }
 0x918   : > { %5848 = vst.msk [vmem:[#allocation2 + $0xa8] sm:$0xff] %vm2094_vm5, %v5760_v60  ;;  %v7410_v52 = vpack.c.bf16 %v7317_v10, %v7314_v19  ;;  %v13455_v10 = vld [vmem:[%s15103_s1 + $0xe0] sm:$0xff] }
 0x919   : > { %5757 = vrot.lane.b32.xlu1 %v5687_v29, %s15806_s16 }
 0x91a   : > { %7688 = vmatprep.mubr.bf16.mxu1 %v7410_v52 }
 0x91b   : > { %6792 = vperm.xlu0 %9097, %v16056_v62   ;;  %v13441_v40 = vpop.permute.xlu0 %5648  ;;  %v7316_v21 = vld [vmem:[#allocation2 + $0x18] sm:$0xff] }
 0x91c   : > { %16057 = vst [vmem:[#allocation110_spill] sm:$0xff] %v13441_v40  ;;  %v13443_v51 = vpop.permute.xlu1 %6413  ;;  %v7409_v23 = vpack.c.bf16 %v7316_v21, %v7313_v39 }
 0x91d   : > { %16058 = vst [vmem:[#allocation36_spill] sm:$0xff] %v13443_v51  ;;  %6059 = vperm.xlu1 %9081, %v5929_v42  }
 0x91e   : > { %7689 = vmatmul.mubr.bf16.vlgmr.msra.gmra.mrb[32].mxu1 %v7409_v23  ;;  %v16060_v23 = vld [vmem:[#allocation66_spill] sm:$0xff] }
 0x91f   : > { %6807 = vperm.xlu0 %9097, %v13265_v57   ;;  %v13446_v19 = vpop.permute.xlu0 %6561  ;;  %v15481_v62 = vrot.slane %v16060_v23, 1 }
 0x921   : > { %9082 = vset.pattern.permute.xlu1 %v15975_v49  ;;  %v13449_v29 = vpop.permute.xlu1 %6797 }
 0x922   : > { %16059 = vst [vmem:[#allocation128_spill] sm:$0xff] %v13449_v29  ;;  %6443 = vperm.xlu1 %9082, %v5929_v42   ;;  %v16064_v29 = vld [vmem:[#allocation16_spill] sm:$0xff] }
 0x923   : > { %6827 = vperm.xlu0 %9097, %v5929_v42   ;;  %v5378_v60 = vpop.permute.xlu0 %5377 }
 0x924   : > { %5465 = vst.msk [vmem:[#allocation2 + $0xc0] sm:$0xff] %vm1709_vm4, %v5378_v60  ;;  %v16061_v60 = vrot.slane %v16048_v12, 1  ;;  %v16063_v12 = vmov 8  }
 0x925   : > { %v13457_v52 = vpop.permute.xlu1 %6802 }
 0x926   : > { %6448 = vperm.xlu1 %9082, %v13168_v18   ;;  %v13475_v25 = vsel %vm1324_vm3, %v16061_v60, %v15481_v62  ;;  %v6495_v60 = vmul.f32 %v13295_v56, %v16064_v29  ;;  %v16065_v62 = vld [vmem:[#allocation69_spill] sm:$0xff]  ;;  %v16070_v56 = vld [vmem:[#allocation84_spill] sm:$0xff] }
 0x927   : > { %6847 = vperm.xlu0 %9097, %v13455_v10   ;;  %v13461_v57 = vpop.permute.xlu0 %6945  ;;  %v6111_v40 = vmul.f32 %v13290_v13, %v13475_v25 }
 0x92a   : > { %9083 = vset.pattern.permute.xlu1 %v15976_v41  ;;  %v13465_v39 = vpop.permute.xlu1 %5618 }
 0x92b   : > { %6832 = vperm.xlu1 %9083, %v13168_v18   ;;  %6862 = vperm.xlu0 %9097, %v13418_v2   ;;  %v5762_v21 = vpop.permute.xlu0 %5761 }
 0x92c   : > { %5849 = vst.msk [vmem:[#allocation2 + $0xc0] sm:$0xff] %vm2094_vm5, %v5762_v21  ;;  %v16066_v21 = vld [vmem:[#allocation30_spill] sm:$0xff] }
 0x92d   : > { %v6105_v51 = vmul.f32 %v16066_v21, %v16065_v62 }
 0x92e   : > { %v6166_v17 = vpop.permute.xlu1 %6165 }
 0x92f   : > { %6259 = vst.msk [vmem:[#allocation2 + $0x38] sm:$0xff] %vm1259_vm2, %v6166_v17  ;;  %9084 = vset.pattern.permute.xlu1 %v15977_v54  ;;  %6189 = vrot.lane.b32.xlu0 %v6111_v40, %s15756_s29  ;;  %v13483_v18 = vpop.permute.xlu0 %5653  ;;  %v16067_v17 = vrot.slane %v12202_v20, 1  ;;  %v16068_v40 = vrot.slane %v12195_v6, 1 }
 0x930   : > { %16062 = vst [vmem:[#allocation59_spill] sm:$0xff] %v13483_v18  ;;  %5643 = vperm.xlu1 %9084, %v5929_v42   ;;  %9101 = vset.pattern.permute.xlu0 %v16063_v12 }
 0x931   : > { %v13498_v42 = vsel %vm1324_vm3, %v16068_v40, %v16067_v17 }
 0x932   : > { %v6550_v11 = vpop.permute.xlu1 %6549  ;;  %16069 = vst [vmem:[#allocation119_spill] sm:$0xff] %v13498_v42  ;;  %v5311_v21 = vmul.f32 %v16070_v56, %v13498_v42 }
 0x933   : > { %6643 = vst.msk [vmem:[#allocation2 + $0x38] sm:$0xff] %vm1709_vm4, %v6550_v11  ;;  %6573 = vrot.lane.b32.xlu0 %v6495_v60, %s15787_s15  ;;  %v6184_v13 = vpop.permute.xlu0 %6183  ;;  %v16071_v11 = vld [vmem:[#allocation114_spill] sm:$0xff] }
 0x934   : > { %6268 = vst.msk [vmem:[#allocation2 + $0x110] sm:$0xff] %vm1259_vm2, %v6184_v13  ;;  %6177 = vrot.lane.b32.xlu1 %v6105_v51, %s15756_s29  ;;  %v6106_v60 = vmul.f32 %v16071_v11, %v13248_v63  ;;  %v6490_v51 = vmul.f32 %v13123_v27, %v16034_v36  ;;  %v6874_v27 = vmul.f32 %v13144_v26, %v12174_v61 }
 0x935   : > { %9085 = vset.pattern.permute.xlu1 %v15974_v31 }
 0x936   : > { %v5366_v18 = vpop.permute.xlu1 %5365 }
 0x937   : > { %5459 = vst.msk [vmem:[#allocation2 + $0x30] sm:$0xff] %vm1709_vm4, %v5366_v18  ;;  %5389 = vrot.lane.b32.xlu0 %v5311_v21, %s15787_s15  ;;  %v6568_v20 = vpop.permute.xlu0 %6567  ;;  %v16072_v18 = vld [vmem:[#allocation83_spill] sm:$0xff] }
 0x938   : > { %6652 = vst.msk [vmem:[#allocation2 + $0x110] sm:$0xff] %vm1709_vm4, %v6568_v20  ;;  %6179 = vrot.lane.b32.xlu1 %v6106_v60, %s15756_s29  ;;  %v5306_v40 = vmul.f32 %v16072_v18, %v13078_v53  ;;  %v7323_v60 = vld [vmem:[#allocation2 + $0x50] sm:$0xff] }
 0x93a   : > { %v6934_v13 = vpop.permute.xlu1 %6933 }
 0x93b   : > { %7027 = vst.msk [vmem:[#allocation2 + $0x38] sm:$0xff] %vm2094_vm5, %v6934_v13  ;;  %v5384_v17 = vpop.permute.xlu0 %5383  ;;  %v16073_v13 = vld [vmem:[#allocation107_spill] sm:$0xff] }
 0x93c   : > { %5468 = vst.msk [vmem:[#allocation2 + $0x108] sm:$0xff] %vm1709_vm4, %v5384_v17  ;;  %6563 = vrot.lane.b32.xlu1 %v6490_v51, %s15787_s15  ;;  %v5690_v17 = vmul.f32 %v16073_v13, %v12151_v37 }
 0x93e   : > { %v5750_v56 = vpop.permute.xlu1 %5749 }
 0x93f   : > { %5843 = vst.msk [vmem:[#allocation2 + $0x30] sm:$0xff] %vm2094_vm5, %v5750_v56  ;;  %v6952_v21 = vpop.permute.xlu0 %6951  ;;  %v7322_v56 = vld [vmem:[#allocation2 + $0x48] sm:$0xff] }
 0x940   : > { %7036 = vst.msk [vmem:[#allocation2 + $0x110] sm:$0xff] %vm2094_vm5, %v6952_v21  ;;  %5379 = vrot.lane.b32.xlu1 %v5306_v40, %s15787_s15 }
 0x942   : > { %v13523_v36 = vpop.permute.xlu1 %6039  ;;  %v7320_v11 = vld [vmem:[#allocation2 + $0x38] sm:$0xff] }
 0x943   : > { %v5768_v20 = vpop.permute.xlu0 %5767  ;;  %v7413_v51 = vpack.c.bf16 %v7323_v60, %v7320_v11 }
 0x944   : > { %5852 = vst.msk [vmem:[#allocation2 + $0x108] sm:$0xff] %vm2094_vm5, %v5768_v20  ;;  %6947 = vrot.lane.b32.xlu1 %v6874_v27, %s15806_s16 }
 0x945   : > { %7696 = vmatprep.mubr.bf16.mxu1 %v7413_v51 }
 0x946   : > { %v7319_v18 = vld [vmem:[#allocation2 + $0x30] sm:$0xff] }
 0x947   : > { %v13529_v40 = vpop.permute.xlu1 %6423  ;;  %v13531_v21 = vpop.permute.xlu0 %5668  ;;  %v7412_v61 = vpack.c.bf16 %v7322_v56, %v7319_v18  ;;  %v6107_v56 = vmul.f32 %v13177_v34, %v13348_v59  ;;  %v16078_v34 = vld [vmem:[#allocation80_spill] sm:$0xff] }
 0x948   : > { %16074 = vst [vmem:[#allocation54_spill] sm:$0xff] %v13531_v21  ;;  %5763 = vrot.lane.b32.xlu1 %v5690_v17, %s15806_s16  ;;  %v5307_v59 = vmul.f32 %v16078_v34, %v16065_v62 }
 0x949   : > { %7697 = vmatmul.mubr.bf16.gmra.mrb[36].mxu1 %v7412_v61 }
 0x94b   : > { %v13534_v26 = vpop.permute.xlu1 %6428 }
 0x94c   : > { %6074 = vperm.xlu1 %9085, %v13407_v9   ;;  %v13537_v11 = vpop.permute.xlu0 %5999 }
 0x950   : > { %9086 = vset.pattern.permute.xlu1 %v15975_v49  ;;  %v13540_v27 = vpop.permute.xlu1 %6812  ;;  %v13542_v37 = vpop.permute.xlu0 %6014 }
 0x951   : > { %6453 = vperm.xlu1 %9086, %v13213_v46  }
 0x954   : > { %v13545_v60 = vpop.permute.xlu0 %6029 }
 0x955   : > { %9087 = vset.pattern.permute.xlu1 %v15976_v41  ;;  %v13548_v20 = vpop.permute.xlu1 %5623 }
 0x956   : > { %6837 = vperm.xlu1 %9087, %v13213_v46  }
 0x958   : > { %v13551_v51 = vpop.permute.xlu0 %6044 }
 0x959   : > { %v6170_v13 = vpop.permute.xlu1 %6169 }
 0x95a   : > { %6261 = vst.msk [vmem:[#allocation2 + $0x68] sm:$0xff] %vm1259_vm2, %v6170_v13  ;;  %6842 = vperm.xlu1 %9087, %v13407_v9  }
 0x95b   : > { %6645 = vst.msk [vmem:[#allocation2 + $0x68] sm:$0xff] %vm1709_vm4, %v13363_v48 }
 0x95c   : > { %7029 = vst.msk [vmem:[#allocation2 + $0x68] sm:$0xff] %vm2094_vm5, %v13382_v43  ;;  %v13559_v17 = vpop.permute.xlu0 %6049  ;;  %v16076_v43 = vld [vmem:[#allocation115_spill] sm:$0xff] }
 0x95d   : > { %v6172_v18 = vpop.permute.xlu1 %6171  ;;  %v6491_v13 = vmul.f32 %v16076_v43, %v16049_v4  ;;  %v6875_v4 = vmul.f32 %v13202_v5, %v12195_v6  ;;  %v7325_v5 = vld [vmem:[#allocation2 + $0x60] sm:$0xff] }
 0x95e   : > { %6262 = vst.msk [vmem:[#allocation2 + $0x80] sm:$0xff] %vm1259_vm2, %v6172_v18  ;;  %9088 = vset.pattern.permute.xlu1 %v15977_v54 }
 0x95f   : > { %5658 = vperm.xlu1 %9088, %v13407_v9  }
 0x960   : > { %v13564_v46 = vpop.permute.xlu0 %6064 }
 0x961   : > { %v6556_v61 = vpop.permute.xlu1 %6555 }
 0x962   : > { %6646 = vst.msk [vmem:[#allocation2 + $0x80] sm:$0xff] %vm1709_vm4, %v6556_v61 }
 0x963   : > { %6181 = vrot.lane.b32.xlu1 %v6107_v56, %s15756_s29 }
 0x964   : > { %v13570_v48 = vpop.permute.xlu0 %6069  ;;  %9089 = vset.pattern.permute.xlu1 %v15974_v31 }
 0x965   : > { %16075 = vst [vmem:[#allocation129_spill] sm:$0xff] %v13570_v48  ;;  %v5372_v18 = vpop.permute.xlu1 %5371 }
 0x966   : > { %5462 = vst.msk [vmem:[#allocation2 + $0x78] sm:$0xff] %vm1709_vm4, %v5372_v18  ;;  %v5691_v18 = vmul.f32 %v13216_v28, %v12181_v24 }
 0x967   : > { %6565 = vrot.lane.b32.xlu1 %v6491_v13, %s15787_s15 }
 0x968   : > { %v13577_v9 = vpop.permute.xlu0 %6084 }
 0x969   : > { %16077 = vst [vmem:[#allocation60_spill] sm:$0xff] %v13577_v9  ;;  %v6940_v61 = vpop.permute.xlu1 %6939 }
 0x96a   : > { %7030 = vst.msk [vmem:[#allocation2 + $0x80] sm:$0xff] %vm2094_vm5, %v6940_v61  ;;  %v7326_v61 = vld [vmem:[#allocation2 + $0x68] sm:$0xff] }
 0x96b   : > { %5381 = vrot.lane.b32.xlu1 %v5307_v59, %s15787_s15 }
 0x96c   : > { %v13583_v56 = vpop.permute.xlu0 %6569 }
 0x96d   : > { %v5756_v43 = vpop.permute.xlu1 %5755 }
 0x96e   : > { %5846 = vst.msk [vmem:[#allocation2 + $0x78] sm:$0xff] %vm2094_vm5, %v5756_v43 }
 0x96f   : > { %6949 = vrot.lane.b32.xlu1 %v6875_v4, %s15806_s16 }
 0x970   : > { %v5386_v13 = vpop.permute.xlu0 %5385 }
 0x971   : > { %5469 = vst.msk [vmem:[#allocation2 + $0x120] sm:$0xff] %vm1709_vm4, %v5386_v13  ;;  %v13592_v34 = vpop.permute.xlu1 %6054  ;;  %v7329_v59 = vld [vmem:[#allocation2 + $0x80] sm:$0xff] }
 0x972   : > { %v7416_v62 = vpack.c.bf16 %v7329_v59, %v7326_v61 }
 0x973   : > { %5765 = vrot.lane.b32.xlu1 %v5691_v18, %s15806_s16 }
 0x974   : > { %7704 = vmatprep.mubr.bf16.mxu1 %v7416_v62  ;;  %v13595_v6 = vpop.permute.xlu0 %6953 }
 0x975   : > { %v7328_v43 = vld [vmem:[#allocation2 + $0x78] sm:$0xff] }
 0x976   : > { %v13597_v48 = vpop.permute.xlu1 %6433  ;;  %v7415_v4 = vpack.c.bf16 %v7328_v43, %v7325_v5 }
 0x977   : > { %6079 = vperm.xlu1 %9089, %v13455_v10  }
 0x978   : > { %v5770_v24 = vpop.permute.xlu0 %5769  ;;  %7705 = vmatmul.mubr.bf16.gmra.mrb[40].mxu1 %v7415_v4  ;;  %v6109_v4 = vmul.f32 %v13537_v11, %v13498_v42  ;;  %v16084_v11 = vld [vmem:[#allocation109_spill] sm:$0xff] }
 0x979   : > { %5853 = vst.msk [vmem:[#allocation2 + $0x120] sm:$0xff] %vm2094_vm5, %v5770_v24 }
 0x97b   : > { %9090 = vset.pattern.permute.xlu1 %v15975_v49  ;;  %v13602_v28 = vpop.permute.xlu1 %6817 }
 0x97c   : > { %16079 = vst [vmem:[#allocation112_spill] sm:$0xff] %v13602_v28  ;;  %6463 = vperm.xlu1 %9090, %v13455_v10   ;;  %v13605_v62 = vpop.permute.xlu0 %6089 }
 0x97d   : > { %16080 = vst [vmem:[#allocation39_spill] sm:$0xff] %v13605_v62 }
 0x97f   : > { %v13607_v13 = vpop.permute.xlu1 %6822 }
 0x980   : > { %6468 = vperm.xlu1 %9090, %v13275_v44  }
 0x981   : > { %v6404_v18 = vpop.permute.xlu0 %6403 }
 0x984   : > { %9091 = vset.pattern.permute.xlu1 %v15976_v41  ;;  %v13611_v61 = vpop.permute.xlu1 %5638 }
 0x985   : > { %6852 = vperm.xlu1 %9091, %v13275_v44   ;;  %v13614_v59 = vpop.permute.xlu0 %6418  ;;  %v16081_v44 = vld [vmem:[#allocation57_spill] sm:$0xff] }
 0x988   : > { %v6174_v5 = vpop.permute.xlu1 %6173 }
 0x989   : > { %6263 = vst.msk [vmem:[#allocation2 + $0x98] sm:$0xff] %vm1259_vm2, %v6174_v5  ;;  %9092 = vset.pattern.permute.xlu1 %v15977_v54  ;;  %v13618_v43 = vpop.permute.xlu0 %6438  ;;  %v6110_v5 = vmul.f32 %v13239_v50, %v16081_v44  ;;  %v16086_v50 = vld [vmem:[#allocation85_spill] sm:$0xff] }
 0x98a   : > { %5663 = vperm.xlu1 %9092, %v13455_v10   ;;  %v16083_v10 = vld [vmem:[#allocation12_spill] sm:$0xff]  ;;  %v5310_v53 = vmul.f32 %v16086_v50, %v13227_v32  ;;  %v7335_v32 = vld [vmem:[#allocation2 + $0xb0] sm:$0xff] }
 0x98b   : > { %v6494_v42 = vmul.f32 %v16084_v11, %v16083_v10 }
 0x98c   : > { %v6558_v24 = vpop.permute.xlu1 %6557 }
 0x98d   : > { %6647 = vst.msk [vmem:[#allocation2 + $0x98] sm:$0xff] %vm1709_vm4, %v6558_v24  ;;  %v13624_v62 = vpop.permute.xlu0 %6458 }
 0x98e   : > { %6185 = vrot.lane.b32.xlu1 %v6109_v4, %s15756_s29 }
 0x98f   : > { %9095 = vset.pattern.permute.xlu1 %v15974_v31  ;;  %v16085_v31 = vld [vmem:[#allocation13_spill] sm:$0xff] }
 0x990   : > { %v5374_v21 = vpop.permute.xlu1 %5373 }
 0x991   : > { %5463 = vst.msk [vmem:[#allocation2 + $0x90] sm:$0xff] %vm1709_vm4, %v5374_v21  ;;  %v13631_v63 = vpop.permute.xlu0 %6478  ;;  %v16087_v21 = vld [vmem:[#allocation14_spill] sm:$0xff] }
 0x992   : > { %16082 = vst [vmem:[#allocation130_spill] sm:$0xff] %v13631_v63  ;;  %6187 = vrot.lane.b32.xlu1 %v6110_v5, %s15756_s29  ;;  %v15488_v5 = vrot.slane %v16087_v21, 1 }
 0x994   : > { %v6942_v24 = vpop.permute.xlu1 %6941 }
 0x995   : > { %7031 = vst.msk [vmem:[#allocation2 + $0x98] sm:$0xff] %vm2094_vm5, %v6942_v24  ;;  %v5695_v24 = vmul.f32 %v13321_v3, %v16040_v33  ;;  %v5694_v33 = vmul.f32 %v13286_v47, %v16031_v35  ;;  %v7057_v47 = vld [vmem:[%s15103_s1] sm:$0xff] }
 0x996   : > { %6571 = vrot.lane.b32.xlu1 %v6494_v42, %s15787_s15  ;;  %v6778_v4 = vpop.permute.xlu0 %6777  ;;  %v5057_v42 = vrot.slane %v16085_v31, 1 }
 0x997   : > { %v6879_v9 = vmul.f32 %v6778_v4, %v16085_v31  ;;  %v6878_v4 = vmul.f32 %v13277_v8, %v16060_v23  ;;  %v7334_v31 = vld [vmem:[#allocation2 + $0xa8] sm:$0xff] }
 0x998   : > { %v5758_v28 = vpop.permute.xlu1 %5757 }
 0x999   : > { %5847 = vst.msk [vmem:[#allocation2 + $0x90] sm:$0xff] %vm2094_vm5, %v5758_v28  ;;  %6957 = vrot.lane.b32.xlu0 %v6879_v9, %s15806_s16 }
 0x99a   : > { %5387 = vrot.lane.b32.xlu1 %v5310_v53, %s15787_s15  ;;  %v6793_v11 = vpop.permute.xlu0 %6792  ;;  %v13657_v53 = vsel %vm1324_vm3, %v5057_v42, %v15488_v5 }
 0x99b   : > { %v6113_v8 = vmul.f32 %v13331_v14, %v13657_v53  ;;  %v16090_v14 = vrot.slane %v16060_v23, 1 }
 0x99c   : > { %v13650_v63 = vpop.permute.xlu1 %6059  ;;  %v7332_v50 = vld [vmem:[#allocation2 + $0x98] sm:$0xff] }
 0x99d   : > { %16088 = vst [vmem:[#allocation61_spill] sm:$0xff] %v13650_v63  ;;  %5773 = vrot.lane.b32.xlu0 %v5695_v24, %s15806_s16  ;;  %v7419_v9 = vpack.c.bf16 %v7335_v32, %v7332_v50 }
 0x99e   : > { %6955 = vrot.lane.b32.xlu1 %v6878_v4, %s15806_s16  ;;  %v13660_v3 = vpop.permute.xlu0 %6807  ;;  %v16089_v4 = vld [vmem:[#allocation20_spill] sm:$0xff] }
 0x99f   : > { %7712 = vmatprep.mubr.bf16.mxu1 %v7419_v9  ;;  %v6497_v5 = vmul.f32 %v6404_v18, %v16089_v4  ;;  %v13686_v9 = vsel %vm1324_vm3, %v16090_v14, %v5057_v42 }
 0x9a0   : > { %v7331_v28 = vld [vmem:[#allocation2 + $0x90] sm:$0xff] }
 0x9a1   : > { %v13666_v32 = vpop.permute.xlu1 %6443  ;;  %6193 = vrot.lane.b32.xlu0 %v6113_v8, %s15756_s29  ;;  %v7418_v24 = vpack.c.bf16 %v7334_v31, %v7331_v28  ;;  %v16091_v8 = vld [vmem:[#allocation89_spill] sm:$0xff] }
 0x9a2   : > { %5771 = vrot.lane.b32.xlu1 %v5694_v33, %s15806_s16  ;;  %v13670_v50 = vpop.permute.xlu0 %6827  ;;  %v5314_v33 = vmul.f32 %v16091_v8, %v13686_v9  ;;  %v16092_v31 = vld [vmem:[#allocation17_spill] sm:$0xff] }
 0x9a3   : > { %7713 = vmatmul.mubr.bf16.gmra.mrb[44].mxu1 %v7418_v24  ;;  %v6882_v23 = vmul.f32 %v6793_v11, %v16092_v31  ;;  %v16093_v24 = vmov 2   ;;  %v16094_v11 = vld [vmem:[#allocation22_spill] sm:$0xff] }
 0x9a4   : > { %v5061_v8 = vrot.slane %v16094_v11, 1 }
 0x9a5   : > { %v13673_v63 = vpop.permute.xlu1 %6448  ;;  %6577 = vrot.lane.b32.xlu0 %v6497_v5, %s15787_s15 }
 0x9a6   : > { %6094 = vperm.xlu1 %9095, %v13418_v2   ;;  %v13677_v35 = vpop.permute.xlu0 %6847 }
 0x9a9   : > { %7091 = vperm.xlu0 %9101, %v7057_v47   ;;  %v7060_v47 = vld [vmem:[%s15103_s1 + $0x18] sm:$0xff] }
 0x9aa   : > { %v13688_v18 = vpop.permute.xlu1 %6832  ;;  %9096 = vset.pattern.permute.xlu1 %v15975_v49  ;;  %v13691_v5 = vpop.permute.xlu0 %6862 }
 0x9ab   : > { %6473 = vperm.xlu1 %9096, %v13377_v16  }
 0x9ad   : > { %5395 = vrot.lane.b32.xlu0 %v5314_v33, %s15787_s15 }
 0x9ae   : > { %v6190_v28 = vpop.permute.xlu0 %6189 }
 0x9af   : > { %6271 = vst.msk [vmem:[#allocation2 + $0x158] sm:$0xff] %vm1259_vm2, %v6190_v28  ;;  %v13699_v42 = vpop.permute.xlu1 %5643  ;;  %9098 = vset.pattern.permute.xlu1 %v16093_v24  ;;  %v16095_v28 = vld [vmem:[#allocation15_spill] sm:$0xff] }
 0x9b0   : > { %5294 = vperm.xlu1 %9098, %v13418_v2  }
 0x9b1   : > { %6963 = vrot.lane.b32.xlu0 %v6882_v23, %s15806_s16  ;;  %v5698_v23 = vmul.f32 %v13386_v7, %v16095_v28 }
 0x9b2   : > { %v6574_v49 = vpop.permute.xlu0 %6573 }
 0x9b3   : > { %6655 = vst.msk [vmem:[#allocation2 + $0x158] sm:$0xff] %vm1709_vm4, %v6574_v49  ;;  %v6178_v14 = vpop.permute.xlu1 %6177 }
 0x9b4   : > { %6265 = vst.msk [vmem:[#allocation2 + $0xc8] sm:$0xff] %vm1259_vm2, %v6178_v14  ;;  %9099 = vset.pattern.permute.xlu1 %v15976_v41  ;;  %v5060_v41 = vrot.slane %v16092_v31, 1  ;;  %v6112_v14 = vmul.f32 %v13542_v37, %v13686_v9  ;;  %v16098_v37 = vrot.slane %v16087_v21, 1 }
 0x9b5   : > { %6649 = vst.msk [vmem:[#allocation2 + $0xc8] sm:$0xff] %vm1709_vm4, %v13446_v19  ;;  %6857 = vperm.xlu1 %9099, %v13377_v16   ;;  %7106 = vperm.xlu0 %9101, %v7060_v47  }
 0x9b6   : > { %7033 = vst.msk [vmem:[#allocation2 + $0xc8] sm:$0xff] %vm2094_vm5, %v13461_v57  ;;  %v5390_v33 = vpop.permute.xlu0 %5389  ;;  %v13729_v19 = vsel %vm1324_vm3, %v5060_v41, %v5061_v8 }
 0x9b7   : > { %5471 = vst.msk [vmem:[#allocation2 + $0x150] sm:$0xff] %vm1709_vm4, %v5390_v33  ;;  %v6180_v24 = vpop.permute.xlu1 %6179  ;;  %v6116_v7 = vmul.f32 %v13432_v58, %v13729_v19  ;;  %v7062_v33 = vld [vmem:[%s15103_s1 + $0x28] sm:$0xff] }
 0x9b8   : > { %6266 = vst.msk [vmem:[#allocation2 + $0xe0] sm:$0xff] %vm1259_vm2, %v6180_v24  ;;  %v16099_v24 = vld [vmem:[#allocation91_spill] sm:$0xff] }
 0x9b9   : > { %9100 = vset.pattern.permute.xlu1 %v15977_v54  ;;  %5779 = vrot.lane.b32.xlu0 %v5698_v23, %s15806_s16  ;;  %v16096_v54 = vld [vmem:[#allocation23_spill] sm:$0xff] }
 0x9ba   : > { %5673 = vperm.xlu1 %9100, %v13377_v16   ;;  %v6500_v49 = vmul.f32 %v13614_v59, %v16096_v54  ;;  %v16097_v16 = vld [vmem:[#allocation18_spill] sm:$0xff]  ;;  %v6496_v59 = vmul.f32 %v13304_v22, %v16095_v28  ;;  %v16101_v28 = vld [vmem:[#allocation21_spill] sm:$0xff] }
 0x9bb   : > { %v6564_v57 = vpop.permute.xlu1 %6563  ;;  %v5059_v58 = vrot.slane %v16097_v16, 1 }
 0x9bc   : > { %6650 = vst.msk [vmem:[#allocation2 + $0xe0] sm:$0xff] %vm1709_vm4, %v6564_v57  ;;  %v16100_v57 = vld [vmem:[#allocation87_spill] sm:$0xff] }
 0x9bd   : > { %6199 = vrot.lane.b32.xlu0 %v6116_v7, %s15756_s29  ;;  %v13758_v23 = vsel %vm1324_vm3, %v16098_v37, %v5059_v58  ;;  %v5312_v22 = vmul.f32 %v16100_v57, %v16081_v44  ;;  %v7064_v37 = vld [vmem:[%s15103_s1 + $0x38] sm:$0xff] }
 0x9be   : > { %5678 = vperm.xlu1 %9100, %v13418_v2   ;;  %v5316_v7 = vmul.f32 %v16099_v24, %v13758_v23  ;;  %v7337_v24 = vld [vmem:[#allocation2 + $0xc0] sm:$0xff] }
 0x9bf   : > { %v5380_v47 = vpop.permute.xlu1 %5379 }
 0x9c0   : > { %5466 = vst.msk [vmem:[#allocation2 + $0xd8] sm:$0xff] %vm1709_vm4, %v5380_v47 }
 0x9c1   : > { %6583 = vrot.lane.b32.xlu0 %v6500_v49, %s15787_s15  ;;  %v6884_v49 = vmul.f32 %v13457_v52, %v16101_v28  ;;  %v5696_v52 = vmul.f32 %v13113_v15, %v16083_v10 }
 0x9c2   : > { %6191 = vrot.lane.b32.xlu1 %v6112_v14, %s15756_s29  ;;  %v7338_v14 = vld [vmem:[#allocation2 + $0xc8] sm:$0xff] }
 0x9c3   : > { %v6948_v2 = vpop.permute.xlu1 %6947  ;;  %9102 = vset.pattern.permute.xlu1 %v16063_v12 }
 0x9c4   : > { %7034 = vst.msk [vmem:[#allocation2 + $0xe0] sm:$0xff] %vm2094_vm5, %v6948_v2  ;;  %v6880_v2 = vmul.f32 %v13313_v1, %v16087_v21  ;;  %v16102_v1 = vld [vmem:[#allocation28_spill] sm:$0xff] }
 0x9c5   : > { %7116 = vperm.xlu0 %9101, %v7062_v33   ;;  %v5063_v21 = vrot.slane %v16102_v1, 1 }
 0x9c6   : > { %6575 = vrot.lane.b32.xlu1 %v6496_v59, %s15787_s15 }
 0x9c7   : > { %v5764_v12 = vpop.permute.xlu1 %5763 }
 0x9c8   : > { %5850 = vst.msk [vmem:[#allocation2 + $0xd8] sm:$0xff] %vm2094_vm5, %v5764_v12 }
 0x9c9   : > { %5399 = vrot.lane.b32.xlu0 %v5316_v7, %s15787_s15 }
 0x9ca   : > { %5391 = vrot.lane.b32.xlu1 %v5312_v22, %s15787_s15  ;;  %v16103_v22 = vld [vmem:[#allocation19_spill] sm:$0xff] }
 0x9cb   : > { %v13770_v47 = vpop.permute.xlu1 %6074  ;;  %v7341_v33 = vld [vmem:[#allocation2 + $0xe0] sm:$0xff] }
 0x9cc   : > { %v7422_v59 = vpack.c.bf16 %v7341_v33, %v7338_v14  ;;  %v5062_v14 = vrot.slane %v16101_v28, 1  ;;  %v6114_v33 = vmul.f32 %v13339_v55, %v13758_v23  ;;  %v6498_v55 = vmul.f32 %v13358_v45, %v16103_v22  ;;  %v7066_v45 = vld [vmem:[%s15103_s1 + $0x48] sm:$0xff] }
 0x9cd   : > { %6967 = vrot.lane.b32.xlu0 %v6884_v49, %s15806_s16  ;;  %v5700_v49 = vmul.f32 %v13465_v39, %v16103_v22 }
 0x9ce   : > { %6959 = vrot.lane.b32.xlu1 %v6880_v2, %s15806_s16  ;;  %7720 = vmatprep.mubr.bf16.mxu1 %v7422_v59  ;;  %v13799_v15 = vsel %vm1324_vm3, %v5062_v14, %v5063_v21  ;;  %v16104_v59 = vld [vmem:[#allocation29_spill] sm:$0xff] }
 0x9cf   : > { %v7340_v7 = vld [vmem:[#allocation2 + $0xd8] sm:$0xff]  ;;  %v6118_v39 = vmul.f32 %v13551_v51, %v13799_v15 }
 0x9d0   : > { %v13781_v12 = vpop.permute.xlu1 %6453  ;;  %v7421_v57 = vpack.c.bf16 %v7340_v7, %v7337_v24  ;;  %v7058_v24 = vld [vmem:[%s15103_s1 + $0x8] sm:$0xff]  ;;  %v16105_v51 = vld [vmem:[#allocation86_spill] sm:$0xff] }
 0x9d1   : > { %7126 = vperm.xlu0 %9101, %v7064_v37   ;;  %v6502_v37 = vmul.f32 %v13534_v26, %v16104_v59  ;;  %v16106_v26 = vld [vmem:[#allocation93_spill] sm:$0xff] }
 0x9d2   : > { %5775 = vrot.lane.b32.xlu1 %v5696_v52, %s15806_s16  ;;  %7721 = vmatmul.mubr.bf16.gmra.mrb[48].mxu1 %v7421_v57  ;;  %v5313_v52 = vmul.f32 %v16105_v51, %v13475_v25  ;;  %v5318_v22 = vmul.f32 %v16106_v26, %v13729_v19  ;;  %v13855_v26 = vsel %vm1324_vm3, %v5059_v58, %v5060_v41 }
 0x9d5   : > { %v13790_v2 = vpop.permute.xlu1 %6837  ;;  %5783 = vrot.lane.b32.xlu0 %v5700_v49, %s15806_s16  ;;  %v6881_v49 = vmul.f32 %v13366_v38, %v16097_v16  ;;  %v7068_v38 = vld [vmem:[%s15103_s1 + $0x58] sm:$0xff] }
 0x9d6   : > { %6195 = vrot.lane.b32.xlu1 %v6114_v33, %s15756_s29 }
 0x9d9   : > { %v13806_v10 = vpop.permute.xlu1 %6842  ;;  %6203 = vrot.lane.b32.xlu0 %v6118_v39, %s15756_s29  ;;  %v16107_v39 = vld [vmem:[#allocation26_spill] sm:$0xff] }
 0x9da   : > { %6579 = vrot.lane.b32.xlu1 %v6498_v55, %s15787_s15  ;;  %v6886_v55 = vmul.f32 %v13540_v27, %v16107_v39  ;;  %v16108_v27 = vld [vmem:[#allocation34_spill] sm:$0xff] }
 0x9db   : > { %v5065_v51 = vrot.slane %v16108_v27, 1 }
 0x9dd   : > { %6587 = vrot.lane.b32.xlu0 %v6502_v37, %s15787_s15  ;;  %v7059_v37 = vld [vmem:[%s15103_s1 + $0x10] sm:$0xff] }
 0x9de   : > { %v13816_v7 = vpop.permute.xlu1 %5658  ;;  %7096 = vperm.xlu1 %9102, %v7058_v24  }
 0x9e1   : > { %7136 = vperm.xlu0 %9101, %v7066_v45   ;;  %v5697_v45 = vmul.f32 %v13379_v30, %v16064_v29  ;;  %v16109_v30 = vld [vmem:[#allocation53_spill] sm:$0xff] }
 0x9e2   : > { %v6182_v57 = vpop.permute.xlu1 %6181  ;;  %5393 = vrot.lane.b32.xlu1 %v5313_v52, %s15787_s15  ;;  %v5702_v29 = vmul.f32 %v16109_v30, %v16096_v54  ;;  %v7347_v30 = vld [vmem:[#allocation2 + $0x110] sm:$0xff] }
 0x9e3   : > { %6267 = vst.msk [vmem:[#allocation2 + $0xf8] sm:$0xff] %vm1259_vm2, %v6182_v57  ;;  %v9139_v57 = vld [vmem:[%s15109_s7 + $0x80] sm:$0xff]  }
 0x9e4   : > { %8891 = vmatprep.subr.bf16.mxu0 %v9139_v57  ;;  %8949 = vmatprep.subr.bf16.mxu1 %v9139_v57 }
 0x9e5   : > { %5403 = vrot.lane.b32.xlu0 %v5318_v22, %s15787_s15  ;;  %v5064_v22 = vrot.slane %v16107_v39, 1  ;;  %8892 = vmatpush3.bf16.msra.mxu0 %v9139_v57  ;;  %v7349_v39 = vld [vmem:[#allocation2 + $0x120] sm:$0xff] }
 0x9e6   : > { %v6566_v33 = vpop.permute.xlu1 %6565  ;;  %6961 = vrot.lane.b32.xlu1 %v6881_v49, %s15806_s16  ;;  %v6115_v49 = vmul.f32 %v13545_v60, %v13855_v26  ;;  %v9140_v60 = vld [vmem:[%s15109_s7 + $0x88] sm:$0xff]   ;;  %8951 = vmatpush3.bf16.msra.mxu1 %v9139_v57 }
 0x9e7   : > { %6651 = vst.msk [vmem:[#allocation2 + $0xf8] sm:$0xff] %vm1709_vm4, %v6566_v33  ;;  %v13870_v31 = vsel %vm1324_vm3, %v5064_v22, %v5065_v51  ;;  %8893 = vmatprep.subr.bf16.mxu0 %v9140_v60  ;;  %8950 = vmatprep.subr.bf16.mxu1 %v9140_v60 }
 0x9e8   : > { %v6120_v16 = vmul.f32 %v13592_v34, %v13870_v31 }
 0x9e9   : > { %6971 = vrot.lane.b32.xlu0 %v6886_v55, %s15806_s16  ;;  %8894 = vmatpush3.bf16.msra.mxu0 %v9140_v60 }
 0x9ea   : > { %v5382_v24 = vpop.permute.xlu1 %5381  ;;  %7101 = vperm.xlu1 %9102, %v7059_v37   ;;  %v16110_v37 = vld [vmem:[#allocation25_spill] sm:$0xff]  ;;  %8952 = vmatpush3.bf16.msra.mxu1 %v9140_v60 }
 0x9eb   : > { %5467 = vst.msk [vmem:[#allocation2 + $0xf0] sm:$0xff] %vm1709_vm4, %v5382_v24  ;;  %v16111_v24 = vld [vmem:[#allocation36_spill] sm:$0xff] }
 0x9ed   : > { %7146 = vperm.xlu0 %9101, %v7068_v38   ;;  %v6499_v38 = vmul.f32 %v16111_v24, %v16110_v37 }
 0x9ee   : > { %v6950_v52 = vpop.permute.xlu1 %6949  ;;  %5777 = vrot.lane.b32.xlu1 %v5697_v45, %s15806_s16 }
 0x9ef   : > { %7035 = vst.msk [vmem:[#allocation2 + $0xf8] sm:$0xff] %vm2094_vm5, %v6950_v52 }
 0x9f1   : > { %v8734_v33 = vpop.f32.mrb[32].mxu1  ;;  %5787 = vrot.lane.b32.xlu0 %v5702_v29, %s15806_s16  ;;  %v16112_v29 = vld [vmem:[#allocation35_spill] sm:$0xff] }
 0x9f2   : > { %v8735_v41 = vpop.f32.mrb[33].mxu1  ;;  %v5766_v54 = vpop.permute.xlu1 %5765  ;;  %6197 = vrot.lane.b32.xlu1 %v6115_v49, %s15756_s29  ;;  %v6504_v49 = vmul.f32 %v13618_v43, %v16112_v29  ;;  %v16113_v43 = vld [vmem:[#allocation88_spill] sm:$0xff] }
 0x9f3   : > { %v13878_v58 = vadd.f32 %v8735_v41, %v8734_v33  ;;  %5851 = vst.msk [vmem:[#allocation2 + $0xf0] sm:$0xff] %vm2094_vm5, %v5766_v54  ;;  %v8737_v55 = vpop.f32.mrb[34].mxu1  ;;  %v7061_v41 = vld [vmem:[%s15103_s1 + $0x20] sm:$0xff]  ;;  %v7070_v54 = vld [vmem:[%s15103_s1 + $0x68] sm:$0xff] }
 0x9f4   : > { %v8738_v45 = vpop.f32.mrb[35].mxu1 }
 0x9f5   : > { %v13883_v52 = vadd.f32 %v8738_v45, %v8737_v55  ;;  %6207 = vrot.lane.b32.xlu0 %v6120_v16, %s15756_s29  ;;  %v7346_v55 = vld [vmem:[#allocation2 + $0x108] sm:$0xff]  ;;  %v16114_v45 = vld [vmem:[#allocation95_spill] sm:$0xff] }
 0x9f6   : > { %v13886_v57 = vpop.permute.xlu1 %6079  ;;  %6581 = vrot.lane.b32.xlu1 %v6499_v38, %s15787_s15  ;;  %v7344_v34 = vld [vmem:[#allocation2 + $0xf8] sm:$0xff]  ;;  %v5315_v38 = vmul.f32 %v16113_v43, %v13657_v53 }
 0x9f7   : > { %v7425_v33 = vpack.c.bf16 %v7347_v30, %v7344_v34  ;;  %v5320_v34 = vmul.f32 %v16114_v45, %v13799_v15  ;;  %v16117_v43 = vld [vmem:[#allocation126_spill] sm:$0xff] }
 0x9f9   : > { %6591 = vrot.lane.b32.xlu0 %v6504_v49, %s15787_s15  ;;  %7728 = vmatprep.mubr.bf16.mxu1 %v7425_v33  ;;  %v16115_v49 = vld [vmem:[#allocation128_spill] sm:$0xff] }
 0x9fa   : > { %7111 = vperm.xlu1 %9102, %v7061_v41   ;;  %v7343_v16 = vld [vmem:[#allocation2 + $0xf0] sm:$0xff]  ;;  %v6883_v33 = vmul.f32 %v16115_v49, %v16094_v11  ;;  %v16116_v41 = vld [vmem:[#allocation32_spill] sm:$0xff]  ;;  %v13934_v49 = vsel %vm1324_vm3, %v5061_v8, %v5062_v14  ;;  %v16119_v8 = vld [vmem:[#allocation31_spill] sm:$0xff] }
 0x9fb   : > { %v13898_v24 = vpop.permute.xlu1 %6463  ;;  %v7424_v60 = vpack.c.bf16 %v7346_v55, %v7343_v16  ;;  %v6888_v16 = vmul.f32 %v13607_v13, %v16116_v41  ;;  %v16118_v13 = vld [vmem:[#allocation40_spill] sm:$0xff]  ;;  %v6501_v28 = vmul.f32 %v13529_v40, %v16119_v8 }
 0x9fc   : > { %v7065_v40 = vld [vmem:[%s15103_s1 + $0x40] sm:$0xff] }
 0x9fd   : > { %7156 = vperm.xlu0 %9101, %v7070_v54   ;;  %7729 = vmatmul.mubr.bf16.gmra.mrb[52].mxu1 %v7424_v60  ;;  %v7063_v54 = vld [vmem:[%s15103_s1 + $0x30] sm:$0xff]  ;;  %v7072_v60 = vld [vmem:[%s15103_s1 + $0x78] sm:$0xff] }
 0x9fe   : > { %5397 = vrot.lane.b32.xlu1 %v5315_v38, %s15787_s15  ;;  %v5699_v38 = vmul.f32 %v16117_v43, %v16089_v4  ;;  %v5066_v4 = vrot.slane %v16116_v41, 1  ;;  %v7074_v43 = vld [vmem:[%s15103_s1 + $0x88] sm:$0xff] }
 0x9ff   : > { %v13905_v30 = vpop.permute.xlu1 %6468  ;;  %v16137_v41 = vld [vmem:[#allocation8_spill] sm:$0xff] }
 0xa01   : > { %5407 = vrot.lane.b32.xlu0 %v5320_v34, %s15787_s15  ;;  %v5067_v34 = vrot.slane %v16118_v13, 1 }
 0xa02   : > { %6965 = vrot.lane.b32.xlu1 %v6883_v33, %s15806_s16  ;;  %v5704_v33 = vmul.f32 %v13611_v61, %v16104_v59 }
 0xa03   : > { %v13949_v11 = vsel %vm1324_vm3, %v5066_v4, %v5067_v34 }
 0xa04   : > { %v13916_v55 = vpop.permute.xlu1 %6852 }
 0xa05   : > { %6975 = vrot.lane.b32.xlu0 %v6888_v16, %s15806_s16 }
 0xa06   : > { %7121 = vperm.xlu1 %9102, %v7063_v54   ;;  %v6117_v54 = vmul.f32 %v13523_v36, %v13934_v49  ;;  %v6122_v36 = vmul.f32 %v13564_v46, %v13949_v11  ;;  %v16120_v46 = vld [vmem:[#allocation41_spill] sm:$0xff] }
 0xa07   : > { %v6506_v59 = vmul.f32 %v13673_v63, %v16120_v46  ;;  %v16121_v63 = vld [vmem:[#allocation90_spill] sm:$0xff] }
 0xa09   : > { %v13924_v45 = vpop.permute.xlu1 %5663  ;;  %7166 = vperm.xlu0 %9101, %v7072_v60  }
 0xa0a   : > { %5781 = vrot.lane.b32.xlu1 %v5699_v38, %s15806_s16 }
 0xa0b   : > { %v6958_v16 = vpop.permute.xlu0 %6957 }
 0xa0c   : > { %7039 = vst.msk [vmem:[#allocation2 + $0x158] sm:$0xff] %vm2094_vm5, %v6958_v16 }
 0xa0d   : > { %v6186_v60 = vpop.permute.xlu1 %6185  ;;  %5791 = vrot.lane.b32.xlu0 %v5704_v33, %s15806_s16  ;;  %v5317_v33 = vmul.f32 %v16121_v63, %v13855_v26 }
 0xa0e   : > { %6269 = vst.msk [vmem:[#allocation2 + $0x128] sm:$0xff] %vm1259_vm2, %v6186_v60  ;;  %6201 = vrot.lane.b32.xlu1 %v6117_v54, %s15756_s29  ;;  %v16122_v54 = vld [vmem:[#allocation97_spill] sm:$0xff] }
 0xa0f   : > { %6653 = vst.msk [vmem:[#allocation2 + $0x128] sm:$0xff] %vm1709_vm4, %v13583_v56  ;;  %v5774_v61 = vpop.permute.xlu0 %5773  ;;  %v5322_v60 = vmul.f32 %v16122_v54, %v13870_v31 }
 0xa10   : > { %7037 = vst.msk [vmem:[#allocation2 + $0x128] sm:$0xff] %vm2094_vm5, %v13595_v6  ;;  %5855 = vst.msk [vmem:[#allocation2 + $0x150] sm:$0xff] %vm2094_vm5, %v5774_v61 }
 0xa11   : > { %v6188_v14 = vpop.permute.xlu1 %6187  ;;  %6211 = vrot.lane.b32.xlu0 %v6122_v36, %s15756_s29  ;;  %v6885_v36 = vmul.f32 %v13660_v3, %v16102_v1  ;;  %v7067_v3 = vld [vmem:[%s15103_s1 + $0x50] sm:$0xff] }
 0xa12   : > { %6270 = vst.msk [vmem:[#allocation2 + $0x140] sm:$0xff] %vm1259_vm2, %v6188_v14  ;;  %6585 = vrot.lane.b32.xlu1 %v6501_v28, %s15787_s15 }
 0xa13   : > { %v6194_v56 = vpop.permute.xlu0 %6193 }
 0xa14   : > { %6273 = vst.msk [vmem:[#allocation2 + $0x188] sm:$0xff] %vm1259_vm2, %v6194_v56 }
 0xa15   : > { %v6572_v6 = vpop.permute.xlu1 %6571  ;;  %6595 = vrot.lane.b32.xlu0 %v6506_v59, %s15787_s15 }
 0xa16   : > { %6654 = vst.msk [vmem:[#allocation2 + $0x140] sm:$0xff] %vm1709_vm4, %v6572_v6  ;;  %7131 = vperm.xlu1 %9102, %v7065_v40   ;;  %v16123_v40 = vld [vmem:[#allocation38_spill] sm:$0xff] }
 0xa17   : > { %v6578_v38 = vpop.permute.xlu0 %6577  ;;  %v6890_v6 = vmul.f32 %v13688_v18, %v16123_v40  ;;  %v5701_v18 = vmul.f32 %v13548_v20, %v16110_v37  ;;  %v7350_v54 = vld [vmem:[#allocation2 + $0x128] sm:$0xff]  ;;  %v16125_v20 = vld [vmem:[#allocation110_spill] sm:$0xff] }
 0xa18   : > { %6657 = vst.msk [vmem:[#allocation2 + $0x188] sm:$0xff] %vm1709_vm4, %v6578_v38  ;;  %v5706_v37 = vmul.f32 %v16125_v20, %v16112_v29 }
 0xa19   : > { %v5388_v16 = vpop.permute.xlu1 %5387  ;;  %7176 = vperm.xlu0 %9101, %v7074_v43  }
 0xa1a   : > { %5470 = vst.msk [vmem:[#allocation2 + $0x138] sm:$0xff] %vm1709_vm4, %v5388_v16  ;;  %5401 = vrot.lane.b32.xlu1 %v5317_v33, %s15787_s15  ;;  %v7076_v33 = vld [vmem:[%s15103_s1 + $0x98] sm:$0xff] }
 0xa1c   : > { %v8740_v61 = vpop.f32.mrb[36].mxu1 }
 0xa1d   : > { %v8741_v28 = vpop.f32.mrb[37].mxu1  ;;  %v6956_v14 = vpop.permute.xlu1 %6955  ;;  %5411 = vrot.lane.b32.xlu0 %v5322_v60, %s15787_s15 }
 0xa1e   : > { %v13986_v59 = vadd.f32 %v8741_v28, %v8740_v61  ;;  %7038 = vst.msk [vmem:[#allocation2 + $0x140] sm:$0xff] %vm2094_vm5, %v6956_v14  ;;  %v8743_v56 = vpop.f32.mrb[38].mxu1  ;;  %6969 = vrot.lane.b32.xlu1 %v6885_v36, %s15806_s16  ;;  %v16124_v36 = vld [vmem:[#allocation46_spill] sm:$0xff]  ;;  %v14014_v14 = vsel %vm1324_vm3, %v5063_v21, %v5064_v22 }
 0xa1f   : > { %v8744_v43 = vpop.f32.mrb[39].mxu1  ;;  %v5069_v61 = vrot.slane %v16124_v36, 1 }
 0xa20   : > { %v13995_v38 = vadd.f32 %v8744_v43, %v8743_v56  ;;  %v5068_v56 = vrot.slane %v16123_v40, 1  ;;  %v16151_v40 = vld [vmem:[#allocation11_spill] sm:$0xff] }
 0xa21   : > { %v5772_v63 = vpop.permute.xlu1 %5771  ;;  %6979 = vrot.lane.b32.xlu0 %v6890_v6, %s15806_s16  ;;  %v6119_v6 = vmul.f32 %v13559_v17, %v14014_v14 }
 0xa22   : > { %5854 = vst.msk [vmem:[#allocation2 + $0x138] sm:$0xff] %vm2094_vm5, %v5772_v63  ;;  %7141 = vperm.xlu1 %9102, %v7067_v3   ;;  %v16126_v3 = vld [vmem:[#allocation51_spill] sm:$0xff]  ;;  %v14029_v21 = vsel %vm1324_vm3, %v5068_v56, %v5069_v61 }
 0xa23   : > { %v6124_v29 = vmul.f32 %v13770_v47, %v14029_v21  ;;  %v7069_v47 = vld [vmem:[%s15103_s1 + $0x60] sm:$0xff] }
 0xa25   : > { %v14004_v16 = vpop.permute.xlu1 %6094  ;;  %7186 = vperm.xlu0 %9101, %v7076_v33   ;;  %v7353_v60 = vld [vmem:[#allocation2 + $0x140] sm:$0xff]  ;;  %v16127_v33 = vld [vmem:[#allocation37_spill] sm:$0xff] }
 0xa26   : > { %5785 = vrot.lane.b32.xlu1 %v5701_v18, %s15806_s16  ;;  %v7428_v28 = vpack.c.bf16 %v7353_v60, %v7350_v54  ;;  %v6503_v18 = vmul.f32 %v13597_v48, %v16127_v33  ;;  %v16128_v60 = vld [vmem:[#allocation47_spill] sm:$0xff]  ;;  %v7078_v48 = vld [vmem:[%s15103_s1 + $0xa8] sm:$0xff] }
 0xa28   : > { %v7092_v43 = vpop.permute.xlu0 %7091  ;;  %7736 = vmatprep.mubr.bf16.mxu1 %v7428_v28  ;;  %v6508_v28 = vmul.f32 %v13624_v62, %v16128_v60 }
 0xa29   : > { %v7249_v63 = vmul.f32 %v7092_v43, %v16126_v3  ;;  %5795 = vrot.lane.b32.xlu0 %v5706_v37, %s15806_s16  ;;  %v7352_v1 = vld [vmem:[#allocation2 + $0x138] sm:$0xff] }
 0xa2a   : > { %v14031_v22 = vpop.permute.xlu1 %6473  ;;  %6205 = vrot.lane.b32.xlu1 %v6119_v6, %s15756_s29  ;;  %v7427_v17 = vpack.c.bf16 %v7352_v1, %v7349_v39  ;;  %v16129_v6 = vld [vmem:[#allocation92_spill] sm:$0xff]  ;;  %v16131_v1 = vld [vmem:[#allocation99_spill] sm:$0xff] }
 0xa2b   : > { %7281 = vst.msk [vmem:[#allocation2 + $0x10] sm:$0xff] %vm15489_vm0, %v7249_v63  ;;  %v5319_v43 = vmul.f32 %v16129_v6, %v13934_v49  ;;  %v16130_v63 = vld [vmem:[#allocation52_spill] sm:$0xff]  ;;  %v7071_v6 = vld [vmem:[%s15103_s1 + $0x70] sm:$0xff] }
 0xa2c   : > { %v5396_v54 = vpop.permute.xlu0 %5395  ;;  %7737 = vmatmul.mubr.bf16.gmra.mrb[56].mxu1 %v7427_v17  ;;  %v5324_v17 = vmul.f32 %v16131_v1, %v13949_v11 }
 0xa2d   : > { %5474 = vst.msk [vmem:[#allocation2 + $0x198] sm:$0xff] %vm1709_vm4, %v5396_v54  ;;  %6215 = vrot.lane.b32.xlu0 %v6124_v29, %s15756_s29  ;;  %v16132_v29 = vld [vmem:[#allocation112_spill] sm:$0xff] }
 0xa2e   : > { %6589 = vrot.lane.b32.xlu1 %v6503_v18, %s15787_s15  ;;  %v6887_v18 = vmul.f32 %v16132_v29, %v16108_v27  ;;  %v14094_v29 = vsel %vm1324_vm3, %v5065_v51, %v5066_v4  ;;  %v16138_v27 = vrot.slane %v16137_v41, 1 }
 0xa2f   : > { %v14044_v20 = vpop.permute.xlu1 %5294 }
 0xa30   : > { %v14049_v37 = vpop.permute.xlu0 %6963 }
 0xa31   : > { %6599 = vrot.lane.b32.xlu0 %v6508_v28, %s15787_s15 }
 0xa32   : > { %7151 = vperm.xlu1 %9102, %v7069_v47   ;;  %v16133_v47 = vld [vmem:[#allocation44_spill] sm:$0xff] }
 0xa34   : > { %v14057_v3 = vpop.permute.xlu1 %6857  ;;  %v7107_v62 = vpop.permute.xlu0 %7106 }
 0xa35   : > { %v7252_v39 = vmul.f32 %v7107_v62, %v16130_v63  ;;  %7196 = vperm.xlu0 %9101, %v7078_v48   ;;  %v6892_v48 = vmul.f32 %v13806_v10, %v16133_v47  ;;  %v7080_v63 = vld [vmem:[%s15103_s1 + $0xb8] sm:$0xff] }
 0xa36   : > { %5405 = vrot.lane.b32.xlu1 %v5319_v43, %s15787_s15 }
 0xa37   : > { %7284 = vst.msk [vmem:[#allocation2 + $0x58] sm:$0xff] %vm15489_vm0, %v7252_v39  ;;  %v16134_v39 = vld [vmem:[#allocation127_spill] sm:$0xff] }
 0xa38   : > { %v5780_v54 = vpop.permute.xlu0 %5779  ;;  %v5703_v1 = vmul.f32 %v16134_v39, %v16119_v8  ;;  %v5708_v8 = vmul.f32 %v13816_v7, %v16120_v46  ;;  %v16139_v7 = vld [vmem:[#allocation60_spill] sm:$0xff]  ;;  %v16140_v46 = vld [vmem:[#allocation43_spill] sm:$0xff] }
 0xa39   : > { %5858 = vst.msk [vmem:[#allocation2 + $0x198] sm:$0xff] %vm2094_vm5, %v5780_v54  ;;  %v14067_v28 = vpop.permute.xlu1 %5673  ;;  %5415 = vrot.lane.b32.xlu0 %v5324_v17, %s15787_s15  ;;  %v16135_v54 = vld [vmem:[#allocation61_spill] sm:$0xff] }
 0xa3a   : > { %6973 = vrot.lane.b32.xlu1 %v6887_v18, %s15806_s16  ;;  %v5070_v18 = vrot.slane %v16133_v47, 1 }
 0xa3c   : > { %v6200_v43 = vpop.permute.xlu0 %6199  ;;  %v14109_v51 = vsel %vm1324_vm3, %v5070_v18, %v16138_v27 }
 0xa3d   : > { %6276 = vst.msk [vmem:[#allocation2 + $0x1d0] sm:$0xff] %vm1259_vm2, %v6200_v43  ;;  %v14077_v62 = vpop.permute.xlu1 %5678  ;;  %6983 = vrot.lane.b32.xlu0 %v6892_v48, %s15806_s16  ;;  %v6121_v48 = vmul.f32 %v16135_v54, %v14094_v29  ;;  %v16136_v43 = vld [vmem:[#allocation124_spill] sm:$0xff]  ;;  %v6126_v4 = vmul.f32 %v16139_v7, %v14109_v51 }
 0xa3e   : > { %7161 = vperm.xlu1 %9102, %v7071_v6  }
 0xa40   : > { %v6584_v10 = vpop.permute.xlu0 %6583 }
 0xa41   : > { %6660 = vst.msk [vmem:[#allocation2 + $0x1d0] sm:$0xff] %vm1709_vm4, %v6584_v10  ;;  %v6192_v17 = vpop.permute.xlu1 %6191  ;;  %7206 = vperm.xlu0 %9101, %v7080_v63  }
 0xa42   : > { %6272 = vst.msk [vmem:[#allocation2 + $0x170] sm:$0xff] %vm1259_vm2, %v6192_v17  ;;  %5789 = vrot.lane.b32.xlu1 %v5703_v1, %s15806_s16  ;;  %v6505_v1 = vmul.f32 %v13666_v32, %v16140_v46 }
 0xa44   : > { %v7117_v6 = vpop.permute.xlu0 %7116 }
 0xa45   : > { %v7254_v63 = vmul.f32 %v7117_v6, %v16136_v43  ;;  %v6576_v39 = vpop.permute.xlu1 %6575  ;;  %5799 = vrot.lane.b32.xlu0 %v5708_v8, %s15806_s16  ;;  %v16141_v8 = vld [vmem:[#allocation76_spill] sm:$0xff] }
 0xa46   : > { %6656 = vst.msk [vmem:[#allocation2 + $0x170] sm:$0xff] %vm1709_vm4, %v6576_v39  ;;  %6209 = vrot.lane.b32.xlu1 %v6121_v48, %s15756_s29  ;;  %v6510_v54 = vmul.f32 %v13905_v30, %v16141_v8  ;;  %v7073_v6 = vld [vmem:[%s15103_s1 + $0x80] sm:$0xff]  ;;  %v7082_v30 = vld [vmem:[%s15103_s1 + $0xc8] sm:$0xff] }
 0xa47   : > { %7286 = vst.msk [vmem:[#allocation2 + $0x88] sm:$0xff] %vm15489_vm0, %v7254_v63 }
 0xa48   : > { %v5400_v10 = vpop.permute.xlu0 %5399 }
 0xa49   : > { %5476 = vst.msk [vmem:[#allocation2 + $0x1c8] sm:$0xff] %vm1709_vm4, %v5400_v10  ;;  %v5392_v17 = vpop.permute.xlu1 %5391  ;;  %6219 = vrot.lane.b32.xlu0 %v6126_v4, %s15756_s29 }
 0xa4a   : > { %5472 = vst.msk [vmem:[#allocation2 + $0x168] sm:$0xff] %vm1709_vm4, %v5392_v17  ;;  %6593 = vrot.lane.b32.xlu1 %v6505_v1, %s15787_s15  ;;  %v16142_v1 = vld [vmem:[#allocation94_spill] sm:$0xff] }
 0xa4b   : > { %v8746_v48 = vpop.f32.mrb[40].mxu1  ;;  %v5321_v10 = vmul.f32 %v16142_v1, %v14014_v14  ;;  %v7356_v1 = vld [vmem:[#allocation2 + $0x158] sm:$0xff] }
 0xa4c   : > { %v6968_v43 = vpop.permute.xlu0 %6967  ;;  %v8747_v32 = vpop.f32.mrb[41].mxu1 }
 0xa4d   : > { %7044 = vst.msk [vmem:[#allocation2 + $0x1d0] sm:$0xff] %vm2094_vm5, %v6968_v43  ;;  %v14128_v63 = vadd.f32 %v8747_v32, %v8746_v48  ;;  %v6960_v39 = vpop.permute.xlu1 %6959  ;;  %6603 = vrot.lane.b32.xlu0 %v6510_v54, %s15787_s15  ;;  %v8749_v27 = vpop.f32.mrb[42].mxu1  ;;  %v16143_v48 = vld [vmem:[#allocation33_spill] sm:$0xff]  ;;  %v16144_v54 = vld [vmem:[#allocation98_spill] sm:$0xff] }
 0xa4e   : > { %7040 = vst.msk [vmem:[#allocation2 + $0x170] sm:$0xff] %vm2094_vm5, %v6960_v39  ;;  %7171 = vperm.xlu1 %9102, %v7073_v6   ;;  %v8750_v7 = vpop.f32.mrb[43].mxu1  ;;  %v5326_v6 = vmul.f32 %v16144_v54, %v14029_v21  ;;  %v6889_v39 = vmul.f32 %v13670_v50, %v16118_v13  ;;  %v7075_v50 = vld [vmem:[%s15103_s1 + $0x90] sm:$0xff] }
 0xa4f   : > { %v14135_v4 = vadd.f32 %v8750_v7, %v8749_v27  ;;  %v7355_v54 = vld [vmem:[#allocation2 + $0x150] sm:$0xff] }
 0xa50   : > { %v7127_v17 = vpop.permute.xlu0 %7126  ;;  %v16150_v13 = vld [vmem:[#allocation113_spill] sm:$0xff] }
 0xa51   : > { %v7256_v43 = vmul.f32 %v7127_v17, %v16143_v48  ;;  %v5776_v32 = vpop.permute.xlu1 %5775  ;;  %7216 = vperm.xlu0 %9101, %v7082_v30   ;;  %v16145_v17 = vld [vmem:[#allocation9_spill] sm:$0xff] }
 0xa52   : > { %5856 = vst.msk [vmem:[#allocation2 + $0x168] sm:$0xff] %vm2094_vm5, %v5776_v32  ;;  %5409 = vrot.lane.b32.xlu1 %v5321_v10, %s15787_s15  ;;  %v6894_v48 = vmul.f32 %v13916_v55, %v16145_v17  ;;  %v7084_v55 = vld [vmem:[%s15103_s1 + $0xd8] sm:$0xff]  ;;  %v16148_v17 = vld [vmem:[#allocation129_spill] sm:$0xff] }
 0xa53   : > { %7288 = vst.msk [vmem:[#allocation2 + $0xb8] sm:$0xff] %vm15489_vm0, %v7256_v43 }
 0xa54   : > { %v5784_v27 = vpop.permute.xlu0 %5783 }
 0xa55   : > { %5860 = vst.msk [vmem:[#allocation2 + $0x1c8] sm:$0xff] %vm2094_vm5, %v5784_v27  ;;  %v6196_v7 = vpop.permute.xlu1 %6195  ;;  %5419 = vrot.lane.b32.xlu0 %v5326_v6, %s15787_s15  ;;  %v7359_v30 = vld [vmem:[#allocation2 + $0x170] sm:$0xff]  ;;  %v5705_v27 = vmul.f32 %v13699_v42, %v16127_v33 }
 0xa56   : > { %6274 = vst.msk [vmem:[#allocation2 + $0x1a0] sm:$0xff] %vm1259_vm2, %v6196_v7  ;;  %6977 = vrot.lane.b32.xlu1 %v6889_v39, %s15806_s16  ;;  %v7431_v10 = vpack.c.bf16 %v7359_v30, %v7356_v1  ;;  %v16146_v30 = vld [vmem:[#allocation106_spill] sm:$0xff] }
 0xa57   : > { %v16147_v42 = vld [vmem:[#allocation54_spill] sm:$0xff] }
 0xa58   : > { %v6204_v43 = vpop.permute.xlu0 %6203  ;;  %7744 = vmatprep.mubr.bf16.mxu1 %v7431_v10  ;;  %v5710_v33 = vmul.f32 %v16147_v42, %v16128_v60  ;;  %v16154_v42 = vld [vmem:[#allocation73_spill] sm:$0xff] }
 0xa59   : > { %6278 = vst.msk [vmem:[#allocation2 + $0x200] sm:$0xff] %vm1259_vm2, %v6204_v43  ;;  %v6580_v32 = vpop.permute.xlu1 %6579  ;;  %6987 = vrot.lane.b32.xlu0 %v6894_v48, %s15806_s16  ;;  %v7358_v6 = vld [vmem:[#allocation2 + $0x168] sm:$0xff] }
 0xa5a   : > { %6658 = vst.msk [vmem:[#allocation2 + $0x1a0] sm:$0xff] %vm1709_vm4, %v6580_v32  ;;  %7181 = vperm.xlu1 %9102, %v7075_v50   ;;  %v7430_v39 = vpack.c.bf16 %v7358_v6, %v7355_v54  ;;  %v16149_v43 = vld [vmem:[#allocation108_spill] sm:$0xff] }
 0xa5b   : > { %7042 = vst.msk [vmem:[#allocation2 + $0x1a0] sm:$0xff] %vm2094_vm5, %v14049_v37  ;;  %v14175_v37 = vsel %vm1324_vm3, %v5067_v34, %v5068_v56  ;;  %v6128_v34 = vmul.f32 %v14004_v16, %v16150_v13  ;;  %v6507_v56 = vmul.f32 %v13781_v12, %v16151_v40  ;;  %v7077_v16 = vld [vmem:[%s15103_s1 + $0xa0] sm:$0xff] }
 0xa5c   : > { %v6588_v7 = vpop.permute.xlu0 %6587  ;;  %7745 = vmatmul.mubr.bf16.gmra.mrb[60].mxu1 %v7430_v39  ;;  %v6123_v48 = vmul.f32 %v16148_v17, %v14175_v37  ;;  %v16152_v39 = vld [vmem:[#allocation74_spill] sm:$0xff]  ;;  %v7086_v17 = vld [vmem:[%s15103_s1 + $0xe8] sm:$0xff] }
 0xa5d   : > { %6662 = vst.msk [vmem:[#allocation2 + $0x200] sm:$0xff] %vm1709_vm4, %v6588_v7  ;;  %v7097_v1 = vpop.permute.xlu1 %7096  ;;  %7226 = vperm.xlu0 %9101, %v7084_v55   ;;  %v16153_v55 = vld [vmem:[#allocation130_spill] sm:$0xff] }
 0xa5e   : > { %v7250_v10 = vmul.f32 %v7097_v1, %v16146_v30  ;;  %5793 = vrot.lane.b32.xlu1 %v5705_v27, %s15806_s16  ;;  %v6512_v27 = vmul.f32 %v16153_v55, %v16152_v39  ;;  %v7315_v7 = vld [vmem:[#allocation2 + $0x10] sm:$0xff]  ;;  %v6891_v39 = vmul.f32 %v13790_v2, %v16124_v36  ;;  %v7324_v2 = vld [vmem:[#allocation2 + $0x58] sm:$0xff]  ;;  %v16159_v36 = vmov 0  }
 0xa60   : > { %7282 = vst.msk [vmem:[#allocation2 + $0x28] sm:$0xff] %vm15489_vm0, %v7250_v10  ;;  %v7137_v50 = vpop.permute.xlu0 %7136 }
 0xa61   : > { %v7258_v32 = vmul.f32 %v7137_v50, %v16149_v43  ;;  %v5394_v54 = vpop.permute.xlu1 %5393  ;;  %5803 = vrot.lane.b32.xlu0 %v5710_v33, %s15806_s16 }
 0xa62   : > { %5473 = vst.msk [vmem:[#allocation2 + $0x180] sm:$0xff] %vm1709_vm4, %v5394_v54  ;;  %6213 = vrot.lane.b32.xlu1 %v6123_v48, %s15756_s29  ;;  %v16155_v48 = vld [vmem:[#allocation96_spill] sm:$0xff] }
 0xa63   : > { %7290 = vst.msk [vmem:[#allocation2 + $0xe8] sm:$0xff] %vm15489_vm0, %v7258_v32  ;;  %v5323_v50 = vmul.f32 %v16155_v48, %v14094_v29 }
 0xa64   : > { %v5404_v60 = vpop.permute.xlu0 %5403 }
 0xa65   : > { %5478 = vst.msk [vmem:[#allocation2 + $0x1f8] sm:$0xff] %vm1709_vm4, %v5404_v60  ;;  %v6962_v6 = vpop.permute.xlu1 %6961  ;;  %6223 = vrot.lane.b32.xlu0 %v6128_v34, %s15756_s29 }
 0xa66   : > { %7041 = vst.msk [vmem:[#allocation2 + $0x188] sm:$0xff] %vm2094_vm5, %v6962_v6  ;;  %6597 = vrot.lane.b32.xlu1 %v6507_v56, %s15787_s15  ;;  %v7365_v56 = vld [vmem:[#allocation2 + $0x1a0] sm:$0xff]  ;;  %v5328_v6 = vmul.f32 %v14044_v20, %v14109_v51  ;;  %v7079_v20 = vld [vmem:[%s15103_s1 + $0xb0] sm:$0xff] }
 0xa67   : > { %v7318_v1 = vld [vmem:[#allocation2 + $0x28] sm:$0xff] }
 0xa68   : > { %v6972_v12 = vpop.permute.xlu0 %6971  ;;  %v7411_v30 = vpack.c.bf16 %v7318_v1, %v7315_v7 }
 0xa69   : > { %7046 = vst.msk [vmem:[#allocation2 + $0x200] sm:$0xff] %vm2094_vm5, %v6972_v12  ;;  %v7102_v10 = vpop.permute.xlu1 %7101  ;;  %6607 = vrot.lane.b32.xlu0 %v6512_v27, %s15787_s15  ;;  %v16156_v27 = vld [vmem:[#allocation103_spill] sm:$0xff] }
 0xa6a   : > { %v7251_v33 = vmul.f32 %v7102_v10, %v16154_v42  ;;  %7191 = vperm.xlu1 %9102, %v7077_v16   ;;  %8895 = vmatprep.mubr.msk.bf16.mxu0 %vm15489_vm0, %v7411_v30  ;;  %v6896_v16 = vmul.f32 %v13691_v5, %v16156_v27  ;;  %v7364_v42 = vld [vmem:[#allocation2 + $0x198] sm:$0xff] }
 0xa6c   : > { %7283 = vst.msk [vmem:[#allocation2 + $0x40] sm:$0xff] %vm15489_vm0, %v7251_v33  ;;  %v7147_v43 = vpop.permute.xlu0 %7146 }
 0xa6d   : > { %v7260_v32 = vmul.f32 %v7147_v43, %v16081_v44  ;;  %v5778_v54 = vpop.permute.xlu1 %5777  ;;  %7236 = vperm.xlu0 %9101, %v7086_v17   ;;  %v7362_v34 = vld [vmem:[#allocation2 + $0x188] sm:$0xff]  ;;  %v7088_v17 = vld [vmem:[%s15103_s1 + $0xf8] sm:$0xff] }
 0xa6e   : > { %5857 = vst.msk [vmem:[#allocation2 + $0x180] sm:$0xff] %vm2094_vm5, %v5778_v54  ;;  %5413 = vrot.lane.b32.xlu1 %v5323_v50, %s15787_s15  ;;  %v7434_v60 = vpack.c.bf16 %v7365_v56, %v7362_v34  ;;  %v16157_v50 = vld [vmem:[#allocation59_spill] sm:$0xff] }
 0xa6f   : > { %7292 = vst.msk [vmem:[#allocation2 + $0x118] sm:$0xff] %vm15489_vm0, %v7260_v32  ;;  %v5707_v43 = vmul.f32 %v16157_v50, %v16140_v46  ;;  %v14249_v46 = vsel %vm1324_vm3, %v5069_v61, %v5070_v18  ;;  %v16160_v61 = vld [vmem:[#allocation10_spill] sm:$0xff] }
 0xa70   : > { %v5788_v55 = vpop.permute.xlu0 %5787  ;;  %7752 = vmatprep.mubr.bf16.mxu1 %v7434_v60  ;;  %v6125_v27 = vmul.f32 %v13886_v57, %v14249_v46  ;;  %v6509_v47 = vmul.f32 %v13898_v24, %v16160_v61  ;;  %v16161_v24 = vld [vmem:[#allocation69_spill] sm:$0xff] }
 0xa71   : > { %5862 = vst.msk [vmem:[#allocation2 + $0x1f8] sm:$0xff] %vm2094_vm5, %v5788_v55  ;;  %v6198_v44 = vpop.permute.xlu1 %6197  ;;  %5423 = vrot.lane.b32.xlu0 %v5328_v6, %s15787_s15  ;;  %v16158_v6 = vld [vmem:[#allocation125_spill] sm:$0xff] }
 0xa72   : > { %6275 = vst.msk [vmem:[#allocation2 + $0x1b8] sm:$0xff] %vm1259_vm2, %v6198_v44  ;;  %6981 = vrot.lane.b32.xlu1 %v6891_v39, %s15806_s16  ;;  %v5712_v44 = vmul.f32 %v14077_v62, %v16141_v8  ;;  %v7330_v8 = vld [vmem:[#allocation2 + $0x88] sm:$0xff]  ;;  %v7371_v50 = vld [vmem:[#allocation2 + $0x1d0] sm:$0xff] }
 0xa73   : > { %v7321_v7 = vld [vmem:[#allocation2 + $0x40] sm:$0xff] }
 0xa74   : > { %v6208_v1 = vpop.permute.xlu0 %6207  ;;  %v7414_v12 = vpack.c.bf16 %v7324_v2, %v7321_v7 }
 0xa75   : > { %6280 = vst.msk [vmem:[#allocation2 + $0x230] sm:$0xff] %vm1259_vm2, %v6208_v1  ;;  %v6582_v30 = vpop.permute.xlu1 %6581  ;;  %6991 = vrot.lane.b32.xlu0 %v6896_v16, %s15806_s16  ;;  %v7361_v10 = vld [vmem:[#allocation2 + $0x180] sm:$0xff] }
 0xa76   : > { %6659 = vst.msk [vmem:[#allocation2 + $0x1b8] sm:$0xff] %vm1709_vm4, %v6582_v30  ;;  %7201 = vperm.xlu1 %9102, %v7079_v20   ;;  %v8752_v33 = vpop.f32.mrb[44].mxu1  ;;  %8896 = vmatmul.mubr.msk.bf16.vlgmr.msra.gmra.mrb[64].mxu0 %vm15489_vm0, %v7414_v12  ;;  %v7433_v5 = vpack.c.bf16 %v7364_v42, %v7361_v10  ;;  %v16162_v10 = vld [vmem:[#allocation100_spill] sm:$0xff] }
 0xa77   : > { %v8753_v48 = vpop.f32.mrb[45].mxu1  ;;  %v5325_v42 = vmul.f32 %v16162_v10, %v14175_v37 }
 0xa78   : > { %v14236_v32 = vadd.f32 %v8753_v48, %v8752_v33  ;;  %v6592_v54 = vpop.permute.xlu0 %6591  ;;  %v8755_v34 = vpop.f32.mrb[46].mxu1  ;;  %7753 = vmatmul.mubr.bf16.gmra.mrb[64].mxu1 %v7433_v5 }
 0xa79   : > { %6664 = vst.msk [vmem:[#allocation2 + $0x230] sm:$0xff] %vm1709_vm4, %v6592_v54  ;;  %v7112_v56 = vpop.permute.xlu1 %7111  ;;  %7246 = vperm.xlu0 %9101, %v7088_v17   ;;  %v8756_v60 = vpop.f32.mrb[47].mxu1  ;;  %v6893_v54 = vmul.f32 %v13677_v35, %v16137_v41 }
 0xa7a   : > { %v7253_v39 = vmul.f32 %v7112_v56, %v16158_v6  ;;  %v14240_v55 = vadd.f32 %v8756_v60, %v8755_v34  ;;  %5797 = vrot.lane.b32.xlu1 %v5707_v43, %s15806_s16  ;;  %v7336_v6 = vld [vmem:[#allocation2 + $0xb8] sm:$0xff] }
 0xa7c   : > { %7285 = vst.msk [vmem:[#allocation2 + $0x70] sm:$0xff] %vm15489_vm0, %v7253_v39  ;;  %v7157_v16 = vpop.permute.xlu0 %7156 }
 0xa7d   : > { %v7262_v20 = vmul.f32 %v7157_v16, %v13686_v9  ;;  %v5398_v7 = vpop.permute.xlu1 %5397  ;;  %5807 = vrot.lane.b32.xlu0 %v5712_v44, %s15806_s16  ;;  %v7081_v9 = vld [vmem:[%s15103_s1 + $0xc0] sm:$0xff] }
 0xa7e   : > { %5475 = vst.msk [vmem:[#allocation2 + $0x1b0] sm:$0xff] %vm1709_vm4, %v5398_v7  ;;  %6217 = vrot.lane.b32.xlu1 %v6125_v27, %s15756_s29  ;;  %9104 = vset.pattern.permute.xlu0 %v16159_v36  ;;  %v7370_v27 = vld [vmem:[#allocation2 + $0x1c8] sm:$0xff] }
 0xa7f   : > { %7294 = vst.msk [vmem:[#allocation2 + $0x148] sm:$0xff] %vm15489_vm0, %v7262_v20  ;;  %v5709_v20 = vmul.f32 %v13924_v45, %v16151_v40  ;;  %v16166_v45 = vld [vmem:[#allocation79_spill] sm:$0xff] }
 0xa80   : > { %v5408_v57 = vpop.permute.xlu0 %5407  ;;  %v6511_v40 = vmul.f32 %v14031_v22, %v16166_v45  ;;  %v16167_v22 = vld [vmem:[#allocation119_spill] sm:$0xff] }
 0xa81   : > { %5480 = vst.msk [vmem:[#allocation2 + $0x228] sm:$0xff] %vm1709_vm4, %v5408_v57  ;;  %v6966_v62 = vpop.permute.xlu1 %6965  ;;  %v16163_v57 = vld [vmem:[#allocation117_spill] sm:$0xff] }
 0xa82   : > { %7043 = vst.msk [vmem:[#allocation2 + $0x1b8] sm:$0xff] %vm2094_vm5, %v6966_v62  ;;  %6601 = vrot.lane.b32.xlu1 %v6509_v47, %s15787_s15 }
 0xa83   : > { %v7327_v18 = vld [vmem:[#allocation2 + $0x70] sm:$0xff] }
 0xa84   : > { %v6976_v2 = vpop.permute.xlu0 %6975  ;;  %v7417_v1 = vpack.c.bf16 %v7330_v8, %v7327_v18  ;;  %v16165_v18 = vld [vmem:[#allocation39_spill] sm:$0xff] }
 0xa85   : > { %7048 = vst.msk [vmem:[#allocation2 + $0x230] sm:$0xff] %vm2094_vm5, %v6976_v2  ;;  %v7122_v12 = vpop.permute.xlu1 %7121 }
 0xa86   : > { %v7255_v30 = vmul.f32 %v7122_v12, %v16161_v24  ;;  %7211 = vperm.xlu1 %9102, %v7081_v9   ;;  %8899 = vmatprep.mubr.msk.bf16.mxu0 %vm15489_vm0, %v7417_v1  ;;  %v16164_v9 = vld [vmem:[#allocation105_spill] sm:$0xff] }
 0xa87   : > { %v6127_v8 = vmul.f32 %v16165_v18, %v16164_v9  ;;  %v7348_v18 = vld [vmem:[#allocation2 + $0x118] sm:$0xff] }
 0xa88   : > { %7287 = vst.msk [vmem:[#allocation2 + $0xa0] sm:$0xff] %vm15489_vm0, %v7255_v30  ;;  %v7167_v33 = vpop.permute.xlu0 %7166 }
 0xa89   : > { %v7264_v5 = vmul.f32 %v7167_v33, %v13758_v23  ;;  %v5782_v17 = vpop.permute.xlu1 %5781  ;;  %v7368_v48 = vld [vmem:[#allocation2 + $0x1b8] sm:$0xff]  ;;  %v7083_v23 = vld [vmem:[%s15103_s1 + $0xd0] sm:$0xff] }
 0xa8a   : > { %5859 = vst.msk [vmem:[#allocation2 + $0x1b0] sm:$0xff] %vm2094_vm5, %v5782_v17  ;;  %5417 = vrot.lane.b32.xlu1 %v5325_v42, %s15787_s15  ;;  %v7437_v43 = vpack.c.bf16 %v7371_v50, %v7368_v48  ;;  %v7342_v42 = vld [vmem:[#allocation2 + $0xe8] sm:$0xff]  ;;  %v16168_v50 = vld [vmem:[#allocation75_spill] sm:$0xff] }
 0xa8b   : > { %7296 = vst.msk [vmem:[#allocation2 + $0x178] sm:$0xff] %vm15489_vm0, %v7264_v5 }
 0xa8c   : > { %v5792_v34 = vpop.permute.xlu0 %5791  ;;  %7760 = vmatprep.mubr.bf16.mxu1 %v7437_v43  ;;  %v5327_v43 = vmul.f32 %v16168_v50, %v14249_v46 }
 0xa8d   : > { %5864 = vst.msk [vmem:[#allocation2 + $0x228] sm:$0xff] %vm2094_vm5, %v5792_v34  ;;  %v6202_v56 = vpop.permute.xlu1 %6201 }
 0xa8e   : > { %6277 = vst.msk [vmem:[#allocation2 + $0x1e8] sm:$0xff] %vm1259_vm2, %v6202_v56  ;;  %6985 = vrot.lane.b32.xlu1 %v6893_v54, %s15806_s16 }
 0xa8f   : > { %v7333_v60 = vld [vmem:[#allocation2 + $0xa0] sm:$0xff] }
 0xa90   : > { %v6212_v39 = vpop.permute.xlu0 %6211  ;;  %v7420_v44 = vpack.c.bf16 %v7336_v6, %v7333_v60  ;;  %v7377_v6 = vld [vmem:[#allocation2 + $0x200] sm:$0xff] }
 0xa91   : > { %6282 = vst.msk [vmem:[#allocation2 + $0x260] sm:$0xff] %vm1259_vm2, %v6212_v39  ;;  %v6586_v35 = vpop.permute.xlu1 %6585  ;;  %v7367_v41 = vld [vmem:[#allocation2 + $0x1b0] sm:$0xff] }
 0xa92   : > { %6661 = vst.msk [vmem:[#allocation2 + $0x1e8] sm:$0xff] %vm1709_vm4, %v6586_v35  ;;  %7221 = vperm.xlu1 %9102, %v7083_v23   ;;  %8900 = vmatmul.mubr.msk.bf16.gmra.mrb[68].mxu0 %vm15489_vm0, %v7420_v44  ;;  %v7436_v16 = vpack.c.bf16 %v7370_v27, %v7367_v41  ;;  %v16169_v27 = vld [vmem:[#allocation102_spill] sm:$0xff] }
 0xa94   : > { %v6596_v7 = vpop.permute.xlu0 %6595  ;;  %7761 = vmatmul.mubr.bf16.gmra.mrb[68].mxu1 %v7436_v16  ;;  %v6895_v16 = vmul.f32 %v14057_v3, %v16169_v27  ;;  %v7382_v27 = vld [vmem:[#allocation2 + $0x228] sm:$0xff] }
 0xa95   : > { %6666 = vst.msk [vmem:[#allocation2 + $0x260] sm:$0xff] %vm1709_vm4, %v6596_v7  ;;  %v7132_v47 = vpop.permute.xlu1 %7131 }
 0xa96   : > { %v7257_v62 = vmul.f32 %v7132_v47, %v16163_v57  ;;  %5801 = vrot.lane.b32.xlu1 %v5709_v20, %s15806_s16  ;;  %v7087_v57 = vld [vmem:[%s15103_s1 + $0xf0] sm:$0xff] }
 0xa98   : > { %7289 = vst.msk [vmem:[#allocation2 + $0xd0] sm:$0xff] %vm15489_vm0, %v7257_v62  ;;  %v7177_v2 = vpop.permute.xlu0 %7176 }
 0xa99   : > { %v7266_v1 = vmul.f32 %v7177_v2, %v13729_v19  ;;  %v5402_v12 = vpop.permute.xlu1 %5401  ;;  %v7085_v19 = vld [vmem:[%s15103_s1 + $0xe0] sm:$0xff] }
 0xa9a   : > { %5477 = vst.msk [vmem:[#allocation2 + $0x1e0] sm:$0xff] %vm1709_vm4, %v5402_v12  ;;  %6221 = vrot.lane.b32.xlu1 %v6127_v8, %s15756_s29  ;;  %v7376_v12 = vld [vmem:[#allocation2 + $0x1f8] sm:$0xff]  ;;  %s9260_s29 = smov [#allocation5]  }
 0xa9b   : > { %7298 = vst.msk [vmem:[#allocation2 + $0x1a8] sm:$0xff] %vm15489_vm0, %v7266_v1 }
 0xa9c   : > { %v5412_v24 = vpop.permute.xlu0 %5411 }
 0xa9d   : > { %5482 = vst.msk [vmem:[#allocation2 + $0x258] sm:$0xff] %vm1709_vm4, %v5412_v24  ;;  %v6970_v30 = vpop.permute.xlu1 %6969 }
 0xa9e   : > { %7045 = vst.msk [vmem:[#allocation2 + $0x1e8] sm:$0xff] %vm2094_vm5, %v6970_v30  ;;  %6605 = vrot.lane.b32.xlu1 %v6511_v40, %s15787_s15  ;;  %v5711_v40 = vmul.f32 %v14067_v28, %v16160_v61 }
 0xa9f   : > { %v7339_v10 = vld [vmem:[#allocation2 + $0xd0] sm:$0xff] }
 0xaa0   : > { %v6980_v33 = vpop.permute.xlu0 %6979  ;;  %v7423_v5 = vpack.c.bf16 %v7342_v42, %v7339_v10 }
 0xaa1   : > { %7050 = vst.msk [vmem:[#allocation2 + $0x260] sm:$0xff] %vm2094_vm5, %v6980_v33  ;;  %v7142_v17 = vpop.permute.xlu1 %7141 }
 0xaa2   : > { %v7259_v48 = vmul.f32 %v7142_v17, %v16167_v22  ;;  %7231 = vperm.xlu1 %9102, %v7085_v19   ;;  %8903 = vmatprep.mubr.msk.bf16.mxu0 %vm15489_vm0, %v7423_v5  ;;  %v7354_v5 = vld [vmem:[#allocation2 + $0x148] sm:$0xff] }
 0xaa4   : > { %7291 = vst.msk [vmem:[#allocation2 + $0x100] sm:$0xff] %vm15489_vm0, %v7259_v48  ;;  %v7187_v54 = vpop.permute.xlu0 %7186 }
 0xaa5   : > { %v7268_v34 = vmul.f32 %v7187_v54, %v13799_v15  ;;  %v5786_v56 = vpop.permute.xlu1 %5785  ;;  %v8758_v23 = vpop.f32.mrb[48].mxu1  ;;  %v7374_v60 = vld [vmem:[#allocation2 + $0x1e8] sm:$0xff] }
 0xaa6   : > { %5861 = vst.msk [vmem:[#allocation2 + $0x1e0] sm:$0xff] %vm2094_vm5, %v5786_v56  ;;  %5421 = vrot.lane.b32.xlu1 %v5327_v43, %s15787_s15  ;;  %v8759_v39 = vpop.f32.mrb[49].mxu1  ;;  %v7440_v44 = vpack.c.bf16 %v7377_v6, %v7374_v60  ;;  %v7360_v6 = vld [vmem:[#allocation2 + $0x178] sm:$0xff]  ;;  %s9186_s15 = sshll.u32 %s9260_s29, 4  ;;  %s9187_s15 = int_to_ptr.vmem [resolvable:$false] %s9186_s15 }
 0xaa7   : > { %7300 = vst.msk [vmem:[#allocation2 + $0x1d8] sm:$0xff] %vm15489_vm0, %v7268_v34  ;;  %v14321_v35 = vadd.f32 %v8759_v39, %v8758_v23  ;;  %v8761_v41 = vpop.f32.mrb[50].mxu1  ;;  %v7383_v34 = vld [vmem:[#allocation2 + $0x230] sm:$0xff] }
 0xaa8   : > { %v5796_v20 = vpop.permute.xlu0 %5795  ;;  %v8762_v15 = vpop.f32.mrb[51].mxu1  ;;  %7768 = vmatprep.mubr.bf16.mxu1 %v7440_v44 }
 0xaa9   : > { %5866 = vst.msk [vmem:[#allocation2 + $0x258] sm:$0xff] %vm2094_vm5, %v5796_v20  ;;  %v14326_v7 = vadd.f32 %v8762_v15, %v8761_v41  ;;  %v6206_v47 = vpop.permute.xlu1 %6205 }
 0xaaa   : > { %6279 = vst.msk [vmem:[#allocation2 + $0x218] sm:$0xff] %vm1259_vm2, %v6206_v47  ;;  %6989 = vrot.lane.b32.xlu1 %v6895_v16, %s15806_s16 }
 0xaab   : > { %v7345_v62 = vld [vmem:[#allocation2 + $0x100] sm:$0xff] }
 0xaac   : > { %v6216_v8 = vpop.permute.xlu0 %6215  ;;  %v7426_v3 = vpack.c.bf16 %v7348_v18, %v7345_v62 }
 0xaad   : > { %6284 = vst.msk [vmem:[#allocation2 + $0x290] sm:$0xff] %vm1259_vm2, %v6216_v8  ;;  %v6590_v2 = vpop.permute.xlu1 %6589  ;;  %v7373_v1 = vld [vmem:[#allocation2 + $0x1e0] sm:$0xff] }
 0xaae   : > { %6663 = vst.msk [vmem:[#allocation2 + $0x218] sm:$0xff] %vm1709_vm4, %v6590_v2  ;;  %7241 = vperm.xlu1 %9102, %v7087_v57   ;;  %8904 = vmatmul.mubr.msk.bf16.gmra.mrb[72].mxu0 %vm15489_vm0, %v7426_v3  ;;  %v7439_v45 = vpack.c.bf16 %v7376_v12, %v7373_v1 }
 0xab0   : > { %v6600_v24 = vpop.permute.xlu0 %6599  ;;  %7769 = vmatmul.mubr.bf16.gmra.mrb[72].mxu1 %v7439_v45 }
 0xab1   : > { %6668 = vst.msk [vmem:[#allocation2 + $0x290] sm:$0xff] %vm1709_vm4, %v6600_v24  ;;  %v7152_v30 = vpop.permute.xlu1 %7151 }
 0xab2   : > { %v7261_v19 = vmul.f32 %v7152_v30, %v13475_v25  ;;  %5805 = vrot.lane.b32.xlu1 %v5711_v40, %s15806_s16  ;;  %s9188_s16 = scalar_lea.vmem %s9187_s15, 8192 }
 0xab3   : > { %9103 = vset.pattern.permute.xlu1 %v16159_v36 }
 0xab4   : > { %7293 = vst.msk [vmem:[#allocation2 + $0x130] sm:$0xff] %vm15489_vm0, %v7261_v19  ;;  %v7197_v10 = vpop.permute.xlu0 %7196 }
 0xab5   : > { %v7270_v42 = vmul.f32 %v7197_v10, %v13870_v31  ;;  %v5406_v33 = vpop.permute.xlu1 %5405 }
 0xab6   : > { %5479 = vst.msk [vmem:[#allocation2 + $0x210] sm:$0xff] %vm1709_vm4, %v5406_v33 }
 0xab7   : > { %7302 = vst.msk [vmem:[#allocation2 + $0x208] sm:$0xff] %vm15489_vm0, %v7270_v42 }
 0xab8   : > { %v5416_v28 = vpop.permute.xlu0 %5415 }
 0xab9   : > { %5484 = vst.msk [vmem:[#allocation2 + $0x288] sm:$0xff] %vm1709_vm4, %v5416_v28  ;;  %v6974_v61 = vpop.permute.xlu1 %6973 }
 0xaba   : > { %7047 = vst.msk [vmem:[#allocation2 + $0x218] sm:$0xff] %vm2094_vm5, %v6974_v61 }
 0xabb   : > { %v7351_v25 = vld [vmem:[#allocation2 + $0x130] sm:$0xff] }
 0xabc   : > { %v6984_v17 = vpop.permute.xlu0 %6983  ;;  %v7429_v36 = vpack.c.bf16 %v7354_v5, %v7351_v25  ;;  %v7389_v5 = vld [vmem:[#allocation2 + $0x260] sm:$0xff] }
 0xabd   : > { %7052 = vst.msk [vmem:[#allocation2 + $0x290] sm:$0xff] %vm2094_vm5, %v6984_v17  ;;  %v7162_v22 = vpop.permute.xlu1 %7161 }
 0xabe   : > { %v7263_v31 = vmul.f32 %v7162_v22, %v13657_v53  ;;  %8907 = vmatprep.mubr.msk.bf16.mxu0 %vm15489_vm0, %v7429_v36 }
 0xac0   : > { %7295 = vst.msk [vmem:[#allocation2 + $0x160] sm:$0xff] %vm15489_vm0, %v7263_v31  ;;  %v7207_v48 = vpop.permute.xlu0 %7206  ;;  %v7372_v31 = vld [vmem:[#allocation2 + $0x1d8] sm:$0xff] }
 0xac1   : > { %v7272_v50 = vmul.f32 %v7207_v48, %v13949_v11  ;;  %v5790_v43 = vpop.permute.xlu1 %5789  ;;  %v7380_v54 = vld [vmem:[#allocation2 + $0x218] sm:$0xff] }
 0xac2   : > { %5863 = vst.msk [vmem:[#allocation2 + $0x210] sm:$0xff] %vm2094_vm5, %v5790_v43  ;;  %v7443_v56 = vpack.c.bf16 %v7383_v34, %v7380_v54  ;;  %v7388_v54 = vld [vmem:[#allocation2 + $0x258] sm:$0xff] }
 0xac3   : > { %7304 = vst.msk [vmem:[#allocation2 + $0x238] sm:$0xff] %vm15489_vm0, %v7272_v50 }
 0xac4   : > { %v5800_v23 = vpop.permute.xlu0 %5799  ;;  %7776 = vmatprep.mubr.bf16.mxu1 %v7443_v56 }
 0xac5   : > { %5868 = vst.msk [vmem:[#allocation2 + $0x288] sm:$0xff] %vm2094_vm5, %v5800_v23  ;;  %v6210_v53 = vpop.permute.xlu1 %6209 }
 0xac6   : > { %6281 = vst.msk [vmem:[#allocation2 + $0x248] sm:$0xff] %vm1259_vm2, %v6210_v53 }
 0xac7   : > { %v7357_v60 = vld [vmem:[#allocation2 + $0x160] sm:$0xff] }
 0xac8   : > { %v6220_v39 = vpop.permute.xlu0 %6219  ;;  %v7432_v44 = vpack.c.bf16 %v7360_v6, %v7357_v60 }
 0xac9   : > { %6286 = vst.msk [vmem:[#allocation2 + $0x2c0] sm:$0xff] %vm1259_vm2, %v6220_v39  ;;  %v6594_v11 = vpop.permute.xlu1 %6593  ;;  %v7379_v41 = vld [vmem:[#allocation2 + $0x210] sm:$0xff] }
 0xaca   : > { %6665 = vst.msk [vmem:[#allocation2 + $0x248] sm:$0xff] %vm1709_vm4, %v6594_v11  ;;  %8908 = vmatmul.mubr.msk.bf16.gmra.mrb[76].mxu0 %vm15489_vm0, %v7432_v44  ;;  %v7442_v16 = vpack.c.bf16 %v7382_v27, %v7379_v41  ;;  %v7378_v27 = vld [vmem:[#allocation2 + $0x208] sm:$0xff] }
 0xacc   : > { %v6604_v20 = vpop.permute.xlu0 %6603  ;;  %7777 = vmatmul.mubr.bf16.gmra.mrb[76].mxu1 %v7442_v16 }
 0xacd   : > { %6670 = vst.msk [vmem:[#allocation2 + $0x2c0] sm:$0xff] %vm1709_vm4, %v6604_v20  ;;  %v7172_v15 = vpop.permute.xlu1 %7171 }
 0xace   : > { %v7265_v47 = vmul.f32 %v7172_v15, %v13855_v26 }
 0xad0   : > { %7297 = vst.msk [vmem:[#allocation2 + $0x190] sm:$0xff] %vm15489_vm0, %v7265_v47  ;;  %v7217_v57 = vpop.permute.xlu0 %7216  ;;  %v8764_v62 = vpop.f32.mrb[52].mxu1  ;;  %v16170_v47 = vld [vmem:[#allocation27_spill] sm:$0xff] }
 0xad1   : > { %v7274_v18 = vmul.f32 %v7217_v57, %v14029_v21  ;;  %v5410_v8 = vpop.permute.xlu1 %5409  ;;  %v8765_v3 = vpop.f32.mrb[53].mxu1  ;;  %v7366_v21 = vld [vmem:[#allocation2 + $0x1a8] sm:$0xff] }
 0xad2   : > { %5481 = vst.msk [vmem:[#allocation2 + $0x240] sm:$0xff] %vm1709_vm4, %v5410_v8  ;;  %v14365_v2 = vadd.f32 %v8765_v3, %v8764_v62  ;;  %v8767_v1 = vpop.f32.mrb[54].mxu1  ;;  %v7395_v8 = vld [vmem:[#allocation2 + $0x290] sm:$0xff] }
 0xad3   : > { %7306 = vst.msk [vmem:[#allocation2 + $0x268] sm:$0xff] %vm15489_vm0, %v7274_v18  ;;  %v8768_v12 = vpop.f32.mrb[55].mxu1 }
 0xad4   : > { %v14368_v45 = vadd.f32 %v8768_v12, %v8767_v1  ;;  %v5420_v40 = vpop.permute.xlu0 %5419 }
 0xad5   : > { %5486 = vst.msk [vmem:[#allocation2 + $0x2b8] sm:$0xff] %vm1709_vm4, %v5420_v40  ;;  %v6978_v26 = vpop.permute.xlu1 %6977 }
 0xad6   : > { %7049 = vst.msk [vmem:[#allocation2 + $0x248] sm:$0xff] %vm2094_vm5, %v6978_v26  ;;  %v7384_v26 = vld [vmem:[#allocation2 + $0x238] sm:$0xff] }
 0xad7   : > { %v7363_v24 = vld [vmem:[#allocation2 + $0x190] sm:$0xff] }
 0xad8   : > { %v6988_v30 = vpop.permute.xlu0 %6987  ;;  %v7435_v19 = vpack.c.bf16 %v7366_v21, %v7363_v24 }
 0xad9   : > { %7054 = vst.msk [vmem:[#allocation2 + $0x2c0] sm:$0xff] %vm2094_vm5, %v6988_v30  ;;  %v7182_v10 = vpop.permute.xlu1 %7181 }
 0xada   : > { %v7267_v42 = vmul.f32 %v7182_v10, %v13934_v49  ;;  %8911 = vmatprep.mubr.msk.bf16.mxu0 %vm15489_vm0, %v7435_v19 }
 0xadc   : > { %7299 = vst.msk [vmem:[#allocation2 + $0x1c0] sm:$0xff] %vm15489_vm0, %v7267_v42  ;;  %v7227_v33 = vpop.permute.xlu0 %7226 }
 0xadd   : > { %v7276_v28 = vmul.f32 %v7227_v33, %v14109_v51  ;;  %v5794_v61 = vpop.permute.xlu1 %5793  ;;  %v7386_v25 = vld [vmem:[#allocation2 + $0x248] sm:$0xff] }
 0xade   : > { %5865 = vst.msk [vmem:[#allocation2 + $0x240] sm:$0xff] %vm2094_vm5, %v5794_v61  ;;  %v7446_v17 = vpack.c.bf16 %v7389_v5, %v7386_v25  ;;  %v7394_v33 = vld [vmem:[#allocation2 + $0x288] sm:$0xff] }
 0xadf   : > { %7308 = vst.msk [vmem:[#allocation2 + $0x298] sm:$0xff] %vm15489_vm0, %v7276_v28 }
 0xae0   : > { %v5804_v36 = vpop.permute.xlu0 %5803  ;;  %7784 = vmatprep.mubr.bf16.mxu1 %v7446_v17 }
 0xae1   : > { %5870 = vst.msk [vmem:[#allocation2 + $0x2b8] sm:$0xff] %vm2094_vm5, %v5804_v36  ;;  %v6214_v49 = vpop.permute.xlu1 %6213 }
 0xae2   : > { %6283 = vst.msk [vmem:[#allocation2 + $0x278] sm:$0xff] %vm1259_vm2, %v6214_v49 }
 0xae3   : > { %v7369_v22 = vld [vmem:[#allocation2 + $0x1c0] sm:$0xff] }
 0xae4   : > { %v6224_v48 = vpop.permute.xlu0 %6223  ;;  %v7438_v50 = vpack.c.bf16 %v7372_v31, %v7369_v22  ;;  %v7390_v31 = vld [vmem:[#allocation2 + $0x268] sm:$0xff] }
 0xae5   : > { %6288 = vst.msk [vmem:[#allocation2 + $0x2f0] sm:$0xff] %vm1259_vm2, %v6224_v48  ;;  %v6598_v51 = vpop.permute.xlu1 %6597  ;;  %v7385_v43 = vld [vmem:[#allocation2 + $0x240] sm:$0xff] }
 0xae6   : > { %6667 = vst.msk [vmem:[#allocation2 + $0x278] sm:$0xff] %vm1709_vm4, %v6598_v51  ;;  %8912 = vmatmul.mubr.msk.bf16.gmra.mrb[80].mxu0 %vm15489_vm0, %v7438_v50  ;;  %v7445_v34 = vpack.c.bf16 %v7388_v54, %v7385_v43  ;;  %v7401_v54 = vld [vmem:[#allocation2 + $0x2c0] sm:$0xff] }
 0xae8   : > { %v6608_v56 = vpop.permute.xlu0 %6607  ;;  %7785 = vmatmul.mubr.bf16.gmra.mrb[80].mxu1 %v7445_v34 }
 0xae9   : > { %6672 = vst.msk [vmem:[#allocation2 + $0x2f0] sm:$0xff] %vm1709_vm4, %v6608_v56  ;;  %v7192_v23 = vpop.permute.xlu1 %7191 }
 0xaea   : > { %v7269_v53 = vmul.f32 %v7192_v23, %v14014_v14 }
 0xaec   : > { %7301 = vst.msk [vmem:[#allocation2 + $0x1f0] sm:$0xff] %vm15489_vm0, %v7269_v53  ;;  %v7237_v60 = vpop.permute.xlu0 %7236  ;;  %v7396_v53 = vld [vmem:[#allocation2 + $0x298] sm:$0xff] }
 0xaed   : > { %v7278_v6 = vmul.f32 %v7237_v60, %v16150_v13  ;;  %v5414_v39 = vpop.permute.xlu1 %5413 }
 0xaee   : > { %5483 = vst.msk [vmem:[#allocation2 + $0x270] sm:$0xff] %vm1709_vm4, %v5414_v39 }
 0xaef   : > { %7310 = vst.msk [vmem:[#allocation2 + $0x2c8] sm:$0xff] %vm15489_vm0, %v7278_v6 }
 0xaf0   : > { %v5424_v44 = vpop.permute.xlu0 %5423 }
 0xaf1   : > { %5488 = vst.msk [vmem:[#allocation2 + $0x2e8] sm:$0xff] %vm1709_vm4, %v5424_v44  ;;  %v6982_v11 = vpop.permute.xlu1 %6981 }
 0xaf2   : > { %7051 = vst.msk [vmem:[#allocation2 + $0x278] sm:$0xff] %vm2094_vm5, %v6982_v11 }
 0xaf3   : > { %v7375_v41 = vld [vmem:[#allocation2 + $0x1f0] sm:$0xff] }
 0xaf4   : > { %v6992_v16 = vpop.permute.xlu0 %6991  ;;  %v7441_v14 = vpack.c.bf16 %v7378_v27, %v7375_v41 }
 0xaf5   : > { %7056 = vst.msk [vmem:[#allocation2 + $0x2f0] sm:$0xff] %vm2094_vm5, %v6992_v16  ;;  %v7202_v20 = vpop.permute.xlu1 %7201 }
 0xaf6   : > { %v7271_v13 = vmul.f32 %v7202_v20, %v14094_v29  ;;  %8915 = vmatprep.mubr.msk.bf16.mxu0 %vm15489_vm0, %v7441_v14  ;;  %v16171_v20 = vld [vmem:[#allocation77_spill] sm:$0xff] }
 0xaf8   : > { %7303 = vst.msk [vmem:[#allocation2 + $0x220] sm:$0xff] %vm15489_vm0, %v7271_v13  ;;  %v7247_v15 = vpop.permute.xlu0 %7246 }
 0xaf9   : > { %v7280_v57 = vmul.f32 %v7247_v15, %v16170_v47  ;;  %v5798_v62 = vpop.permute.xlu1 %5797  ;;  %v7392_v18 = vld [vmem:[#allocation2 + $0x278] sm:$0xff] }
 0xafa   : > { %5867 = vst.msk [vmem:[#allocation2 + $0x270] sm:$0xff] %vm2094_vm5, %v5798_v62  ;;  %v7449_v3 = vpack.c.bf16 %v7395_v8, %v7392_v18 }
 0xafb   : > { %7312 = vst.msk [vmem:[#allocation2 + $0x2f8] sm:$0xff] %vm15489_vm0, %v7280_v57 }
 0xafc   : > { %v5808_v1 = vpop.permute.xlu0 %5807  ;;  %7792 = vmatprep.mubr.bf16.mxu1 %v7449_v3  ;;  %v7407_v8 = vld [vmem:[#allocation2 + $0x2f0] sm:$0xff] }
 0xafd   : > { %5872 = vst.msk [vmem:[#allocation2 + $0x2e8] sm:$0xff] %vm2094_vm5, %v5808_v1  ;;  %v6218_v29 = vpop.permute.xlu1 %6217 }
 0xafe   : > { %6285 = vst.msk [vmem:[#allocation2 + $0x2a8] sm:$0xff] %vm1259_vm2, %v6218_v29 }
 0xaff   : > { %v8770_v12 = vpop.f32.mrb[56].mxu1  ;;  %v7381_v40 = vld [vmem:[#allocation2 + $0x220] sm:$0xff] }
 0xb00   : > { %v8771_v24 = vpop.f32.mrb[57].mxu1  ;;  %v7444_v21 = vpack.c.bf16 %v7384_v26, %v7381_v40 }
 0xb01   : > { %v14401_v30 = vadd.f32 %v8771_v24, %v8770_v12  ;;  %v6602_v19 = vpop.permute.xlu1 %6601  ;;  %v8773_v10 = vpop.f32.mrb[58].mxu1  ;;  %v7391_v42 = vld [vmem:[#allocation2 + $0x270] sm:$0xff] }
 0xb02   : > { %6669 = vst.msk [vmem:[#allocation2 + $0x2a8] sm:$0xff] %vm1709_vm4, %v6602_v19  ;;  %v8774_v28 = vpop.f32.mrb[59].mxu1  ;;  %8916 = vmatmul.mubr.msk.bf16.gmra.mrb[84].mxu0 %vm15489_vm0, %v7444_v21  ;;  %v7448_v61 = vpack.c.bf16 %v7394_v33, %v7391_v42  ;;  %v7402_v21 = vld [vmem:[#allocation2 + $0x2c8] sm:$0xff]  ;;  %v7408_v42 = vld [vmem:[#allocation2 + $0x2f8] sm:$0xff] }
 0xb03   : > { %v14405_v25 = vadd.f32 %v8774_v28, %v8773_v10  ;;  %v14434_v28 = vld [vmem:[%s15110_s8] ss:$0 sm:$0xff] }
 0xb04   : > { %7793 = vmatmul.mubr.bf16.gmra.mrb[84].mxu1 %v7448_v61  ;;  %v7406_v26 = vld [vmem:[#allocation2 + $0x2e8] sm:$0xff]  ;;  %v7699_v61 = vadd.f32 %v13986_v59, %v14434_v28 }
 0xb05   : > { %v7212_v5 = vpop.permute.xlu1 %7211 }
 0xb06   : > { %v7273_v17 = vmul.f32 %v7212_v5, %v14175_v37 }
 0xb08   : > { %7305 = vst.msk [vmem:[#allocation2 + $0x250] sm:$0xff] %vm15489_vm0, %v7273_v17  ;;  %v7691_v17 = vadd.f32 %v13878_v58, %v14434_v28 }
 0xb09   : > { %v5418_v36 = vpop.permute.xlu1 %5417 }
 0xb0a   : > { %5485 = vst.msk [vmem:[#allocation2 + $0x2a0] sm:$0xff] %vm1709_vm4, %v5418_v36 }
 0xb0d   : > { %v6986_v49 = vpop.permute.xlu1 %6985 }
 0xb0e   : > { %7053 = vst.msk [vmem:[#allocation2 + $0x2a8] sm:$0xff] %vm2094_vm5, %v6986_v49 }
 0xb0f   : > { %v7387_v22 = vld [vmem:[#allocation2 + $0x250] sm:$0xff] }
 0xb10   : > { %v7447_v48 = vpack.c.bf16 %v7390_v31, %v7387_v22  ;;  %v7702_v22 = vadd.f32 %v13995_v38, %v14434_v28  ;;  %v7715_v38 = vadd.f32 %v14236_v32, %v14434_v28 }
 0xb11   : > { %v7222_v50 = vpop.permute.xlu1 %7221 }
 0xb12   : > { %v7275_v51 = vmul.f32 %v7222_v50, %v14249_v46  ;;  %8919 = vmatprep.mubr.msk.bf16.mxu0 %vm15489_vm0, %v7447_v48  ;;  %v7400_v46 = vld [vmem:[#allocation2 + $0x2b8] sm:$0xff] }
 0xb14   : > { %7307 = vst.msk [vmem:[#allocation2 + $0x280] sm:$0xff] %vm15489_vm0, %v7275_v51  ;;  %v7694_v51 = vadd.f32 %v13883_v52, %v14434_v28 }
 0xb15   : > { %v5802_v43 = vpop.permute.xlu1 %5801  ;;  %v7398_v37 = vld [vmem:[#allocation2 + $0x2a8] sm:$0xff] }
 0xb16   : > { %5869 = vst.msk [vmem:[#allocation2 + $0x2a0] sm:$0xff] %vm2094_vm5, %v5802_v43  ;;  %v7452_v34 = vpack.c.bf16 %v7401_v54, %v7398_v37 }
 0xb18   : > { %7800 = vmatprep.mubr.bf16.mxu1 %v7452_v34 }
 0xb19   : > { %v6222_v56 = vpop.permute.xlu1 %6221 }
 0xb1a   : > { %6287 = vst.msk [vmem:[#allocation2 + $0x2d8] sm:$0xff] %vm1259_vm2, %v6222_v56  ;;  %vm8145_vm2 = vcmask 1041408  }
 0xb1b   : > { %v7393_v23 = vld [vmem:[#allocation2 + $0x280] sm:$0xff] }
 0xb1c   : > { %v7450_v60 = vpack.c.bf16 %v7396_v53, %v7393_v23 }
 0xb1d   : > { %v6606_v6 = vpop.permute.xlu1 %6605  ;;  %v7397_v39 = vld [vmem:[#allocation2 + $0x2a0] sm:$0xff] }
 0xb1e   : > { %6671 = vst.msk [vmem:[#allocation2 + $0x2d8] sm:$0xff] %vm1709_vm4, %v6606_v6  ;;  %8920 = vmatmul.mubr.msk.bf16.gmra.mrb[88].mxu0 %vm15489_vm0, %v7450_v60  ;;  %v7451_v44 = vpack.c.bf16 %v7400_v46, %v7397_v39  ;;  %v7707_v60 = vadd.f32 %v14128_v63, %v14434_v28  ;;  %v7718_v39 = vadd.f32 %v14240_v55, %v14434_v28 }
 0xb1f   : > { %v7731_v55 = vadd.f32 %v14365_v2, %v14434_v28 }
 0xb20   : > { %7801 = vmatmul.mubr.bf16.gmra.mrb[88].mxu1 %v7451_v44 }
 0xb21   : > { %v7232_v11 = vpop.permute.xlu1 %7231 }
 0xb22   : > { %v7277_v41 = vmul.f32 %v7232_v11, %v16164_v9 }
 0xb24   : > { %7309 = vst.msk [vmem:[#allocation2 + $0x2b0] sm:$0xff] %vm15489_vm0, %v7277_v41  ;;  %v7710_v41 = vadd.f32 %v14135_v4, %v14434_v28 }
 0xb25   : > { %v5422_v27 = vpop.permute.xlu1 %5421 }
 0xb26   : > { %5487 = vst.msk [vmem:[#allocation2 + $0x2d0] sm:$0xff] %vm1709_vm4, %v5422_v27  ;;  %vm8141_vm4 = vcmask 15360  }
 0xb29   : > { %v6990_v16 = vpop.permute.xlu1 %6989 }
 0xb2a   : > { %7055 = vst.msk [vmem:[#allocation2 + $0x2d8] sm:$0xff] %vm2094_vm5, %v6990_v16 }
 0xb2b   : > { %v7399_v12 = vld [vmem:[#allocation2 + $0x2b0] sm:$0xff] }
 0xb2c   : > { %v7453_v19 = vpack.c.bf16 %v7402_v21, %v7399_v12  ;;  %v7726_v12 = vadd.f32 %v14326_v7, %v14434_v28 }
 0xb2d   : > { %v7242_v14 = vpop.permute.xlu1 %7241 }
 0xb2e   : > { %v7279_v13 = vmul.f32 %v7242_v14, %v16171_v20 }
 0xb2f   : > { %v8776_v15 = vpop.f32.mrb[60].mxu1 }
 0xb30   : > { %7311 = vst.msk [vmem:[#allocation2 + $0x2e0] sm:$0xff] %vm15489_vm0, %v7279_v13  ;;  %v8777_v47 = vpop.f32.mrb[61].mxu1 }
 0xb31   : > { %v14424_v57 = vadd.f32 %v8777_v47, %v8776_v15  ;;  %v5806_v62 = vpop.permute.xlu1 %5805  ;;  %v8779_v18 = vpop.f32.mrb[62].mxu1  ;;  %v7404_v9 = vld [vmem:[#allocation2 + $0x2d8] sm:$0xff] }
 0xb32   : > { %5871 = vst.msk [vmem:[#allocation2 + $0x2d0] sm:$0xff] %vm2094_vm5, %v5806_v62  ;;  %v8780_v3 = vpop.f32.mrb[63].mxu1  ;;  %v7455_v1 = vpack.c.bf16 %v7407_v8, %v7404_v9  ;;  %v7723_v62 = vadd.f32 %v14321_v35, %v14434_v28  ;;  %v7734_v9 = vadd.f32 %v14368_v45, %v14434_v28 }
 0xb33   : > { %v14427_v29 = vadd.f32 %v8780_v3, %v8779_v18  ;;  %v7747_v45 = vadd.f32 %v14424_v57, %v14434_v28 }
 0xb34   : > { %7808 = vmatprep.mubr.bf16.mxu1 %v7455_v1 }
 0xb37   : > { %v7405_v10 = vld [vmem:[#allocation2 + $0x2e0] sm:$0xff] }
 0xb38   : > { %v7456_v33 = vpack.c.bf16 %v7408_v42, %v7405_v10 }
 0xb39   : > { %v7403_v40 = vld [vmem:[#allocation2 + $0x2d0] sm:$0xff] }
 0xb3a   : > { %v7454_v24 = vpack.c.bf16 %v7406_v26, %v7403_v40 }
 0xb3c   : > { %7809 = vmatmul.mubr.bf16.gmra.mrb[92].mxu1 %v7454_v24 }
 0xb3d   : > { %8923 = vmatprep.mubr.msk.bf16.mxu1 %vm15489_vm0, %v7453_v19 }
 0xb44   : > { %8924 = vmatmul.mubr.msk.bf16.vlgmr.msra.gmra.mrb[96].mxu1 %vm15489_vm0, %v7456_v33  ;;  %v7739_v33 = vadd.f32 %v14401_v30, %v14434_v28 }
 0xb49   : > { %v8897_v5 = vpop.f32.mrb[64].mxu0 }
 0xb4a   : > { %v14440_v36 = vadd.f32 %v8897_v5, %v7699_v61  ;;  %v7851_v49 = vpop.f32.mrb[65].mxu0  ;;  %v7750_v5 = vadd.f32 %v14427_v29, %v14434_v28  ;;  %v8049_v29 = vld [vmem:[%s15111_s9] sm:$0xff] }
 0xb4b   : > { %v14444_v31 = vadd.f32 %v7851_v49, %v7691_v17  ;;  %v8782_v48 = vpop.f32.mrb[64].mxu1  ;;  %v8898_v50 = vpop.f32.mrb[66].mxu0 }
 0xb4c   : > { %v14448_v43 = vadd.f32 %v8898_v50, %v7702_v22  ;;  %v8783_v59 = vpop.f32.mrb[65].mxu1  ;;  %v7854_v37 = vpop.f32.mrb[67].mxu0 }
 0xb4d   : > { %v14450_v54 = vadd.f32 %v8783_v59, %v8782_v48  ;;  %v14452_v58 = vadd.f32 %v7854_v37, %v7694_v51  ;;  %v8785_v34 = vpop.f32.mrb[66].mxu1  ;;  %v7742_v48 = vadd.f32 %v14405_v25, %v14434_v28  ;;  %v9257_v25 = vmov 0.0|0.0  }
 0xb4e   : > { %v8786_v56 = vpop.f32.mrb[67].mxu1  ;;  %8943 = vmatprep.subr.bf16.mxu1 %v9257_v25 }
 0xb4f   : > { %v14454_v23 = vadd.f32 %v8786_v56, %v8785_v34 }
 0xb65   : > { %v8901_v53 = vpop.f32.mrb[68].mxu0 }
 0xb66   : > { %v14460_v52 = vadd.f32 %v8901_v53, %v7715_v38  ;;  %v7867_v6 = vpop.f32.mrb[69].mxu0  ;;  %v8050_v38 = vld [vmem:[%s15111_s9 + $0x8] sm:$0xff] }
 0xb67   : > { %v14464_v46 = vadd.f32 %v7867_v6, %v7707_v60  ;;  %v8788_v44 = vpop.f32.mrb[68].mxu1  ;;  %v8902_v11 = vpop.f32.mrb[70].mxu0  ;;  %v8944_v53 = vpack.c.bf16 %v8050_v38, %v8049_v29  ;;  %v8051_v60 = vld [vmem:[%s15111_s9 + $0x10] sm:$0xff]  ;;  %v8052_v6 = vld [vmem:[%s15111_s9 + $0x18] sm:$0xff] }
 0xb68   : > { %v14468_v27 = vadd.f32 %v8902_v11, %v7718_v39  ;;  %v8789_v32 = vpop.f32.mrb[69].mxu1  ;;  %v7870_v16 = vpop.f32.mrb[71].mxu0  ;;  %v8947_v39 = vpack.c.bf16 %v8052_v6, %v8051_v60  ;;  %v504_v11 = vld [vmem:[#allocation4] sm:$0x1] }
 0xb69   : > { %v8790_v14 = vadd.f32 %v8789_v32, %v8788_v44  ;;  %v14470_v20 = vadd.f32 %v7870_v16, %v7710_v41  ;;  %v8791_v63 = vpop.f32.mrb[70].mxu1  ;;  %8945 = vmatpush3.bf16.msra.mxu1 %v8944_v53  ;;  %v9259_v44 = vmov 0.0   ;;  %8130 = vperm.xlu1 %9103, %v504_v11   ;;  %v7755_v16 = vadd.f32 %v14450_v54, %v14434_v28 }
 0xb6a   : > { %v8792_v13 = vpop.f32.mrb[71].mxu1  ;;  %8935 = vmatprep.mubr.msk.f32.mxu1 %vm9258_vm1, %v9259_v44  ;;  %8946 = vmatprep.subr.bf16.mxu1 %v9257_v25  ;;  %v7978_v54 = vsel %vm15489_vm0, %v14444_v31, 0.0 }
 0xb6b   : > { %v8793_v15 = vadd.f32 %v8792_v13, %v8791_v63  ;;  %v7763_v41 = vadd.f32 %v8790_v14, %v14434_v28 }
 0xb6d   : > { %8948 = vmatpush3.bf16.msra.mxu1 %v8947_v39 }
 0xb6e   : > { %8938 = vmatprep.subr.mxu1 %v9259_v44 }
 0xb81   : > { %v8905_v47 = vpop.f32.mrb[72].mxu0 }
 0xb82   : > { %v14476_v18 = vadd.f32 %v8905_v47, %v7731_v55  ;;  %v7883_v4 = vpop.f32.mrb[73].mxu0  ;;  %v7766_v55 = vadd.f32 %v8793_v15, %v14434_v28  ;;  %v7979_v47 = vsel %vm15489_vm0, %v14452_v58, 0.0 }
 0xb83   : > { %v14480_v8 = vadd.f32 %v7883_v4, %v7723_v62  ;;  %v8794_v3 = vpop.f32.mrb[72].mxu1  ;;  %v8906_v1 = vpop.f32.mrb[74].mxu0 }
 0xb84   : > { %v14484_v40 = vadd.f32 %v8906_v1, %v7734_v9  ;;  %v8795_v2 = vpop.f32.mrb[73].mxu1  ;;  %v7886_v26 = vpop.f32.mrb[75].mxu0 }
 0xb85   : > { %v14486_v24 = vadd.f32 %v8795_v2, %v8794_v3  ;;  %v14488_v35 = vadd.f32 %v7886_v26, %v7726_v12  ;;  %v8797_v21 = vpop.f32.mrb[74].mxu1  ;;  %v7758_v3 = vadd.f32 %v14454_v23, %v14434_v28  ;;  %v7983_v23 = vsel %vm15489_vm0, %v14448_v43, 0.0 }
 0xb86   : > { %v8798_v19 = vpop.f32.mrb[75].mxu1 }
 0xb87   : > { %v14490_v10 = vadd.f32 %v8798_v19, %v8797_v21  ;;  %v7980_v21 = vadd.f32 %v7979_v47, %v7978_v54  ;;  %v7771_v25 = vadd.f32 %v14486_v24, %v14434_v28  ;;  %v7997_v54 = vsel %vm15489_vm0, %v14476_v18, 0.0 }
 0xb9d   : > { %v8909_v42 = vpop.f32.mrb[76].mxu0 }
 0xb9e   : > { %v14496_v7 = vadd.f32 %v8909_v42, %v7747_v45  ;;  %v7899_v61 = vpop.f32.mrb[77].mxu0  ;;  %v7981_v42 = vsel %vm15489_vm0, %v14440_v36, 0.0 }
 0xb9f   : > { %v14500_v17 = vadd.f32 %v7899_v61, %v7739_v33  ;;  %v8800_v49 = vpop.f32.mrb[76].mxu1  ;;  %v8910_v22 = vpop.f32.mrb[78].mxu0  ;;  %v7982_v33 = vadd.f32 %v7981_v42, %v7980_v21  ;;  %v7985_v61 = vsel %vm15489_vm0, %v14464_v46, 0.0  ;;  %v7999_v21 = vsel %vm15489_vm0, %v14484_v40, 0.0 }
 0xba0   : > { %v14504_v50 = vadd.f32 %v8910_v22, %v7750_v5  ;;  %v8801_v57 = vpop.f32.mrb[77].mxu1  ;;  %v7902_v51 = vpop.f32.mrb[79].mxu0  ;;  %v7987_v22 = vsel %vm15489_vm0, %v14470_v20, 0.0 }
 0xba1   : > { %v8802_v59 = vadd.f32 %v8801_v57, %v8800_v49  ;;  %v14506_v37 = vadd.f32 %v7902_v51, %v7742_v48  ;;  %v8803_v30 = vpop.f32.mrb[78].mxu1  ;;  %v7984_v5 = vadd.f32 %v7983_v23, %v7982_v33  ;;  %v7989_v57 = vsel %vm15489_vm0, %v14460_v52, 0.0 }
 0xba2   : > { %v8804_v34 = vpop.f32.mrb[79].mxu1 }
 0xba3   : > { %v8805_v56 = vadd.f32 %v8804_v34, %v8803_v30  ;;  %v7986_v49 = vadd.f32 %v7985_v61, %v7984_v5  ;;  %v7991_v30 = vsel %vm15489_vm0, %v14468_v27, 0.0  ;;  %v7993_v34 = vsel %vm15489_vm0, %v14480_v8, 0.0 }
 0xba4   : > { %v7779_v38 = vadd.f32 %v8802_v59, %v14434_v28  ;;  %v7774_v59 = vadd.f32 %v14490_v10, %v14434_v28  ;;  %v8001_v10 = vsel %vm15489_vm0, %v14500_v17, 0.0  ;;  %v8003_v33 = vsel %vm15489_vm0, %v14506_v37, 0.0 }
 0xba5   : > { %v7988_v48 = vadd.f32 %v7987_v22, %v7986_v49  ;;  %v7782_v11 = vadd.f32 %v8805_v56, %v14434_v28  ;;  %v8005_v61 = vsel %vm15489_vm0, %v14496_v7, 0.0  ;;  %v8007_v49 = vsel %vm15489_vm0, %v14504_v50, 0.0 }
 0xba7   : > { %v7990_v51 = vadd.f32 %v7989_v57, %v7988_v48 }
 0xba9   : > { %v7992_v29 = vadd.f32 %v7991_v30, %v7990_v51 }
 0xbab   : > { %v7994_v60 = vadd.f32 %v7993_v34, %v7992_v29 }
 0xbb9   : > { %v8913_v32 = vpop.f32.mrb[80].mxu0 }
 0xbba   : > { %v14526_v63 = vadd.f32 %v8913_v32, %v7763_v41  ;;  %v7915_v13 = vpop.f32.mrb[81].mxu0  ;;  %v7995_v41 = vsel %vm15489_vm0, %v14488_v35, 0.0 }
 0xbbb   : > { %v14531_v62 = vadd.f32 %v7915_v13, %v7755_v16  ;;  %v8806_v4 = vpop.f32.mrb[80].mxu1  ;;  %v8914_v9 = vpop.f32.mrb[82].mxu0 }
 0xbbc   : > { %v14535_v14 = vadd.f32 %v8914_v9, %v7766_v55  ;;  %v8807_v1 = vpop.f32.mrb[81].mxu1  ;;  %v7918_v12 = vpop.f32.mrb[83].mxu0 }
 0xbbd   : > { %v8808_v2 = vadd.f32 %v8807_v1, %v8806_v4  ;;  %v14539_v26 = vadd.f32 %v7918_v12, %v7758_v3  ;;  %v8809_v15 = vpop.f32.mrb[82].mxu1  ;;  %v7996_v1 = vadd.f32 %v7995_v41, %v7994_v60  ;;  %v8009_v22 = vsel %vm15489_vm0, %v14531_v62, 0.0 }
 0xbbe   : > { %v8810_v19 = vpop.f32.mrb[83].mxu1 }
 0xbbf   : > { %v8811_v45 = vadd.f32 %v8810_v19, %v8809_v15  ;;  %v7998_v15 = vadd.f32 %v7997_v54, %v7996_v1  ;;  %v7787_v30 = vadd.f32 %v8808_v2, %v14434_v28  ;;  %v8015_v54 = vsel %vm15489_vm0, %v14535_v14, 0.0 }
 0xbc1   : > { %v8000_v19 = vadd.f32 %v7999_v21, %v7998_v15  ;;  %v7790_v41 = vadd.f32 %v8811_v45, %v14434_v28 }
 0xbc3   : > { %v8002_v42 = vadd.f32 %v8001_v10, %v8000_v19 }
 0xbc5   : > { %v8004_v23 = vadd.f32 %v8003_v33, %v8002_v42 }
 0xbc7   : > { %v8006_v5 = vadd.f32 %v8005_v61, %v8004_v23 }
 0xbc9   : > { %v8008_v48 = vadd.f32 %v8007_v49, %v8006_v5 }
 0xbcb   : > { %v8010_v34 = vadd.f32 %v8009_v22, %v8008_v48 }
 0xbd5   : > { %v8917_v53 = vpop.f32.mrb[84].mxu0 }
 0xbd6   : > { %v14558_v6 = vadd.f32 %v8917_v53, %v7779_v38  ;;  %v7931_v39 = vpop.f32.mrb[85].mxu0 }
 0xbd7   : > { %v14563_v32 = vadd.f32 %v7931_v39, %v7771_v25  ;;  %v8812_v16 = vpop.f32.mrb[84].mxu1  ;;  %v8918_v13 = vpop.f32.mrb[86].mxu0  ;;  %v8011_v25 = vsel %vm15489_vm0, %v14539_v26, 0.0 }
 0xbd8   : > { %v14567_v55 = vadd.f32 %v8918_v13, %v7782_v11  ;;  %v8813_v47 = vpop.f32.mrb[85].mxu1  ;;  %v7934_v24 = vpop.f32.mrb[87].mxu0  ;;  %v8021_v42 = vsel %vm15489_vm0, %v14558_v6, 0.0 }
 0xbd9   : > { %v8814_v4 = vadd.f32 %v8813_v47, %v8812_v16  ;;  %v14569_v9 = vadd.f32 %v7934_v24, %v7774_v59  ;;  %v8815_v3 = vpop.f32.mrb[86].mxu1  ;;  %v8017_v45 = vsel %vm15489_vm0, %v14563_v32, 0.0 }
 0xbda   : > { %v8816_v56 = vpop.f32.mrb[87].mxu1  ;;  %v8023_v23 = vsel %vm15489_vm0, %v14567_v55, 0.0 }
 0xbdb   : > { %v8817_v12 = vadd.f32 %v8816_v56, %v8815_v3  ;;  %v7795_v57 = vadd.f32 %v8814_v4, %v14434_v28  ;;  %v8012_v4 = vadd.f32 %v8011_v25, %v8010_v34  ;;  %v8013_v56 = vsel %vm15489_vm0, %v14526_v63, 0.0 }
 0xbdc   : > { %v8019_v10 = vsel %vm15489_vm0, %v14569_v9, 0.0 }
 0xbdd   : > { %v7798_v53 = vadd.f32 %v8817_v12, %v14434_v28  ;;  %v8014_v12 = vadd.f32 %v8013_v56, %v8012_v4 }
 0xbdf   : > { %v8016_v15 = vadd.f32 %v8015_v54, %v8014_v12 }
 0xbe1   : > { %v8018_v21 = vadd.f32 %v8017_v45, %v8016_v15 }
 0xbe3   : > { %v8020_v19 = vadd.f32 %v8019_v10, %v8018_v21 }
 0xbe5   : > { %v8022_v33 = vadd.f32 %v8021_v42, %v8020_v19 }
 0xbe7   : > { %v8024_v5 = vadd.f32 %v8023_v23, %v8022_v33 }
 0xbf1   : > { %v8921_v51 = vpop.f32.mrb[88].mxu0 }
 0xbf2   : > { %v14587_v29 = vadd.f32 %v8921_v51, %v7795_v57  ;;  %v7947_v38 = vpop.f32.mrb[89].mxu0 }
 0xbf3   : > { %v14592_v60 = vadd.f32 %v7947_v38, %v7787_v30  ;;  %v8818_v39 = vpop.f32.mrb[88].mxu1  ;;  %v8922_v11 = vpop.f32.mrb[90].mxu0 }
 0xbf4   : > { %v14595_v16 = vadd.f32 %v8922_v11, %v7798_v53  ;;  %v8819_v13 = vpop.f32.mrb[89].mxu1  ;;  %v7950_v59 = vpop.f32.mrb[91].mxu0  ;;  %v8029_v25 = vsel %vm15489_vm0, %v14587_v29, 0.0 }
 0xbf5   : > { %v8820_v2 = vadd.f32 %v8819_v13, %v8818_v39  ;;  %v14597_v47 = vadd.f32 %v7950_v59, %v7790_v41  ;;  %v8821_v24 = vpop.f32.mrb[90].mxu1  ;;  %v8025_v61 = vsel %vm15489_vm0, %v14592_v60, 0.0 }
 0xbf6   : > { %v8822_v3 = vpop.f32.mrb[91].mxu1  ;;  %v8026_v49 = vadd.f32 %v8025_v61, %v8024_v5 }
 0xbf7   : > { %v8823_v1 = vadd.f32 %v8822_v3, %v8821_v24  ;;  %v8027_v22 = vsel %vm15489_vm0, %v14597_v47, 0.0  ;;  %v7803_v13 = vadd.f32 %v8820_v2, %v14434_v28  ;;  %v8031_v3 = vsel %vm15489_vm0, %v14595_v16, 0.0 }
 0xbf8   : > { %v8028_v34 = vadd.f32 %v8027_v22, %v8026_v49 }
 0xbf9   : > { %v7806_v54 = vadd.f32 %v8823_v1, %v14434_v28 }
 0xbfa   : > { %v8030_v39 = vadd.f32 %v8029_v25, %v8028_v34  ;;  %v8139_v34 = vld [vmem:[%s15113_s12] sm:$0x3] }
 0xbfb   : > { %v8053_v25 = vld [vmem:[%s15112_s10] sm:$0x1] }
 0xbfc   : > { %v8032_v45 = vadd.f32 %v8031_v3, %v8030_v39 }
 0xc0f   : > { %v8824_v48 = vpop.f32.mrb[92].mxu1 }
 0xc10   : > { %v8825_v57 = vpop.f32.mrb[93].mxu1 }
 0xc11   : > { %v8826_v51 = vadd.f32 %v8825_v57, %v8824_v48  ;;  %v8827_v30 = vpop.f32.mrb[94].mxu1 }
 0xc12   : > { %v8828_v38 = vpop.f32.mrb[95].mxu1 }
 0xc13   : > { %v8829_v53 = vadd.f32 %v8828_v38, %v8827_v30  ;;  %v7811_v11 = vadd.f32 %v8826_v51, %v14434_v28  ;;  %v8135_v38 = vsub.s32 0, %v15925_v0 }
 0xc15   : > { %v7814_v4 = vadd.f32 %v8829_v53, %v14434_v28  ;;  %v8131_v53 = vpop.permute.xlu1 %8130 }
 0xc16   : > { %v8136_v39 = vrot.slane %v8131_v53, %v8135_v38 }
 0xc17   : > { %v8925_v41 = vpop.f32.mrb[96].mxu1 }
 0xc18   : > { %v14619_v59 = vadd.f32 %v8925_v41, %v7811_v11  ;;  %v7963_v24 = vpop.f32.mrb[97].mxu1 }
 0xc19   : > { %v14624_v56 = vadd.f32 %v7963_v24, %v7803_v13  ;;  %v8926_v12 = vpop.f32.mrb[98].mxu1 }
 0xc1a   : > { %v14627_v15 = vadd.f32 %v8926_v12, %v7814_v4  ;;  %v7966_v21 = vpop.f32.mrb[99].mxu1  ;;  %v8037_v23 = vsel %vm15489_vm0, %v14619_v59, 0.0  ;;  %v8140_v4 = vld [vmem:[%s15114_s13] sm:$0x1] }
 0xc1b   : > { %v8033_v2 = vsel %vm15489_vm0, %v14624_v56, 0.0  ;;  %v14631_v10 = vadd.f32 %v7966_v21, %v7806_v54 }
 0xc1c   : > { %v8034_v19 = vadd.f32 %v8033_v2, %v8032_v45  ;;  %v8039_v28 = vsel %vm15489_vm0, %v14627_v15, 0.0 }
 0xc1d   : > { %v8035_v42 = vsel %vm15489_vm0, %v14631_v10, 0.0 }
 0xc1e   : > { %v8036_v33 = vadd.f32 %v8035_v42, %v8034_v19 }
 0xc20   : > { %v8038_v61 = vadd.f32 %v8037_v23, %v8036_v33 }
 0xc22   : > { %v8040_v1 = vadd.f32 %v8039_v28, %v8038_v61 }
 0xc24   : > { %v8041_v5 = vrot.slane %v8040_v1, 4 }
 0xc26   : > { %v8042_v49 = vadd.f32 %v8041_v5, %v8040_v1 }
 0xc28   : > { %v8043_v22 = vrot.slane %v8042_v49, 2 }
 0xc2a   : > { %v8044_v48 = vadd.f32 %v8043_v22, %v8042_v49 }
 0xc2c   : > { %v8045_v57 = vrot.slane %v8044_v48, 1 }
 0xc2e   : > { %v8046_v51 = vadd.f32 %v8045_v57, %v8044_v48  ;;  %v9155_v57 = vld [vmem:[%s9423_s30 + $0x28] sm:$0xff] }
 0xc30   : > { %v8048_v30 = vmul.f32 0.00390625, %v8046_v51 }
 0xc32   : > { %8936 = vmatmul.mubr.msk.f32.vlgmr.msra.gmra.mrb[100].mxu1 %vm15489_vm0, %v8048_v30  ;;  %v9156_v30 = vld [vmem:[%s9423_s30 + $0x30] sm:$0xff] }
 0xc33   : > { %8940 = vmatprep.mubr.msk.f32.mxu1 %vm9258_vm1, %v9259_v44  ;;  %8939 = vmatpush3.msk.msra.mxu1 %vm8145_vm2, %v8139_v34 }
 0xd05   : > { %v8123_v11 = vpop.f32.mrb[100].mxu1 }
 0xd06   : > { %v8124_v41 = vadd.f32 %v8123_v11, %v8053_v25  ;;  %v8937_v13 = vpop.f32.mrb[101].mxu1  ;;  %v9158_v25 = vld [vmem:[%s9423_s30 + $0x40] sm:$0xff]  ;;  %v9159_v11 = vld [vmem:[%s9423_s30 + $0x48] sm:$0xff] }
 0xd07   : > { %v9160_v13 = vld [vmem:[%s9423_s30 + $0x50] sm:$0xff] }
 0xd08   : > { %vm8127_vm3 = vcmp.gt.f32.partialorder %v8124_v41, 0.0  ;;  %v8137_v24 = vmul.f32 %v8136_v39, %v8124_v41 }
 0xd0a   : > { %v8138_v44 = vsel %vm8127_vm3, %v8124_v41, %v8137_v24 }
 0xd0b   : > { %8941 = vmatmul.mubr.msk.f32.vlgmr.msra.gmra.mrb[102].mxu1 %vm8141_vm4, %v8138_v44  ;;  %v9161_v44 = vld [vmem:[%s9423_s30 + $0x58] sm:$0xff] }
 0xdde   : > { %v8215_v3 = vpop.f32.mrb[102].mxu1 }
 0xddf   : > { %v8216_v0 = vadd.f32 %v8215_v3, %v8140_v4  ;;  %v8942_v12 = vpop.f32.mrb[103].mxu1  ;;  %v9162_v3 = vld [vmem:[%s9423_s30 + $0x60] sm:$0xff] }
 0xde0   : > { %v9163_v12 = vld [vmem:[%s9423_s30 + $0x68] sm:$0xff] }
 0xde1   : > { %v8580_v54 = vmul.f32 -1.442695, %v8216_v0 }
 0xde3   : > { %9141 = vpow2.f32 %v8580_v54 }
 0xded   : > { %v9142_v45 = vpop.eup %9141 }
 0xdee   : > { %v8222_v21 = vadd.f32 1.0, %v9142_v45  ;;  %v9164_v45 = vld [vmem:[%s9423_s30 + $0x70] sm:$0xff] }
 0xdf0   : > { %9143 = vrcp.f32 %v8222_v21 }
 0xdfa   : > { %v9144_v2 = vpop.eup %9143 }
 0xdfb   : > { %v8228_v19 = vrot.slane %v9144_v2, %v8135_v38  ;;  %v9157_v38 = vld [vmem:[%s9423_s30 + $0x38] sm:$0xff] }
 0xdfc   : > { %v9165_v2 = vld [vmem:[%s9423_s30 + $0x78] sm:$0xff] }
 0xdfd   : > { %v8229_v42 = vmul.f32 %v8228_v19, %v14444_v31  ;;  %v8230_v33 = vmul.f32 %v8228_v19, %v14452_v58  ;;  %v8231_v23 = vmul.f32 %v8228_v19, %v14440_v36  ;;  %v8232_v61 = vmul.f32 %v8228_v19, %v14448_v43 }
 0xdfe   : > { %v8233_v28 = vmul.f32 %v8228_v19, %v14464_v46  ;;  %v8234_v1 = vmul.f32 %v8228_v19, %v14470_v20  ;;  %v8235_v5 = vmul.f32 %v8228_v19, %v14460_v52  ;;  %v8236_v49 = vmul.f32 %v8228_v19, %v14468_v27 }
 0xdff   : > { %v8237_v22 = vmul.f32 %v8228_v19, %v14480_v8  ;;  %v8238_v48 = vmul.f32 %v8228_v19, %v14488_v35  ;;  %v8239_v31 = vmul.f32 %v8228_v19, %v14476_v18  ;;  %v8240_v58 = vmul.f32 %v8228_v19, %v14484_v40 }
 0xe00   : > { %v8241_v36 = vmul.f32 %v8228_v19, %v14500_v17  ;;  %v8242_v43 = vmul.f32 %v8228_v19, %v14506_v37  ;;  %v8243_v46 = vmul.f32 %v8228_v19, %v14496_v7  ;;  %v8244_v20 = vmul.f32 %v8228_v19, %v14504_v50 }
 0xe01   : > { %v8245_v52 = vmul.f32 %v8228_v19, %v14531_v62  ;;  %v8246_v27 = vmul.f32 %v8228_v19, %v14539_v26  ;;  %v8247_v8 = vmul.f32 %v8228_v19, %v14526_v63  ;;  %v8248_v18 = vmul.f32 %v8228_v19, %v14535_v14 }
 0xe02   : > { %v8249_v40 = vmul.f32 %v8228_v19, %v14563_v32  ;;  %v8250_v35 = vmul.f32 %v8228_v19, %v14569_v9  ;;  %v8251_v17 = vmul.f32 %v8228_v19, %v14558_v6  ;;  %v8252_v7 = vmul.f32 %v8228_v19, %v14567_v55  ;;  %v9150_v55 = vld [vmem:[%s9423_s30] sm:$0xff] }
 0xe03   : > { %v8253_v50 = vmul.f32 %v8228_v19, %v14592_v60  ;;  %v8254_v37 = vmul.f32 %v8228_v19, %v14597_v47  ;;  %v8255_v63 = vmul.f32 %v8228_v19, %v14587_v29  ;;  %v8256_v62 = vmul.f32 %v8228_v19, %v14595_v16  ;;  %v9151_v29 = vld [vmem:[%s9423_s30 + $0x8] sm:$0xff]  ;;  %v9152_v16 = vld [vmem:[%s9423_s30 + $0x10] sm:$0xff] }
 0xe04   : > { %v8257_v14 = vmul.f32 %v8228_v19, %v14624_v56  ;;  %v8258_v26 = vmul.f32 %v8228_v19, %v14631_v10  ;;  %v14683_v6 = vmul.f32 %v8228_v19, %v14619_v59  ;;  %v14686_v32 = vmul.f32 %v8228_v19, %v14627_v15  ;;  %v9153_v56 = vld [vmem:[%s9423_s30 + $0x18] sm:$0xff]  ;;  %v9154_v10 = vld [vmem:[%s9423_s30 + $0x20] sm:$0xff] }
 0xe05   : > { %v14689_v9 = vadd.f32 %v9150_v55, %v8229_v42  ;;  %v14692_v60 = vadd.f32 %v9151_v29, %v8230_v33  ;;  %v14695_v47 = vadd.f32 %v9152_v16, %v8231_v23  ;;  %v14698_v59 = vadd.f32 %v9153_v56, %v8232_v61  ;;  %v9166_v42 = vld [vmem:[%s9423_s30 + $0x80] sm:$0xff]  ;;  %v9167_v23 = vld [vmem:[%s9423_s30 + $0x88] sm:$0xff]  ;;  %v9177_v29 = vld [vmem:[%s9423_s30 + $0xd8] sm:$0xff] }
 0xe06   : > { %v14701_v15 = vadd.f32 %v9154_v10, %v8233_v28  ;;  %v14704_v51 = vadd.f32 %v9155_v57, %v8234_v1  ;;  %v14707_v34 = vadd.f32 %v9156_v30, %v8235_v5  ;;  %v14710_v53 = vadd.f32 %v9157_v38, %v8236_v49  ;;  %v9168_v28 = vld [vmem:[%s9423_s30 + $0x90] sm:$0xff]  ;;  %v9169_v5 = vld [vmem:[%s9423_s30 + $0x98] sm:$0xff]  ;;  %v9178_v16 = vld [vmem:[%s9423_s30 + $0xe0] sm:$0xff] }
 0xe07   : > { %v14713_v39 = vadd.f32 %v9158_v25, %v8237_v22  ;;  %v14716_v41 = vadd.f32 %v9159_v11, %v8238_v48  ;;  %v14719_v24 = vadd.f32 %v9160_v13, %v8239_v31  ;;  %v14722_v4 = vadd.f32 %v9161_v44, %v8240_v58  ;;  %v9170_v22 = vld [vmem:[%s9423_s30 + $0xa0] sm:$0xff]  ;;  %v9171_v31 = vld [vmem:[%s9423_s30 + $0xa8] sm:$0xff]  ;;  %v9181_v57 = vld [vmem:[%s9423_s30 + $0xf8] sm:$0xff] }
 0xe08   : > { %v14725_v0 = vadd.f32 %v9162_v3, %v8241_v36  ;;  %v14728_v54 = vadd.f32 %v9163_v12, %v8242_v43  ;;  %v14731_v21 = vadd.f32 %v9164_v45, %v8243_v46  ;;  %v14734_v19 = vadd.f32 %v9165_v2, %v8244_v20  ;;  %v9172_v36 = vld [vmem:[%s9423_s30 + $0xb0] sm:$0xff]  ;;  %v9173_v46 = vld [vmem:[%s9423_s30 + $0xb8] sm:$0xff] }
 0xe09   : > { %v14737_v33 = vadd.f32 %v9166_v42, %v8245_v52  ;;  %v14740_v61 = vadd.f32 %v9167_v23, %v8246_v27  ;;  %v14743_v1 = vadd.f32 %v9168_v28, %v8247_v8  ;;  %v14746_v49 = vadd.f32 %v9169_v5, %v8248_v18  ;;  %v9174_v52 = vld [vmem:[%s9423_s30 + $0xc0] sm:$0xff]  ;;  %v9175_v8 = vld [vmem:[%s9423_s30 + $0xc8] sm:$0xff] }
 0xe0a   : > { %v14749_v48 = vadd.f32 %v9170_v22, %v8249_v40  ;;  %v14752_v58 = vadd.f32 %v9171_v31, %v8250_v35  ;;  %v14755_v43 = vadd.f32 %v9172_v36, %v8251_v17  ;;  %v14758_v20 = vadd.f32 %v9173_v46, %v8252_v7  ;;  %v9176_v40 = vld [vmem:[%s9423_s30 + $0xd0] sm:$0xff]  ;;  %v9179_v17 = vld [vmem:[%s9423_s30 + $0xe8] sm:$0xff] }
 0xe0b   : > { %v14761_v27 = vadd.f32 %v9174_v52, %v8253_v50  ;;  %v14764_v18 = vadd.f32 %v9175_v8, %v8254_v37  ;;  %v14767_v55 = vadd.f32 %v9176_v40, %v8255_v63  ;;  %v14770_v35 = vadd.f32 %v9177_v29, %v8256_v62  ;;  %v9180_v7 = vld [vmem:[%s9423_s30 + $0xf0] sm:$0xff]  ;;  %s462_s30 = sand.u32 1, %s9236_s18  }
 0xe0c   : > { %v14773_v56 = vadd.f32 %v9178_v16, %v8257_v14  ;;  %v14776_v10 = vadd.f32 %v9179_v17, %v8258_v26  ;;  %v14780_v50 = vadd.f32 %v9180_v7, %v14683_v6  ;;  %v14784_v37 = vadd.f32 %v9181_v57, %v14686_v32  ;;  %v16177_v63 = vld [vmem:[#allocation101_spill] sm:$0xff]  ;;  %s14837_s5 = sshll.u32 %s462_s30, 8  ;;  %s15061_s4 = scalar_lea.sflag [#allocation6], %s462_s30 }
 0xe0d   : > { %16172 = vst [vmem:[#allocation121_spill] sm:$0xff] %v14761_v27  ;;  %16173 = vst [vmem:[#allocation56_spill] sm:$0xff] %v14764_v18  ;;  %vm8293_vm5 = vcmp.gt.f32.partialorder %v14689_v9, 0.0  ;;  %vm8294_vm8 = vcmp.gt.f32.partialorder %v14692_v60, 0.0  ;;  %vm8295_vm9 = vcmp.gt.f32.partialorder %v14695_v47, 0.0  ;;  %vm8296_vm10 = vcmp.gt.f32.partialorder %v14698_v59, 0.0 }
 0xe0e   : > { %16174 = vst [vmem:[#allocation131_spill] sm:$0xff] %v14770_v35  ;;  %16175 = vst [vmem:[#allocation62_spill] sm:$0xff] %v14773_v56  ;;  %vm8297_vm11 = vcmp.gt.f32.partialorder %v14701_v15, 0.0  ;;  %vm8298_vm12 = vcmp.gt.f32.partialorder %v14704_v51, 0.0  ;;  %vm8299_vm13 = vcmp.gt.f32.partialorder %v14707_v34, 0.0  ;;  %vm8300_vm14 = vcmp.gt.f32.partialorder %v14710_v53, 0.0 }
 0xe0f   : > { %16176 = vst [vmem:[#allocation116_spill] sm:$0xff] %v14776_v10  ;;  %vm8301_vm15 = vcmp.gt.f32.partialorder %v14713_v39, 0.0  ;;  %vm8302_vm6 = vcmp.gt.f32.partialorder %v14716_v41, 0.0  ;;  %vm8303_vm7 = vcmp.gt.f32.partialorder %v14719_v24, 0.0  ;;  %vm8304_vm1 = vcmp.gt.f32.partialorder %v14722_v4, 0.0  ;;  %s14912_s22 = scalar_lea.vmem [#allocation5], %s14837_s5 }
 0xe10   : > { %v8325_v62 = vmul.f32 %v14689_v9, %v16177_v63  ;;  %v8326_v14 = vmul.f32 %v14692_v60, %v16177_v63  ;;  %v8327_v26 = vmul.f32 %v14695_v47, %v16177_v63  ;;  %v8328_v6 = vmul.f32 %v14698_v59, %v16177_v63  ;;  %s8435_s0 = sshll.u32 %s14912_s22, 4  ;;  %s15009_s0 = int_to_ptr.vmem [resolvable:$true] %s8435_s0 }
 0xe11   : > { %v8329_v32 = vmul.f32 %v14701_v15, %v16177_v63  ;;  %v8330_v30 = vmul.f32 %v14704_v51, %v16177_v63  ;;  %v8331_v38 = vmul.f32 %v14707_v34, %v16177_v63  ;;  %v8332_v25 = vmul.f32 %v14710_v53, %v16177_v63  ;;  %s9182_s27 = scalar_lea.vmem %s15009_s0, 4096  ;;  %p9189_p0 = scmp.lt.s32.totalorder %s15009_s0, %s9187_s15 }
 0xe12   : > { %v8333_v11 = vmul.f32 %v14713_v39, %v16177_v63  ;;  %v8334_v13 = vmul.f32 %v14716_v41, %v16177_v63  ;;  %v8335_v44 = vmul.f32 %v14719_v24, %v16177_v63  ;;  %v8336_v3 = vmul.f32 %v14722_v4, %v16177_v63  ;;  %p9183_p11 = scmp.ne.s32.totalorder %s15009_s0, %s9182_s27  ;;  %p9190_p1 = scmp.lt.s32.totalorder %s9188_s16, %s9182_s27 }
 0xe13   : > { %v8337_v12 = vmul.f32 %v14725_v0, %v16177_v63  ;;  %v8338_v45 = vmul.f32 %v14728_v54, %v16177_v63  ;;  %v8339_v2 = vmul.f32 %v14731_v21, %v16177_v63  ;;  %v8340_v42 = vmul.f32 %v14734_v19, %v16177_v63 }
 0xe14   : > { %vm8321_vm3 = vcmp.gt.f32.partialorder %v14773_v56, 0.0  ;;  %vm8322_vm4 = vcmp.gt.f32.partialorder %v14776_v10, 0.0  ;;  %vm8323_vm0 = vcmp.gt.f32.partialorder %v14780_v50, 0.0  ;;  %vm8324_vm2 = vcmp.gt.f32.partialorder %v14784_v37, 0.0  ;;  %p9184_p12 = pnand %p9183_p11, %p9382_p5  ;;  %p9191_p2 = por %p9190_p1, %p9189_p0 }
 0xe15   : > { %v8341_v23 = vmul.f32 %v14737_v33, %v16177_v63  ;;  %v8342_v28 = vmul.f32 %v14740_v61, %v16177_v63  ;;  %v8343_v5 = vmul.f32 %v14743_v1, %v16177_v63  ;;  %v8344_v22 = vmul.f32 %v14746_v49, %v16177_v63 }
 0xe16   : > { %v8345_v31 = vmul.f32 %v14749_v48, %v16177_v63  ;;  %v8346_v36 = vmul.f32 %v14752_v58, %v16177_v63  ;;  %v8347_v46 = vmul.f32 %v14755_v43, %v16177_v63  ;;  %v8348_v52 = vmul.f32 %v14758_v20, %v16177_v63  ;;  %p9185_p13 = pneg %p9184_p12 }
 0xe17   : > { %v8349_v8 = vmul.f32 %v14761_v27, %v16177_v63  ;;  %v8350_v40 = vmul.f32 %v14764_v18, %v16177_v63  ;;  %v8351_v29 = vmul.f32 %v14767_v55, %v16177_v63  ;;  %v8352_v16 = vmul.f32 %v14770_v35, %v16177_v63 }
 0xe18   : > { %v8353_v17 = vmul.f32 %v14773_v56, %v16177_v63  ;;  %v8354_v7 = vmul.f32 %v14776_v10, %v16177_v63  ;;  %v8355_v57 = vmul.f32 %v14780_v50, %v16177_v63  ;;  %v8356_v27 = vmul.f32 %v14784_v37, %v16177_v63  ;;  %p9192_p3 = pnand %p9191_p2, %p9185_p13 }
 0xe19   : > { %v8357_v18 = vsel %vm8293_vm5, %v14689_v9, %v8325_v62  ;;  %v8358_v35 = vsel %vm8294_vm8, %v14692_v60, %v8326_v14  ;;  %v8359_v56 = vsel %vm8295_vm9, %v14695_v47, %v8327_v26  ;;  %v8360_v10 = vsel %vm8296_vm10, %v14698_v59, %v8328_v6 }
 0xe1a   : > { %v8361_v63 = vsel %vm8297_vm11, %v14701_v15, %v8329_v32  ;;  %v8362_v9 = vsel %vm8298_vm12, %v14704_v51, %v8330_v30  ;;  %v8363_v60 = vsel %vm8299_vm13, %v14707_v34, %v8331_v38  ;;  %v8364_v47 = vsel %vm8300_vm14, %v14710_v53, %v8332_v25 }
 0xe1b   : > { %vm16178_vm5 = vcmask 261120   ;;  %v8365_v59 = vsel %vm8301_vm15, %v14713_v39, %v8333_v11  ;;  %v8366_v15 = vsel %vm8302_vm6, %v14716_v41, %v8334_v13  ;;  %v8367_v51 = vsel %vm8303_vm7, %v14719_v24, %v8335_v44 }
 0xe1c   : > { %8389 = vst.msk [vmem:[%s14912_s22] sm:$0xff] %vm16178_vm5, %v8357_v18  ;;  %vm16179_vm8 = vmmov %vm16178_vm5  ;;  %v8368_v34 = vsel %vm8304_vm1, %v14722_v4, %v8336_v3  ;;  %vm16186_vm15 = vcmp.gt.f32.partialorder %v14725_v0, 0.0  ;;  %vm16187_vm6 = vcmp.gt.f32.partialorder %v14728_v54, 0.0  ;;  %vm16188_vm7 = vcmp.gt.f32.partialorder %v14731_v21, 0.0  ;;  %v16214_v18 = vld [vmem:[#allocation131_spill] sm:$0xff] }
 0xe1d   : > { %8390 = vst.msk [vmem:[%s14912_s22 + $0x8] sm:$0xff] %vm16179_vm8, %v8358_v35  ;;  %vm16180_vm9 = vmmov %vm16178_vm5  ;;  %v8369_v53 = vsel %vm16186_vm15, %v14725_v0, %v8337_v12  ;;  %v8370_v39 = vsel %vm16187_vm6, %v14728_v54, %v8338_v45  ;;  %v8371_v41 = vsel %vm16188_vm7, %v14731_v21, %v8339_v2  ;;  %vm16189_vm1 = vcmp.gt.f32.partialorder %v14734_v19, 0.0 }
 0xe1e   : > { %8391 = vst.msk [vmem:[%s14912_s22 + $0x10] sm:$0xff] %vm16180_vm9, %v8359_v56  ;;  %vm16181_vm10 = vmmov %vm16178_vm5  ;;  %v8372_v24 = vsel %vm16189_vm1, %v14734_v19, %v8340_v42  ;;  %v16220_v56 = vld [vmem:[#allocation62_spill] sm:$0xff]  ;;  %v8387_v14 = vsel %vm8323_vm0, %v14780_v50, %v8355_v57  ;;  %v8388_v26 = vsel %vm8324_vm2, %v14784_v37, %v8356_v27 }
 0xe1f   : > { %8392 = vst.msk [vmem:[%s14912_s22 + $0x18] sm:$0xff] %vm16181_vm10, %v8360_v10  ;;  %vm16182_vm11 = vmmov %vm16178_vm5  ;;  %v16221_v10 = vld [vmem:[#allocation116_spill] sm:$0xff] }
 0xe20   : > { %8393 = vst.msk [vmem:[%s14912_s22 + $0x20] sm:$0xff] %vm16182_vm11, %v8361_v63  ;;  %vm16183_vm12 = vmmov %vm16178_vm5  ;;  %vm16193_vm11 = vcmp.gt.f32.partialorder %v14737_v33, 0.0  ;;  %v8386_v62 = vsel %vm8322_vm4, %v16221_v10, %v8354_v7 }
 0xe21   : > { %8394 = vst.msk [vmem:[%s14912_s22 + $0x28] sm:$0xff] %vm16183_vm12, %v8362_v9  ;;  %vm16184_vm13 = vmmov %vm16178_vm5  ;;  %v8373_v4 = vsel %vm16193_vm11, %v14737_v33, %v8341_v23  ;;  %vm16194_vm12 = vcmp.gt.f32.partialorder %v14740_v61, 0.0 }
 0xe22   : > { %8395 = vst.msk [vmem:[%s14912_s22 + $0x30] sm:$0xff] %vm16184_vm13, %v8363_v60  ;;  %vm16185_vm14 = vmmov %vm16178_vm5  ;;  %v8374_v0 = vsel %vm16194_vm12, %v14740_v61, %v8342_v28  ;;  %vm16195_vm13 = vcmp.gt.f32.partialorder %v14743_v1, 0.0 }
 0xe23   : > { %8396 = vst.msk [vmem:[%s14912_s22 + $0x38] sm:$0xff] %vm16185_vm14, %v8364_v47  ;;  %vm16190_vm8 = vmmov %vm16178_vm5  ;;  %v8375_v54 = vsel %vm16195_vm13, %v14743_v1, %v8343_v5  ;;  %vm16196_vm14 = vcmp.gt.f32.partialorder %v14746_v49, 0.0 }
 0xe24   : > { %8397 = vst.msk [vmem:[%s14912_s22 + $0x40] sm:$0xff] %vm16178_vm5, %v8365_v59  ;;  %vm16191_vm9 = vmmov %vm16178_vm5  ;;  %v8376_v21 = vsel %vm16196_vm14, %v14746_v49, %v8344_v22  ;;  %v16209_v49 = vld [vmem:[#allocation121_spill] sm:$0xff] }
 0xe25   : > { %8398 = vst.msk [vmem:[%s14912_s22 + $0x48] sm:$0xff] %vm16190_vm8, %v8366_v15  ;;  %vm16192_vm10 = vmmov %vm16178_vm5  ;;  %vm16202_vm8 = vcmp.gt.f32.partialorder %v14752_v58, 0.0 }
 0xe26   : > { %8399 = vst.msk [vmem:[%s14912_s22 + $0x50] sm:$0xff] %vm16191_vm9, %v8367_v51  ;;  %vm16197_vm15 = vmmov %vm16178_vm5  ;;  %v8378_v33 = vsel %vm16202_vm8, %v14752_v58, %v8346_v36  ;;  %vm16203_vm9 = vcmp.gt.f32.partialorder %v14755_v43, 0.0  ;;  %v16211_v58 = vld [vmem:[#allocation56_spill] sm:$0xff] }
 0xe27   : > { %8400 = vst.msk [vmem:[%s14912_s22 + $0x58] sm:$0xff] %vm16192_vm10, %v8368_v34  ;;  %vm16198_vm6 = vmmov %vm16178_vm5  ;;  %v8379_v61 = vsel %vm16203_vm9, %v14755_v43, %v8347_v46  ;;  %vm16204_vm10 = vcmp.gt.f32.partialorder %v14758_v20, 0.0 }
 0xe28   : > { %8401 = vst.msk [vmem:[%s14912_s22 + $0x60] sm:$0xff] %vm16197_vm15, %v8369_v53  ;;  %vm16199_vm7 = vmmov %vm16178_vm5  ;;  %v8380_v1 = vsel %vm16204_vm10, %v14758_v20, %v8348_v52  ;;  %vm16210_vm15 = vcmp.gt.f32.partialorder %v16209_v49, 0.0 }
 0xe29   : > { %8402 = vst.msk [vmem:[%s14912_s22 + $0x68] sm:$0xff] %vm16198_vm6, %v8370_v39  ;;  %vm16200_vm1 = vmmov %vm16178_vm5  ;;  %vm16201_vm5 = vcmp.gt.f32.partialorder %v14749_v48, 0.0  ;;  %vm16212_vm6 = vcmp.gt.f32.partialorder %v16211_v58, 0.0 }
 0xe2a   : > { %8403 = vst.msk [vmem:[%s14912_s22 + $0x70] sm:$0xff] %vm16199_vm7, %v8371_v41  ;;  %v8377_v19 = vsel %vm16201_vm5, %v14749_v48, %v8345_v31  ;;  %vm16205_vm11 = vmmov %vm16200_vm1  ;;  %v8381_v48 = vsel %vm16210_vm15, %v16209_v49, %v8349_v8  ;;  %v8382_v43 = vsel %vm16212_vm6, %v16211_v58, %v8350_v40  ;;  %vm16213_vm7 = vcmp.gt.f32.partialorder %v14767_v55, 0.0 }
 0xe2b   : > { %8404 = vst.msk [vmem:[%s14912_s22 + $0x78] sm:$0xff] %vm16200_vm1, %v8372_v24  ;;  %vm16206_vm12 = vmmov %vm16200_vm1  ;;  %v8383_v20 = vsel %vm16213_vm7, %v14767_v55, %v8351_v29  ;;  %v8385_v55 = vsel %vm8321_vm3, %v16220_v56, %v8353_v17 }
 0xe2c   : > { %8405 = vst.msk [vmem:[%s14912_s22 + $0x80] sm:$0xff] %vm16205_vm11, %v8373_v4  ;;  %vm16207_vm13 = vmmov %vm16200_vm1 }
 0xe2d   : > { %8406 = vst.msk [vmem:[%s14912_s22 + $0x88] sm:$0xff] %vm16206_vm12, %v8374_v0  ;;  %vm16208_vm14 = vmmov %vm16200_vm1  ;;  %vm16215_vm1 = vcmp.gt.f32.partialorder %v16214_v18, 0.0 }
 0xe2e   : > { %8407 = vst.msk [vmem:[%s14912_s22 + $0x90] sm:$0xff] %vm16207_vm13, %v8375_v54  ;;  %v8384_v35 = vsel %vm16215_vm1, %v16214_v18, %v8352_v16  ;;  %vm16216_vm5 = vmmov %vm16205_vm11 }
 0xe2f   : > { %8408 = vst.msk [vmem:[%s14912_s22 + $0x98] sm:$0xff] %vm16208_vm14, %v8376_v21  ;;  %vm16217_vm8 = vmmov %vm16216_vm5 }
 0xe30   : > { %8409 = vst.msk [vmem:[%s14912_s22 + $0xa0] sm:$0xff] %vm16216_vm5, %v8377_v19  ;;  %vm16218_vm9 = vmmov %vm16216_vm5 }
 0xe31   : > { %8410 = vst.msk [vmem:[%s14912_s22 + $0xa8] sm:$0xff] %vm16217_vm8, %v8378_v33  ;;  %vm16219_vm10 = vmmov %vm16216_vm5 }
 0xe32   : > { %8411 = vst.msk [vmem:[%s14912_s22 + $0xb0] sm:$0xff] %vm16218_vm9, %v8379_v61  ;;  %vm16222_vm11 = vmmov %vm16216_vm5 }
 0xe33   : > { %8412 = vst.msk [vmem:[%s14912_s22 + $0xb8] sm:$0xff] %vm16219_vm10, %v8380_v1  ;;  %vm16223_vm12 = vmmov %vm16216_vm5 }
 0xe34   : > { %8413 = vst.msk [vmem:[%s14912_s22 + $0xc0] sm:$0xff] %vm16222_vm11, %v8381_v48  ;;  %vm16224_vm13 = vmmov %vm16216_vm5 }
 0xe35   : > { %8414 = vst.msk [vmem:[%s14912_s22 + $0xc8] sm:$0xff] %vm16223_vm12, %v8382_v43  ;;  %vm16225_vm3 = vmmov %vm16216_vm5 }
 0xe36   : > { %8415 = vst.msk [vmem:[%s14912_s22 + $0xd0] sm:$0xff] %vm16224_vm13, %v8383_v20  ;;  %vm16226_vm14 = vmmov %vm16225_vm3 }
 0xe37   : > { %8416 = vst.msk [vmem:[%s14912_s22 + $0xd8] sm:$0xff] %vm16225_vm3, %v8384_v35  ;;  %vm16227_vm4 = vmmov %vm16225_vm3 }
 0xe38   : > { %8417 = vst.msk [vmem:[%s14912_s22 + $0xe0] sm:$0xff] %vm16226_vm14, %v8385_v55  ;;  %vm16228_vm15 = vmmov %vm16225_vm3 }
 0xe39   : > { %8418 = vst.msk [vmem:[%s14912_s22 + $0xe8] sm:$0xff] %vm16227_vm4, %v8386_v62  ;;  %vm16229_vm0 = vmmov %vm16225_vm3 }
 0xe3a   : > { %8419 = vst.msk [vmem:[%s14912_s22 + $0xf0] sm:$0xff] %vm16228_vm15, %v8387_v14 }
 0xe3b   : > { %8420 = vst.msk [vmem:[%s14912_s22 + $0xf8] sm:$0xff] %vm16229_vm0, %v8388_v26 }
 0xe3c   : > { %9195 = shalt.err (!%p9192_p3)
}
 0xe3d   : > { %s9196_s11 = scalar_lea.hbm %s15007_s28, 4096  ;;  %s9200_s5 = scalar_lea.hbm %s15115_s14, 8192 }
 0xe3e   : > { %p9197_p4 = scmp.ne.s32.totalorder %s15007_s28, %s9196_s11  ;;  %p9201_p9 = scmp.lt.u32.totalorder %s15007_s28, %s15115_s14 }
 0xe3f   : > { %p9202_p10 = scmp.lt.u32.totalorder %s9200_s5, %s9196_s11  ;;  %p9204_p12 = scmp.lt.u32.totalorder %s9196_s11, %s15007_s28 }
 0xe40   : > { %p9198_p7 = pnand %p9197_p4, %p9382_p5 }
 0xe41   : > { %p9203_p11 = por %p9202_p10, %p9201_p9 }
 0xe42   : > { %p9199_p8 = pneg %p9198_p7 }
 0xe43   : > { %p9205_p13 = por %p9204_p12, %p9203_p11 }
 0xe45   : > { %p9206_p0 = pnand %p9205_p13, %p9199_p8 }
 0xe47   : > { %9209 = shalt.err (!%p9206_p0)
}
 0xe48   : > { %s9261_s6 = smov 128   ;;  %s9262_s2 = smov 8  }
 0xe49   : > { %8953 = dma.vmem_to_hbm [thread:$0]  (%p9382_p5), %s15009_s0, 4096, %s15007_s28, %s15061_s4, %s9261_s6, %s9261_s6, %s9262_s2  }
 0xe4a PF: > { %p8959_p1 = scmp.ge.s32.totalorder %s9244_s20, 2  ;;  %s8450_s27 = sand.u32 1, %s9232_s17  }
 0xe4b   : > { %s8451_s29 = scalar_lea.sflag [#allocation6], %s8450_s27 }
 0xe4c   : > { %p8956_p2 = pnand %p8959_p1, %p9386_p6 }
 0xe4e   : > { %9227 = dma.done.wait (!%p8956_p2), %s8451_s29, 4096  }
 0xe4f   : > { %9229 = vsyncadd (!%p8956_p2), %s8451_s29, 4294963200  ;;  %p28_p3 = scmp.ge.s32.totalorder %s9369_s21, 4   ;;  %s16230_s17 = smov %s9236_s18 }
 0xe50   : > { %s16231_s18 = smov %s9240_s19  ;;  %s16232_s19 = smov %s9380_s24 }
 0xe51   : > { %s16233_s20 = smov %s9369_s21  ;;  %30 = sbr.rel (!%p28_p3) target bundleno = 9 (0x9), region = 111 }
 0xe58   :  { %8456 = vsyncpa [#allocation6], 1 }
 0xe59   :  { %8458 = vsyncpa [#allocation6 + $0x1], 1 }

</bundles_post_ra>
